<compile_context>
chip_gen: v5e
topology: v5e:2x2
jax: 0.10.0
libtpu: 0.0.40
codegen_flags: <defaults>
</compile_context>

<pallas_src>
import jax
import jax.numpy as jnp
from jax import lax
from jax.experimental import pallas as pl
from jax.experimental.pallas import tpu as pltpu

LANE = 128   # lane (last-dim) alignment
SUB = 8      # sublane (second-minor) alignment


def _round_up(x, m):
    return ((x + m - 1) // m) * m


# ----------------------------- Pallas kernel ------------------------------- #

def _make_conv_kernel(*, k, stride, ho, wo, wop, cin, relu, has_res):
    """Direct (im2col-free) conv + folded BN (+residual) (+ReLU) kernel.

    Per grid step (batch i, cout-block j):
      x_ref: (Hin, Winq, Cx) bf16  spatially zero-padded input, full spatial
                                   extent; for stride 2 the W axis is
                                   space-to-depth'd (Cx = 2*cin).
      w_ref: (k*k*cin, tn)  bf16   tap-major weights, BN scale folded in.
      b_ref: (1, tn)        f32    folded BN bias.
      r_ref: (ho*wop, tn)   bf16   optional residual (same layout as output).
      o_ref: (ho*wop, tn)          output block, lane-dense, W padded to 8.
    """
    def kernel(*refs):
        if has_res:
            x_ref, w_ref, b_ref, r_ref, o_ref = refs
        else:
            x_ref, w_ref, b_ref, o_ref = refs
            r_ref = None
        tn = o_ref.shape[-1]
        acc = jnp.zeros((ho * wop, tn), jnp.float32)

        for dy in range(k):
            if stride == 2:
                # Need padded rows dy, dy+2, ..., dy+2*(ho-1): load 2*ho rows
                # and keep the even phase (major-dim reshape -> free).
                rows = x_ref[pl.ds(dy, 2 * ho), :, :]
                rows = rows.reshape(ho, 2, rows.shape[1], rows.shape[2])[:, 0]
            for dx in range(k):
                if stride == 1:
                    patch = x_ref[pl.ds(dy, ho), pl.ds(dx, wop), :]
                else:
                    # W is space-to-depth'd: padded col 2x+dx lives at
                    # col' = x + dx//2, channel block dx % 2.
                    q, p = dx // 2, dx % 2
                    patch = rows[:, q:q + wop, p * cin:(p + 1) * cin]
                patch = patch.reshape(ho * wop, cin)      # wop % 8 == 0: free
                w_tap = w_ref[pl.ds((dy * k + dx) * cin, cin), :]
                acc = acc + jnp.dot(patch, w_tap,
                                    preferred_element_type=jnp.float32)

        out = acc + b_ref[...]
        if has_res:
            out = out + r_ref[...].astype(jnp.float32)
        if relu:
            out = jnp.maximum(out, 0.0)
        if wop != wo:
            # Keep W-padding columns exactly zero so the next layer can reuse
            # them as SAME-conv zero padding.
            out = out.reshape(ho, wop, tn)
            col = lax.broadcasted_iota(jnp.int32, (ho, wop, tn), 1)
            out = jnp.where(col < wo, out, 0.0).reshape(ho * wop, tn)
        o_ref[...] = out.astype(o_ref.dtype)

    return kernel


# ------------------------------ JAX wrapper --------------------------------- #

def conv_bn(a, true_hw, params, *, stride, relu=True, residual=None,
            out_dtype=jnp.bfloat16):
    """Conv (PyTorch OIHW weights) + folded BN (+ReLU) (+residual) via Pallas.

    a        : (N, Hs, Ws, Cin_p) bf16, channel-padded; columns >= true W and
               channels >= true Cin are zero.
    true_hw  : (H, W) true spatial extent of `a`.
    residual : optional (N, Ho, Wop, Cout_p) activation added before ReLU.
    Returns  : ((N, Ho, Wop, Cout_p) bf16, (Ho, Wo)).
    """
    w, scale, bias = params
    cout, cin, k, _ = w.shape
    n, _, _, cin_p = a.shape
    h, wdt = true_hw
    pad = (k - 1) // 2
    ho = (h + 2 * pad - k) // stride + 1
    wo = (wdt + 2 * pad - k) // stride + 1
    wop = _round_up(max(wo, SUB), SUB)
    cout_p = _round_up(cout, LANE)
    hin = (k - 1) + stride * ho          # padded extents the kernel reads
    win = (k - 1) + stride * wop

    # The only per-conv activation copy: a single spatial zero-pad.
    xp = jnp.pad(a[:, :h, :wdt, :],
                 ((0, 0), (pad, hin - pad - h), (pad, win - pad - wdt), (0, 0)))
    cx = cin_p
    if stride == 2:
        # Free reshape: fold W parity into channels so the kernel never needs
        # stride-2 vector loads.
        xp = xp.reshape(n, hin, win // 2, 2 * cin_p)
        cx = 2 * cin_p
    wq = xp.shape[2]

    # Fold the BN scale into the weights; tap-major layout (k*k*Cin_p, Cout_p).
    wt = jnp.transpose(w, (2, 3, 1, 0)) * scale.reshape(1, 1, 1, cout)
    wt = jnp.pad(wt, ((0, 0), (0, 0), (0, cin_p - cin), (0, cout_p - cout)))
    wt = wt.reshape(k * k * cin_p, cout_p).astype(jnp.bfloat16)
    bp = jnp.pad(bias, (0, cout_p - cout)).reshape(1, cout_p).astype(jnp.float32)

    tn = 256 if cout_p % 256 == 0 else 128
    in_specs = [
        pl.BlockSpec((None, hin, wq, cx), lambda i, j: (i, 0, 0, 0)),
        pl.BlockSpec((k * k * cin_p, tn), lambda i, j: (0, j)),
        pl.BlockSpec((1, tn), lambda i, j: (0, j)),
    ]
    args = [xp, wt, bp]
    if residual is not None:
        assert residual.shape == (n, ho, wop, cout_p)
        in_specs.append(pl.BlockSpec((ho * wop, tn), lambda i, j: (i, j)))
        args.append(residual.reshape(n * ho * wop, cout_p))
        # TODO(synk): input_output_aliases={3: 0} could reuse the residual HBM
        # buffer as the output once aliasing-through-jit is validated.

    kernel = _make_conv_kernel(k=k, stride=stride, ho=ho, wo=wo, wop=wop,
                               cin=cin_p, relu=relu,
                               has_res=residual is not None)
    out = pl.pallas_call(
        kernel,
        out_shape=jax.ShapeDtypeStruct((n * ho * wop, cout_p), out_dtype),
        grid=(n, cout_p // tn),
        in_specs=in_specs,
        out_specs=pl.BlockSpec((ho * wop, tn), lambda i, j: (i, j)),
        compiler_params=pltpu.CompilerParams(
            dimension_semantics=("parallel", "parallel"),
            vmem_limit_bytes=32 * 1024 * 1024),
    )(*args)
    return out.reshape(n, ho, wop, cout_p), (ho, wo)


def basic_block(a, hw, blk, stride):
    """torchvision BasicBlock: conv-bn-relu, conv-bn, (+downsample), add, relu."""
    if "down" in blk:
        identity, _ = conv_bn(a, hw, blk["down"], stride=stride, relu=False)
    else:
        identity = a
    hmid, hw1 = conv_bn(a, hw, blk["conv1"], stride=stride, relu=True)
    return conv_bn(hmid, hw1, blk["conv2"], stride=1, relu=True,
                   residual=identity)


# -------------------------- Parameter construction -------------------------- #

def _init_conv_bn(key, cin, cout, k):
    k1, k2, k3 = jax.random.split(key, 3)
    fan_in = float(k * k * cin)
    w = jax.random.normal(k1, (cout, cin, k, k), jnp.float32) / jnp.sqrt(fan_in)
    scale = 1.0 + 0.1 * jax.random.normal(k2, (cout,), jnp.float32)  # gamma/sqrt(var+eps)
    bias = 0.1 * jax.random.normal(k3, (cout,), jnp.float32)         # beta - mean*scale
    return (w, scale, bias)


def init_backbone_params(key, c_in=3, widths=(8, 8, 16, 32, 64)):
    c0, c1, c2, c3, c4 = widths
    keys = iter(jax.random.split(key, 16))
    params = {"stem": _init_conv_bn(next(keys), c_in, c0, 3)}

    def block(cin, cout, downsample):
        b = {"conv1": _init_conv_bn(next(keys), cin, cout, 3),
             "conv2": _init_conv_bn(next(keys), cout, cout, 3)}
        if downsample:
            b["down"] = _init_conv_bn(next(keys), cin, cout, 1)
        return b

    params["layer1"] = block(c0, c1, downsample=(c0 != c1))
    params["layer2"] = block(c1, c2, downsample=True)
    params["layer3"] = block(c2, c3, downsample=True)
    params["layer4"] = block(c3, c4, downsample=True)
    return params


# ---------------------------- BackboneBase.forward -------------------------- #

def backbone_base_forward(x_nchw, params):
    """Equivalent of BackboneBase.forward: returns [layer2, layer3, layer4]."""
    # TODO(synk): parameter freezing (requires_grad_) is training-only and has
    # no forward-pass equivalent; intentionally omitted.
    n, c, h, w = x_nchw.shape
    cin_p = _round_up(c, LANE)
    x = jnp.transpose(x_nchw, (0, 2, 3, 1))                     # NCHW -> NHWC
    x = jnp.pad(x, ((0, 0), (0, 0), (0, 0), (0, cin_p - c))).astype(jnp.bfloat16)

    a, hw = conv_bn(x, (h, w), params["stem"], stride=2, relu=True)   # stem /2
    a, hw = basic_block(a, hw, params["layer1"], stride=1)            # layer1
    c2, hw2 = basic_block(a, hw, params["layer2"], stride=2)          # layer2 -> '0'
    c3, hw3 = basic_block(c2, hw2, params["layer3"], stride=2)        # layer3 -> '1'
    c4, hw4 = basic_block(c3, hw3, params["layer4"], stride=2)        # layer4 -> '2'

    # IntermediateLayerGetter({'layer2':'0','layer3':'1','layer4':'2'}) order.
    feats = []
    for f, (fh, fw), layer in ((c2, hw2, "layer2"), (c3, hw3, "layer3"),
                               (c4, hw4, "layer4")):
        cc = params[layer]["conv2"][0].shape[0]
        feats.append(jnp.transpose(f[:, :fh, :fw, :cc], (0, 3, 1, 2))
                     .astype(jnp.float32))                      # NHWC -> NCHW
    return feats


# ----------------------------------- main ----------------------------------- #

if __name__ == "__main__":
    key = jax.random.PRNGKey(0)
    kx, kp = jax.random.split(key)

    # Small, shape-consistent example: batch=2, RGB, 16x16 spatial.
    x = jax.random.normal(kx, (2, 3, 16, 16), jnp.float32)
    params = init_backbone_params(kp)

    fwd = jax.jit(backbone_base_forward)
    fmp_list = jax.block_until_ready(fwd(x, params))

    assert fmp_list[0].shape == (2, 16, 4, 4)   # layer2, stride /4
    assert fmp_list[1].shape == (2, 32, 2, 2)   # layer3, stride /8
    assert fmp_list[2].shape == (2, 64, 1, 1)   # layer4, stride /16
    assert all(f.dtype == jnp.float32 for f in fmp_list)
    assert all(bool(jnp.all(jnp.isfinite(f))) for f in fmp_list)

    print("KERNEL_OK")
</pallas_src>

<mosaic_0001>
module attributes {stable_mosaic.version = 11 : i64} {
  func.func @kernel(%arg0: i32, %arg1: i32, %arg2: memref<1x18x9x256xbf16, #tpu.memory_space<vmem>>, %arg3: memref<1152x128xbf16, #tpu.memory_space<vmem>>, %arg4: memref<1x128xf32, #tpu.memory_space<vmem>>, %arg5: memref<64x128xbf16, #tpu.memory_space<vmem>>) attributes {dimension_semantics = [#tpu.dimension_semantics<parallel>, #tpu.dimension_semantics<parallel>], iteration_bounds = array<i64: 2, 1>, scalar_prefetch = 0 : i64, scratch_operands = 0 : i64, tpu.core_type = #tpu.core_type<tc>, window_params = [{transform_indices = @transform_0, window_bounds = array<i64: 1, 18, 9, 256>}, {transform_indices = @transform_1, window_bounds = array<i64: 1152, 128>}, {transform_indices = @transform_2, window_bounds = array<i64: 1, 128>}, {transform_indices = @transform_3, window_bounds = array<i64: 64, 128>}]} {
    %cst = arith.constant 0.000000e+00 : f32
    %0 = vector.broadcast %cst : f32 to vector<64x128xf32>
    %c0 = arith.constant 0 : index
    %c0_0 = arith.constant 0 : index
    %c0_1 = arith.constant 0 : index
    %c0_2 = arith.constant 0 : index
    %1 = vector.load %arg2[%c0, %c0_0, %c0_1, %c0_2] : memref<1x18x9x256xbf16, #tpu.memory_space<vmem>>, vector<1x16x9x256xbf16>
    %2 = vector.shape_cast %1 : vector<1x16x9x256xbf16> to vector<16x9x256xbf16>
    %3 = vector.shape_cast %2 : vector<16x9x256xbf16> to vector<8x2x9x256xbf16>
    %4 = vector.extract_strided_slice %3 {offsets = [0, 0, 0, 0], sizes = [8, 1, 9, 256], strides = [1, 1, 1, 1]} : vector<8x2x9x256xbf16> to vector<8x1x9x256xbf16>
    %5 = vector.shape_cast %4 : vector<8x1x9x256xbf16> to vector<8x9x256xbf16>
    %6 = vector.extract_strided_slice %5 {offsets = [0, 0, 0], sizes = [8, 8, 128], strides = [1, 1, 1]} : vector<8x9x256xbf16> to vector<8x8x128xbf16>
    %7 = vector.shape_cast %6 : vector<8x8x128xbf16> to vector<64x128xbf16>
    %c0_3 = arith.constant 0 : index
    %c0_4 = arith.constant 0 : index
    %8 = vector.load %arg3[%c0_3, %c0_4] : memref<1152x128xbf16, #tpu.memory_space<vmem>>, vector<128x128xbf16>
    %cst_5 = arith.constant dense<0.000000e+00> : vector<64x128xf32>
    %9 = tpu.matmul %7, %8, %cst_5 {dimension_numbers = #tpu.dot_dimension_numbers<[1], [0], [0], [1], [0, 0, 1, 1], [], []>} : vector<64x128xbf16>, vector<128x128xbf16>, vector<64x128xf32> -> vector<64x128xf32>
    %10 = arith.addf %0, %9 : vector<64x128xf32>
    %11 = vector.extract_strided_slice %5 {offsets = [0, 0, 128], sizes = [8, 8, 128], strides = [1, 1, 1]} : vector<8x9x256xbf16> to vector<8x8x128xbf16>
    %12 = vector.shape_cast %11 : vector<8x8x128xbf16> to vector<64x128xbf16>
    %c128 = arith.constant 128 : index
    %c0_6 = arith.constant 0 : index
    %13 = vector.load %arg3[%c128, %c0_6] : memref<1152x128xbf16, #tpu.memory_space<vmem>>, vector<128x128xbf16>
    %cst_7 = arith.constant dense<0.000000e+00> : vector<64x128xf32>
    %14 = tpu.matmul %12, %13, %cst_7 {dimension_numbers = #tpu.dot_dimension_numbers<[1], [0], [0], [1], [0, 0, 1, 1], [], []>} : vector<64x128xbf16>, vector<128x128xbf16>, vector<64x128xf32> -> vector<64x128xf32>
    %15 = arith.addf %10, %14 : vector<64x128xf32>
    %16 = vector.extract_strided_slice %5 {offsets = [0, 1, 0], sizes = [8, 8, 128], strides = [1, 1, 1]} : vector<8x9x256xbf16> to vector<8x8x128xbf16>
    %17 = vector.shape_cast %16 : vector<8x8x128xbf16> to vector<64x128xbf16>
    %c256 = arith.constant 256 : index
    %c0_8 = arith.constant 0 : index
    %18 = vector.load %arg3[%c256, %c0_8] : memref<1152x128xbf16, #tpu.memory_space<vmem>>, vector<128x128xbf16>
    %cst_9 = arith.constant dense<0.000000e+00> : vector<64x128xf32>
    %19 = tpu.matmul %17, %18, %cst_9 {dimension_numbers = #tpu.dot_dimension_numbers<[1], [0], [0], [1], [0, 0, 1, 1], [], []>} : vector<64x128xbf16>, vector<128x128xbf16>, vector<64x128xf32> -> vector<64x128xf32>
    %20 = arith.addf %15, %19 : vector<64x128xf32>
    %c0_10 = arith.constant 0 : index
    %c1 = arith.constant 1 : index
    %c0_11 = arith.constant 0 : index
    %c0_12 = arith.constant 0 : index
    %21 = vector.load %arg2[%c0_10, %c1, %c0_11, %c0_12] : memref<1x18x9x256xbf16, #tpu.memory_space<vmem>>, vector<1x16x9x256xbf16>
    %22 = vector.shape_cast %21 : vector<1x16x9x256xbf16> to vector<16x9x256xbf16>
    %23 = vector.shape_cast %22 : vector<16x9x256xbf16> to vector<8x2x9x256xbf16>
    %24 = vector.extract_strided_slice %23 {offsets = [0, 0, 0, 0], sizes = [8, 1, 9, 256], strides = [1, 1, 1, 1]} : vector<8x2x9x256xbf16> to vector<8x1x9x256xbf16>
    %25 = vector.shape_cast %24 : vector<8x1x9x256xbf16> to vector<8x9x256xbf16>
    %26 = vector.extract_strided_slice %25 {offsets = [0, 0, 0], sizes = [8, 8, 128], strides = [1, 1, 1]} : vector<8x9x256xbf16> to vector<8x8x128xbf16>
    %27 = vector.shape_cast %26 : vector<8x8x128xbf16> to vector<64x128xbf16>
    %c384 = arith.constant 384 : index
    %c0_13 = arith.constant 0 : index
    %28 = vector.load %arg3[%c384, %c0_13] : memref<1152x128xbf16, #tpu.memory_space<vmem>>, vector<128x128xbf16>
    %cst_14 = arith.constant dense<0.000000e+00> : vector<64x128xf32>
    %29 = tpu.matmul %27, %28, %cst_14 {dimension_numbers = #tpu.dot_dimension_numbers<[1], [0], [0], [1], [0, 0, 1, 1], [], []>} : vector<64x128xbf16>, vector<128x128xbf16>, vector<64x128xf32> -> vector<64x128xf32>
    %30 = arith.addf %20, %29 : vector<64x128xf32>
    %31 = vector.extract_strided_slice %25 {offsets = [0, 0, 128], sizes = [8, 8, 128], strides = [1, 1, 1]} : vector<8x9x256xbf16> to vector<8x8x128xbf16>
    %32 = vector.shape_cast %31 : vector<8x8x128xbf16> to vector<64x128xbf16>
    %c512 = arith.constant 512 : index
    %c0_15 = arith.constant 0 : index
    %33 = vector.load %arg3[%c512, %c0_15] : memref<1152x128xbf16, #tpu.memory_space<vmem>>, vector<128x128xbf16>
    %cst_16 = arith.constant dense<0.000000e+00> : vector<64x128xf32>
    %34 = tpu.matmul %32, %33, %cst_16 {dimension_numbers = #tpu.dot_dimension_numbers<[1], [0], [0], [1], [0, 0, 1, 1], [], []>} : vector<64x128xbf16>, vector<128x128xbf16>, vector<64x128xf32> -> vector<64x128xf32>
    %35 = arith.addf %30, %34 : vector<64x128xf32>
    %36 = vector.extract_strided_slice %25 {offsets = [0, 1, 0], sizes = [8, 8, 128], strides = [1, 1, 1]} : vector<8x9x256xbf16> to vector<8x8x128xbf16>
    %37 = vector.shape_cast %36 : vector<8x8x128xbf16> to vector<64x128xbf16>
    %c640 = arith.constant 640 : index
    %c0_17 = arith.constant 0 : index
    %38 = vector.load %arg3[%c640, %c0_17] : memref<1152x128xbf16, #tpu.memory_space<vmem>>, vector<128x128xbf16>
    %cst_18 = arith.constant dense<0.000000e+00> : vector<64x128xf32>
    %39 = tpu.matmul %37, %38, %cst_18 {dimension_numbers = #tpu.dot_dimension_numbers<[1], [0], [0], [1], [0, 0, 1, 1], [], []>} : vector<64x128xbf16>, vector<128x128xbf16>, vector<64x128xf32> -> vector<64x128xf32>
    %40 = arith.addf %35, %39 : vector<64x128xf32>
    %c0_19 = arith.constant 0 : index
    %c2 = arith.constant 2 : index
    %c0_20 = arith.constant 0 : index
    %c0_21 = arith.constant 0 : index
    %41 = vector.load %arg2[%c0_19, %c2, %c0_20, %c0_21] : memref<1x18x9x256xbf16, #tpu.memory_space<vmem>>, vector<1x16x9x256xbf16>
    %42 = vector.shape_cast %41 : vector<1x16x9x256xbf16> to vector<16x9x256xbf16>
    %43 = vector.shape_cast %42 : vector<16x9x256xbf16> to vector<8x2x9x256xbf16>
    %44 = vector.extract_strided_slice %43 {offsets = [0, 0, 0, 0], sizes = [8, 1, 9, 256], strides = [1, 1, 1, 1]} : vector<8x2x9x256xbf16> to vector<8x1x9x256xbf16>
    %45 = vector.shape_cast %44 : vector<8x1x9x256xbf16> to vector<8x9x256xbf16>
    %46 = vector.extract_strided_slice %45 {offsets = [0, 0, 0], sizes = [8, 8, 128], strides = [1, 1, 1]} : vector<8x9x256xbf16> to vector<8x8x128xbf16>
    %47 = vector.shape_cast %46 : vector<8x8x128xbf16> to vector<64x128xbf16>
    %c768 = arith.constant 768 : index
    %c0_22 = arith.constant 0 : index
    %48 = vector.load %arg3[%c768, %c0_22] : memref<1152x128xbf16, #tpu.memory_space<vmem>>, vector<128x128xbf16>
    %cst_23 = arith.constant dense<0.000000e+00> : vector<64x128xf32>
    %49 = tpu.matmul %47, %48, %cst_23 {dimension_numbers = #tpu.dot_dimension_numbers<[1], [0], [0], [1], [0, 0, 1, 1], [], []>} : vector<64x128xbf16>, vector<128x128xbf16>, vector<64x128xf32> -> vector<64x128xf32>
    %50 = arith.addf %40, %49 : vector<64x128xf32>
    %51 = vector.extract_strided_slice %45 {offsets = [0, 0, 128], sizes = [8, 8, 128], strides = [1, 1, 1]} : vector<8x9x256xbf16> to vector<8x8x128xbf16>
    %52 = vector.shape_cast %51 : vector<8x8x128xbf16> to vector<64x128xbf16>
    %c896 = arith.constant 896 : index
    %c0_24 = arith.constant 0 : index
    %53 = vector.load %arg3[%c896, %c0_24] : memref<1152x128xbf16, #tpu.memory_space<vmem>>, vector<128x128xbf16>
    %cst_25 = arith.constant dense<0.000000e+00> : vector<64x128xf32>
    %54 = tpu.matmul %52, %53, %cst_25 {dimension_numbers = #tpu.dot_dimension_numbers<[1], [0], [0], [1], [0, 0, 1, 1], [], []>} : vector<64x128xbf16>, vector<128x128xbf16>, vector<64x128xf32> -> vector<64x128xf32>
    %55 = arith.addf %50, %54 : vector<64x128xf32>
    %56 = vector.extract_strided_slice %45 {offsets = [0, 1, 0], sizes = [8, 8, 128], strides = [1, 1, 1]} : vector<8x9x256xbf16> to vector<8x8x128xbf16>
    %57 = vector.shape_cast %56 : vector<8x8x128xbf16> to vector<64x128xbf16>
    %c1024 = arith.constant 1024 : index
    %c0_26 = arith.constant 0 : index
    %58 = vector.load %arg3[%c1024, %c0_26] : memref<1152x128xbf16, #tpu.memory_space<vmem>>, vector<128x128xbf16>
    %cst_27 = arith.constant dense<0.000000e+00> : vector<64x128xf32>
    %59 = tpu.matmul %57, %58, %cst_27 {dimension_numbers = #tpu.dot_dimension_numbers<[1], [0], [0], [1], [0, 0, 1, 1], [], []>} : vector<64x128xbf16>, vector<128x128xbf16>, vector<64x128xf32> -> vector<64x128xf32>
    %60 = arith.addf %55, %59 : vector<64x128xf32>
    %c0_28 = arith.constant 0 : index
    %c0_29 = arith.constant 0 : index
    %61 = vector.load %arg4[%c0_28, %c0_29] : memref<1x128xf32, #tpu.memory_space<vmem>>, vector<1x128xf32>
    %62 = vector.broadcast %61 : vector<1x128xf32> to vector<64x128xf32>
    %63 = arith.addf %60, %62 : vector<64x128xf32>
    %cst_30 = arith.constant 0.000000e+00 : f32
    %64 = vector.broadcast %cst_30 : f32 to vector<64x128xf32>
    %65 = arith.maximumf %63, %64 : vector<64x128xf32>
    %66 = arith.truncf %65 : vector<64x128xf32> to vector<64x128xbf16>
    %c0_31 = arith.constant 0 : index
    %c0_32 = arith.constant 0 : index
    %67 = vector.load %arg5[%c0_31, %c0_32] : memref<64x128xbf16, #tpu.memory_space<vmem>>, vector<64x128xbf16>
    tpu.vector_store %arg5[%c0_31, %c0_32], %66 {strides = array<i32>} : memref<64x128xbf16, #tpu.memory_space<vmem>>, vector<64x128xbf16>,
    return
  }
  func.func @transform_0(%arg0: i32, %arg1: i32) -> (i32, i32, i32, i32) {
    %c0_i32 = arith.constant 0 : i32
    %c0_i32_0 = arith.constant 0 : i32
    %c0_i32_1 = arith.constant 0 : i32
    %c0_i32_2 = arith.constant 0 : i32
    return %arg0, %c0_i32, %c0_i32_0, %c0_i32_1 : i32, i32, i32, i32
  }
  func.func @transform_1(%arg0: i32, %arg1: i32) -> (i32, i32) {
    %c0_i32 = arith.constant 0 : i32
    %c0_i32_0 = arith.constant 0 : i32
    return %c0_i32, %arg1 : i32, i32
  }
  func.func @transform_2(%arg0: i32, %arg1: i32) -> (i32, i32) {
    %c0_i32 = arith.constant 0 : i32
    %c0_i32_0 = arith.constant 0 : i32
    return %c0_i32, %arg1 : i32, i32
  }
  func.func @transform_3(%arg0: i32, %arg1: i32) -> (i32, i32) {
    %c0_i32 = arith.constant 0 : i32
    return %arg0, %arg1 : i32, i32
  }
}

module attributes {stable_mosaic.version = 11 : i64} {
  func.func @kernel(%arg0: i32, %arg1: i32, %arg2: memref<1x10x10x128xbf16, #tpu.memory_space<vmem>>, %arg3: memref<1152x128xbf16, #tpu.memory_space<vmem>>, %arg4: memref<1x128xf32, #tpu.memory_space<vmem>>, %arg5: memref<64x128xbf16, #tpu.memory_space<vmem>>, %arg6: memref<64x128xbf16, #tpu.memory_space<vmem>>) attributes {dimension_semantics = [#tpu.dimension_semantics<parallel>, #tpu.dimension_semantics<parallel>], iteration_bounds = array<i64: 2, 1>, scalar_prefetch = 0 : i64, scratch_operands = 0 : i64, tpu.core_type = #tpu.core_type<tc>, window_params = [{transform_indices = @transform_0, window_bounds = array<i64: 1, 10, 10, 128>}, {transform_indices = @transform_1, window_bounds = array<i64: 1152, 128>}, {transform_indices = @transform_2, window_bounds = array<i64: 1, 128>}, {transform_indices = @transform_3, window_bounds = array<i64: 64, 128>}, {transform_indices = @transform_4, window_bounds = array<i64: 64, 128>}]} {
    %cst = arith.constant 0.000000e+00 : f32
    %0 = vector.broadcast %cst : f32 to vector<64x128xf32>
    %c0 = arith.constant 0 : index
    %c0_0 = arith.constant 0 : index
    %c0_1 = arith.constant 0 : index
    %c0_2 = arith.constant 0 : index
    %1 = vector.load %arg2[%c0, %c0_0, %c0_1, %c0_2] : memref<1x10x10x128xbf16, #tpu.memory_space<vmem>>, vector<1x8x8x128xbf16>
    %2 = vector.shape_cast %1 : vector<1x8x8x128xbf16> to vector<8x8x128xbf16>
    %3 = vector.shape_cast %2 : vector<8x8x128xbf16> to vector<64x128xbf16>
    %c0_3 = arith.constant 0 : index
    %c0_4 = arith.constant 0 : index
    %4 = vector.load %arg3[%c0_3, %c0_4] : memref<1152x128xbf16, #tpu.memory_space<vmem>>, vector<128x128xbf16>
    %cst_5 = arith.constant dense<0.000000e+00> : vector<64x128xf32>
    %5 = tpu.matmul %3, %4, %cst_5 {dimension_numbers = #tpu.dot_dimension_numbers<[1], [0], [0], [1], [0, 0, 1, 1], [], []>} : vector<64x128xbf16>, vector<128x128xbf16>, vector<64x128xf32> -> vector<64x128xf32>
    %6 = arith.addf %0, %5 : vector<64x128xf32>
    %c0_6 = arith.constant 0 : index
    %c0_7 = arith.constant 0 : index
    %c1 = arith.constant 1 : index
    %c0_8 = arith.constant 0 : index
    %7 = vector.load %arg2[%c0_6, %c0_7, %c1, %c0_8] : memref<1x10x10x128xbf16, #tpu.memory_space<vmem>>, vector<1x8x8x128xbf16>
    %8 = vector.shape_cast %7 : vector<1x8x8x128xbf16> to vector<8x8x128xbf16>
    %9 = vector.shape_cast %8 : vector<8x8x128xbf16> to vector<64x128xbf16>
    %c128 = arith.constant 128 : index
    %c0_9 = arith.constant 0 : index
    %10 = vector.load %arg3[%c128, %c0_9] : memref<1152x128xbf16, #tpu.memory_space<vmem>>, vector<128x128xbf16>
    %cst_10 = arith.constant dense<0.000000e+00> : vector<64x128xf32>
    %11 = tpu.matmul %9, %10, %cst_10 {dimension_numbers = #tpu.dot_dimension_numbers<[1], [0], [0], [1], [0, 0, 1, 1], [], []>} : vector<64x128xbf16>, vector<128x128xbf16>, vector<64x128xf32> -> vector<64x128xf32>
    %12 = arith.addf %6, %11 : vector<64x128xf32>
    %c0_11 = arith.constant 0 : index
    %c0_12 = arith.constant 0 : index
    %c2 = arith.constant 2 : index
    %c0_13 = arith.constant 0 : index
    %13 = vector.load %arg2[%c0_11, %c0_12, %c2, %c0_13] : memref<1x10x10x128xbf16, #tpu.memory_space<vmem>>, vector<1x8x8x128xbf16>
    %14 = vector.shape_cast %13 : vector<1x8x8x128xbf16> to vector<8x8x128xbf16>
    %15 = vector.shape_cast %14 : vector<8x8x128xbf16> to vector<64x128xbf16>
    %c256 = arith.constant 256 : index
    %c0_14 = arith.constant 0 : index
    %16 = vector.load %arg3[%c256, %c0_14] : memref<1152x128xbf16, #tpu.memory_space<vmem>>, vector<128x128xbf16>
    %cst_15 = arith.constant dense<0.000000e+00> : vector<64x128xf32>
    %17 = tpu.matmul %15, %16, %cst_15 {dimension_numbers = #tpu.dot_dimension_numbers<[1], [0], [0], [1], [0, 0, 1, 1], [], []>} : vector<64x128xbf16>, vector<128x128xbf16>, vector<64x128xf32> -> vector<64x128xf32>
    %18 = arith.addf %12, %17 : vector<64x128xf32>
    %c0_16 = arith.constant 0 : index
    %c1_17 = arith.constant 1 : index
    %c0_18 = arith.constant 0 : index
    %c0_19 = arith.constant 0 : index
    %19 = vector.load %arg2[%c0_16, %c1_17, %c0_18, %c0_19] : memref<1x10x10x128xbf16, #tpu.memory_space<vmem>>, vector<1x8x8x128xbf16>
    %20 = vector.shape_cast %19 : vector<1x8x8x128xbf16> to vector<8x8x128xbf16>
    %21 = vector.shape_cast %20 : vector<8x8x128xbf16> to vector<64x128xbf16>
    %c384 = arith.constant 384 : index
    %c0_20 = arith.constant 0 : index
    %22 = vector.load %arg3[%c384, %c0_20] : memref<1152x128xbf16, #tpu.memory_space<vmem>>, vector<128x128xbf16>
    %cst_21 = arith.constant dense<0.000000e+00> : vector<64x128xf32>
    %23 = tpu.matmul %21, %22, %cst_21 {dimension_numbers = #tpu.dot_dimension_numbers<[1], [0], [0], [1], [0, 0, 1, 1], [], []>} : vector<64x128xbf16>, vector<128x128xbf16>, vector<64x128xf32> -> vector<64x128xf32>
    %24 = arith.addf %18, %23 : vector<64x128xf32>
    %c0_22 = arith.constant 0 : index
    %c1_23 = arith.constant 1 : index
    %c1_24 = arith.constant 1 : index
    %c0_25 = arith.constant 0 : index
    %25 = vector.load %arg2[%c0_22, %c1_23, %c1_24, %c0_25] : memref<1x10x10x128xbf16, #tpu.memory_space<vmem>>, vector<1x8x8x128xbf16>
    %26 = vector.shape_cast %25 : vector<1x8x8x128xbf16> to vector<8x8x128xbf16>
    %27 = vector.shape_cast %26 : vector<8x8x128xbf16> to vector<64x128xbf16>
    %c512 = arith.constant 512 : index
    %c0_26 = arith.constant 0 : index
    %28 = vector.load %arg3[%c512, %c0_26] : memref<1152x128xbf16, #tpu.memory_space<vmem>>, vector<128x128xbf16>
    %cst_27 = arith.constant dense<0.000000e+00> : vector<64x128xf32>
    %29 = tpu.matmul %27, %28, %cst_27 {dimension_numbers = #tpu.dot_dimension_numbers<[1], [0], [0], [1], [0, 0, 1, 1], [], []>} : vector<64x128xbf16>, vector<128x128xbf16>, vector<64x128xf32> -> vector<64x128xf32>
    %30 = arith.addf %24, %29 : vector<64x128xf32>
    %c0_28 = arith.constant 0 : index
    %c1_29 = arith.constant 1 : index
    %c2_30 = arith.constant 2 : index
    %c0_31 = arith.constant 0 : index
    %31 = vector.load %arg2[%c0_28, %c1_29, %c2_30, %c0_31] : memref<1x10x10x128xbf16, #tpu.memory_space<vmem>>, vector<1x8x8x128xbf16>
    %32 = vector.shape_cast %31 : vector<1x8x8x128xbf16> to vector<8x8x128xbf16>
    %33 = vector.shape_cast %32 : vector<8x8x128xbf16> to vector<64x128xbf16>
    %c640 = arith.constant 640 : index
    %c0_32 = arith.constant 0 : index
    %34 = vector.load %arg3[%c640, %c0_32] : memref<1152x128xbf16, #tpu.memory_space<vmem>>, vector<128x128xbf16>
    %cst_33 = arith.constant dense<0.000000e+00> : vector<64x128xf32>
    %35 = tpu.matmul %33, %34, %cst_33 {dimension_numbers = #tpu.dot_dimension_numbers<[1], [0], [0], [1], [0, 0, 1, 1], [], []>} : vector<64x128xbf16>, vector<128x128xbf16>, vector<64x128xf32> -> vector<64x128xf32>
    %36 = arith.addf %30, %35 : vector<64x128xf32>
    %c0_34 = arith.constant 0 : index
    %c2_35 = arith.constant 2 : index
    %c0_36 = arith.constant 0 : index
    %c0_37 = arith.constant 0 : index
    %37 = vector.load %arg2[%c0_34, %c2_35, %c0_36, %c0_37] : memref<1x10x10x128xbf16, #tpu.memory_space<vmem>>, vector<1x8x8x128xbf16>
    %38 = vector.shape_cast %37 : vector<1x8x8x128xbf16> to vector<8x8x128xbf16>
    %39 = vector.shape_cast %38 : vector<8x8x128xbf16> to vector<64x128xbf16>
    %c768 = arith.constant 768 : index
    %c0_38 = arith.constant 0 : index
    %40 = vector.load %arg3[%c768, %c0_38] : memref<1152x128xbf16, #tpu.memory_space<vmem>>, vector<128x128xbf16>
    %cst_39 = arith.constant dense<0.000000e+00> : vector<64x128xf32>
    %41 = tpu.matmul %39, %40, %cst_39 {dimension_numbers = #tpu.dot_dimension_numbers<[1], [0], [0], [1], [0, 0, 1, 1], [], []>} : vector<64x128xbf16>, vector<128x128xbf16>, vector<64x128xf32> -> vector<64x128xf32>
    %42 = arith.addf %36, %41 : vector<64x128xf32>
    %c0_40 = arith.constant 0 : index
    %c2_41 = arith.constant 2 : index
    %c1_42 = arith.constant 1 : index
    %c0_43 = arith.constant 0 : index
    %43 = vector.load %arg2[%c0_40, %c2_41, %c1_42, %c0_43] : memref<1x10x10x128xbf16, #tpu.memory_space<vmem>>, vector<1x8x8x128xbf16>
    %44 = vector.shape_cast %43 : vector<1x8x8x128xbf16> to vector<8x8x128xbf16>
    %45 = vector.shape_cast %44 : vector<8x8x128xbf16> to vector<64x128xbf16>
    %c896 = arith.constant 896 : index
    %c0_44 = arith.constant 0 : index
    %46 = vector.load %arg3[%c896, %c0_44] : memref<1152x128xbf16, #tpu.memory_space<vmem>>, vector<128x128xbf16>
    %cst_45 = arith.constant dense<0.000000e+00> : vector<64x128xf32>
    %47 = tpu.matmul %45, %46, %cst_45 {dimension_numbers = #tpu.dot_dimension_numbers<[1], [0], [0], [1], [0, 0, 1, 1], [], []>} : vector<64x128xbf16>, vector<128x128xbf16>, vector<64x128xf32> -> vector<64x128xf32>
    %48 = arith.addf %42, %47 : vector<64x128xf32>
    %c0_46 = arith.constant 0 : index
    %c2_47 = arith.constant 2 : index
    %c2_48 = arith.constant 2 : index
    %c0_49 = arith.constant 0 : index
    %49 = vector.load %arg2[%c0_46, %c2_47, %c2_48, %c0_49] : memref<1x10x10x128xbf16, #tpu.memory_space<vmem>>, vector<1x8x8x128xbf16>
    %50 = vector.shape_cast %49 : vector<1x8x8x128xbf16> to vector<8x8x128xbf16>
    %51 = vector.shape_cast %50 : vector<8x8x128xbf16> to vector<64x128xbf16>
    %c1024 = arith.constant 1024 : index
    %c0_50 = arith.constant 0 : index
    %52 = vector.load %arg3[%c1024, %c0_50] : memref<1152x128xbf16, #tpu.memory_space<vmem>>, vector<128x128xbf16>
    %cst_51 = arith.constant dense<0.000000e+00> : vector<64x128xf32>
    %53 = tpu.matmul %51, %52, %cst_51 {dimension_numbers = #tpu.dot_dimension_numbers<[1], [0], [0], [1], [0, 0, 1, 1], [], []>} : vector<64x128xbf16>, vector<128x128xbf16>, vector<64x128xf32> -> vector<64x128xf32>
    %54 = arith.addf %48, %53 : vector<64x128xf32>
    %c0_52 = arith.constant 0 : index
    %c0_53 = arith.constant 0 : index
    %55 = vector.load %arg4[%c0_52, %c0_53] : memref<1x128xf32, #tpu.memory_space<vmem>>, vector<1x128xf32>
    %56 = vector.broadcast %55 : vector<1x128xf32> to vector<64x128xf32>
    %57 = arith.addf %54, %56 : vector<64x128xf32>
    %c0_54 = arith.constant 0 : index
    %c0_55 = arith.constant 0 : index
    %58 = vector.load %arg5[%c0_54, %c0_55] : memref<64x128xbf16, #tpu.memory_space<vmem>>, vector<64x128xbf16>
    %59 = arith.extf %58 : vector<64x128xbf16> to vector<64x128xf32>
    %60 = arith.addf %57, %59 : vector<64x128xf32>
    %cst_56 = arith.constant 0.000000e+00 : f32
    %61 = vector.broadcast %cst_56 : f32 to vector<64x128xf32>
    %62 = arith.maximumf %60, %61 : vector<64x128xf32>
    %63 = arith.truncf %62 : vector<64x128xf32> to vector<64x128xbf16>
    %c0_57 = arith.constant 0 : index
    %c0_58 = arith.constant 0 : index
    %64 = vector.load %arg6[%c0_57, %c0_58] : memref<64x128xbf16, #tpu.memory_space<vmem>>, vector<64x128xbf16>
    tpu.vector_store %arg6[%c0_57, %c0_58], %63 {strides = array<i32>} : memref<64x128xbf16, #tpu.memory_space<vmem>>, vector<64x128xbf16>,
    return
  }
  func.func @transform_0(%arg0: i32, %arg1: i32) -> (i32, i32, i32, i32) {
    %c0_i32 = arith.constant 0 : i32
    %c0_i32_0 = arith.constant 0 : i32
    %c0_i32_1 = arith.constant 0 : i32
    %c0_i32_2 = arith.constant 0 : i32
    return %arg0, %c0_i32, %c0_i32_0, %c0_i32_1 : i32, i32, i32, i32
  }
  func.func @transform_1(%arg0: i32, %arg1: i32) -> (i32, i32) {
    %c0_i32 = arith.constant 0 : i32
    %c0_i32_0 = arith.constant 0 : i32
    return %c0_i32, %arg1 : i32, i32
  }
  func.func @transform_2(%arg0: i32, %arg1: i32) -> (i32, i32) {
    %c0_i32 = arith.constant 0 : i32
    %c0_i32_0 = arith.constant 0 : i32
    return %c0_i32, %arg1 : i32, i32
  }
  func.func @transform_3(%arg0: i32, %arg1: i32) -> (i32, i32) {
    %c0_i32 = arith.constant 0 : i32
    return %arg0, %arg1 : i32, i32
  }
  func.func @transform_4(%arg0: i32, %arg1: i32) -> (i32, i32) {
    %c0_i32 = arith.constant 0 : i32
    return %arg0, %arg1 : i32, i32
  }
}

module attributes {stable_mosaic.version = 11 : i64} {
  func.func @kernel(%arg0: i32, %arg1: i32, %arg2: memref<1x10x10x128xbf16, #tpu.memory_space<vmem>>, %arg3: memref<1152x128xbf16, #tpu.memory_space<vmem>>, %arg4: memref<1x128xf32, #tpu.memory_space<vmem>>, %arg5: memref<64x128xbf16, #tpu.memory_space<vmem>>) attributes {dimension_semantics = [#tpu.dimension_semantics<parallel>, #tpu.dimension_semantics<parallel>], iteration_bounds = array<i64: 2, 1>, scalar_prefetch = 0 : i64, scratch_operands = 0 : i64, tpu.core_type = #tpu.core_type<tc>, window_params = [{transform_indices = @transform_0, window_bounds = array<i64: 1, 10, 10, 128>}, {transform_indices = @transform_1, window_bounds = array<i64: 1152, 128>}, {transform_indices = @transform_2, window_bounds = array<i64: 1, 128>}, {transform_indices = @transform_3, window_bounds = array<i64: 64, 128>}]} {
    %cst = arith.constant 0.000000e+00 : f32
    %0 = vector.broadcast %cst : f32 to vector<64x128xf32>
    %c0 = arith.constant 0 : index
    %c0_0 = arith.constant 0 : index
    %c0_1 = arith.constant 0 : index
    %c0_2 = arith.constant 0 : index
    %1 = vector.load %arg2[%c0, %c0_0, %c0_1, %c0_2] : memref<1x10x10x128xbf16, #tpu.memory_space<vmem>>, vector<1x8x8x128xbf16>
    %2 = vector.shape_cast %1 : vector<1x8x8x128xbf16> to vector<8x8x128xbf16>
    %3 = vector.shape_cast %2 : vector<8x8x128xbf16> to vector<64x128xbf16>
    %c0_3 = arith.constant 0 : index
    %c0_4 = arith.constant 0 : index
    %4 = vector.load %arg3[%c0_3, %c0_4] : memref<1152x128xbf16, #tpu.memory_space<vmem>>, vector<128x128xbf16>
    %cst_5 = arith.constant dense<0.000000e+00> : vector<64x128xf32>
    %5 = tpu.matmul %3, %4, %cst_5 {dimension_numbers = #tpu.dot_dimension_numbers<[1], [0], [0], [1], [0, 0, 1, 1], [], []>} : vector<64x128xbf16>, vector<128x128xbf16>, vector<64x128xf32> -> vector<64x128xf32>
    %6 = arith.addf %0, %5 : vector<64x128xf32>
    %c0_6 = arith.constant 0 : index
    %c0_7 = arith.constant 0 : index
    %c1 = arith.constant 1 : index
    %c0_8 = arith.constant 0 : index
    %7 = vector.load %arg2[%c0_6, %c0_7, %c1, %c0_8] : memref<1x10x10x128xbf16, #tpu.memory_space<vmem>>, vector<1x8x8x128xbf16>
    %8 = vector.shape_cast %7 : vector<1x8x8x128xbf16> to vector<8x8x128xbf16>
    %9 = vector.shape_cast %8 : vector<8x8x128xbf16> to vector<64x128xbf16>
    %c128 = arith.constant 128 : index
    %c0_9 = arith.constant 0 : index
    %10 = vector.load %arg3[%c128, %c0_9] : memref<1152x128xbf16, #tpu.memory_space<vmem>>, vector<128x128xbf16>
    %cst_10 = arith.constant dense<0.000000e+00> : vector<64x128xf32>
    %11 = tpu.matmul %9, %10, %cst_10 {dimension_numbers = #tpu.dot_dimension_numbers<[1], [0], [0], [1], [0, 0, 1, 1], [], []>} : vector<64x128xbf16>, vector<128x128xbf16>, vector<64x128xf32> -> vector<64x128xf32>
    %12 = arith.addf %6, %11 : vector<64x128xf32>
    %c0_11 = arith.constant 0 : index
    %c0_12 = arith.constant 0 : index
    %c2 = arith.constant 2 : index
    %c0_13 = arith.constant 0 : index
    %13 = vector.load %arg2[%c0_11, %c0_12, %c2, %c0_13] : memref<1x10x10x128xbf16, #tpu.memory_space<vmem>>, vector<1x8x8x128xbf16>
    %14 = vector.shape_cast %13 : vector<1x8x8x128xbf16> to vector<8x8x128xbf16>
    %15 = vector.shape_cast %14 : vector<8x8x128xbf16> to vector<64x128xbf16>
    %c256 = arith.constant 256 : index
    %c0_14 = arith.constant 0 : index
    %16 = vector.load %arg3[%c256, %c0_14] : memref<1152x128xbf16, #tpu.memory_space<vmem>>, vector<128x128xbf16>
    %cst_15 = arith.constant dense<0.000000e+00> : vector<64x128xf32>
    %17 = tpu.matmul %15, %16, %cst_15 {dimension_numbers = #tpu.dot_dimension_numbers<[1], [0], [0], [1], [0, 0, 1, 1], [], []>} : vector<64x128xbf16>, vector<128x128xbf16>, vector<64x128xf32> -> vector<64x128xf32>
    %18 = arith.addf %12, %17 : vector<64x128xf32>
    %c0_16 = arith.constant 0 : index
    %c1_17 = arith.constant 1 : index
    %c0_18 = arith.constant 0 : index
    %c0_19 = arith.constant 0 : index
    %19 = vector.load %arg2[%c0_16, %c1_17, %c0_18, %c0_19] : memref<1x10x10x128xbf16, #tpu.memory_space<vmem>>, vector<1x8x8x128xbf16>
    %20 = vector.shape_cast %19 : vector<1x8x8x128xbf16> to vector<8x8x128xbf16>
    %21 = vector.shape_cast %20 : vector<8x8x128xbf16> to vector<64x128xbf16>
    %c384 = arith.constant 384 : index
    %c0_20 = arith.constant 0 : index
    %22 = vector.load %arg3[%c384, %c0_20] : memref<1152x128xbf16, #tpu.memory_space<vmem>>, vector<128x128xbf16>
    %cst_21 = arith.constant dense<0.000000e+00> : vector<64x128xf32>
    %23 = tpu.matmul %21, %22, %cst_21 {dimension_numbers = #tpu.dot_dimension_numbers<[1], [0], [0], [1], [0, 0, 1, 1], [], []>} : vector<64x128xbf16>, vector<128x128xbf16>, vector<64x128xf32> -> vector<64x128xf32>
    %24 = arith.addf %18, %23 : vector<64x128xf32>
    %c0_22 = arith.constant 0 : index
    %c1_23 = arith.constant 1 : index
    %c1_24 = arith.constant 1 : index
    %c0_25 = arith.constant 0 : index
    %25 = vector.load %arg2[%c0_22, %c1_23, %c1_24, %c0_25] : memref<1x10x10x128xbf16, #tpu.memory_space<vmem>>, vector<1x8x8x128xbf16>
    %26 = vector.shape_cast %25 : vector<1x8x8x128xbf16> to vector<8x8x128xbf16>
    %27 = vector.shape_cast %26 : vector<8x8x128xbf16> to vector<64x128xbf16>
    %c512 = arith.constant 512 : index
    %c0_26 = arith.constant 0 : index
    %28 = vector.load %arg3[%c512, %c0_26] : memref<1152x128xbf16, #tpu.memory_space<vmem>>, vector<128x128xbf16>
    %cst_27 = arith.constant dense<0.000000e+00> : vector<64x128xf32>
    %29 = tpu.matmul %27, %28, %cst_27 {dimension_numbers = #tpu.dot_dimension_numbers<[1], [0], [0], [1], [0, 0, 1, 1], [], []>} : vector<64x128xbf16>, vector<128x128xbf16>, vector<64x128xf32> -> vector<64x128xf32>
    %30 = arith.addf %24, %29 : vector<64x128xf32>
    %c0_28 = arith.constant 0 : index
    %c1_29 = arith.constant 1 : index
    %c2_30 = arith.constant 2 : index
    %c0_31 = arith.constant 0 : index
    %31 = vector.load %arg2[%c0_28, %c1_29, %c2_30, %c0_31] : memref<1x10x10x128xbf16, #tpu.memory_space<vmem>>, vector<1x8x8x128xbf16>
    %32 = vector.shape_cast %31 : vector<1x8x8x128xbf16> to vector<8x8x128xbf16>
    %33 = vector.shape_cast %32 : vector<8x8x128xbf16> to vector<64x128xbf16>
    %c640 = arith.constant 640 : index
    %c0_32 = arith.constant 0 : index
    %34 = vector.load %arg3[%c640, %c0_32] : memref<1152x128xbf16, #tpu.memory_space<vmem>>, vector<128x128xbf16>
    %cst_33 = arith.constant dense<0.000000e+00> : vector<64x128xf32>
    %35 = tpu.matmul %33, %34, %cst_33 {dimension_numbers = #tpu.dot_dimension_numbers<[1], [0], [0], [1], [0, 0, 1, 1], [], []>} : vector<64x128xbf16>, vector<128x128xbf16>, vector<64x128xf32> -> vector<64x128xf32>
    %36 = arith.addf %30, %35 : vector<64x128xf32>
    %c0_34 = arith.constant 0 : index
    %c2_35 = arith.constant 2 : index
    %c0_36 = arith.constant 0 : index
    %c0_37 = arith.constant 0 : index
    %37 = vector.load %arg2[%c0_34, %c2_35, %c0_36, %c0_37] : memref<1x10x10x128xbf16, #tpu.memory_space<vmem>>, vector<1x8x8x128xbf16>
    %38 = vector.shape_cast %37 : vector<1x8x8x128xbf16> to vector<8x8x128xbf16>
    %39 = vector.shape_cast %38 : vector<8x8x128xbf16> to vector<64x128xbf16>
    %c768 = arith.constant 768 : index
    %c0_38 = arith.constant 0 : index
    %40 = vector.load %arg3[%c768, %c0_38] : memref<1152x128xbf16, #tpu.memory_space<vmem>>, vector<128x128xbf16>
    %cst_39 = arith.constant dense<0.000000e+00> : vector<64x128xf32>
    %41 = tpu.matmul %39, %40, %cst_39 {dimension_numbers = #tpu.dot_dimension_numbers<[1], [0], [0], [1], [0, 0, 1, 1], [], []>} : vector<64x128xbf16>, vector<128x128xbf16>, vector<64x128xf32> -> vector<64x128xf32>
    %42 = arith.addf %36, %41 : vector<64x128xf32>
    %c0_40 = arith.constant 0 : index
    %c2_41 = arith.constant 2 : index
    %c1_42 = arith.constant 1 : index
    %c0_43 = arith.constant 0 : index
    %43 = vector.load %arg2[%c0_40, %c2_41, %c1_42, %c0_43] : memref<1x10x10x128xbf16, #tpu.memory_space<vmem>>, vector<1x8x8x128xbf16>
    %44 = vector.shape_cast %43 : vector<1x8x8x128xbf16> to vector<8x8x128xbf16>
    %45 = vector.shape_cast %44 : vector<8x8x128xbf16> to vector<64x128xbf16>
    %c896 = arith.constant 896 : index
    %c0_44 = arith.constant 0 : index
    %46 = vector.load %arg3[%c896, %c0_44] : memref<1152x128xbf16, #tpu.memory_space<vmem>>, vector<128x128xbf16>
    %cst_45 = arith.constant dense<0.000000e+00> : vector<64x128xf32>
    %47 = tpu.matmul %45, %46, %cst_45 {dimension_numbers = #tpu.dot_dimension_numbers<[1], [0], [0], [1], [0, 0, 1, 1], [], []>} : vector<64x128xbf16>, vector<128x128xbf16>, vector<64x128xf32> -> vector<64x128xf32>
    %48 = arith.addf %42, %47 : vector<64x128xf32>
    %c0_46 = arith.constant 0 : index
    %c2_47 = arith.constant 2 : index
    %c2_48 = arith.constant 2 : index
    %c0_49 = arith.constant 0 : index
    %49 = vector.load %arg2[%c0_46, %c2_47, %c2_48, %c0_49] : memref<1x10x10x128xbf16, #tpu.memory_space<vmem>>, vector<1x8x8x128xbf16>
    %50 = vector.shape_cast %49 : vector<1x8x8x128xbf16> to vector<8x8x128xbf16>
    %51 = vector.shape_cast %50 : vector<8x8x128xbf16> to vector<64x128xbf16>
    %c1024 = arith.constant 1024 : index
    %c0_50 = arith.constant 0 : index
    %52 = vector.load %arg3[%c1024, %c0_50] : memref<1152x128xbf16, #tpu.memory_space<vmem>>, vector<128x128xbf16>
    %cst_51 = arith.constant dense<0.000000e+00> : vector<64x128xf32>
    %53 = tpu.matmul %51, %52, %cst_51 {dimension_numbers = #tpu.dot_dimension_numbers<[1], [0], [0], [1], [0, 0, 1, 1], [], []>} : vector<64x128xbf16>, vector<128x128xbf16>, vector<64x128xf32> -> vector<64x128xf32>
    %54 = arith.addf %48, %53 : vector<64x128xf32>
    %c0_52 = arith.constant 0 : index
    %c0_53 = arith.constant 0 : index
    %55 = vector.load %arg4[%c0_52, %c0_53] : memref<1x128xf32, #tpu.memory_space<vmem>>, vector<1x128xf32>
    %56 = vector.broadcast %55 : vector<1x128xf32> to vector<64x128xf32>
    %57 = arith.addf %54, %56 : vector<64x128xf32>
    %cst_54 = arith.constant 0.000000e+00 : f32
    %58 = vector.broadcast %cst_54 : f32 to vector<64x128xf32>
    %59 = arith.maximumf %57, %58 : vector<64x128xf32>
    %60 = arith.truncf %59 : vector<64x128xf32> to vector<64x128xbf16>
    %c0_55 = arith.constant 0 : index
    %c0_56 = arith.constant 0 : index
    %61 = vector.load %arg5[%c0_55, %c0_56] : memref<64x128xbf16, #tpu.memory_space<vmem>>, vector<64x128xbf16>
    tpu.vector_store %arg5[%c0_55, %c0_56], %60 {strides = array<i32>} : memref<64x128xbf16, #tpu.memory_space<vmem>>, vector<64x128xbf16>,
    return
  }
  func.func @transform_0(%arg0: i32, %arg1: i32) -> (i32, i32, i32, i32) {
    %c0_i32 = arith.constant 0 : i32
    %c0_i32_0 = arith.constant 0 : i32
    %c0_i32_1 = arith.constant 0 : i32
    %c0_i32_2 = arith.constant 0 : i32
    return %arg0, %c0_i32, %c0_i32_0, %c0_i32_1 : i32, i32, i32, i32
  }
  func.func @transform_1(%arg0: i32, %arg1: i32) -> (i32, i32) {
    %c0_i32 = arith.constant 0 : i32
    %c0_i32_0 = arith.constant 0 : i32
    return %c0_i32, %arg1 : i32, i32
  }
  func.func @transform_2(%arg0: i32, %arg1: i32) -> (i32, i32) {
    %c0_i32 = arith.constant 0 : i32
    %c0_i32_0 = arith.constant 0 : i32
    return %c0_i32, %arg1 : i32, i32
  }
  func.func @transform_3(%arg0: i32, %arg1: i32) -> (i32, i32) {
    %c0_i32 = arith.constant 0 : i32
    return %arg0, %arg1 : i32, i32
  }
}

module attributes {stable_mosaic.version = 11 : i64} {
  func.func @kernel(%arg0: i32, %arg1: i32, %arg2: memref<1x10x9x256xbf16, #tpu.memory_space<vmem>>, %arg3: memref<1152x128xbf16, #tpu.memory_space<vmem>>, %arg4: memref<1x128xf32, #tpu.memory_space<vmem>>, %arg5: memref<32x128xbf16, #tpu.memory_space<vmem>>) attributes {dimension_semantics = [#tpu.dimension_semantics<parallel>, #tpu.dimension_semantics<parallel>], iteration_bounds = array<i64: 2, 1>, scalar_prefetch = 0 : i64, scratch_operands = 0 : i64, tpu.core_type = #tpu.core_type<tc>, window_params = [{transform_indices = @transform_0, window_bounds = array<i64: 1, 10, 9, 256>}, {transform_indices = @transform_1, window_bounds = array<i64: 1152, 128>}, {transform_indices = @transform_2, window_bounds = array<i64: 1, 128>}, {transform_indices = @transform_3, window_bounds = array<i64: 32, 128>}]} {
    %cst = arith.constant 0.000000e+00 : f32
    %0 = vector.broadcast %cst : f32 to vector<32x128xf32>
    %c0 = arith.constant 0 : index
    %c0_0 = arith.constant 0 : index
    %c0_1 = arith.constant 0 : index
    %c0_2 = arith.constant 0 : index
    %1 = vector.load %arg2[%c0, %c0_0, %c0_1, %c0_2] : memref<1x10x9x256xbf16, #tpu.memory_space<vmem>>, vector<1x8x9x256xbf16>
    %2 = vector.shape_cast %1 : vector<1x8x9x256xbf16> to vector<8x9x256xbf16>
    %3 = vector.shape_cast %2 : vector<8x9x256xbf16> to vector<4x2x9x256xbf16>
    %4 = vector.extract_strided_slice %3 {offsets = [0, 0, 0, 0], sizes = [4, 1, 9, 256], strides = [1, 1, 1, 1]} : vector<4x2x9x256xbf16> to vector<4x1x9x256xbf16>
    %5 = vector.shape_cast %4 : vector<4x1x9x256xbf16> to vector<4x9x256xbf16>
    %6 = vector.extract_strided_slice %5 {offsets = [0, 0, 0], sizes = [4, 8, 128], strides = [1, 1, 1]} : vector<4x9x256xbf16> to vector<4x8x128xbf16>
    %7 = vector.shape_cast %6 : vector<4x8x128xbf16> to vector<32x128xbf16>
    %c0_3 = arith.constant 0 : index
    %c0_4 = arith.constant 0 : index
    %8 = vector.load %arg3[%c0_3, %c0_4] : memref<1152x128xbf16, #tpu.memory_space<vmem>>, vector<128x128xbf16>
    %cst_5 = arith.constant dense<0.000000e+00> : vector<32x128xf32>
    %9 = tpu.matmul %7, %8, %cst_5 {dimension_numbers = #tpu.dot_dimension_numbers<[1], [0], [0], [1], [0, 0, 1, 1], [], []>} : vector<32x128xbf16>, vector<128x128xbf16>, vector<32x128xf32> -> vector<32x128xf32>
    %10 = arith.addf %0, %9 : vector<32x128xf32>
    %11 = vector.extract_strided_slice %5 {offsets = [0, 0, 128], sizes = [4, 8, 128], strides = [1, 1, 1]} : vector<4x9x256xbf16> to vector<4x8x128xbf16>
    %12 = vector.shape_cast %11 : vector<4x8x128xbf16> to vector<32x128xbf16>
    %c128 = arith.constant 128 : index
    %c0_6 = arith.constant 0 : index
    %13 = vector.load %arg3[%c128, %c0_6] : memref<1152x128xbf16, #tpu.memory_space<vmem>>, vector<128x128xbf16>
    %cst_7 = arith.constant dense<0.000000e+00> : vector<32x128xf32>
    %14 = tpu.matmul %12, %13, %cst_7 {dimension_numbers = #tpu.dot_dimension_numbers<[1], [0], [0], [1], [0, 0, 1, 1], [], []>} : vector<32x128xbf16>, vector<128x128xbf16>, vector<32x128xf32> -> vector<32x128xf32>
    %15 = arith.addf %10, %14 : vector<32x128xf32>
    %16 = vector.extract_strided_slice %5 {offsets = [0, 1, 0], sizes = [4, 8, 128], strides = [1, 1, 1]} : vector<4x9x256xbf16> to vector<4x8x128xbf16>
    %17 = vector.shape_cast %16 : vector<4x8x128xbf16> to vector<32x128xbf16>
    %c256 = arith.constant 256 : index
    %c0_8 = arith.constant 0 : index
    %18 = vector.load %arg3[%c256, %c0_8] : memref<1152x128xbf16, #tpu.memory_space<vmem>>, vector<128x128xbf16>
    %cst_9 = arith.constant dense<0.000000e+00> : vector<32x128xf32>
    %19 = tpu.matmul %17, %18, %cst_9 {dimension_numbers = #tpu.dot_dimension_numbers<[1], [0], [0], [1], [0, 0, 1, 1], [], []>} : vector<32x128xbf16>, vector<128x128xbf16>, vector<32x128xf32> -> vector<32x128xf32>
    %20 = arith.addf %15, %19 : vector<32x128xf32>
    %c0_10 = arith.constant 0 : index
    %c1 = arith.constant 1 : index
    %c0_11 = arith.constant 0 : index
    %c0_12 = arith.constant 0 : index
    %21 = vector.load %arg2[%c0_10, %c1, %c0_11, %c0_12] : memref<1x10x9x256xbf16, #tpu.memory_space<vmem>>, vector<1x8x9x256xbf16>
    %22 = vector.shape_cast %21 : vector<1x8x9x256xbf16> to vector<8x9x256xbf16>
    %23 = vector.shape_cast %22 : vector<8x9x256xbf16> to vector<4x2x9x256xbf16>
    %24 = vector.extract_strided_slice %23 {offsets = [0, 0, 0, 0], sizes = [4, 1, 9, 256], strides = [1, 1, 1, 1]} : vector<4x2x9x256xbf16> to vector<4x1x9x256xbf16>
    %25 = vector.shape_cast %24 : vector<4x1x9x256xbf16> to vector<4x9x256xbf16>
    %26 = vector.extract_strided_slice %25 {offsets = [0, 0, 0], sizes = [4, 8, 128], strides = [1, 1, 1]} : vector<4x9x256xbf16> to vector<4x8x128xbf16>
    %27 = vector.shape_cast %26 : vector<4x8x128xbf16> to vector<32x128xbf16>
    %c384 = arith.constant 384 : index
    %c0_13 = arith.constant 0 : index
    %28 = vector.load %arg3[%c384, %c0_13] : memref<1152x128xbf16, #tpu.memory_space<vmem>>, vector<128x128xbf16>
    %cst_14 = arith.constant dense<0.000000e+00> : vector<32x128xf32>
    %29 = tpu.matmul %27, %28, %cst_14 {dimension_numbers = #tpu.dot_dimension_numbers<[1], [0], [0], [1], [0, 0, 1, 1], [], []>} : vector<32x128xbf16>, vector<128x128xbf16>, vector<32x128xf32> -> vector<32x128xf32>
    %30 = arith.addf %20, %29 : vector<32x128xf32>
    %31 = vector.extract_strided_slice %25 {offsets = [0, 0, 128], sizes = [4, 8, 128], strides = [1, 1, 1]} : vector<4x9x256xbf16> to vector<4x8x128xbf16>
    %32 = vector.shape_cast %31 : vector<4x8x128xbf16> to vector<32x128xbf16>
    %c512 = arith.constant 512 : index
    %c0_15 = arith.constant 0 : index
    %33 = vector.load %arg3[%c512, %c0_15] : memref<1152x128xbf16, #tpu.memory_space<vmem>>, vector<128x128xbf16>
    %cst_16 = arith.constant dense<0.000000e+00> : vector<32x128xf32>
    %34 = tpu.matmul %32, %33, %cst_16 {dimension_numbers = #tpu.dot_dimension_numbers<[1], [0], [0], [1], [0, 0, 1, 1], [], []>} : vector<32x128xbf16>, vector<128x128xbf16>, vector<32x128xf32> -> vector<32x128xf32>
    %35 = arith.addf %30, %34 : vector<32x128xf32>
    %36 = vector.extract_strided_slice %25 {offsets = [0, 1, 0], sizes = [4, 8, 128], strides = [1, 1, 1]} : vector<4x9x256xbf16> to vector<4x8x128xbf16>
    %37 = vector.shape_cast %36 : vector<4x8x128xbf16> to vector<32x128xbf16>
    %c640 = arith.constant 640 : index
    %c0_17 = arith.constant 0 : index
    %38 = vector.load %arg3[%c640, %c0_17] : memref<1152x128xbf16, #tpu.memory_space<vmem>>, vector<128x128xbf16>
    %cst_18 = arith.constant dense<0.000000e+00> : vector<32x128xf32>
    %39 = tpu.matmul %37, %38, %cst_18 {dimension_numbers = #tpu.dot_dimension_numbers<[1], [0], [0], [1], [0, 0, 1, 1], [], []>} : vector<32x128xbf16>, vector<128x128xbf16>, vector<32x128xf32> -> vector<32x128xf32>
    %40 = arith.addf %35, %39 : vector<32x128xf32>
    %c0_19 = arith.constant 0 : index
    %c2 = arith.constant 2 : index
    %c0_20 = arith.constant 0 : index
    %c0_21 = arith.constant 0 : index
    %41 = vector.load %arg2[%c0_19, %c2, %c0_20, %c0_21] : memref<1x10x9x256xbf16, #tpu.memory_space<vmem>>, vector<1x8x9x256xbf16>
    %42 = vector.shape_cast %41 : vector<1x8x9x256xbf16> to vector<8x9x256xbf16>
    %43 = vector.shape_cast %42 : vector<8x9x256xbf16> to vector<4x2x9x256xbf16>
    %44 = vector.extract_strided_slice %43 {offsets = [0, 0, 0, 0], sizes = [4, 1, 9, 256], strides = [1, 1, 1, 1]} : vector<4x2x9x256xbf16> to vector<4x1x9x256xbf16>
    %45 = vector.shape_cast %44 : vector<4x1x9x256xbf16> to vector<4x9x256xbf16>
    %46 = vector.extract_strided_slice %45 {offsets = [0, 0, 0], sizes = [4, 8, 128], strides = [1, 1, 1]} : vector<4x9x256xbf16> to vector<4x8x128xbf16>
    %47 = vector.shape_cast %46 : vector<4x8x128xbf16> to vector<32x128xbf16>
    %c768 = arith.constant 768 : index
    %c0_22 = arith.constant 0 : index
    %48 = vector.load %arg3[%c768, %c0_22] : memref<1152x128xbf16, #tpu.memory_space<vmem>>, vector<128x128xbf16>
    %cst_23 = arith.constant dense<0.000000e+00> : vector<32x128xf32>
    %49 = tpu.matmul %47, %48, %cst_23 {dimension_numbers = #tpu.dot_dimension_numbers<[1], [0], [0], [1], [0, 0, 1, 1], [], []>} : vector<32x128xbf16>, vector<128x128xbf16>, vector<32x128xf32> -> vector<32x128xf32>
    %50 = arith.addf %40, %49 : vector<32x128xf32>
    %51 = vector.extract_strided_slice %45 {offsets = [0, 0, 128], sizes = [4, 8, 128], strides = [1, 1, 1]} : vector<4x9x256xbf16> to vector<4x8x128xbf16>
    %52 = vector.shape_cast %51 : vector<4x8x128xbf16> to vector<32x128xbf16>
    %c896 = arith.constant 896 : index
    %c0_24 = arith.constant 0 : index
    %53 = vector.load %arg3[%c896, %c0_24] : memref<1152x128xbf16, #tpu.memory_space<vmem>>, vector<128x128xbf16>
    %cst_25 = arith.constant dense<0.000000e+00> : vector<32x128xf32>
    %54 = tpu.matmul %52, %53, %cst_25 {dimension_numbers = #tpu.dot_dimension_numbers<[1], [0], [0], [1], [0, 0, 1, 1], [], []>} : vector<32x128xbf16>, vector<128x128xbf16>, vector<32x128xf32> -> vector<32x128xf32>
    %55 = arith.addf %50, %54 : vector<32x128xf32>
    %56 = vector.extract_strided_slice %45 {offsets = [0, 1, 0], sizes = [4, 8, 128], strides = [1, 1, 1]} : vector<4x9x256xbf16> to vector<4x8x128xbf16>
    %57 = vector.shape_cast %56 : vector<4x8x128xbf16> to vector<32x128xbf16>
    %c1024 = arith.constant 1024 : index
    %c0_26 = arith.constant 0 : index
    %58 = vector.load %arg3[%c1024, %c0_26] : memref<1152x128xbf16, #tpu.memory_space<vmem>>, vector<128x128xbf16>
    %cst_27 = arith.constant dense<0.000000e+00> : vector<32x128xf32>
    %59 = tpu.matmul %57, %58, %cst_27 {dimension_numbers = #tpu.dot_dimension_numbers<[1], [0], [0], [1], [0, 0, 1, 1], [], []>} : vector<32x128xbf16>, vector<128x128xbf16>, vector<32x128xf32> -> vector<32x128xf32>
    %60 = arith.addf %55, %59 : vector<32x128xf32>
    %c0_28 = arith.constant 0 : index
    %c0_29 = arith.constant 0 : index
    %61 = vector.load %arg4[%c0_28, %c0_29] : memref<1x128xf32, #tpu.memory_space<vmem>>, vector<1x128xf32>
    %62 = vector.broadcast %61 : vector<1x128xf32> to vector<32x128xf32>
    %63 = arith.addf %60, %62 : vector<32x128xf32>
    %cst_30 = arith.constant 0.000000e+00 : f32
    %64 = vector.broadcast %cst_30 : f32 to vector<32x128xf32>
    %65 = arith.maximumf %63, %64 : vector<32x128xf32>
    %66 = vector.shape_cast %65 : vector<32x128xf32> to vector<4x8x128xf32>
    %67 = tpu.iota {dimensions = array<i32: 1>} : vector<4x8x128xi32>
    %c4_i32 = arith.constant 4 : i32
    %68 = vector.broadcast %c4_i32 : i32 to vector<4x8x128xi32>
    %69 = arith.cmpi slt, %67, %68 : vector<4x8x128xi32>
    %cst_31 = arith.constant 0.000000e+00 : f32
    %70 = vector.broadcast %cst_31 : f32 to vector<4x8x128xf32>
    %71 = arith.select %69, %66, %70 : vector<4x8x128xi1>, vector<4x8x128xf32>
    %72 = vector.shape_cast %71 : vector<4x8x128xf32> to vector<32x128xf32>
    %73 = arith.truncf %72 : vector<32x128xf32> to vector<32x128xbf16>
    %c0_32 = arith.constant 0 : index
    %c0_33 = arith.constant 0 : index
    %74 = vector.load %arg5[%c0_32, %c0_33] : memref<32x128xbf16, #tpu.memory_space<vmem>>, vector<32x128xbf16>
    tpu.vector_store %arg5[%c0_32, %c0_33], %73 {strides = array<i32>} : memref<32x128xbf16, #tpu.memory_space<vmem>>, vector<32x128xbf16>,
    return
  }
  func.func @transform_0(%arg0: i32, %arg1: i32) -> (i32, i32, i32, i32) {
    %c0_i32 = arith.constant 0 : i32
    %c0_i32_0 = arith.constant 0 : i32
    %c0_i32_1 = arith.constant 0 : i32
    %c0_i32_2 = arith.constant 0 : i32
    return %arg0, %c0_i32, %c0_i32_0, %c0_i32_1 : i32, i32, i32, i32
  }
  func.func @transform_1(%arg0: i32, %arg1: i32) -> (i32, i32) {
    %c0_i32 = arith.constant 0 : i32
    %c0_i32_0 = arith.constant 0 : i32
    return %c0_i32, %arg1 : i32, i32
  }
  func.func @transform_2(%arg0: i32, %arg1: i32) -> (i32, i32) {
    %c0_i32 = arith.constant 0 : i32
    %c0_i32_0 = arith.constant 0 : i32
    return %c0_i32, %arg1 : i32, i32
  }
  func.func @transform_3(%arg0: i32, %arg1: i32) -> (i32, i32) {
    %c0_i32 = arith.constant 0 : i32
    return %arg0, %arg1 : i32, i32
  }
}

module attributes {stable_mosaic.version = 11 : i64} {
  func.func @kernel(%arg0: i32, %arg1: i32, %arg2: memref<1x8x8x256xbf16, #tpu.memory_space<vmem>>, %arg3: memref<128x128xbf16, #tpu.memory_space<vmem>>, %arg4: memref<1x128xf32, #tpu.memory_space<vmem>>, %arg5: memref<32x128xbf16, #tpu.memory_space<vmem>>) attributes {dimension_semantics = [#tpu.dimension_semantics<parallel>, #tpu.dimension_semantics<parallel>], iteration_bounds = array<i64: 2, 1>, scalar_prefetch = 0 : i64, scratch_operands = 0 : i64, tpu.core_type = #tpu.core_type<tc>, window_params = [{transform_indices = @transform_0, window_bounds = array<i64: 1, 8, 8, 256>}, {transform_indices = @transform_1, window_bounds = array<i64: 128, 128>}, {transform_indices = @transform_2, window_bounds = array<i64: 1, 128>}, {transform_indices = @transform_3, window_bounds = array<i64: 32, 128>}]} {
    %cst = arith.constant 0.000000e+00 : f32
    %0 = vector.broadcast %cst : f32 to vector<32x128xf32>
    %c0 = arith.constant 0 : index
    %c0_0 = arith.constant 0 : index
    %c0_1 = arith.constant 0 : index
    %c0_2 = arith.constant 0 : index
    %1 = vector.load %arg2[%c0, %c0_0, %c0_1, %c0_2] : memref<1x8x8x256xbf16, #tpu.memory_space<vmem>>, vector<1x8x8x256xbf16>
    %2 = vector.shape_cast %1 : vector<1x8x8x256xbf16> to vector<8x8x256xbf16>
    %3 = vector.shape_cast %2 : vector<8x8x256xbf16> to vector<4x2x8x256xbf16>
    %4 = vector.extract_strided_slice %3 {offsets = [0, 0, 0, 0], sizes = [4, 1, 8, 256], strides = [1, 1, 1, 1]} : vector<4x2x8x256xbf16> to vector<4x1x8x256xbf16>
    %5 = vector.shape_cast %4 : vector<4x1x8x256xbf16> to vector<4x8x256xbf16>
    %6 = vector.extract_strided_slice %5 {offsets = [0, 0, 0], sizes = [4, 8, 128], strides = [1, 1, 1]} : vector<4x8x256xbf16> to vector<4x8x128xbf16>
    %7 = vector.shape_cast %6 : vector<4x8x128xbf16> to vector<32x128xbf16>
    %c0_3 = arith.constant 0 : index
    %c0_4 = arith.constant 0 : index
    %8 = vector.load %arg3[%c0_3, %c0_4] : memref<128x128xbf16, #tpu.memory_space<vmem>>, vector<128x128xbf16>
    %cst_5 = arith.constant dense<0.000000e+00> : vector<32x128xf32>
    %9 = tpu.matmul %7, %8, %cst_5 {dimension_numbers = #tpu.dot_dimension_numbers<[1], [0], [0], [1], [0, 0, 1, 1], [], []>} : vector<32x128xbf16>, vector<128x128xbf16>, vector<32x128xf32> -> vector<32x128xf32>
    %10 = arith.addf %0, %9 : vector<32x128xf32>
    %c0_6 = arith.constant 0 : index
    %c0_7 = arith.constant 0 : index
    %11 = vector.load %arg4[%c0_6, %c0_7] : memref<1x128xf32, #tpu.memory_space<vmem>>, vector<1x128xf32>
    %12 = vector.broadcast %11 : vector<1x128xf32> to vector<32x128xf32>
    %13 = arith.addf %10, %12 : vector<32x128xf32>
    %14 = vector.shape_cast %13 : vector<32x128xf32> to vector<4x8x128xf32>
    %15 = tpu.iota {dimensions = array<i32: 1>} : vector<4x8x128xi32>
    %c4_i32 = arith.constant 4 : i32
    %16 = vector.broadcast %c4_i32 : i32 to vector<4x8x128xi32>
    %17 = arith.cmpi slt, %15, %16 : vector<4x8x128xi32>
    %cst_8 = arith.constant 0.000000e+00 : f32
    %18 = vector.broadcast %cst_8 : f32 to vector<4x8x128xf32>
    %19 = arith.select %17, %14, %18 : vector<4x8x128xi1>, vector<4x8x128xf32>
    %20 = vector.shape_cast %19 : vector<4x8x128xf32> to vector<32x128xf32>
    %21 = arith.truncf %20 : vector<32x128xf32> to vector<32x128xbf16>
    %c0_9 = arith.constant 0 : index
    %c0_10 = arith.constant 0 : index
    %22 = vector.load %arg5[%c0_9, %c0_10] : memref<32x128xbf16, #tpu.memory_space<vmem>>, vector<32x128xbf16>
    tpu.vector_store %arg5[%c0_9, %c0_10], %21 {strides = array<i32>} : memref<32x128xbf16, #tpu.memory_space<vmem>>, vector<32x128xbf16>,
    return
  }
  func.func @transform_0(%arg0: i32, %arg1: i32) -> (i32, i32, i32, i32) {
    %c0_i32 = arith.constant 0 : i32
    %c0_i32_0 = arith.constant 0 : i32
    %c0_i32_1 = arith.constant 0 : i32
    %c0_i32_2 = arith.constant 0 : i32
    return %arg0, %c0_i32, %c0_i32_0, %c0_i32_1 : i32, i32, i32, i32
  }
  func.func @transform_1(%arg0: i32, %arg1: i32) -> (i32, i32) {
    %c0_i32 = arith.constant 0 : i32
    %c0_i32_0 = arith.constant 0 : i32
    return %c0_i32, %arg1 : i32, i32
  }
  func.func @transform_2(%arg0: i32, %arg1: i32) -> (i32, i32) {
    %c0_i32 = arith.constant 0 : i32
    %c0_i32_0 = arith.constant 0 : i32
    return %c0_i32, %arg1 : i32, i32
  }
  func.func @transform_3(%arg0: i32, %arg1: i32) -> (i32, i32) {
    %c0_i32 = arith.constant 0 : i32
    return %arg0, %arg1 : i32, i32
  }
}

module attributes {stable_mosaic.version = 11 : i64} {
  func.func @kernel(%arg0: i32, %arg1: i32, %arg2: memref<1x6x10x128xbf16, #tpu.memory_space<vmem>>, %arg3: memref<1152x128xbf16, #tpu.memory_space<vmem>>, %arg4: memref<1x128xf32, #tpu.memory_space<vmem>>, %arg5: memref<32x128xbf16, #tpu.memory_space<vmem>>, %arg6: memref<32x128xbf16, #tpu.memory_space<vmem>>) attributes {dimension_semantics = [#tpu.dimension_semantics<parallel>, #tpu.dimension_semantics<parallel>], iteration_bounds = array<i64: 2, 1>, scalar_prefetch = 0 : i64, scratch_operands = 0 : i64, tpu.core_type = #tpu.core_type<tc>, window_params = [{transform_indices = @transform_0, window_bounds = array<i64: 1, 6, 10, 128>}, {transform_indices = @transform_1, window_bounds = array<i64: 1152, 128>}, {transform_indices = @transform_2, window_bounds = array<i64: 1, 128>}, {transform_indices = @transform_3, window_bounds = array<i64: 32, 128>}, {transform_indices = @transform_4, window_bounds = array<i64: 32, 128>}]} {
    %cst = arith.constant 0.000000e+00 : f32
    %0 = vector.broadcast %cst : f32 to vector<32x128xf32>
    %c0 = arith.constant 0 : index
    %c0_0 = arith.constant 0 : index
    %c0_1 = arith.constant 0 : index
    %c0_2 = arith.constant 0 : index
    %1 = vector.load %arg2[%c0, %c0_0, %c0_1, %c0_2] : memref<1x6x10x128xbf16, #tpu.memory_space<vmem>>, vector<1x4x8x128xbf16>
    %2 = vector.shape_cast %1 : vector<1x4x8x128xbf16> to vector<4x8x128xbf16>
    %3 = vector.shape_cast %2 : vector<4x8x128xbf16> to vector<32x128xbf16>
    %c0_3 = arith.constant 0 : index
    %c0_4 = arith.constant 0 : index
    %4 = vector.load %arg3[%c0_3, %c0_4] : memref<1152x128xbf16, #tpu.memory_space<vmem>>, vector<128x128xbf16>
    %cst_5 = arith.constant dense<0.000000e+00> : vector<32x128xf32>
    %5 = tpu.matmul %3, %4, %cst_5 {dimension_numbers = #tpu.dot_dimension_numbers<[1], [0], [0], [1], [0, 0, 1, 1], [], []>} : vector<32x128xbf16>, vector<128x128xbf16>, vector<32x128xf32> -> vector<32x128xf32>
    %6 = arith.addf %0, %5 : vector<32x128xf32>
    %c0_6 = arith.constant 0 : index
    %c0_7 = arith.constant 0 : index
    %c1 = arith.constant 1 : index
    %c0_8 = arith.constant 0 : index
    %7 = vector.load %arg2[%c0_6, %c0_7, %c1, %c0_8] : memref<1x6x10x128xbf16, #tpu.memory_space<vmem>>, vector<1x4x8x128xbf16>
    %8 = vector.shape_cast %7 : vector<1x4x8x128xbf16> to vector<4x8x128xbf16>
    %9 = vector.shape_cast %8 : vector<4x8x128xbf16> to vector<32x128xbf16>
    %c128 = arith.constant 128 : index
    %c0_9 = arith.constant 0 : index
    %10 = vector.load %arg3[%c128, %c0_9] : memref<1152x128xbf16, #tpu.memory_space<vmem>>, vector<128x128xbf16>
    %cst_10 = arith.constant dense<0.000000e+00> : vector<32x128xf32>
    %11 = tpu.matmul %9, %10, %cst_10 {dimension_numbers = #tpu.dot_dimension_numbers<[1], [0], [0], [1], [0, 0, 1, 1], [], []>} : vector<32x128xbf16>, vector<128x128xbf16>, vector<32x128xf32> -> vector<32x128xf32>
    %12 = arith.addf %6, %11 : vector<32x128xf32>
    %c0_11 = arith.constant 0 : index
    %c0_12 = arith.constant 0 : index
    %c2 = arith.constant 2 : index
    %c0_13 = arith.constant 0 : index
    %13 = vector.load %arg2[%c0_11, %c0_12, %c2, %c0_13] : memref<1x6x10x128xbf16, #tpu.memory_space<vmem>>, vector<1x4x8x128xbf16>
    %14 = vector.shape_cast %13 : vector<1x4x8x128xbf16> to vector<4x8x128xbf16>
    %15 = vector.shape_cast %14 : vector<4x8x128xbf16> to vector<32x128xbf16>
    %c256 = arith.constant 256 : index
    %c0_14 = arith.constant 0 : index
    %16 = vector.load %arg3[%c256, %c0_14] : memref<1152x128xbf16, #tpu.memory_space<vmem>>, vector<128x128xbf16>
    %cst_15 = arith.constant dense<0.000000e+00> : vector<32x128xf32>
    %17 = tpu.matmul %15, %16, %cst_15 {dimension_numbers = #tpu.dot_dimension_numbers<[1], [0], [0], [1], [0, 0, 1, 1], [], []>} : vector<32x128xbf16>, vector<128x128xbf16>, vector<32x128xf32> -> vector<32x128xf32>
    %18 = arith.addf %12, %17 : vector<32x128xf32>
    %c0_16 = arith.constant 0 : index
    %c1_17 = arith.constant 1 : index
    %c0_18 = arith.constant 0 : index
    %c0_19 = arith.constant 0 : index
    %19 = vector.load %arg2[%c0_16, %c1_17, %c0_18, %c0_19] : memref<1x6x10x128xbf16, #tpu.memory_space<vmem>>, vector<1x4x8x128xbf16>
    %20 = vector.shape_cast %19 : vector<1x4x8x128xbf16> to vector<4x8x128xbf16>
    %21 = vector.shape_cast %20 : vector<4x8x128xbf16> to vector<32x128xbf16>
    %c384 = arith.constant 384 : index
    %c0_20 = arith.constant 0 : index
    %22 = vector.load %arg3[%c384, %c0_20] : memref<1152x128xbf16, #tpu.memory_space<vmem>>, vector<128x128xbf16>
    %cst_21 = arith.constant dense<0.000000e+00> : vector<32x128xf32>
    %23 = tpu.matmul %21, %22, %cst_21 {dimension_numbers = #tpu.dot_dimension_numbers<[1], [0], [0], [1], [0, 0, 1, 1], [], []>} : vector<32x128xbf16>, vector<128x128xbf16>, vector<32x128xf32> -> vector<32x128xf32>
    %24 = arith.addf %18, %23 : vector<32x128xf32>
    %c0_22 = arith.constant 0 : index
    %c1_23 = arith.constant 1 : index
    %c1_24 = arith.constant 1 : index
    %c0_25 = arith.constant 0 : index
    %25 = vector.load %arg2[%c0_22, %c1_23, %c1_24, %c0_25] : memref<1x6x10x128xbf16, #tpu.memory_space<vmem>>, vector<1x4x8x128xbf16>
    %26 = vector.shape_cast %25 : vector<1x4x8x128xbf16> to vector<4x8x128xbf16>
    %27 = vector.shape_cast %26 : vector<4x8x128xbf16> to vector<32x128xbf16>
    %c512 = arith.constant 512 : index
    %c0_26 = arith.constant 0 : index
    %28 = vector.load %arg3[%c512, %c0_26] : memref<1152x128xbf16, #tpu.memory_space<vmem>>, vector<128x128xbf16>
    %cst_27 = arith.constant dense<0.000000e+00> : vector<32x128xf32>
    %29 = tpu.matmul %27, %28, %cst_27 {dimension_numbers = #tpu.dot_dimension_numbers<[1], [0], [0], [1], [0, 0, 1, 1], [], []>} : vector<32x128xbf16>, vector<128x128xbf16>, vector<32x128xf32> -> vector<32x128xf32>
    %30 = arith.addf %24, %29 : vector<32x128xf32>
    %c0_28 = arith.constant 0 : index
    %c1_29 = arith.constant 1 : index
    %c2_30 = arith.constant 2 : index
    %c0_31 = arith.constant 0 : index
    %31 = vector.load %arg2[%c0_28, %c1_29, %c2_30, %c0_31] : memref<1x6x10x128xbf16, #tpu.memory_space<vmem>>, vector<1x4x8x128xbf16>
    %32 = vector.shape_cast %31 : vector<1x4x8x128xbf16> to vector<4x8x128xbf16>
    %33 = vector.shape_cast %32 : vector<4x8x128xbf16> to vector<32x128xbf16>
    %c640 = arith.constant 640 : index
    %c0_32 = arith.constant 0 : index
    %34 = vector.load %arg3[%c640, %c0_32] : memref<1152x128xbf16, #tpu.memory_space<vmem>>, vector<128x128xbf16>
    %cst_33 = arith.constant dense<0.000000e+00> : vector<32x128xf32>
    %35 = tpu.matmul %33, %34, %cst_33 {dimension_numbers = #tpu.dot_dimension_numbers<[1], [0], [0], [1], [0, 0, 1, 1], [], []>} : vector<32x128xbf16>, vector<128x128xbf16>, vector<32x128xf32> -> vector<32x128xf32>
    %36 = arith.addf %30, %35 : vector<32x128xf32>
    %c0_34 = arith.constant 0 : index
    %c2_35 = arith.constant 2 : index
    %c0_36 = arith.constant 0 : index
    %c0_37 = arith.constant 0 : index
    %37 = vector.load %arg2[%c0_34, %c2_35, %c0_36, %c0_37] : memref<1x6x10x128xbf16, #tpu.memory_space<vmem>>, vector<1x4x8x128xbf16>
    %38 = vector.shape_cast %37 : vector<1x4x8x128xbf16> to vector<4x8x128xbf16>
    %39 = vector.shape_cast %38 : vector<4x8x128xbf16> to vector<32x128xbf16>
    %c768 = arith.constant 768 : index
    %c0_38 = arith.constant 0 : index
    %40 = vector.load %arg3[%c768, %c0_38] : memref<1152x128xbf16, #tpu.memory_space<vmem>>, vector<128x128xbf16>
    %cst_39 = arith.constant dense<0.000000e+00> : vector<32x128xf32>
    %41 = tpu.matmul %39, %40, %cst_39 {dimension_numbers = #tpu.dot_dimension_numbers<[1], [0], [0], [1], [0, 0, 1, 1], [], []>} : vector<32x128xbf16>, vector<128x128xbf16>, vector<32x128xf32> -> vector<32x128xf32>
    %42 = arith.addf %36, %41 : vector<32x128xf32>
    %c0_40 = arith.constant 0 : index
    %c2_41 = arith.constant 2 : index
    %c1_42 = arith.constant 1 : index
    %c0_43 = arith.constant 0 : index
    %43 = vector.load %arg2[%c0_40, %c2_41, %c1_42, %c0_43] : memref<1x6x10x128xbf16, #tpu.memory_space<vmem>>, vector<1x4x8x128xbf16>
    %44 = vector.shape_cast %43 : vector<1x4x8x128xbf16> to vector<4x8x128xbf16>
    %45 = vector.shape_cast %44 : vector<4x8x128xbf16> to vector<32x128xbf16>
    %c896 = arith.constant 896 : index
    %c0_44 = arith.constant 0 : index
    %46 = vector.load %arg3[%c896, %c0_44] : memref<1152x128xbf16, #tpu.memory_space<vmem>>, vector<128x128xbf16>
    %cst_45 = arith.constant dense<0.000000e+00> : vector<32x128xf32>
    %47 = tpu.matmul %45, %46, %cst_45 {dimension_numbers = #tpu.dot_dimension_numbers<[1], [0], [0], [1], [0, 0, 1, 1], [], []>} : vector<32x128xbf16>, vector<128x128xbf16>, vector<32x128xf32> -> vector<32x128xf32>
    %48 = arith.addf %42, %47 : vector<32x128xf32>
    %c0_46 = arith.constant 0 : index
    %c2_47 = arith.constant 2 : index
    %c2_48 = arith.constant 2 : index
    %c0_49 = arith.constant 0 : index
    %49 = vector.load %arg2[%c0_46, %c2_47, %c2_48, %c0_49] : memref<1x6x10x128xbf16, #tpu.memory_space<vmem>>, vector<1x4x8x128xbf16>
    %50 = vector.shape_cast %49 : vector<1x4x8x128xbf16> to vector<4x8x128xbf16>
    %51 = vector.shape_cast %50 : vector<4x8x128xbf16> to vector<32x128xbf16>
    %c1024 = arith.constant 1024 : index
    %c0_50 = arith.constant 0 : index
    %52 = vector.load %arg3[%c1024, %c0_50] : memref<1152x128xbf16, #tpu.memory_space<vmem>>, vector<128x128xbf16>
    %cst_51 = arith.constant dense<0.000000e+00> : vector<32x128xf32>
    %53 = tpu.matmul %51, %52, %cst_51 {dimension_numbers = #tpu.dot_dimension_numbers<[1], [0], [0], [1], [0, 0, 1, 1], [], []>} : vector<32x128xbf16>, vector<128x128xbf16>, vector<32x128xf32> -> vector<32x128xf32>
    %54 = arith.addf %48, %53 : vector<32x128xf32>
    %c0_52 = arith.constant 0 : index
    %c0_53 = arith.constant 0 : index
    %55 = vector.load %arg4[%c0_52, %c0_53] : memref<1x128xf32, #tpu.memory_space<vmem>>, vector<1x128xf32>
    %56 = vector.broadcast %55 : vector<1x128xf32> to vector<32x128xf32>
    %57 = arith.addf %54, %56 : vector<32x128xf32>
    %c0_54 = arith.constant 0 : index
    %c0_55 = arith.constant 0 : index
    %58 = vector.load %arg5[%c0_54, %c0_55] : memref<32x128xbf16, #tpu.memory_space<vmem>>, vector<32x128xbf16>
    %59 = arith.extf %58 : vector<32x128xbf16> to vector<32x128xf32>
    %60 = arith.addf %57, %59 : vector<32x128xf32>
    %cst_56 = arith.constant 0.000000e+00 : f32
    %61 = vector.broadcast %cst_56 : f32 to vector<32x128xf32>
    %62 = arith.maximumf %60, %61 : vector<32x128xf32>
    %63 = vector.shape_cast %62 : vector<32x128xf32> to vector<4x8x128xf32>
    %64 = tpu.iota {dimensions = array<i32: 1>} : vector<4x8x128xi32>
    %c4_i32 = arith.constant 4 : i32
    %65 = vector.broadcast %c4_i32 : i32 to vector<4x8x128xi32>
    %66 = arith.cmpi slt, %64, %65 : vector<4x8x128xi32>
    %cst_57 = arith.constant 0.000000e+00 : f32
    %67 = vector.broadcast %cst_57 : f32 to vector<4x8x128xf32>
    %68 = arith.select %66, %63, %67 : vector<4x8x128xi1>, vector<4x8x128xf32>
    %69 = vector.shape_cast %68 : vector<4x8x128xf32> to vector<32x128xf32>
    %70 = arith.truncf %69 : vector<32x128xf32> to vector<32x128xbf16>
    %c0_58 = arith.constant 0 : index
    %c0_59 = arith.constant 0 : index
    %71 = vector.load %arg6[%c0_58, %c0_59] : memref<32x128xbf16, #tpu.memory_space<vmem>>, vector<32x128xbf16>
    tpu.vector_store %arg6[%c0_58, %c0_59], %70 {strides = array<i32>} : memref<32x128xbf16, #tpu.memory_space<vmem>>, vector<32x128xbf16>,
    return
  }
  func.func @transform_0(%arg0: i32, %arg1: i32) -> (i32, i32, i32, i32) {
    %c0_i32 = arith.constant 0 : i32
    %c0_i32_0 = arith.constant 0 : i32
    %c0_i32_1 = arith.constant 0 : i32
    %c0_i32_2 = arith.constant 0 : i32
    return %arg0, %c0_i32, %c0_i32_0, %c0_i32_1 : i32, i32, i32, i32
  }
  func.func @transform_1(%arg0: i32, %arg1: i32) -> (i32, i32) {
    %c0_i32 = arith.constant 0 : i32
    %c0_i32_0 = arith.constant 0 : i32
    return %c0_i32, %arg1 : i32, i32
  }
  func.func @transform_2(%arg0: i32, %arg1: i32) -> (i32, i32) {
    %c0_i32 = arith.constant 0 : i32
    %c0_i32_0 = arith.constant 0 : i32
    return %c0_i32, %arg1 : i32, i32
  }
  func.func @transform_3(%arg0: i32, %arg1: i32) -> (i32, i32) {
    %c0_i32 = arith.constant 0 : i32
    return %arg0, %arg1 : i32, i32
  }
  func.func @transform_4(%arg0: i32, %arg1: i32) -> (i32, i32) {
    %c0_i32 = arith.constant 0 : i32
    return %arg0, %arg1 : i32, i32
  }
}

module attributes {stable_mosaic.version = 11 : i64} {
  func.func @kernel(%arg0: i32, %arg1: i32, %arg2: memref<1x6x9x256xbf16, #tpu.memory_space<vmem>>, %arg3: memref<1152x128xbf16, #tpu.memory_space<vmem>>, %arg4: memref<1x128xf32, #tpu.memory_space<vmem>>, %arg5: memref<16x128xbf16, #tpu.memory_space<vmem>>) attributes {dimension_semantics = [#tpu.dimension_semantics<parallel>, #tpu.dimension_semantics<parallel>], iteration_bounds = array<i64: 2, 1>, scalar_prefetch = 0 : i64, scratch_operands = 0 : i64, tpu.core_type = #tpu.core_type<tc>, window_params = [{transform_indices = @transform_0, window_bounds = array<i64: 1, 6, 9, 256>}, {transform_indices = @transform_1, window_bounds = array<i64: 1152, 128>}, {transform_indices = @transform_2, window_bounds = array<i64: 1, 128>}, {transform_indices = @transform_3, window_bounds = array<i64: 16, 128>}]} {
    %cst = arith.constant 0.000000e+00 : f32
    %0 = vector.broadcast %cst : f32 to vector<16x128xf32>
    %c0 = arith.constant 0 : index
    %c0_0 = arith.constant 0 : index
    %c0_1 = arith.constant 0 : index
    %c0_2 = arith.constant 0 : index
    %1 = vector.load %arg2[%c0, %c0_0, %c0_1, %c0_2] : memref<1x6x9x256xbf16, #tpu.memory_space<vmem>>, vector<1x4x9x256xbf16>
    %2 = vector.shape_cast %1 : vector<1x4x9x256xbf16> to vector<4x9x256xbf16>
    %3 = vector.shape_cast %2 : vector<4x9x256xbf16> to vector<2x2x9x256xbf16>
    %4 = vector.extract_strided_slice %3 {offsets = [0, 0, 0, 0], sizes = [2, 1, 9, 256], strides = [1, 1, 1, 1]} : vector<2x2x9x256xbf16> to vector<2x1x9x256xbf16>
    %5 = vector.shape_cast %4 : vector<2x1x9x256xbf16> to vector<2x9x256xbf16>
    %6 = vector.extract_strided_slice %5 {offsets = [0, 0, 0], sizes = [2, 8, 128], strides = [1, 1, 1]} : vector<2x9x256xbf16> to vector<2x8x128xbf16>
    %7 = vector.shape_cast %6 : vector<2x8x128xbf16> to vector<16x128xbf16>
    %c0_3 = arith.constant 0 : index
    %c0_4 = arith.constant 0 : index
    %8 = vector.load %arg3[%c0_3, %c0_4] : memref<1152x128xbf16, #tpu.memory_space<vmem>>, vector<128x128xbf16>
    %cst_5 = arith.constant dense<0.000000e+00> : vector<16x128xf32>
    %9 = tpu.matmul %7, %8, %cst_5 {dimension_numbers = #tpu.dot_dimension_numbers<[1], [0], [0], [1], [0, 0, 1, 1], [], []>} : vector<16x128xbf16>, vector<128x128xbf16>, vector<16x128xf32> -> vector<16x128xf32>
    %10 = arith.addf %0, %9 : vector<16x128xf32>
    %11 = vector.extract_strided_slice %5 {offsets = [0, 0, 128], sizes = [2, 8, 128], strides = [1, 1, 1]} : vector<2x9x256xbf16> to vector<2x8x128xbf16>
    %12 = vector.shape_cast %11 : vector<2x8x128xbf16> to vector<16x128xbf16>
    %c128 = arith.constant 128 : index
    %c0_6 = arith.constant 0 : index
    %13 = vector.load %arg3[%c128, %c0_6] : memref<1152x128xbf16, #tpu.memory_space<vmem>>, vector<128x128xbf16>
    %cst_7 = arith.constant dense<0.000000e+00> : vector<16x128xf32>
    %14 = tpu.matmul %12, %13, %cst_7 {dimension_numbers = #tpu.dot_dimension_numbers<[1], [0], [0], [1], [0, 0, 1, 1], [], []>} : vector<16x128xbf16>, vector<128x128xbf16>, vector<16x128xf32> -> vector<16x128xf32>
    %15 = arith.addf %10, %14 : vector<16x128xf32>
    %16 = vector.extract_strided_slice %5 {offsets = [0, 1, 0], sizes = [2, 8, 128], strides = [1, 1, 1]} : vector<2x9x256xbf16> to vector<2x8x128xbf16>
    %17 = vector.shape_cast %16 : vector<2x8x128xbf16> to vector<16x128xbf16>
    %c256 = arith.constant 256 : index
    %c0_8 = arith.constant 0 : index
    %18 = vector.load %arg3[%c256, %c0_8] : memref<1152x128xbf16, #tpu.memory_space<vmem>>, vector<128x128xbf16>
    %cst_9 = arith.constant dense<0.000000e+00> : vector<16x128xf32>
    %19 = tpu.matmul %17, %18, %cst_9 {dimension_numbers = #tpu.dot_dimension_numbers<[1], [0], [0], [1], [0, 0, 1, 1], [], []>} : vector<16x128xbf16>, vector<128x128xbf16>, vector<16x128xf32> -> vector<16x128xf32>
    %20 = arith.addf %15, %19 : vector<16x128xf32>
    %c0_10 = arith.constant 0 : index
    %c1 = arith.constant 1 : index
    %c0_11 = arith.constant 0 : index
    %c0_12 = arith.constant 0 : index
    %21 = vector.load %arg2[%c0_10, %c1, %c0_11, %c0_12] : memref<1x6x9x256xbf16, #tpu.memory_space<vmem>>, vector<1x4x9x256xbf16>
    %22 = vector.shape_cast %21 : vector<1x4x9x256xbf16> to vector<4x9x256xbf16>
    %23 = vector.shape_cast %22 : vector<4x9x256xbf16> to vector<2x2x9x256xbf16>
    %24 = vector.extract_strided_slice %23 {offsets = [0, 0, 0, 0], sizes = [2, 1, 9, 256], strides = [1, 1, 1, 1]} : vector<2x2x9x256xbf16> to vector<2x1x9x256xbf16>
    %25 = vector.shape_cast %24 : vector<2x1x9x256xbf16> to vector<2x9x256xbf16>
    %26 = vector.extract_strided_slice %25 {offsets = [0, 0, 0], sizes = [2, 8, 128], strides = [1, 1, 1]} : vector<2x9x256xbf16> to vector<2x8x128xbf16>
    %27 = vector.shape_cast %26 : vector<2x8x128xbf16> to vector<16x128xbf16>
    %c384 = arith.constant 384 : index
    %c0_13 = arith.constant 0 : index
    %28 = vector.load %arg3[%c384, %c0_13] : memref<1152x128xbf16, #tpu.memory_space<vmem>>, vector<128x128xbf16>
    %cst_14 = arith.constant dense<0.000000e+00> : vector<16x128xf32>
    %29 = tpu.matmul %27, %28, %cst_14 {dimension_numbers = #tpu.dot_dimension_numbers<[1], [0], [0], [1], [0, 0, 1, 1], [], []>} : vector<16x128xbf16>, vector<128x128xbf16>, vector<16x128xf32> -> vector<16x128xf32>
    %30 = arith.addf %20, %29 : vector<16x128xf32>
    %31 = vector.extract_strided_slice %25 {offsets = [0, 0, 128], sizes = [2, 8, 128], strides = [1, 1, 1]} : vector<2x9x256xbf16> to vector<2x8x128xbf16>
    %32 = vector.shape_cast %31 : vector<2x8x128xbf16> to vector<16x128xbf16>
    %c512 = arith.constant 512 : index
    %c0_15 = arith.constant 0 : index
    %33 = vector.load %arg3[%c512, %c0_15] : memref<1152x128xbf16, #tpu.memory_space<vmem>>, vector<128x128xbf16>
    %cst_16 = arith.constant dense<0.000000e+00> : vector<16x128xf32>
    %34 = tpu.matmul %32, %33, %cst_16 {dimension_numbers = #tpu.dot_dimension_numbers<[1], [0], [0], [1], [0, 0, 1, 1], [], []>} : vector<16x128xbf16>, vector<128x128xbf16>, vector<16x128xf32> -> vector<16x128xf32>
    %35 = arith.addf %30, %34 : vector<16x128xf32>
    %36 = vector.extract_strided_slice %25 {offsets = [0, 1, 0], sizes = [2, 8, 128], strides = [1, 1, 1]} : vector<2x9x256xbf16> to vector<2x8x128xbf16>
    %37 = vector.shape_cast %36 : vector<2x8x128xbf16> to vector<16x128xbf16>
    %c640 = arith.constant 640 : index
    %c0_17 = arith.constant 0 : index
    %38 = vector.load %arg3[%c640, %c0_17] : memref<1152x128xbf16, #tpu.memory_space<vmem>>, vector<128x128xbf16>
    %cst_18 = arith.constant dense<0.000000e+00> : vector<16x128xf32>
    %39 = tpu.matmul %37, %38, %cst_18 {dimension_numbers = #tpu.dot_dimension_numbers<[1], [0], [0], [1], [0, 0, 1, 1], [], []>} : vector<16x128xbf16>, vector<128x128xbf16>, vector<16x128xf32> -> vector<16x128xf32>
    %40 = arith.addf %35, %39 : vector<16x128xf32>
    %c0_19 = arith.constant 0 : index
    %c2 = arith.constant 2 : index
    %c0_20 = arith.constant 0 : index
    %c0_21 = arith.constant 0 : index
    %41 = vector.load %arg2[%c0_19, %c2, %c0_20, %c0_21] : memref<1x6x9x256xbf16, #tpu.memory_space<vmem>>, vector<1x4x9x256xbf16>
    %42 = vector.shape_cast %41 : vector<1x4x9x256xbf16> to vector<4x9x256xbf16>
    %43 = vector.shape_cast %42 : vector<4x9x256xbf16> to vector<2x2x9x256xbf16>
    %44 = vector.extract_strided_slice %43 {offsets = [0, 0, 0, 0], sizes = [2, 1, 9, 256], strides = [1, 1, 1, 1]} : vector<2x2x9x256xbf16> to vector<2x1x9x256xbf16>
    %45 = vector.shape_cast %44 : vector<2x1x9x256xbf16> to vector<2x9x256xbf16>
    %46 = vector.extract_strided_slice %45 {offsets = [0, 0, 0], sizes = [2, 8, 128], strides = [1, 1, 1]} : vector<2x9x256xbf16> to vector<2x8x128xbf16>
    %47 = vector.shape_cast %46 : vector<2x8x128xbf16> to vector<16x128xbf16>
    %c768 = arith.constant 768 : index
    %c0_22 = arith.constant 0 : index
    %48 = vector.load %arg3[%c768, %c0_22] : memref<1152x128xbf16, #tpu.memory_space<vmem>>, vector<128x128xbf16>
    %cst_23 = arith.constant dense<0.000000e+00> : vector<16x128xf32>
    %49 = tpu.matmul %47, %48, %cst_23 {dimension_numbers = #tpu.dot_dimension_numbers<[1], [0], [0], [1], [0, 0, 1, 1], [], []>} : vector<16x128xbf16>, vector<128x128xbf16>, vector<16x128xf32> -> vector<16x128xf32>
    %50 = arith.addf %40, %49 : vector<16x128xf32>
    %51 = vector.extract_strided_slice %45 {offsets = [0, 0, 128], sizes = [2, 8, 128], strides = [1, 1, 1]} : vector<2x9x256xbf16> to vector<2x8x128xbf16>
    %52 = vector.shape_cast %51 : vector<2x8x128xbf16> to vector<16x128xbf16>
    %c896 = arith.constant 896 : index
    %c0_24 = arith.constant 0 : index
    %53 = vector.load %arg3[%c896, %c0_24] : memref<1152x128xbf16, #tpu.memory_space<vmem>>, vector<128x128xbf16>
    %cst_25 = arith.constant dense<0.000000e+00> : vector<16x128xf32>
    %54 = tpu.matmul %52, %53, %cst_25 {dimension_numbers = #tpu.dot_dimension_numbers<[1], [0], [0], [1], [0, 0, 1, 1], [], []>} : vector<16x128xbf16>, vector<128x128xbf16>, vector<16x128xf32> -> vector<16x128xf32>
    %55 = arith.addf %50, %54 : vector<16x128xf32>
    %56 = vector.extract_strided_slice %45 {offsets = [0, 1, 0], sizes = [2, 8, 128], strides = [1, 1, 1]} : vector<2x9x256xbf16> to vector<2x8x128xbf16>
    %57 = vector.shape_cast %56 : vector<2x8x128xbf16> to vector<16x128xbf16>
    %c1024 = arith.constant 1024 : index
    %c0_26 = arith.constant 0 : index
    %58 = vector.load %arg3[%c1024, %c0_26] : memref<1152x128xbf16, #tpu.memory_space<vmem>>, vector<128x128xbf16>
    %cst_27 = arith.constant dense<0.000000e+00> : vector<16x128xf32>
    %59 = tpu.matmul %57, %58, %cst_27 {dimension_numbers = #tpu.dot_dimension_numbers<[1], [0], [0], [1], [0, 0, 1, 1], [], []>} : vector<16x128xbf16>, vector<128x128xbf16>, vector<16x128xf32> -> vector<16x128xf32>
    %60 = arith.addf %55, %59 : vector<16x128xf32>
    %c0_28 = arith.constant 0 : index
    %c0_29 = arith.constant 0 : index
    %61 = vector.load %arg4[%c0_28, %c0_29] : memref<1x128xf32, #tpu.memory_space<vmem>>, vector<1x128xf32>
    %62 = vector.broadcast %61 : vector<1x128xf32> to vector<16x128xf32>
    %63 = arith.addf %60, %62 : vector<16x128xf32>
    %cst_30 = arith.constant 0.000000e+00 : f32
    %64 = vector.broadcast %cst_30 : f32 to vector<16x128xf32>
    %65 = arith.maximumf %63, %64 : vector<16x128xf32>
    %66 = vector.shape_cast %65 : vector<16x128xf32> to vector<2x8x128xf32>
    %67 = tpu.iota {dimensions = array<i32: 1>} : vector<2x8x128xi32>
    %c2_i32 = arith.constant 2 : i32
    %68 = vector.broadcast %c2_i32 : i32 to vector<2x8x128xi32>
    %69 = arith.cmpi slt, %67, %68 : vector<2x8x128xi32>
    %cst_31 = arith.constant 0.000000e+00 : f32
    %70 = vector.broadcast %cst_31 : f32 to vector<2x8x128xf32>
    %71 = arith.select %69, %66, %70 : vector<2x8x128xi1>, vector<2x8x128xf32>
    %72 = vector.shape_cast %71 : vector<2x8x128xf32> to vector<16x128xf32>
    %73 = arith.truncf %72 : vector<16x128xf32> to vector<16x128xbf16>
    %c0_32 = arith.constant 0 : index
    %c0_33 = arith.constant 0 : index
    %74 = vector.load %arg5[%c0_32, %c0_33] : memref<16x128xbf16, #tpu.memory_space<vmem>>, vector<16x128xbf16>
    tpu.vector_store %arg5[%c0_32, %c0_33], %73 {strides = array<i32>} : memref<16x128xbf16, #tpu.memory_space<vmem>>, vector<16x128xbf16>,
    return
  }
  func.func @transform_0(%arg0: i32, %arg1: i32) -> (i32, i32, i32, i32) {
    %c0_i32 = arith.constant 0 : i32
    %c0_i32_0 = arith.constant 0 : i32
    %c0_i32_1 = arith.constant 0 : i32
    %c0_i32_2 = arith.constant 0 : i32
    return %arg0, %c0_i32, %c0_i32_0, %c0_i32_1 : i32, i32, i32, i32
  }
  func.func @transform_1(%arg0: i32, %arg1: i32) -> (i32, i32) {
    %c0_i32 = arith.constant 0 : i32
    %c0_i32_0 = arith.constant 0 : i32
    return %c0_i32, %arg1 : i32, i32
  }
  func.func @transform_2(%arg0: i32, %arg1: i32) -> (i32, i32) {
    %c0_i32 = arith.constant 0 : i32
    %c0_i32_0 = arith.constant 0 : i32
    return %c0_i32, %arg1 : i32, i32
  }
  func.func @transform_3(%arg0: i32, %arg1: i32) -> (i32, i32) {
    %c0_i32 = arith.constant 0 : i32
    return %arg0, %arg1 : i32, i32
  }
}

module attributes {stable_mosaic.version = 11 : i64} {
  func.func @kernel(%arg0: i32, %arg1: i32, %arg2: memref<1x4x8x256xbf16, #tpu.memory_space<vmem>>, %arg3: memref<128x128xbf16, #tpu.memory_space<vmem>>, %arg4: memref<1x128xf32, #tpu.memory_space<vmem>>, %arg5: memref<16x128xbf16, #tpu.memory_space<vmem>>) attributes {dimension_semantics = [#tpu.dimension_semantics<parallel>, #tpu.dimension_semantics<parallel>], iteration_bounds = array<i64: 2, 1>, scalar_prefetch = 0 : i64, scratch_operands = 0 : i64, tpu.core_type = #tpu.core_type<tc>, window_params = [{transform_indices = @transform_0, window_bounds = array<i64: 1, 4, 8, 256>}, {transform_indices = @transform_1, window_bounds = array<i64: 128, 128>}, {transform_indices = @transform_2, window_bounds = array<i64: 1, 128>}, {transform_indices = @transform_3, window_bounds = array<i64: 16, 128>}]} {
    %cst = arith.constant 0.000000e+00 : f32
    %0 = vector.broadcast %cst : f32 to vector<16x128xf32>
    %c0 = arith.constant 0 : index
    %c0_0 = arith.constant 0 : index
    %c0_1 = arith.constant 0 : index
    %c0_2 = arith.constant 0 : index
    %1 = vector.load %arg2[%c0, %c0_0, %c0_1, %c0_2] : memref<1x4x8x256xbf16, #tpu.memory_space<vmem>>, vector<1x4x8x256xbf16>
    %2 = vector.shape_cast %1 : vector<1x4x8x256xbf16> to vector<4x8x256xbf16>
    %3 = vector.shape_cast %2 : vector<4x8x256xbf16> to vector<2x2x8x256xbf16>
    %4 = vector.extract_strided_slice %3 {offsets = [0, 0, 0, 0], sizes = [2, 1, 8, 256], strides = [1, 1, 1, 1]} : vector<2x2x8x256xbf16> to vector<2x1x8x256xbf16>
    %5 = vector.shape_cast %4 : vector<2x1x8x256xbf16> to vector<2x8x256xbf16>
    %6 = vector.extract_strided_slice %5 {offsets = [0, 0, 0], sizes = [2, 8, 128], strides = [1, 1, 1]} : vector<2x8x256xbf16> to vector<2x8x128xbf16>
    %7 = vector.shape_cast %6 : vector<2x8x128xbf16> to vector<16x128xbf16>
    %c0_3 = arith.constant 0 : index
    %c0_4 = arith.constant 0 : index
    %8 = vector.load %arg3[%c0_3, %c0_4] : memref<128x128xbf16, #tpu.memory_space<vmem>>, vector<128x128xbf16>
    %cst_5 = arith.constant dense<0.000000e+00> : vector<16x128xf32>
    %9 = tpu.matmul %7, %8, %cst_5 {dimension_numbers = #tpu.dot_dimension_numbers<[1], [0], [0], [1], [0, 0, 1, 1], [], []>} : vector<16x128xbf16>, vector<128x128xbf16>, vector<16x128xf32> -> vector<16x128xf32>
    %10 = arith.addf %0, %9 : vector<16x128xf32>
    %c0_6 = arith.constant 0 : index
    %c0_7 = arith.constant 0 : index
    %11 = vector.load %arg4[%c0_6, %c0_7] : memref<1x128xf32, #tpu.memory_space<vmem>>, vector<1x128xf32>
    %12 = vector.broadcast %11 : vector<1x128xf32> to vector<16x128xf32>
    %13 = arith.addf %10, %12 : vector<16x128xf32>
    %14 = vector.shape_cast %13 : vector<16x128xf32> to vector<2x8x128xf32>
    %15 = tpu.iota {dimensions = array<i32: 1>} : vector<2x8x128xi32>
    %c2_i32 = arith.constant 2 : i32
    %16 = vector.broadcast %c2_i32 : i32 to vector<2x8x128xi32>
    %17 = arith.cmpi slt, %15, %16 : vector<2x8x128xi32>
    %cst_8 = arith.constant 0.000000e+00 : f32
    %18 = vector.broadcast %cst_8 : f32 to vector<2x8x128xf32>
    %19 = arith.select %17, %14, %18 : vector<2x8x128xi1>, vector<2x8x128xf32>
    %20 = vector.shape_cast %19 : vector<2x8x128xf32> to vector<16x128xf32>
    %21 = arith.truncf %20 : vector<16x128xf32> to vector<16x128xbf16>
    %c0_9 = arith.constant 0 : index
    %c0_10 = arith.constant 0 : index
    %22 = vector.load %arg5[%c0_9, %c0_10] : memref<16x128xbf16, #tpu.memory_space<vmem>>, vector<16x128xbf16>
    tpu.vector_store %arg5[%c0_9, %c0_10], %21 {strides = array<i32>} : memref<16x128xbf16, #tpu.memory_space<vmem>>, vector<16x128xbf16>,
    return
  }
  func.func @transform_0(%arg0: i32, %arg1: i32) -> (i32, i32, i32, i32) {
    %c0_i32 = arith.constant 0 : i32
    %c0_i32_0 = arith.constant 0 : i32
    %c0_i32_1 = arith.constant 0 : i32
    %c0_i32_2 = arith.constant 0 : i32
    return %arg0, %c0_i32, %c0_i32_0, %c0_i32_1 : i32, i32, i32, i32
  }
  func.func @transform_1(%arg0: i32, %arg1: i32) -> (i32, i32) {
    %c0_i32 = arith.constant 0 : i32
    %c0_i32_0 = arith.constant 0 : i32
    return %c0_i32, %arg1 : i32, i32
  }
  func.func @transform_2(%arg0: i32, %arg1: i32) -> (i32, i32) {
    %c0_i32 = arith.constant 0 : i32
    %c0_i32_0 = arith.constant 0 : i32
    return %c0_i32, %arg1 : i32, i32
  }
  func.func @transform_3(%arg0: i32, %arg1: i32) -> (i32, i32) {
    %c0_i32 = arith.constant 0 : i32
    return %arg0, %arg1 : i32, i32
  }
}

module attributes {stable_mosaic.version = 11 : i64} {
  func.func @kernel(%arg0: i32, %arg1: i32, %arg2: memref<1x4x10x128xbf16, #tpu.memory_space<vmem>>, %arg3: memref<1152x128xbf16, #tpu.memory_space<vmem>>, %arg4: memref<1x128xf32, #tpu.memory_space<vmem>>, %arg5: memref<16x128xbf16, #tpu.memory_space<vmem>>, %arg6: memref<16x128xbf16, #tpu.memory_space<vmem>>) attributes {dimension_semantics = [#tpu.dimension_semantics<parallel>, #tpu.dimension_semantics<parallel>], iteration_bounds = array<i64: 2, 1>, scalar_prefetch = 0 : i64, scratch_operands = 0 : i64, tpu.core_type = #tpu.core_type<tc>, window_params = [{transform_indices = @transform_0, window_bounds = array<i64: 1, 4, 10, 128>}, {transform_indices = @transform_1, window_bounds = array<i64: 1152, 128>}, {transform_indices = @transform_2, window_bounds = array<i64: 1, 128>}, {transform_indices = @transform_3, window_bounds = array<i64: 16, 128>}, {transform_indices = @transform_4, window_bounds = array<i64: 16, 128>}]} {
    %cst = arith.constant 0.000000e+00 : f32
    %0 = vector.broadcast %cst : f32 to vector<16x128xf32>
    %c0 = arith.constant 0 : index
    %c0_0 = arith.constant 0 : index
    %c0_1 = arith.constant 0 : index
    %c0_2 = arith.constant 0 : index
    %1 = vector.load %arg2[%c0, %c0_0, %c0_1, %c0_2] : memref<1x4x10x128xbf16, #tpu.memory_space<vmem>>, vector<1x2x8x128xbf16>
    %2 = vector.shape_cast %1 : vector<1x2x8x128xbf16> to vector<2x8x128xbf16>
    %3 = vector.shape_cast %2 : vector<2x8x128xbf16> to vector<16x128xbf16>
    %c0_3 = arith.constant 0 : index
    %c0_4 = arith.constant 0 : index
    %4 = vector.load %arg3[%c0_3, %c0_4] : memref<1152x128xbf16, #tpu.memory_space<vmem>>, vector<128x128xbf16>
    %cst_5 = arith.constant dense<0.000000e+00> : vector<16x128xf32>
    %5 = tpu.matmul %3, %4, %cst_5 {dimension_numbers = #tpu.dot_dimension_numbers<[1], [0], [0], [1], [0, 0, 1, 1], [], []>} : vector<16x128xbf16>, vector<128x128xbf16>, vector<16x128xf32> -> vector<16x128xf32>
    %6 = arith.addf %0, %5 : vector<16x128xf32>
    %c0_6 = arith.constant 0 : index
    %c0_7 = arith.constant 0 : index
    %c1 = arith.constant 1 : index
    %c0_8 = arith.constant 0 : index
    %7 = vector.load %arg2[%c0_6, %c0_7, %c1, %c0_8] : memref<1x4x10x128xbf16, #tpu.memory_space<vmem>>, vector<1x2x8x128xbf16>
    %8 = vector.shape_cast %7 : vector<1x2x8x128xbf16> to vector<2x8x128xbf16>
    %9 = vector.shape_cast %8 : vector<2x8x128xbf16> to vector<16x128xbf16>
    %c128 = arith.constant 128 : index
    %c0_9 = arith.constant 0 : index
    %10 = vector.load %arg3[%c128, %c0_9] : memref<1152x128xbf16, #tpu.memory_space<vmem>>, vector<128x128xbf16>
    %cst_10 = arith.constant dense<0.000000e+00> : vector<16x128xf32>
    %11 = tpu.matmul %9, %10, %cst_10 {dimension_numbers = #tpu.dot_dimension_numbers<[1], [0], [0], [1], [0, 0, 1, 1], [], []>} : vector<16x128xbf16>, vector<128x128xbf16>, vector<16x128xf32> -> vector<16x128xf32>
    %12 = arith.addf %6, %11 : vector<16x128xf32>
    %c0_11 = arith.constant 0 : index
    %c0_12 = arith.constant 0 : index
    %c2 = arith.constant 2 : index
    %c0_13 = arith.constant 0 : index
    %13 = vector.load %arg2[%c0_11, %c0_12, %c2, %c0_13] : memref<1x4x10x128xbf16, #tpu.memory_space<vmem>>, vector<1x2x8x128xbf16>
    %14 = vector.shape_cast %13 : vector<1x2x8x128xbf16> to vector<2x8x128xbf16>
    %15 = vector.shape_cast %14 : vector<2x8x128xbf16> to vector<16x128xbf16>
    %c256 = arith.constant 256 : index
    %c0_14 = arith.constant 0 : index
    %16 = vector.load %arg3[%c256, %c0_14] : memref<1152x128xbf16, #tpu.memory_space<vmem>>, vector<128x128xbf16>
    %cst_15 = arith.constant dense<0.000000e+00> : vector<16x128xf32>
    %17 = tpu.matmul %15, %16, %cst_15 {dimension_numbers = #tpu.dot_dimension_numbers<[1], [0], [0], [1], [0, 0, 1, 1], [], []>} : vector<16x128xbf16>, vector<128x128xbf16>, vector<16x128xf32> -> vector<16x128xf32>
    %18 = arith.addf %12, %17 : vector<16x128xf32>
    %c0_16 = arith.constant 0 : index
    %c1_17 = arith.constant 1 : index
    %c0_18 = arith.constant 0 : index
    %c0_19 = arith.constant 0 : index
    %19 = vector.load %arg2[%c0_16, %c1_17, %c0_18, %c0_19] : memref<1x4x10x128xbf16, #tpu.memory_space<vmem>>, vector<1x2x8x128xbf16>
    %20 = vector.shape_cast %19 : vector<1x2x8x128xbf16> to vector<2x8x128xbf16>
    %21 = vector.shape_cast %20 : vector<2x8x128xbf16> to vector<16x128xbf16>
    %c384 = arith.constant 384 : index
    %c0_20 = arith.constant 0 : index
    %22 = vector.load %arg3[%c384, %c0_20] : memref<1152x128xbf16, #tpu.memory_space<vmem>>, vector<128x128xbf16>
    %cst_21 = arith.constant dense<0.000000e+00> : vector<16x128xf32>
    %23 = tpu.matmul %21, %22, %cst_21 {dimension_numbers = #tpu.dot_dimension_numbers<[1], [0], [0], [1], [0, 0, 1, 1], [], []>} : vector<16x128xbf16>, vector<128x128xbf16>, vector<16x128xf32> -> vector<16x128xf32>
    %24 = arith.addf %18, %23 : vector<16x128xf32>
    %c0_22 = arith.constant 0 : index
    %c1_23 = arith.constant 1 : index
    %c1_24 = arith.constant 1 : index
    %c0_25 = arith.constant 0 : index
    %25 = vector.load %arg2[%c0_22, %c1_23, %c1_24, %c0_25] : memref<1x4x10x128xbf16, #tpu.memory_space<vmem>>, vector<1x2x8x128xbf16>
    %26 = vector.shape_cast %25 : vector<1x2x8x128xbf16> to vector<2x8x128xbf16>
    %27 = vector.shape_cast %26 : vector<2x8x128xbf16> to vector<16x128xbf16>
    %c512 = arith.constant 512 : index
    %c0_26 = arith.constant 0 : index
    %28 = vector.load %arg3[%c512, %c0_26] : memref<1152x128xbf16, #tpu.memory_space<vmem>>, vector<128x128xbf16>
    %cst_27 = arith.constant dense<0.000000e+00> : vector<16x128xf32>
    %29 = tpu.matmul %27, %28, %cst_27 {dimension_numbers = #tpu.dot_dimension_numbers<[1], [0], [0], [1], [0, 0, 1, 1], [], []>} : vector<16x128xbf16>, vector<128x128xbf16>, vector<16x128xf32> -> vector<16x128xf32>
    %30 = arith.addf %24, %29 : vector<16x128xf32>
    %c0_28 = arith.constant 0 : index
    %c1_29 = arith.constant 1 : index
    %c2_30 = arith.constant 2 : index
    %c0_31 = arith.constant 0 : index
    %31 = vector.load %arg2[%c0_28, %c1_29, %c2_30, %c0_31] : memref<1x4x10x128xbf16, #tpu.memory_space<vmem>>, vector<1x2x8x128xbf16>
    %32 = vector.shape_cast %31 : vector<1x2x8x128xbf16> to vector<2x8x128xbf16>
    %33 = vector.shape_cast %32 : vector<2x8x128xbf16> to vector<16x128xbf16>
    %c640 = arith.constant 640 : index
    %c0_32 = arith.constant 0 : index
    %34 = vector.load %arg3[%c640, %c0_32] : memref<1152x128xbf16, #tpu.memory_space<vmem>>, vector<128x128xbf16>
    %cst_33 = arith.constant dense<0.000000e+00> : vector<16x128xf32>
    %35 = tpu.matmul %33, %34, %cst_33 {dimension_numbers = #tpu.dot_dimension_numbers<[1], [0], [0], [1], [0, 0, 1, 1], [], []>} : vector<16x128xbf16>, vector<128x128xbf16>, vector<16x128xf32> -> vector<16x128xf32>
    %36 = arith.addf %30, %35 : vector<16x128xf32>
    %c0_34 = arith.constant 0 : index
    %c2_35 = arith.constant 2 : index
    %c0_36 = arith.constant 0 : index
    %c0_37 = arith.constant 0 : index
    %37 = vector.load %arg2[%c0_34, %c2_35, %c0_36, %c0_37] : memref<1x4x10x128xbf16, #tpu.memory_space<vmem>>, vector<1x2x8x128xbf16>
    %38 = vector.shape_cast %37 : vector<1x2x8x128xbf16> to vector<2x8x128xbf16>
    %39 = vector.shape_cast %38 : vector<2x8x128xbf16> to vector<16x128xbf16>
    %c768 = arith.constant 768 : index
    %c0_38 = arith.constant 0 : index
    %40 = vector.load %arg3[%c768, %c0_38] : memref<1152x128xbf16, #tpu.memory_space<vmem>>, vector<128x128xbf16>
    %cst_39 = arith.constant dense<0.000000e+00> : vector<16x128xf32>
    %41 = tpu.matmul %39, %40, %cst_39 {dimension_numbers = #tpu.dot_dimension_numbers<[1], [0], [0], [1], [0, 0, 1, 1], [], []>} : vector<16x128xbf16>, vector<128x128xbf16>, vector<16x128xf32> -> vector<16x128xf32>
    %42 = arith.addf %36, %41 : vector<16x128xf32>
    %c0_40 = arith.constant 0 : index
    %c2_41 = arith.constant 2 : index
    %c1_42 = arith.constant 1 : index
    %c0_43 = arith.constant 0 : index
    %43 = vector.load %arg2[%c0_40, %c2_41, %c1_42, %c0_43] : memref<1x4x10x128xbf16, #tpu.memory_space<vmem>>, vector<1x2x8x128xbf16>
    %44 = vector.shape_cast %43 : vector<1x2x8x128xbf16> to vector<2x8x128xbf16>
    %45 = vector.shape_cast %44 : vector<2x8x128xbf16> to vector<16x128xbf16>
    %c896 = arith.constant 896 : index
    %c0_44 = arith.constant 0 : index
    %46 = vector.load %arg3[%c896, %c0_44] : memref<1152x128xbf16, #tpu.memory_space<vmem>>, vector<128x128xbf16>
    %cst_45 = arith.constant dense<0.000000e+00> : vector<16x128xf32>
    %47 = tpu.matmul %45, %46, %cst_45 {dimension_numbers = #tpu.dot_dimension_numbers<[1], [0], [0], [1], [0, 0, 1, 1], [], []>} : vector<16x128xbf16>, vector<128x128xbf16>, vector<16x128xf32> -> vector<16x128xf32>
    %48 = arith.addf %42, %47 : vector<16x128xf32>
    %c0_46 = arith.constant 0 : index
    %c2_47 = arith.constant 2 : index
    %c2_48 = arith.constant 2 : index
    %c0_49 = arith.constant 0 : index
    %49 = vector.load %arg2[%c0_46, %c2_47, %c2_48, %c0_49] : memref<1x4x10x128xbf16, #tpu.memory_space<vmem>>, vector<1x2x8x128xbf16>
    %50 = vector.shape_cast %49 : vector<1x2x8x128xbf16> to vector<2x8x128xbf16>
    %51 = vector.shape_cast %50 : vector<2x8x128xbf16> to vector<16x128xbf16>
    %c1024 = arith.constant 1024 : index
    %c0_50 = arith.constant 0 : index
    %52 = vector.load %arg3[%c1024, %c0_50] : memref<1152x128xbf16, #tpu.memory_space<vmem>>, vector<128x128xbf16>
    %cst_51 = arith.constant dense<0.000000e+00> : vector<16x128xf32>
    %53 = tpu.matmul %51, %52, %cst_51 {dimension_numbers = #tpu.dot_dimension_numbers<[1], [0], [0], [1], [0, 0, 1, 1], [], []>} : vector<16x128xbf16>, vector<128x128xbf16>, vector<16x128xf32> -> vector<16x128xf32>
    %54 = arith.addf %48, %53 : vector<16x128xf32>
    %c0_52 = arith.constant 0 : index
    %c0_53 = arith.constant 0 : index
    %55 = vector.load %arg4[%c0_52, %c0_53] : memref<1x128xf32, #tpu.memory_space<vmem>>, vector<1x128xf32>
    %56 = vector.broadcast %55 : vector<1x128xf32> to vector<16x128xf32>
    %57 = arith.addf %54, %56 : vector<16x128xf32>
    %c0_54 = arith.constant 0 : index
    %c0_55 = arith.constant 0 : index
    %58 = vector.load %arg5[%c0_54, %c0_55] : memref<16x128xbf16, #tpu.memory_space<vmem>>, vector<16x128xbf16>
    %59 = arith.extf %58 : vector<16x128xbf16> to vector<16x128xf32>
    %60 = arith.addf %57, %59 : vector<16x128xf32>
    %cst_56 = arith.constant 0.000000e+00 : f32
    %61 = vector.broadcast %cst_56 : f32 to vector<16x128xf32>
    %62 = arith.maximumf %60, %61 : vector<16x128xf32>
    %63 = vector.shape_cast %62 : vector<16x128xf32> to vector<2x8x128xf32>
    %64 = tpu.iota {dimensions = array<i32: 1>} : vector<2x8x128xi32>
    %c2_i32 = arith.constant 2 : i32
    %65 = vector.broadcast %c2_i32 : i32 to vector<2x8x128xi32>
    %66 = arith.cmpi slt, %64, %65 : vector<2x8x128xi32>
    %cst_57 = arith.constant 0.000000e+00 : f32
    %67 = vector.broadcast %cst_57 : f32 to vector<2x8x128xf32>
    %68 = arith.select %66, %63, %67 : vector<2x8x128xi1>, vector<2x8x128xf32>
    %69 = vector.shape_cast %68 : vector<2x8x128xf32> to vector<16x128xf32>
    %70 = arith.truncf %69 : vector<16x128xf32> to vector<16x128xbf16>
    %c0_58 = arith.constant 0 : index
    %c0_59 = arith.constant 0 : index
    %71 = vector.load %arg6[%c0_58, %c0_59] : memref<16x128xbf16, #tpu.memory_space<vmem>>, vector<16x128xbf16>
    tpu.vector_store %arg6[%c0_58, %c0_59], %70 {strides = array<i32>} : memref<16x128xbf16, #tpu.memory_space<vmem>>, vector<16x128xbf16>,
    return
  }
  func.func @transform_0(%arg0: i32, %arg1: i32) -> (i32, i32, i32, i32) {
    %c0_i32 = arith.constant 0 : i32
    %c0_i32_0 = arith.constant 0 : i32
    %c0_i32_1 = arith.constant 0 : i32
    %c0_i32_2 = arith.constant 0 : i32
    return %arg0, %c0_i32, %c0_i32_0, %c0_i32_1 : i32, i32, i32, i32
  }
  func.func @transform_1(%arg0: i32, %arg1: i32) -> (i32, i32) {
    %c0_i32 = arith.constant 0 : i32
    %c0_i32_0 = arith.constant 0 : i32
    return %c0_i32, %arg1 : i32, i32
  }
  func.func @transform_2(%arg0: i32, %arg1: i32) -> (i32, i32) {
    %c0_i32 = arith.constant 0 : i32
    %c0_i32_0 = arith.constant 0 : i32
    return %c0_i32, %arg1 : i32, i32
  }
  func.func @transform_3(%arg0: i32, %arg1: i32) -> (i32, i32) {
    %c0_i32 = arith.constant 0 : i32
    return %arg0, %arg1 : i32, i32
  }
  func.func @transform_4(%arg0: i32, %arg1: i32) -> (i32, i32) {
    %c0_i32 = arith.constant 0 : i32
    return %arg0, %arg1 : i32, i32
  }
}

module attributes {stable_mosaic.version = 11 : i64} {
  func.func @kernel(%arg0: i32, %arg1: i32, %arg2: memref<1x4x9x256xbf16, #tpu.memory_space<vmem>>, %arg3: memref<1152x128xbf16, #tpu.memory_space<vmem>>, %arg4: memref<1x128xf32, #tpu.memory_space<vmem>>, %arg5: memref<8x128xbf16, #tpu.memory_space<vmem>>) attributes {dimension_semantics = [#tpu.dimension_semantics<parallel>, #tpu.dimension_semantics<parallel>], iteration_bounds = array<i64: 2, 1>, scalar_prefetch = 0 : i64, scratch_operands = 0 : i64, tpu.core_type = #tpu.core_type<tc>, window_params = [{transform_indices = @transform_0, window_bounds = array<i64: 1, 4, 9, 256>}, {transform_indices = @transform_1, window_bounds = array<i64: 1152, 128>}, {transform_indices = @transform_2, window_bounds = array<i64: 1, 128>}, {transform_indices = @transform_3, window_bounds = array<i64: 8, 128>}]} {
    %cst = arith.constant 0.000000e+00 : f32
    %0 = vector.broadcast %cst : f32 to vector<8x128xf32>
    %c0 = arith.constant 0 : index
    %c0_0 = arith.constant 0 : index
    %c0_1 = arith.constant 0 : index
    %c0_2 = arith.constant 0 : index
    %1 = vector.load %arg2[%c0, %c0_0, %c0_1, %c0_2] : memref<1x4x9x256xbf16, #tpu.memory_space<vmem>>, vector<1x2x9x256xbf16>
    %2 = vector.shape_cast %1 : vector<1x2x9x256xbf16> to vector<2x9x256xbf16>
    %3 = vector.shape_cast %2 : vector<2x9x256xbf16> to vector<1x2x9x256xbf16>
    %4 = vector.extract_strided_slice %3 {offsets = [0, 0, 0, 0], sizes = [1, 1, 9, 256], strides = [1, 1, 1, 1]} : vector<1x2x9x256xbf16> to vector<1x1x9x256xbf16>
    %5 = vector.shape_cast %4 : vector<1x1x9x256xbf16> to vector<1x9x256xbf16>
    %6 = vector.extract_strided_slice %5 {offsets = [0, 0, 0], sizes = [1, 8, 128], strides = [1, 1, 1]} : vector<1x9x256xbf16> to vector<1x8x128xbf16>
    %7 = vector.shape_cast %6 : vector<1x8x128xbf16> to vector<8x128xbf16>
    %c0_3 = arith.constant 0 : index
    %c0_4 = arith.constant 0 : index
    %8 = vector.load %arg3[%c0_3, %c0_4] : memref<1152x128xbf16, #tpu.memory_space<vmem>>, vector<128x128xbf16>
    %cst_5 = arith.constant dense<0.000000e+00> : vector<8x128xf32>
    %9 = tpu.matmul %7, %8, %cst_5 {dimension_numbers = #tpu.dot_dimension_numbers<[1], [0], [0], [1], [0, 0, 1, 1], [], []>} : vector<8x128xbf16>, vector<128x128xbf16>, vector<8x128xf32> -> vector<8x128xf32>
    %10 = arith.addf %0, %9 : vector<8x128xf32>
    %11 = vector.extract_strided_slice %5 {offsets = [0, 0, 128], sizes = [1, 8, 128], strides = [1, 1, 1]} : vector<1x9x256xbf16> to vector<1x8x128xbf16>
    %12 = vector.shape_cast %11 : vector<1x8x128xbf16> to vector<8x128xbf16>
    %c128 = arith.constant 128 : index
    %c0_6 = arith.constant 0 : index
    %13 = vector.load %arg3[%c128, %c0_6] : memref<1152x128xbf16, #tpu.memory_space<vmem>>, vector<128x128xbf16>
    %cst_7 = arith.constant dense<0.000000e+00> : vector<8x128xf32>
    %14 = tpu.matmul %12, %13, %cst_7 {dimension_numbers = #tpu.dot_dimension_numbers<[1], [0], [0], [1], [0, 0, 1, 1], [], []>} : vector<8x128xbf16>, vector<128x128xbf16>, vector<8x128xf32> -> vector<8x128xf32>
    %15 = arith.addf %10, %14 : vector<8x128xf32>
    %16 = vector.extract_strided_slice %5 {offsets = [0, 1, 0], sizes = [1, 8, 128], strides = [1, 1, 1]} : vector<1x9x256xbf16> to vector<1x8x128xbf16>
    %17 = vector.shape_cast %16 : vector<1x8x128xbf16> to vector<8x128xbf16>
    %c256 = arith.constant 256 : index
    %c0_8 = arith.constant 0 : index
    %18 = vector.load %arg3[%c256, %c0_8] : memref<1152x128xbf16, #tpu.memory_space<vmem>>, vector<128x128xbf16>
    %cst_9 = arith.constant dense<0.000000e+00> : vector<8x128xf32>
    %19 = tpu.matmul %17, %18, %cst_9 {dimension_numbers = #tpu.dot_dimension_numbers<[1], [0], [0], [1], [0, 0, 1, 1], [], []>} : vector<8x128xbf16>, vector<128x128xbf16>, vector<8x128xf32> -> vector<8x128xf32>
    %20 = arith.addf %15, %19 : vector<8x128xf32>
    %c0_10 = arith.constant 0 : index
    %c1 = arith.constant 1 : index
    %c0_11 = arith.constant 0 : index
    %c0_12 = arith.constant 0 : index
    %21 = vector.load %arg2[%c0_10, %c1, %c0_11, %c0_12] : memref<1x4x9x256xbf16, #tpu.memory_space<vmem>>, vector<1x2x9x256xbf16>
    %22 = vector.shape_cast %21 : vector<1x2x9x256xbf16> to vector<2x9x256xbf16>
    %23 = vector.shape_cast %22 : vector<2x9x256xbf16> to vector<1x2x9x256xbf16>
    %24 = vector.extract_strided_slice %23 {offsets = [0, 0, 0, 0], sizes = [1, 1, 9, 256], strides = [1, 1, 1, 1]} : vector<1x2x9x256xbf16> to vector<1x1x9x256xbf16>
    %25 = vector.shape_cast %24 : vector<1x1x9x256xbf16> to vector<1x9x256xbf16>
    %26 = vector.extract_strided_slice %25 {offsets = [0, 0, 0], sizes = [1, 8, 128], strides = [1, 1, 1]} : vector<1x9x256xbf16> to vector<1x8x128xbf16>
    %27 = vector.shape_cast %26 : vector<1x8x128xbf16> to vector<8x128xbf16>
    %c384 = arith.constant 384 : index
    %c0_13 = arith.constant 0 : index
    %28 = vector.load %arg3[%c384, %c0_13] : memref<1152x128xbf16, #tpu.memory_space<vmem>>, vector<128x128xbf16>
    %cst_14 = arith.constant dense<0.000000e+00> : vector<8x128xf32>
    %29 = tpu.matmul %27, %28, %cst_14 {dimension_numbers = #tpu.dot_dimension_numbers<[1], [0], [0], [1], [0, 0, 1, 1], [], []>} : vector<8x128xbf16>, vector<128x128xbf16>, vector<8x128xf32> -> vector<8x128xf32>
    %30 = arith.addf %20, %29 : vector<8x128xf32>
    %31 = vector.extract_strided_slice %25 {offsets = [0, 0, 128], sizes = [1, 8, 128], strides = [1, 1, 1]} : vector<1x9x256xbf16> to vector<1x8x128xbf16>
    %32 = vector.shape_cast %31 : vector<1x8x128xbf16> to vector<8x128xbf16>
    %c512 = arith.constant 512 : index
    %c0_15 = arith.constant 0 : index
    %33 = vector.load %arg3[%c512, %c0_15] : memref<1152x128xbf16, #tpu.memory_space<vmem>>, vector<128x128xbf16>
    %cst_16 = arith.constant dense<0.000000e+00> : vector<8x128xf32>
    %34 = tpu.matmul %32, %33, %cst_16 {dimension_numbers = #tpu.dot_dimension_numbers<[1], [0], [0], [1], [0, 0, 1, 1], [], []>} : vector<8x128xbf16>, vector<128x128xbf16>, vector<8x128xf32> -> vector<8x128xf32>
    %35 = arith.addf %30, %34 : vector<8x128xf32>
    %36 = vector.extract_strided_slice %25 {offsets = [0, 1, 0], sizes = [1, 8, 128], strides = [1, 1, 1]} : vector<1x9x256xbf16> to vector<1x8x128xbf16>
    %37 = vector.shape_cast %36 : vector<1x8x128xbf16> to vector<8x128xbf16>
    %c640 = arith.constant 640 : index
    %c0_17 = arith.constant 0 : index
    %38 = vector.load %arg3[%c640, %c0_17] : memref<1152x128xbf16, #tpu.memory_space<vmem>>, vector<128x128xbf16>
    %cst_18 = arith.constant dense<0.000000e+00> : vector<8x128xf32>
    %39 = tpu.matmul %37, %38, %cst_18 {dimension_numbers = #tpu.dot_dimension_numbers<[1], [0], [0], [1], [0, 0, 1, 1], [], []>} : vector<8x128xbf16>, vector<128x128xbf16>, vector<8x128xf32> -> vector<8x128xf32>
    %40 = arith.addf %35, %39 : vector<8x128xf32>
    %c0_19 = arith.constant 0 : index
    %c2 = arith.constant 2 : index
    %c0_20 = arith.constant 0 : index
    %c0_21 = arith.constant 0 : index
    %41 = vector.load %arg2[%c0_19, %c2, %c0_20, %c0_21] : memref<1x4x9x256xbf16, #tpu.memory_space<vmem>>, vector<1x2x9x256xbf16>
    %42 = vector.shape_cast %41 : vector<1x2x9x256xbf16> to vector<2x9x256xbf16>
    %43 = vector.shape_cast %42 : vector<2x9x256xbf16> to vector<1x2x9x256xbf16>
    %44 = vector.extract_strided_slice %43 {offsets = [0, 0, 0, 0], sizes = [1, 1, 9, 256], strides = [1, 1, 1, 1]} : vector<1x2x9x256xbf16> to vector<1x1x9x256xbf16>
    %45 = vector.shape_cast %44 : vector<1x1x9x256xbf16> to vector<1x9x256xbf16>
    %46 = vector.extract_strided_slice %45 {offsets = [0, 0, 0], sizes = [1, 8, 128], strides = [1, 1, 1]} : vector<1x9x256xbf16> to vector<1x8x128xbf16>
    %47 = vector.shape_cast %46 : vector<1x8x128xbf16> to vector<8x128xbf16>
    %c768 = arith.constant 768 : index
    %c0_22 = arith.constant 0 : index
    %48 = vector.load %arg3[%c768, %c0_22] : memref<1152x128xbf16, #tpu.memory_space<vmem>>, vector<128x128xbf16>
    %cst_23 = arith.constant dense<0.000000e+00> : vector<8x128xf32>
    %49 = tpu.matmul %47, %48, %cst_23 {dimension_numbers = #tpu.dot_dimension_numbers<[1], [0], [0], [1], [0, 0, 1, 1], [], []>} : vector<8x128xbf16>, vector<128x128xbf16>, vector<8x128xf32> -> vector<8x128xf32>
    %50 = arith.addf %40, %49 : vector<8x128xf32>
    %51 = vector.extract_strided_slice %45 {offsets = [0, 0, 128], sizes = [1, 8, 128], strides = [1, 1, 1]} : vector<1x9x256xbf16> to vector<1x8x128xbf16>
    %52 = vector.shape_cast %51 : vector<1x8x128xbf16> to vector<8x128xbf16>
    %c896 = arith.constant 896 : index
    %c0_24 = arith.constant 0 : index
    %53 = vector.load %arg3[%c896, %c0_24] : memref<1152x128xbf16, #tpu.memory_space<vmem>>, vector<128x128xbf16>
    %cst_25 = arith.constant dense<0.000000e+00> : vector<8x128xf32>
    %54 = tpu.matmul %52, %53, %cst_25 {dimension_numbers = #tpu.dot_dimension_numbers<[1], [0], [0], [1], [0, 0, 1, 1], [], []>} : vector<8x128xbf16>, vector<128x128xbf16>, vector<8x128xf32> -> vector<8x128xf32>
    %55 = arith.addf %50, %54 : vector<8x128xf32>
    %56 = vector.extract_strided_slice %45 {offsets = [0, 1, 0], sizes = [1, 8, 128], strides = [1, 1, 1]} : vector<1x9x256xbf16> to vector<1x8x128xbf16>
    %57 = vector.shape_cast %56 : vector<1x8x128xbf16> to vector<8x128xbf16>
    %c1024 = arith.constant 1024 : index
    %c0_26 = arith.constant 0 : index
    %58 = vector.load %arg3[%c1024, %c0_26] : memref<1152x128xbf16, #tpu.memory_space<vmem>>, vector<128x128xbf16>
    %cst_27 = arith.constant dense<0.000000e+00> : vector<8x128xf32>
    %59 = tpu.matmul %57, %58, %cst_27 {dimension_numbers = #tpu.dot_dimension_numbers<[1], [0], [0], [1], [0, 0, 1, 1], [], []>} : vector<8x128xbf16>, vector<128x128xbf16>, vector<8x128xf32> -> vector<8x128xf32>
    %60 = arith.addf %55, %59 : vector<8x128xf32>
    %c0_28 = arith.constant 0 : index
    %c0_29 = arith.constant 0 : index
    %61 = vector.load %arg4[%c0_28, %c0_29] : memref<1x128xf32, #tpu.memory_space<vmem>>, vector<1x128xf32>
    %62 = vector.broadcast %61 : vector<1x128xf32> to vector<8x128xf32>
    %63 = arith.addf %60, %62 : vector<8x128xf32>
    %cst_30 = arith.constant 0.000000e+00 : f32
    %64 = vector.broadcast %cst_30 : f32 to vector<8x128xf32>
    %65 = arith.maximumf %63, %64 : vector<8x128xf32>
    %66 = vector.shape_cast %65 : vector<8x128xf32> to vector<1x8x128xf32>
    %67 = tpu.iota {dimensions = array<i32: 1>} : vector<1x8x128xi32>
    %c1_i32 = arith.constant 1 : i32
    %68 = vector.broadcast %c1_i32 : i32 to vector<1x8x128xi32>
    %69 = arith.cmpi slt, %67, %68 : vector<1x8x128xi32>
    %cst_31 = arith.constant 0.000000e+00 : f32
    %70 = vector.broadcast %cst_31 : f32 to vector<1x8x128xf32>
    %71 = arith.select %69, %66, %70 : vector<1x8x128xi1>, vector<1x8x128xf32>
    %72 = vector.shape_cast %71 : vector<1x8x128xf32> to vector<8x128xf32>
    %73 = arith.truncf %72 : vector<8x128xf32> to vector<8x128xbf16>
    %c0_32 = arith.constant 0 : index
    %c0_33 = arith.constant 0 : index
    %74 = vector.load %arg5[%c0_32, %c0_33] : memref<8x128xbf16, #tpu.memory_space<vmem>>, vector<8x128xbf16>
    tpu.vector_store %arg5[%c0_32, %c0_33], %73 {strides = array<i32>} : memref<8x128xbf16, #tpu.memory_space<vmem>>, vector<8x128xbf16>,
    return
  }
  func.func @transform_0(%arg0: i32, %arg1: i32) -> (i32, i32, i32, i32) {
    %c0_i32 = arith.constant 0 : i32
    %c0_i32_0 = arith.constant 0 : i32
    %c0_i32_1 = arith.constant 0 : i32
    %c0_i32_2 = arith.constant 0 : i32
    return %arg0, %c0_i32, %c0_i32_0, %c0_i32_1 : i32, i32, i32, i32
  }
  func.func @transform_1(%arg0: i32, %arg1: i32) -> (i32, i32) {
    %c0_i32 = arith.constant 0 : i32
    %c0_i32_0 = arith.constant 0 : i32
    return %c0_i32, %arg1 : i32, i32
  }
  func.func @transform_2(%arg0: i32, %arg1: i32) -> (i32, i32) {
    %c0_i32 = arith.constant 0 : i32
    %c0_i32_0 = arith.constant 0 : i32
    return %c0_i32, %arg1 : i32, i32
  }
  func.func @transform_3(%arg0: i32, %arg1: i32) -> (i32, i32) {
    %c0_i32 = arith.constant 0 : i32
    return %arg0, %arg1 : i32, i32
  }
}

module attributes {stable_mosaic.version = 11 : i64} {
  func.func @kernel(%arg0: i32, %arg1: i32, %arg2: memref<1x2x8x256xbf16, #tpu.memory_space<vmem>>, %arg3: memref<128x128xbf16, #tpu.memory_space<vmem>>, %arg4: memref<1x128xf32, #tpu.memory_space<vmem>>, %arg5: memref<8x128xbf16, #tpu.memory_space<vmem>>) attributes {dimension_semantics = [#tpu.dimension_semantics<parallel>, #tpu.dimension_semantics<parallel>], iteration_bounds = array<i64: 2, 1>, scalar_prefetch = 0 : i64, scratch_operands = 0 : i64, tpu.core_type = #tpu.core_type<tc>, window_params = [{transform_indices = @transform_0, window_bounds = array<i64: 1, 2, 8, 256>}, {transform_indices = @transform_1, window_bounds = array<i64: 128, 128>}, {transform_indices = @transform_2, window_bounds = array<i64: 1, 128>}, {transform_indices = @transform_3, window_bounds = array<i64: 8, 128>}]} {
    %cst = arith.constant 0.000000e+00 : f32
    %0 = vector.broadcast %cst : f32 to vector<8x128xf32>
    %c0 = arith.constant 0 : index
    %c0_0 = arith.constant 0 : index
    %c0_1 = arith.constant 0 : index
    %c0_2 = arith.constant 0 : index
    %1 = vector.load %arg2[%c0, %c0_0, %c0_1, %c0_2] : memref<1x2x8x256xbf16, #tpu.memory_space<vmem>>, vector<1x2x8x256xbf16>
    %2 = vector.shape_cast %1 : vector<1x2x8x256xbf16> to vector<2x8x256xbf16>
    %3 = vector.shape_cast %2 : vector<2x8x256xbf16> to vector<1x2x8x256xbf16>
    %4 = vector.extract_strided_slice %3 {offsets = [0, 0, 0, 0], sizes = [1, 1, 8, 256], strides = [1, 1, 1, 1]} : vector<1x2x8x256xbf16> to vector<1x1x8x256xbf16>
    %5 = vector.shape_cast %4 : vector<1x1x8x256xbf16> to vector<1x8x256xbf16>
    %6 = vector.extract_strided_slice %5 {offsets = [0, 0, 0], sizes = [1, 8, 128], strides = [1, 1, 1]} : vector<1x8x256xbf16> to vector<1x8x128xbf16>
    %7 = vector.shape_cast %6 : vector<1x8x128xbf16> to vector<8x128xbf16>
    %c0_3 = arith.constant 0 : index
    %c0_4 = arith.constant 0 : index
    %8 = vector.load %arg3[%c0_3, %c0_4] : memref<128x128xbf16, #tpu.memory_space<vmem>>, vector<128x128xbf16>
    %cst_5 = arith.constant dense<0.000000e+00> : vector<8x128xf32>
    %9 = tpu.matmul %7, %8, %cst_5 {dimension_numbers = #tpu.dot_dimension_numbers<[1], [0], [0], [1], [0, 0, 1, 1], [], []>} : vector<8x128xbf16>, vector<128x128xbf16>, vector<8x128xf32> -> vector<8x128xf32>
    %10 = arith.addf %0, %9 : vector<8x128xf32>
    %c0_6 = arith.constant 0 : index
    %c0_7 = arith.constant 0 : index
    %11 = vector.load %arg4[%c0_6, %c0_7] : memref<1x128xf32, #tpu.memory_space<vmem>>, vector<1x128xf32>
    %12 = vector.broadcast %11 : vector<1x128xf32> to vector<8x128xf32>
    %13 = arith.addf %10, %12 : vector<8x128xf32>
    %14 = vector.shape_cast %13 : vector<8x128xf32> to vector<1x8x128xf32>
    %15 = tpu.iota {dimensions = array<i32: 1>} : vector<1x8x128xi32>
    %c1_i32 = arith.constant 1 : i32
    %16 = vector.broadcast %c1_i32 : i32 to vector<1x8x128xi32>
    %17 = arith.cmpi slt, %15, %16 : vector<1x8x128xi32>
    %cst_8 = arith.constant 0.000000e+00 : f32
    %18 = vector.broadcast %cst_8 : f32 to vector<1x8x128xf32>
    %19 = arith.select %17, %14, %18 : vector<1x8x128xi1>, vector<1x8x128xf32>
    %20 = vector.shape_cast %19 : vector<1x8x128xf32> to vector<8x128xf32>
    %21 = arith.truncf %20 : vector<8x128xf32> to vector<8x128xbf16>
    %c0_9 = arith.constant 0 : index
    %c0_10 = arith.constant 0 : index
    %22 = vector.load %arg5[%c0_9, %c0_10] : memref<8x128xbf16, #tpu.memory_space<vmem>>, vector<8x128xbf16>
    tpu.vector_store %arg5[%c0_9, %c0_10], %21 {strides = array<i32>} : memref<8x128xbf16, #tpu.memory_space<vmem>>, vector<8x128xbf16>,
    return
  }
  func.func @transform_0(%arg0: i32, %arg1: i32) -> (i32, i32, i32, i32) {
    %c0_i32 = arith.constant 0 : i32
    %c0_i32_0 = arith.constant 0 : i32
    %c0_i32_1 = arith.constant 0 : i32
    %c0_i32_2 = arith.constant 0 : i32
    return %arg0, %c0_i32, %c0_i32_0, %c0_i32_1 : i32, i32, i32, i32
  }
  func.func @transform_1(%arg0: i32, %arg1: i32) -> (i32, i32) {
    %c0_i32 = arith.constant 0 : i32
    %c0_i32_0 = arith.constant 0 : i32
    return %c0_i32, %arg1 : i32, i32
  }
  func.func @transform_2(%arg0: i32, %arg1: i32) -> (i32, i32) {
    %c0_i32 = arith.constant 0 : i32
    %c0_i32_0 = arith.constant 0 : i32
    return %c0_i32, %arg1 : i32, i32
  }
  func.func @transform_3(%arg0: i32, %arg1: i32) -> (i32, i32) {
    %c0_i32 = arith.constant 0 : i32
    return %arg0, %arg1 : i32, i32
  }
}

module attributes {stable_mosaic.version = 11 : i64} {
  func.func @kernel(%arg0: i32, %arg1: i32, %arg2: memref<1x3x10x128xbf16, #tpu.memory_space<vmem>>, %arg3: memref<1152x128xbf16, #tpu.memory_space<vmem>>, %arg4: memref<1x128xf32, #tpu.memory_space<vmem>>, %arg5: memref<8x128xbf16, #tpu.memory_space<vmem>>, %arg6: memref<8x128xbf16, #tpu.memory_space<vmem>>) attributes {dimension_semantics = [#tpu.dimension_semantics<parallel>, #tpu.dimension_semantics<parallel>], iteration_bounds = array<i64: 2, 1>, scalar_prefetch = 0 : i64, scratch_operands = 0 : i64, tpu.core_type = #tpu.core_type<tc>, window_params = [{transform_indices = @transform_0, window_bounds = array<i64: 1, 3, 10, 128>}, {transform_indices = @transform_1, window_bounds = array<i64: 1152, 128>}, {transform_indices = @transform_2, window_bounds = array<i64: 1, 128>}, {transform_indices = @transform_3, window_bounds = array<i64: 8, 128>}, {transform_indices = @transform_4, window_bounds = array<i64: 8, 128>}]} {
    %cst = arith.constant 0.000000e+00 : f32
    %0 = vector.broadcast %cst : f32 to vector<8x128xf32>
    %c0 = arith.constant 0 : index
    %c0_0 = arith.constant 0 : index
    %c0_1 = arith.constant 0 : index
    %c0_2 = arith.constant 0 : index
    %1 = vector.load %arg2[%c0, %c0_0, %c0_1, %c0_2] : memref<1x3x10x128xbf16, #tpu.memory_space<vmem>>, vector<1x1x8x128xbf16>
    %2 = vector.shape_cast %1 : vector<1x1x8x128xbf16> to vector<1x8x128xbf16>
    %3 = vector.shape_cast %2 : vector<1x8x128xbf16> to vector<8x128xbf16>
    %c0_3 = arith.constant 0 : index
    %c0_4 = arith.constant 0 : index
    %4 = vector.load %arg3[%c0_3, %c0_4] : memref<1152x128xbf16, #tpu.memory_space<vmem>>, vector<128x128xbf16>
    %cst_5 = arith.constant dense<0.000000e+00> : vector<8x128xf32>
    %5 = tpu.matmul %3, %4, %cst_5 {dimension_numbers = #tpu.dot_dimension_numbers<[1], [0], [0], [1], [0, 0, 1, 1], [], []>} : vector<8x128xbf16>, vector<128x128xbf16>, vector<8x128xf32> -> vector<8x128xf32>
    %6 = arith.addf %0, %5 : vector<8x128xf32>
    %c0_6 = arith.constant 0 : index
    %c0_7 = arith.constant 0 : index
    %c1 = arith.constant 1 : index
    %c0_8 = arith.constant 0 : index
    %7 = vector.load %arg2[%c0_6, %c0_7, %c1, %c0_8] : memref<1x3x10x128xbf16, #tpu.memory_space<vmem>>, vector<1x1x8x128xbf16>
    %8 = vector.shape_cast %7 : vector<1x1x8x128xbf16> to vector<1x8x128xbf16>
    %9 = vector.shape_cast %8 : vector<1x8x128xbf16> to vector<8x128xbf16>
    %c128 = arith.constant 128 : index
    %c0_9 = arith.constant 0 : index
    %10 = vector.load %arg3[%c128, %c0_9] : memref<1152x128xbf16, #tpu.memory_space<vmem>>, vector<128x128xbf16>
    %cst_10 = arith.constant dense<0.000000e+00> : vector<8x128xf32>
    %11 = tpu.matmul %9, %10, %cst_10 {dimension_numbers = #tpu.dot_dimension_numbers<[1], [0], [0], [1], [0, 0, 1, 1], [], []>} : vector<8x128xbf16>, vector<128x128xbf16>, vector<8x128xf32> -> vector<8x128xf32>
    %12 = arith.addf %6, %11 : vector<8x128xf32>
    %c0_11 = arith.constant 0 : index
    %c0_12 = arith.constant 0 : index
    %c2 = arith.constant 2 : index
    %c0_13 = arith.constant 0 : index
    %13 = vector.load %arg2[%c0_11, %c0_12, %c2, %c0_13] : memref<1x3x10x128xbf16, #tpu.memory_space<vmem>>, vector<1x1x8x128xbf16>
    %14 = vector.shape_cast %13 : vector<1x1x8x128xbf16> to vector<1x8x128xbf16>
    %15 = vector.shape_cast %14 : vector<1x8x128xbf16> to vector<8x128xbf16>
    %c256 = arith.constant 256 : index
    %c0_14 = arith.constant 0 : index
    %16 = vector.load %arg3[%c256, %c0_14] : memref<1152x128xbf16, #tpu.memory_space<vmem>>, vector<128x128xbf16>
    %cst_15 = arith.constant dense<0.000000e+00> : vector<8x128xf32>
    %17 = tpu.matmul %15, %16, %cst_15 {dimension_numbers = #tpu.dot_dimension_numbers<[1], [0], [0], [1], [0, 0, 1, 1], [], []>} : vector<8x128xbf16>, vector<128x128xbf16>, vector<8x128xf32> -> vector<8x128xf32>
    %18 = arith.addf %12, %17 : vector<8x128xf32>
    %c0_16 = arith.constant 0 : index
    %c1_17 = arith.constant 1 : index
    %c0_18 = arith.constant 0 : index
    %c0_19 = arith.constant 0 : index
    %19 = vector.load %arg2[%c0_16, %c1_17, %c0_18, %c0_19] : memref<1x3x10x128xbf16, #tpu.memory_space<vmem>>, vector<1x1x8x128xbf16>
    %20 = vector.shape_cast %19 : vector<1x1x8x128xbf16> to vector<1x8x128xbf16>
    %21 = vector.shape_cast %20 : vector<1x8x128xbf16> to vector<8x128xbf16>
    %c384 = arith.constant 384 : index
    %c0_20 = arith.constant 0 : index
    %22 = vector.load %arg3[%c384, %c0_20] : memref<1152x128xbf16, #tpu.memory_space<vmem>>, vector<128x128xbf16>
    %cst_21 = arith.constant dense<0.000000e+00> : vector<8x128xf32>
    %23 = tpu.matmul %21, %22, %cst_21 {dimension_numbers = #tpu.dot_dimension_numbers<[1], [0], [0], [1], [0, 0, 1, 1], [], []>} : vector<8x128xbf16>, vector<128x128xbf16>, vector<8x128xf32> -> vector<8x128xf32>
    %24 = arith.addf %18, %23 : vector<8x128xf32>
    %c0_22 = arith.constant 0 : index
    %c1_23 = arith.constant 1 : index
    %c1_24 = arith.constant 1 : index
    %c0_25 = arith.constant 0 : index
    %25 = vector.load %arg2[%c0_22, %c1_23, %c1_24, %c0_25] : memref<1x3x10x128xbf16, #tpu.memory_space<vmem>>, vector<1x1x8x128xbf16>
    %26 = vector.shape_cast %25 : vector<1x1x8x128xbf16> to vector<1x8x128xbf16>
    %27 = vector.shape_cast %26 : vector<1x8x128xbf16> to vector<8x128xbf16>
    %c512 = arith.constant 512 : index
    %c0_26 = arith.constant 0 : index
    %28 = vector.load %arg3[%c512, %c0_26] : memref<1152x128xbf16, #tpu.memory_space<vmem>>, vector<128x128xbf16>
    %cst_27 = arith.constant dense<0.000000e+00> : vector<8x128xf32>
    %29 = tpu.matmul %27, %28, %cst_27 {dimension_numbers = #tpu.dot_dimension_numbers<[1], [0], [0], [1], [0, 0, 1, 1], [], []>} : vector<8x128xbf16>, vector<128x128xbf16>, vector<8x128xf32> -> vector<8x128xf32>
    %30 = arith.addf %24, %29 : vector<8x128xf32>
    %c0_28 = arith.constant 0 : index
    %c1_29 = arith.constant 1 : index
    %c2_30 = arith.constant 2 : index
    %c0_31 = arith.constant 0 : index
    %31 = vector.load %arg2[%c0_28, %c1_29, %c2_30, %c0_31] : memref<1x3x10x128xbf16, #tpu.memory_space<vmem>>, vector<1x1x8x128xbf16>
    %32 = vector.shape_cast %31 : vector<1x1x8x128xbf16> to vector<1x8x128xbf16>
    %33 = vector.shape_cast %32 : vector<1x8x128xbf16> to vector<8x128xbf16>
    %c640 = arith.constant 640 : index
    %c0_32 = arith.constant 0 : index
    %34 = vector.load %arg3[%c640, %c0_32] : memref<1152x128xbf16, #tpu.memory_space<vmem>>, vector<128x128xbf16>
    %cst_33 = arith.constant dense<0.000000e+00> : vector<8x128xf32>
    %35 = tpu.matmul %33, %34, %cst_33 {dimension_numbers = #tpu.dot_dimension_numbers<[1], [0], [0], [1], [0, 0, 1, 1], [], []>} : vector<8x128xbf16>, vector<128x128xbf16>, vector<8x128xf32> -> vector<8x128xf32>
    %36 = arith.addf %30, %35 : vector<8x128xf32>
    %c0_34 = arith.constant 0 : index
    %c2_35 = arith.constant 2 : index
    %c0_36 = arith.constant 0 : index
    %c0_37 = arith.constant 0 : index
    %37 = vector.load %arg2[%c0_34, %c2_35, %c0_36, %c0_37] : memref<1x3x10x128xbf16, #tpu.memory_space<vmem>>, vector<1x1x8x128xbf16>
    %38 = vector.shape_cast %37 : vector<1x1x8x128xbf16> to vector<1x8x128xbf16>
    %39 = vector.shape_cast %38 : vector<1x8x128xbf16> to vector<8x128xbf16>
    %c768 = arith.constant 768 : index
    %c0_38 = arith.constant 0 : index
    %40 = vector.load %arg3[%c768, %c0_38] : memref<1152x128xbf16, #tpu.memory_space<vmem>>, vector<128x128xbf16>
    %cst_39 = arith.constant dense<0.000000e+00> : vector<8x128xf32>
    %41 = tpu.matmul %39, %40, %cst_39 {dimension_numbers = #tpu.dot_dimension_numbers<[1], [0], [0], [1], [0, 0, 1, 1], [], []>} : vector<8x128xbf16>, vector<128x128xbf16>, vector<8x128xf32> -> vector<8x128xf32>
    %42 = arith.addf %36, %41 : vector<8x128xf32>
    %c0_40 = arith.constant 0 : index
    %c2_41 = arith.constant 2 : index
    %c1_42 = arith.constant 1 : index
    %c0_43 = arith.constant 0 : index
    %43 = vector.load %arg2[%c0_40, %c2_41, %c1_42, %c0_43] : memref<1x3x10x128xbf16, #tpu.memory_space<vmem>>, vector<1x1x8x128xbf16>
    %44 = vector.shape_cast %43 : vector<1x1x8x128xbf16> to vector<1x8x128xbf16>
    %45 = vector.shape_cast %44 : vector<1x8x128xbf16> to vector<8x128xbf16>
    %c896 = arith.constant 896 : index
    %c0_44 = arith.constant 0 : index
    %46 = vector.load %arg3[%c896, %c0_44] : memref<1152x128xbf16, #tpu.memory_space<vmem>>, vector<128x128xbf16>
    %cst_45 = arith.constant dense<0.000000e+00> : vector<8x128xf32>
    %47 = tpu.matmul %45, %46, %cst_45 {dimension_numbers = #tpu.dot_dimension_numbers<[1], [0], [0], [1], [0, 0, 1, 1], [], []>} : vector<8x128xbf16>, vector<128x128xbf16>, vector<8x128xf32> -> vector<8x128xf32>
    %48 = arith.addf %42, %47 : vector<8x128xf32>
    %c0_46 = arith.constant 0 : index
    %c2_47 = arith.constant 2 : index
    %c2_48 = arith.constant 2 : index
    %c0_49 = arith.constant 0 : index
    %49 = vector.load %arg2[%c0_46, %c2_47, %c2_48, %c0_49] : memref<1x3x10x128xbf16, #tpu.memory_space<vmem>>, vector<1x1x8x128xbf16>
    %50 = vector.shape_cast %49 : vector<1x1x8x128xbf16> to vector<1x8x128xbf16>
    %51 = vector.shape_cast %50 : vector<1x8x128xbf16> to vector<8x128xbf16>
    %c1024 = arith.constant 1024 : index
    %c0_50 = arith.constant 0 : index
    %52 = vector.load %arg3[%c1024, %c0_50] : memref<1152x128xbf16, #tpu.memory_space<vmem>>, vector<128x128xbf16>
    %cst_51 = arith.constant dense<0.000000e+00> : vector<8x128xf32>
    %53 = tpu.matmul %51, %52, %cst_51 {dimension_numbers = #tpu.dot_dimension_numbers<[1], [0], [0], [1], [0, 0, 1, 1], [], []>} : vector<8x128xbf16>, vector<128x128xbf16>, vector<8x128xf32> -> vector<8x128xf32>
    %54 = arith.addf %48, %53 : vector<8x128xf32>
    %c0_52 = arith.constant 0 : index
    %c0_53 = arith.constant 0 : index
    %55 = vector.load %arg4[%c0_52, %c0_53] : memref<1x128xf32, #tpu.memory_space<vmem>>, vector<1x128xf32>
    %56 = vector.broadcast %55 : vector<1x128xf32> to vector<8x128xf32>
    %57 = arith.addf %54, %56 : vector<8x128xf32>
    %c0_54 = arith.constant 0 : index
    %c0_55 = arith.constant 0 : index
    %58 = vector.load %arg5[%c0_54, %c0_55] : memref<8x128xbf16, #tpu.memory_space<vmem>>, vector<8x128xbf16>
    %59 = arith.extf %58 : vector<8x128xbf16> to vector<8x128xf32>
    %60 = arith.addf %57, %59 : vector<8x128xf32>
    %cst_56 = arith.constant 0.000000e+00 : f32
    %61 = vector.broadcast %cst_56 : f32 to vector<8x128xf32>
    %62 = arith.maximumf %60, %61 : vector<8x128xf32>
    %63 = vector.shape_cast %62 : vector<8x128xf32> to vector<1x8x128xf32>
    %64 = tpu.iota {dimensions = array<i32: 1>} : vector<1x8x128xi32>
    %c1_i32 = arith.constant 1 : i32
    %65 = vector.broadcast %c1_i32 : i32 to vector<1x8x128xi32>
    %66 = arith.cmpi slt, %64, %65 : vector<1x8x128xi32>
    %cst_57 = arith.constant 0.000000e+00 : f32
    %67 = vector.broadcast %cst_57 : f32 to vector<1x8x128xf32>
    %68 = arith.select %66, %63, %67 : vector<1x8x128xi1>, vector<1x8x128xf32>
    %69 = vector.shape_cast %68 : vector<1x8x128xf32> to vector<8x128xf32>
    %70 = arith.truncf %69 : vector<8x128xf32> to vector<8x128xbf16>
    %c0_58 = arith.constant 0 : index
    %c0_59 = arith.constant 0 : index
    %71 = vector.load %arg6[%c0_58, %c0_59] : memref<8x128xbf16, #tpu.memory_space<vmem>>, vector<8x128xbf16>
    tpu.vector_store %arg6[%c0_58, %c0_59], %70 {strides = array<i32>} : memref<8x128xbf16, #tpu.memory_space<vmem>>, vector<8x128xbf16>,
    return
  }
  func.func @transform_0(%arg0: i32, %arg1: i32) -> (i32, i32, i32, i32) {
    %c0_i32 = arith.constant 0 : i32
    %c0_i32_0 = arith.constant 0 : i32
    %c0_i32_1 = arith.constant 0 : i32
    %c0_i32_2 = arith.constant 0 : i32
    return %arg0, %c0_i32, %c0_i32_0, %c0_i32_1 : i32, i32, i32, i32
  }
  func.func @transform_1(%arg0: i32, %arg1: i32) -> (i32, i32) {
    %c0_i32 = arith.constant 0 : i32
    %c0_i32_0 = arith.constant 0 : i32
    return %c0_i32, %arg1 : i32, i32
  }
  func.func @transform_2(%arg0: i32, %arg1: i32) -> (i32, i32) {
    %c0_i32 = arith.constant 0 : i32
    %c0_i32_0 = arith.constant 0 : i32
    return %c0_i32, %arg1 : i32, i32
  }
  func.func @transform_3(%arg0: i32, %arg1: i32) -> (i32, i32) {
    %c0_i32 = arith.constant 0 : i32
    return %arg0, %arg1 : i32, i32
  }
  func.func @transform_4(%arg0: i32, %arg1: i32) -> (i32, i32) {
    %c0_i32 = arith.constant 0 : i32
    return %arg0, %arg1 : i32, i32
  }
}

</mosaic_0001>

<bundles_post_ra>
// kernel: backbone_base_forward.12
= control target key start
LH: loop header
LB: loop body
LE: loop exit
PB: predicated region body
PF: predicated region fallthrough
CT: control target
= control target key end

     0   :  { %s2408_s12 = smov 0   ;;  %s2410_s13 = smov 0   ;;  %s2963_s0 = inlined_call_operand.vmem [shape: bf16[2,18,9,256], index: 0, kind: input, shape index: {}]   ;;  %s2964_s1 = inlined_call_operand.vmem [shape: bf16[1152,128], index: 1, kind: input, shape index: {}]   ;;  %s2965_s2 = inlined_call_operand.vmem [shape: f32[1,128], index: 2, kind: input, shape index: {}]   ;;  %s2966_s3 = inlined_call_operand.vmem [shape: bf16[128,128], index: 3, kind: output, shape index: {}]  }
   0x1   :  { %s2412_s14 = smov 0  }
   0x2 LB: > { %s25_s15 = sadd.s32 1, %s2382_s13  ;;  %p1841_p0 = scmp.ge.s32.totalorder %s2386_s14, 1  ;;  %s2386_s14 = sphi %s2412_s14, %s13_s14   ;;  %s2382_s13 = sphi %s2410_s13, %s2970_s13   ;;  %s2378_s12 = sphi %s2408_s12, %s2969_s12  }
   0x3   : > { %p27_p1 = scmp.ge.s32.totalorder %s25_s15, 2  ;;  %p168_p2 = scmp.lt.s32.totalorder %s2386_s14, 3 }
   0x5   : > { %s2972_s15 = smov (%p27_p1, %s25_s15), 0  ;;  %p169_p3 = pnand %p1841_p0, %p168_p2 }
   0x6   : > { %p202_p4 = scmp.lt.s32.totalorder (!%p169_p3), %s2378_s12, 1 }
   0x7   : > { %172 = sbr.rel (%p169_p3) target bundleno = 337 (0x151), region = 32 }
   0xc   : > { %v2234_v0 = vld [vmem:[%s2964_s1 + $0x78] sm:$0xff]  ;;  %v2233_v2 = vld [vmem:[%s2964_s1 + $0x70] sm:$0xff]  ;;  %s203_s22 = scalar_select %p202_p4, %s2378_s12, 1  ;;  %v2232_v6 = vld [vmem:[%s2964_s1 + $0x68] sm:$0xff]  ;;  %vm473_vm0 = vsmask.f32 3328 }
   0xd   : > { %v2242_v1 = vld [vmem:[%s2964_s1 + $0xb8] sm:$0xff]  ;;  %2322 = vmatpush.bf16.msra.mxu1 %v2234_v0  ;;  %351 = vmatpush.bf16.msra.mxu0 %v2234_v0  ;;  %v2241_v3 = vld [vmem:[%s2964_s1 + $0xb0] sm:$0xff]  ;;  %v2240_v7 = vld [vmem:[%s2964_s1 + $0xa8] sm:$0xff]  ;;  %vm474_vm1 = vsmask.f32 7440 }
   0xe   : > { %668 = vmatpush.bf16.msra.mxu2 %v2242_v1  ;;  %v2254_v4 = vld [vmem:[%s2964_s1 + $0xf8] sm:$0xff]  ;;  %s2338_s27 = smul.u32 288, %s203_s22  ;;  %v2253_v5 = vld [vmem:[%s2964_s1 + $0xf0] sm:$0xff]  ;;  %v2252_v8 = vld [vmem:[%s2964_s1 + $0xe8] sm:$0xff] }
   0xf   : > { %810 = vmatpush.bf16.msra.mxu3 %v2254_v4  ;;  %v2231_v11 = vld [vmem:[%s2964_s1 + $0x60] sm:$0xff]  ;;  %v2230_v20 = vld [vmem:[%s2964_s1 + $0x58] sm:$0xff]  ;;  %v2229_v31 = vld [vmem:[%s2964_s1 + $0x50] sm:$0xff] }
  0x10   : > { %s2454_s7 = scalar_lea.vmem %s2963_s0, %s2338_s27  ;;  %v2239_v12 = vld [vmem:[%s2964_s1 + $0xa0] sm:$0xff]  ;;  %v2238_v24 = vld [vmem:[%s2964_s1 + $0x98] sm:$0xff]  ;;  %v2237_v34 = vld [vmem:[%s2964_s1 + $0x90] sm:$0xff] }
  0x11   : > { %2323 = vmatpush.bf16.msra.mxu1 %v2233_v2  ;;  %352 = vmatpush.bf16.msra.mxu0 %v2233_v2  ;;  %v2463_v9 = vld [vmem:[%s2454_s7] sm:$0xff]  ;;  %v224_v13 = vld [vmem:[%s2454_s7 + $0x8] sm:$0x11]  ;;  %v2250_v29 = vld [vmem:[%s2964_s1 + $0xd8] sm:$0xff] }
  0x12   : > { %669 = vmatpush.bf16.msra.mxu2 %v2241_v3  ;;  %v2466_v10 = vld [vmem:[%s2454_s7 + $0x20] sm:$0xff]  ;;  %v477_v14 = vshrl.u32 %v2463_v9, 16  ;;  %v480_v15 = vshll.u32 %v2463_v9, 16  ;;  %v226_v17 = vld [vmem:[%s2454_s7 + $0x28] sm:$0x11]  ;;  %v486_v26 = vshll.u32 %v224_v13, 16  ;;  %vm2510_vm2 = vmor %vm473_vm0, %vm474_vm1 }
  0x13   : > { %811 = vmatpush.bf16.msra.mxu3 %v2253_v5  ;;  %v491_v16 = vshrl.u32 %v2466_v10, 16  ;;  %v2251_v18 = vld [vmem:[%s2964_s1 + $0xe0] sm:$0xff]  ;;  %v494_v19 = vshll.u32 %v2466_v10, 16  ;;  %v500_v27 = vshll.u32 %v226_v17, 16  ;;  %v263_v44 = vrot.slane %v2463_v9, 4  ;;  %v2249_v46 = vld [vmem:[%s2964_s1 + $0xd0] sm:$0xff] }
  0x14   : > { %v479_v21 = vrot.slane %v477_v14, 4  ;;  %v482_v22 = vrot.slane %v480_v15, 5  ;;  %v2496_v32 = vld [vmem:[%s2454_s7 + $0x80] sm:$0xff]  ;;  %v488_v36 = vrot.slane %v486_v26, 5  ;;  %v264_v45 = vrot.slane %v2466_v10, 4  ;;  %v2228_v47 = vld [vmem:[%s2964_s1 + $0x48] sm:$0xff] }
  0x15   : > { %2324 = vmatpush.bf16.msra.mxu1 %v2232_v6  ;;  %353 = vmatpush.bf16.msra.mxu0 %v2232_v6  ;;  %v493_v23 = vrot.slane %v491_v16, 4  ;;  %v496_v25 = vrot.slane %v494_v19, 5  ;;  %v2499_v33 = vld [vmem:[%s2454_s7 + $0xa0] sm:$0xff]  ;;  %v502_v38 = vrot.slane %v500_v27, 5  ;;  %v267_v42 = vrot.slane %v2496_v32, 4  ;;  %v2236_v50 = vld [vmem:[%s2964_s1 + $0x88] sm:$0xff] }
  0x16   : > { %670 = vmatpush.bf16.msra.mxu2 %v2240_v7  ;;  %v483_v28 = vor.u32 %v482_v22, %v479_v21  ;;  %v2507_v39 = vld [vmem:[%s2454_s7 + $0x40] sm:$0xff]  ;;  %v268_v43 = vrot.slane %v2499_v33, 4  ;;  %v287_v57 = vunpack.c.l.b16 %v263_v44  ;;  %v2541_v58 = vunpack.c.l.b16 %v264_v45  ;;  %v2248_v59 = vld [vmem:[%s2964_s1 + $0xc8] sm:$0xff]  ;;  %v2226_v61 = vld [vmem:[%s2964_s1 + $0x38] sm:$0xff] }
  0x17   : > { %812 = vmatpush.bf16.msra.mxu3 %v2252_v8  ;;  %v497_v30 = vor.u32 %v496_v25, %v493_v23  ;;  %v2515_v41 = vld [vmem:[%s2454_s7 + $0x60] sm:$0xff]  ;;  %v505_v48 = vshrl.u32 %v2507_v39, 16  ;;  %v508_v49 = vshll.u32 %v2507_v39, 16  ;;  %v2539_v55 = vunpack.c.l.b16 %v267_v42  ;;  %v2262_v1 = vld [vmem:[%s2964_s1 + $0x138] sm:$0xff]  ;;  %v228_v7 = vld [vmem:[%s2454_s7 + $0x48] sm:$0x11] }
  0x18   : > { %v484_v35 = vrot.slane %v483_v28, 4  ;;  %v519_v53 = vshrl.u32 %v2515_v41, 16  ;;  %v522_v54 = vshll.u32 %v2515_v41, 16  ;;  %v292_v56 = vunpack.c.l.b16 %v268_v43  ;;  %v2227_v60 = vld [vmem:[%s2964_s1 + $0x40] sm:$0xff]  ;;  %v2282_v6 = vld [vmem:[%s2964_s1 + $0x1b8] sm:$0xff]  ;;  %v2225_v15 = vld [vmem:[%s2964_s1 + $0x30] sm:$0xff] }
  0x19   : > { %2325 = vmatpush.bf16.msra.mxu1 %v2231_v11  ;;  %354 = vmatpush.bf16.msra.mxu0 %v2231_v11  ;;  %v2504_v37 = vrot.slane %v497_v30, 4  ;;  %v2235_v0 = vld [vmem:[%s2964_s1 + $0x80] sm:$0xff]  ;;  %v507_v2 = vrot.slane %v505_v48, 4  ;;  %v510_v3 = vrot.slane %v508_v49, 5  ;;  %v230_v8 = vld [vmem:[%s2454_s7 + $0x68] sm:$0x11]  ;;  %v295_v10 = vpack.c.b16 %v2541_v58, %v287_v57 }
  0x1a   : > { %671 = vmatpush.bf16.msra.mxu2 %v2239_v12  ;;  %v489_v51 = vsel %vm2510_vm2, %v484_v35, %v488_v36  ;;  %v521_v4 = vrot.slane %v519_v53, 4  ;;  %v524_v5 = vrot.slane %v522_v54, 5  ;;  %v297_v9 = vpack.c.b16 %v292_v56, %v2539_v55  ;;  %v2247_v12 = vld [vmem:[%s2964_s1 + $0xc0] sm:$0xff]  ;;  %v1975_v13 = vld [vmem:[%s2454_s7 + $0x10] sm:$0xf]  ;;  %v2224_v26 = vld [vmem:[%s2964_s1 + $0x28] sm:$0xff] }
  0x1b   : > { %813 = vmatpush.bf16.msra.mxu3 %v2251_v18  ;;  %v503_v52 = vsel %vm2510_vm2, %v2504_v37, %v502_v38  ;;  %v604_v62 = vunpack.c.l.b16 %v489_v51  ;;  %v2243_v14 = vld [vmem:[%s2454_s7 + $0x2c] sm:$0xf0]  ;;  %v511_v16 = vor.u32 %v510_v3, %v507_v2  ;;  %v514_v17 = vshll.u32 %v228_v7, 16  ;;  %v2586_v25 = vld [vmem:[%s2454_s7 + $0xe0] sm:$0xff]  ;;  %v2280_v35 = vld [vmem:[%s2964_s1 + $0x1a8] sm:$0xff] }
  0x1c   : > { %v605_v63 = vunpack.c.l.b16 %v503_v52  ;;  %v525_v18 = vor.u32 %v524_v5, %v521_v4  ;;  %v528_v19 = vshll.u32 %v230_v8, 16  ;;  %v2261_v21 = vld [vmem:[%s2964_s1 + $0x130] sm:$0xff]  ;;  %v1976_v23 = vor.u32 %v2243_v14, %v1975_v13  ;;  %v2223_v48 = vld [vmem:[%s2964_s1 + $0x20] sm:$0xff]  ;;  %v2278_v14 = vld [vmem:[%s2964_s1 + $0x198] sm:$0xff] }
  0x1d   : > { %2326 = vmatpush.bf16.msra.mxu1 %v2230_v20  ;;  %355 = vmatpush.bf16.msra.mxu0 %v2230_v20  ;;  %v2290_v20 = vld [vmem:[%s2964_s1 + $0x1f8] sm:$0xff]  ;;  %v2281_v22 = vld [vmem:[%s2964_s1 + $0x1b0] sm:$0xff]  ;;  %v2591_v27 = vrot.slane %v511_v16, 4  ;;  %v516_v28 = vrot.slane %v514_v17, 5  ;;  %v270_v38 = vrot.slane %v2586_v25, 4  ;;  %v265_v42 = vrot.slane %v2507_v39, 4 }
  0x1e   : > { %672 = vmatpush.bf16.msra.mxu2 %v2238_v24  ;;  %v612_v11 = vpack.c.b16 %v605_v63, %v604_v62  ;;  %v2583_v24 = vld [vmem:[%s2454_s7 + $0xc0] sm:$0xff]  ;;  %v530_v30 = vrot.slane %v528_v19, 5  ;;  %v266_v43 = vrot.slane %v2515_v41, 4  ;;  %v533_v44 = vshrl.u32 %v2496_v32, 16  ;;  %v2222_v62 = vld [vmem:[%s2964_s1 + $0x18] sm:$0xff]  ;;  %v2221_v7 = vld [vmem:[%s2964_s1 + $0x10] sm:$0xff] }
  0x1f   : > { %814 = vmatpush.bf16.msra.mxu3 %v2250_v29  ;;  %v2593_v29 = vrot.slane %v525_v18, 4  ;;  %v269_v36 = vrot.slane %v2583_v24, 4  ;;  %v536_v45 = vshll.u32 %v2496_v32, 16  ;;  %v517_v39 = vsel %vm2510_vm2, %v2591_v27, %v516_v28  ;;  %v2288_v32 = vld [vmem:[%s2964_s1 + $0x1e8] sm:$0xff]  ;;  %v2279_v49 = vld [vmem:[%s2964_s1 + $0x1a0] sm:$0xff]  ;;  %v2258_v63 = vld [vmem:[%s2964_s1 + $0x118] sm:$0xff] }
  0x20   : > { %v2632_v51 = vunpack.c.l.b16 %v270_v38  ;;  %v2634_v52 = vunpack.c.l.b16 %v265_v42  ;;  %v2636_v53 = vunpack.c.l.b16 %v266_v43  ;;  %v606_v54 = vunpack.c.l.b16 %v517_v39  ;;  %v1979_v5 = vld [vmem:[%s2454_s7 + $0x50] sm:$0xf]  ;;  %v2220_v17 = vld [vmem:[%s2964_s1 + $0x8] sm:$0xff]  ;;  %v2219_v42 = vld [vmem:[%s2964_s1] sm:$0xff] }
  0x21   : > { %2327 = vmatpush.bf16.msra.mxu1 %v2229_v31  ;;  %356 = vmatpush.bf16.msra.mxu0 %v2229_v31  ;;  %v2289_v31 = vld [vmem:[%s2964_s1 + $0x1f0] sm:$0xff]  ;;  %v531_v41 = vsel %vm2510_vm2, %v2593_v29, %v530_v30  ;;  %v535_v57 = vrot.slane %v533_v44, 4  ;;  %v578_v38 = vshll.u32 %v2586_v25, 16  ;;  %v2270_v44 = vld [vmem:[%s2964_s1 + $0x178] sm:$0xff] }
  0x22   : > { %673 = vmatpush.bf16.msra.mxu2 %v2237_v34  ;;  %v2260_v34 = vld [vmem:[%s2964_s1 + $0x128] sm:$0xff]  ;;  %v607_v56 = vunpack.c.l.b16 %v531_v41  ;;  %v296_v3 = vpack.c.b16 %v2636_v53, %v2634_v52  ;;  %v2665_v16 = vld [vmem:[%s2454_s7 + $0x30] sm:$0xff]  ;;  %v1879_v41 = vld [vmem:[%s2454_s7] sm:$0xf] }
  0x23   : > { %815 = vmatpush.bf16.msra.mxu3 %v2249_v46  ;;  %v547_v46 = vshrl.u32 %v2499_v33, 16  ;;  %v848_v30 = vrot.slane %v2665_v16, 4 }
  0x24   : > { %v613_v4 = vpack.c.b16 %v607_v56, %v606_v54  ;;  %v580_v56 = vrot.slane %v578_v38, 5 }
  0x25   : > { %2328 = vmatpush.bf16.msra.mxu1 %v2228_v47  ;;  %357 = vmatpush.bf16.msra.mxu0 %v2228_v47  ;;  %v550_v47 = vshll.u32 %v2499_v33, 16  ;;  %v2259_v33 = vld [vmem:[%s2964_s1 + $0x120] sm:$0xff] }
  0x26   : > { %674 = vmatpush.bf16.msra.mxu2 %v2236_v50  ;;  %v2630_v50 = vunpack.c.l.b16 %v269_v36  ;;  %v575_v36 = vshrl.u32 %v2586_v25, 16  ;;  %v2255_v25 = vld [vmem:[%s2964_s1 + $0x100] sm:$0xff] }
  0x27   : > { %816 = vmatpush.bf16.msra.mxu3 %v2248_v59  ;;  %v538_v59 = vrot.slane %v536_v45, 5 }
  0x28   : > { %v298_v2 = vpack.c.b16 %v2632_v51, %v2630_v50  ;;  %v577_v54 = vrot.slane %v575_v36, 4 }
  0x29   : > { %2329 = vmatpush.bf16.msra.mxu1 %v2227_v60  ;;  %358 = vmatpush.bf16.msra.mxu0 %v2227_v60  ;;  %v549_v60 = vrot.slane %v547_v46, 4  ;;  %v539_v8 = vor.u32 %v538_v59, %v535_v57  ;;  %v872_v46 = vunpack.c.l.b16 %v848_v30  ;;  %v2269_v57 = vld [vmem:[%s2964_s1 + $0x170] sm:$0xff]  ;;  %v236_v59 = vld [vmem:[%s2454_s7 + $0xc8] sm:$0x11]  ;;  %v2295_v30 = vld [vmem:[%s2964_s1 + $0x220] sm:$0xff] }
  0x2a   : > { %675 = vmatpush.bf16.msra.mxu2 %v2235_v0  ;;  %v232_v0 = vld [vmem:[%s2454_s7 + $0x88] sm:$0x11] }
  0x2b   : > { %817 = vmatpush.bf16.msra.mxu3 %v2247_v12  ;;  %v2257_v12 = vld [vmem:[%s2964_s1 + $0x110] sm:$0xff]  ;;  %v2670_v18 = vrot.slane %v539_v8, 4  ;;  %v2276_v8 = vld [vmem:[%s2964_s1 + $0x188] sm:$0xff] }
  0x2c   : > { %369 = vmatmul.bf16.vlgmr.msra.gmra.mxu1 %v297_v9  ;;  %359 = vmatmul.bf16.vlgmr.msra.gmra.mxu0 %v295_v10  ;;  %v542_v9 = vshll.u32 %v232_v0, 16  ;;  %v1983_v0 = vld [vmem:[%s2454_s7 + $0x90] sm:$0xf] }
  0x2d   : > { %444 = vmatpush.bf16.msrb.mxu1 %v2226_v61  ;;  %935 = vmatpush.bf16.msrb.mxu0 %v2262_v1  ;;  %v552_v61 = vrot.slane %v550_v47, 5  ;;  %v234_v1 = vld [vmem:[%s2454_s7 + $0xa8] sm:$0x11]  ;;  %v2298_v47 = vld [vmem:[%s2964_s1 + $0x238] sm:$0xff] }
  0x2e   : > { %1306 = vmatpush.bf16.msrb.mxu2 %v2282_v6  ;;  %818 = vmatmul.bf16.vlgmr.msra.gmra.mxu3 %v1976_v23  ;;  %v2244_v6 = vld [vmem:[%s2454_s7 + $0x6c] sm:$0xf0]  ;;  %v544_v19 = vrot.slane %v542_v9, 5  ;;  %v2256_v23 = vld [vmem:[%s2964_s1 + $0x108] sm:$0xff] }
  0x2f   : > { %676 = vmatmul.bf16.vlgmr.msra.gmra.mxu2 %v612_v11  ;;  %1431 = vmatpush.bf16.msrb.mxu3 %v2290_v20  ;;  %v553_v10 = vor.u32 %v552_v61, %v549_v60  ;;  %v556_v11 = vshll.u32 %v234_v1, 16  ;;  %v1980_v13 = vor.u32 %v2244_v6, %v1979_v5  ;;  %v238_v60 = vld [vmem:[%s2454_s7 + $0xe8] sm:$0x11]  ;;  %v2245_v1 = vld [vmem:[%s2454_s7 + $0xac] sm:$0xf0]  ;;  %v581_v5 = vor.u32 %v580_v56, %v577_v54  ;;  %v2294_v56 = vld [vmem:[%s2964_s1 + $0x218] sm:$0xff] }
  0x30   : > { %v584_v6 = vshll.u32 %v238_v60, 16  ;;  %v1984_v9 = vor.u32 %v2245_v1, %v1983_v0  ;;  %v2781_v54 = vld [vmem:[%s2454_s7 + $0xb0] sm:$0xff]  ;;  %v1887_v1 = vld [vmem:[%s2454_s7 + $0x80] sm:$0xf] }
  0x31   : > { %445 = vmatpush.bf16.msrb.mxu1 %v2225_v15  ;;  %936 = vmatpush.bf16.msrb.mxu0 %v2261_v21  ;;  %v2662_v15 = vld [vmem:[%s2454_s7 + $0x10] sm:$0xff]  ;;  %v554_v20 = vrot.slane %v553_v10, 4  ;;  %v558_v21 = vrot.slane %v556_v11, 5 }
  0x32   : > { %1307 = vmatpush.bf16.msrb.mxu2 %v2281_v22  ;;  %v2287_v22 = vld [vmem:[%s2964_s1 + $0x1e0] sm:$0xff]  ;;  %v847_v28 = vrot.slane %v2662_v15, 4  ;;  %v2726_v10 = vld [vmem:[%s2454_s7 + $0x50] sm:$0xff] }
  0x33   : > { %1432 = vmatpush.bf16.msrb.mxu3 %v2289_v31  ;;  %v561_v31 = vshrl.u32 %v2583_v24, 16  ;;  %v559_v43 = vsel %vm2510_vm2, %v554_v20, %v558_v21  ;;  %v2729_v11 = vld [vmem:[%s2454_s7 + $0x70] sm:$0xff]  ;;  %v2296_v21 = vld [vmem:[%s2964_s1 + $0x228] sm:$0xff] }
  0x34   : > { %v871_v45 = vunpack.c.l.b16 %v847_v28  ;;  %v2285_v20 = vld [vmem:[%s2964_s1 + $0x1d0] sm:$0xff]  ;;  %v2284_v28 = vld [vmem:[%s2964_s1 + $0x1c8] sm:$0xff] }
  0x35   : > { %446 = vmatpush.bf16.msrb.mxu1 %v2224_v26  ;;  %937 = vmatpush.bf16.msrb.mxu0 %v2260_v34  ;;  %v2277_v26 = vld [vmem:[%s2964_s1 + $0x190] sm:$0xff]  ;;  %v564_v34 = vshll.u32 %v2583_v24, 16  ;;  %v545_v24 = vsel %vm2510_vm2, %v2670_v18, %v544_v19  ;;  %v2275_v19 = vld [vmem:[%s2964_s1 + $0x180] sm:$0xff] }
  0x36   : > { %1308 = vmatpush.bf16.msrb.mxu2 %v2280_v35  ;;  %v2286_v35 = vld [vmem:[%s2964_s1 + $0x1d8] sm:$0xff] }
  0x37   : > { %1433 = vmatpush.bf16.msrb.mxu3 %v2288_v32  ;;  %v566_v39 = vrot.slane %v564_v34, 5  ;;  %v2215_v32 = vld [vmem:[%s2454_s7 + $0x1c] sm:$0xf0] }
  0x38   : > { %v1880_v61 = vor.u32 %v2215_v32, %v1879_v41  ;;  %v2264_v32 = vld [vmem:[%s2964_s1 + $0x148] sm:$0xff] }
  0x39   : > { %447 = vmatpush.bf16.msrb.mxu1 %v2223_v48  ;;  %938 = vmatpush.bf16.msrb.mxu0 %v2259_v33  ;;  %v563_v48 = vrot.slane %v561_v31, 4  ;;  %v608_v33 = vunpack.c.l.b16 %v545_v24  ;;  %v2216_v24 = vld [vmem:[%s2454_s7 + $0x5c] sm:$0xf0] }
  0x3a   : > { %1309 = vmatpush.bf16.msrb.mxu2 %v2279_v49  ;;  %v609_v49 = vunpack.c.l.b16 %v559_v43 }
  0x3b   : > { %1434 = vmatpush.bf16.msrb.mxu3 %v2287_v22  ;;  %v2267_v22 = vld [vmem:[%s2964_s1 + $0x160] sm:$0xff] }
  0x3c   : > { %374 = vmatmul.bf16.gmra.mxu1 %v298_v2  ;;  %364 = vmatmul.bf16.gmra.mxu0 %v296_v3  ;;  %v567_v2 = vor.u32 %v566_v39, %v563_v48  ;;  %v2297_v3 = vld [vmem:[%s2964_s1 + $0x230] sm:$0xff] }
  0x3d   : > { %448 = vmatpush.bf16.msrb.mxu1 %v2222_v62  ;;  %939 = vmatpush.bf16.msrb.mxu0 %v2258_v63  ;;  %v879_v62 = vpack.c.b16 %v872_v46, %v871_v45  ;;  %v614_v63 = vpack.c.b16 %v609_v49, %v608_v33  ;;  %v1987_v48 = vld [vmem:[%s2454_s7 + $0xd0] sm:$0xf]  ;;  %v2283_v33 = vld [vmem:[%s2964_s1 + $0x1c0] sm:$0xff] }
  0x3e   : > { %1310 = vmatpush.bf16.msrb.mxu2 %v2278_v14  ;;  %823 = vmatmul.bf16.gmra.mxu3 %v1980_v13  ;;  %v2733_v14 = vrot.slane %v581_v5, 4  ;;  %v2246_v39 = vld [vmem:[%s2454_s7 + $0xec] sm:$0xf0] }
  0x3f   : > { %681 = vmatmul.bf16.gmra.mxu2 %v613_v4  ;;  %1435 = vmatpush.bf16.msrb.mxu3 %v2286_v35  ;;  %v570_v4 = vshll.u32 %v236_v59, 16  ;;  %v2266_v35 = vld [vmem:[%s2964_s1 + $0x158] sm:$0xff]  ;;  %v1988_v41 = vor.u32 %v2246_v39, %v1987_v48  ;;  %v2778_v49 = vld [vmem:[%s2454_s7 + $0x90] sm:$0xff] }
  0x40   : > { %v2293_v59 = vld [vmem:[%s2964_s1 + $0x210] sm:$0xff]  ;;  %v851_v60 = vrot.slane %v2778_v49, 4 }
  0x41   : > { %449 = vmatpush.bf16.msrb.mxu1 %v2221_v7  ;;  %940 = vmatpush.bf16.msrb.mxu0 %v2257_v12  ;;  %v2268_v7 = vld [vmem:[%s2964_s1 + $0x168] sm:$0xff]  ;;  %v2731_v12 = vrot.slane %v567_v2, 4  ;;  %v572_v13 = vrot.slane %v570_v4, 5  ;;  %v2217_v2 = vld [vmem:[%s2454_s7 + $0x9c] sm:$0xf0] }
  0x42   : > { %1311 = vmatpush.bf16.msrb.mxu2 %v2277_v26  ;;  %v850_v26 = vrot.slane %v2729_v11, 4  ;;  %v2271_v4 = vld [vmem:[%s2454_s7 + $0x3c] sm:$0xf0]  ;;  %v1888_v5 = vor.u32 %v2217_v2, %v1887_v1  ;;  %v1015_v1 = vshrl.u32 %v2729_v11, 16  ;;  %v1018_v2 = vshll.u32 %v2729_v11, 16 }
  0x43   : > { %1436 = vmatpush.bf16.msrb.mxu3 %v2285_v20  ;;  %v573_v31 = vsel %vm2510_vm2, %v2731_v12, %v572_v13  ;;  %v2807_v13 = vld [vmem:[%s2454_s7 + $0xd0] sm:$0xff]  ;;  %v976_v20 = vshll.u32 %v2662_v15, 16 }
  0x44   : > { %v874_v38 = vunpack.c.l.b16 %v850_v26  ;;  %v610_v43 = vunpack.c.l.b16 %v573_v31 }
  0x45   : > { %450 = vmatpush.bf16.msrb.mxu1 %v2220_v17  ;;  %941 = vmatpush.bf16.msrb.mxu0 %v2256_v23  ;;  %v586_v17 = vrot.slane %v584_v6, 5  ;;  %v849_v23 = vrot.slane %v2726_v10, 4  ;;  %v978_v26 = vrot.slane %v976_v20, 5 }
  0x46   : > { %1312 = vmatpush.bf16.msrb.mxu2 %v2276_v8  ;;  %v1375_v8 = vpack.c.b16 %v2634_v52, %v2541_v58  ;;  %v987_v58 = vshrl.u32 %v2665_v16, 16  ;;  %v990_v52 = vshll.u32 %v2665_v16, 16  ;;  %v2107_v16 = vld [vmem:[%s2454_s7 + $0x60] sm:$0xf] }
  0x47   : > { %v587_v34 = vsel %vm2510_vm2, %v2733_v14, %v586_v17  ;;  %v873_v36 = vunpack.c.l.b16 %v849_v23  ;;  %1437 = vmatpush.bf16.msrb.mxu3 %v2284_v28  ;;  %v2810_v17 = vld [vmem:[%s2454_s7 + $0xf0] sm:$0xff] }
  0x48   : > { %v989_v28 = vrot.slane %v987_v58, 4  ;;  %v1962_v58 = vld [vmem:[%s2454_s7 + $0x58] sm:$0x11] }
  0x49   : > { %451 = vmatpush.bf16.msrb.mxu1 %v2219_v42  ;;  %942 = vmatpush.bf16.msrb.mxu0 %v2255_v25  ;;  %v1883_v42 = vld [vmem:[%s2454_s7 + $0x40] sm:$0xf]  ;;  %v2265_v25 = vld [vmem:[%s2964_s1 + $0x150] sm:$0xff]  ;;  %v880_v46 = vpack.c.b16 %v874_v38, %v873_v36 }
  0x4a   : > { %1313 = vmatpush.bf16.msrb.mxu2 %v2275_v19  ;;  %v1884_v45 = vor.u32 %v2216_v24, %v1883_v42  ;;  %v973_v19 = vshrl.u32 %v2662_v15, 16  ;;  %v1891_v36 = vld [vmem:[%s2454_s7 + $0xc0] sm:$0xf]  ;;  %v2086_v24 = vld [vmem:[%s2454_s7 + $0x28] sm:$0x11] }
  0x4b   : > { %1438 = vmatpush.bf16.msrb.mxu3 %v2283_v33  ;;  %v2218_v38 = vld [vmem:[%s2454_s7 + $0xdc] sm:$0xf0] }
  0x4c   : > { %452 = vmatmul.bf16.vlgmr.msrb.gmra.mxu1 %v1880_v61  ;;  %943 = vmatmul.bf16.vlgmr.msrb.gmra.mxu0 %v879_v62  ;;  %v852_v61 = vrot.slane %v2781_v54, 4  ;;  %v2292_v62 = vld [vmem:[%s2964_s1 + $0x208] sm:$0xff]  ;;  %v975_v23 = vrot.slane %v973_v19, 4  ;;  %v2272_v42 = vld [vmem:[%s2454_s7 + $0x7c] sm:$0xf0] }
  0x4d   : > { %1164 = vmatpush.bf16.msra.mxu1 %v2270_v44  ;;  %1660 = vmatpush.bf16.msra.mxu0 %v2298_v47  ;;  %v611_v44 = vunpack.c.l.b16 %v587_v34  ;;  %v1958_v34 = vld [vmem:[%s2454_s7 + $0x18] sm:$0x11]  ;;  %v2108_v39 = vor.u32 %v2272_v42, %v2107_v16 }
  0x4e   : > { %828 = vmatmul.bf16.gmra.mxu3 %v1984_v9  ;;  %2330 = vmatpush.bf16.msra.mxu2 %v2298_v47  ;;  %v876_v0 = vunpack.c.l.b16 %v852_v61  ;;  %v2291_v9 = vld [vmem:[%s2964_s1 + $0x200] sm:$0xff] }
  0x4f   : > { %686 = vmatmul.bf16.gmra.mxu2 %v614_v63  ;;  %v615_v47 = vpack.c.b16 %v611_v44, %v610_v43  ;;  %v875_v63 = vunpack.c.l.b16 %v851_v60  ;;  %v2088_v43 = vld [vmem:[%s2454_s7 + $0x48] sm:$0x11]  ;;  %v979_v44 = vor.u32 %v978_v26, %v975_v23  ;;  %v1376_v60 = vpack.c.b16 %v2539_v55, %v2636_v53  ;;  %v2111_v26 = vld [vmem:[%s2454_s7 + $0xa0] sm:$0xf] }
  0x51   : > { %1165 = vmatpush.bf16.msra.mxu1 %v2269_v57  ;;  %1661 = vmatpush.bf16.msra.mxu0 %v2297_v3  ;;  %v2263_v57 = vld [vmem:[%s2964_s1 + $0x140] sm:$0xff]  ;;  %v881_v6 = vpack.c.b16 %v876_v0, %v875_v63  ;;  %v980_v33 = vrot.slane %v979_v44, 4  ;;  %v1001_v63 = vshrl.u32 %v2726_v10, 16  ;;  %v1004_v0 = vshll.u32 %v2726_v10, 16 }
  0x52   : > { %2331 = vmatpush.bf16.msra.mxu2 %v2297_v3  ;;  %v2103_v3 = vld [vmem:[%s2454_s7 + $0x20] sm:$0xf] }
  0x53   : > { %v2093_v10 = vld [vmem:[%s2454_s7 + $0xa0] sm:$0xff] }
  0x55   : > { %1166 = vmatpush.bf16.msra.mxu1 %v2268_v7  ;;  %1662 = vmatpush.bf16.msra.mxu0 %v2296_v21  ;;  %v2104_v7 = vor.u32 %v2271_v4, %v2103_v3 }
  0x56   : > { %2332 = vmatpush.bf16.msra.mxu2 %v2296_v21  ;;  %v853_v21 = vrot.slane %v2807_v13, 4 }
  0x58   : > { %v877_v15 = vunpack.c.l.b16 %v853_v21  ;;  %v1347_v21 = vrot.slane %v2093_v10, 4 }
  0x59   : > { %1167 = vmatpush.bf16.msra.mxu1 %v2267_v22  ;;  %1663 = vmatpush.bf16.msra.mxu0 %v2295_v30  ;;  %v854_v22 = vrot.slane %v2810_v17, 4 }
  0x5a   : > { %2333 = vmatpush.bf16.msra.mxu2 %v2295_v30  ;;  %v992_v30 = vrot.slane %v990_v52, 5  ;;  %v1964_v52 = vld [vmem:[%s2454_s7 + $0x78] sm:$0x11] }
  0x5b   : > { %v878_v31 = vunpack.c.l.b16 %v854_v22  ;;  %v2090_v22 = vld [vmem:[%s2454_s7 + $0x68] sm:$0x11] }
  0x5c   : > { %457 = vmatmul.bf16.gmra.mxu1 %v1884_v45  ;;  %948 = vmatmul.bf16.gmra.mxu0 %v880_v46  ;;  %v982_v45 = vshll.u32 %v1958_v34, 16 }
  0x5d   : > { %1168 = vmatpush.bf16.msra.mxu1 %v2266_v35  ;;  %1664 = vmatpush.bf16.msra.mxu0 %v2294_v56  ;;  %v1960_v35 = vld [vmem:[%s2454_s7 + $0x38] sm:$0x11]  ;;  %v882_v48 = vpack.c.b16 %v878_v31, %v877_v15  ;;  %v1024_v31 = vshll.u32 %v1964_v52, 16  ;;  %v2100_v52 = vld [vmem:[%s2454_s7 + $0x108] sm:$0x11] }
  0x5e   : > { %833 = vmatmul.bf16.gmra.mxu3 %v1988_v41  ;;  %2334 = vmatpush.bf16.msra.mxu2 %v2294_v56  ;;  %v996_v46 = vshll.u32 %v1960_v35, 16  ;;  %v1478_v41 = vshll.u32 %v2086_v24, 16  ;;  %v1371_v35 = vunpack.c.l.b16 %v1347_v21 }
  0x5f   : > { %691 = vmatmul.bf16.gmra.mxu2 %v615_v47  ;;  %v1892_v47 = vor.u32 %v2218_v38, %v1891_v36  ;;  %v1506_v36 = vshll.u32 %v2090_v22, 16  ;;  %v1026_v44 = vrot.slane %v1024_v31, 5 }
  0x60   : > { %v1480_v61 = vrot.slane %v1478_v41, 5  ;;  %v1043_v41 = vshrl.u32 %v2781_v54, 16 }
  0x61   : > { %1169 = vmatpush.bf16.msra.mxu1 %v2265_v25  ;;  %1665 = vmatpush.bf16.msra.mxu0 %v2293_v59  ;;  %v993_v25 = vor.u32 %v992_v30, %v989_v28  ;;  %v2273_v28 = vld [vmem:[%s2454_s7 + $0xbc] sm:$0xf0]  ;;  %v1010_v30 = vshll.u32 %v1962_v58, 16  ;;  %v2098_v58 = vld [vmem:[%s2454_s7 + $0xe8] sm:$0x11] }
  0x62   : > { %2335 = vmatpush.bf16.msra.mxu2 %v2293_v59  ;;  %v998_v59 = vrot.slane %v996_v46, 5  ;;  %v1481_v55 = vsel %vm2510_vm2, %v2504_v37, %v1480_v61  ;;  %v2092_v37 = vld [vmem:[%s2454_s7 + $0x88] sm:$0x11]  ;;  %v2112_v16 = vor.u32 %v2273_v28, %v2111_v26 }
  0x63   : > { %v994_v56 = vrot.slane %v993_v25, 4  ;;  %v1596_v19 = vunpack.c.l.b16 %v1481_v55  ;;  %v1520_v38 = vshll.u32 %v2092_v37, 16  ;;  %v1012_v24 = vrot.slane %v1010_v30, 5  ;;  %v2274_v55 = vld [vmem:[%s2454_s7 + $0xfc] sm:$0xf0] }
  0x64   : > { %v1377_v25 = vpack.c.b16 %v2630_v50, %v1371_v35  ;;  %v1525_v50 = vshrl.u32 %v2093_v10, 16  ;;  %v1576_v35 = vshll.u32 %v2100_v52, 16 }
  0x65   : > { %1170 = vmatpush.bf16.msra.mxu1 %v2264_v32  ;;  %1666 = vmatpush.bf16.msra.mxu0 %v2292_v62  ;;  %v1492_v32 = vshll.u32 %v2088_v43, 16  ;;  %v999_v4 = vsel %vm2510_vm2, %v994_v56, %v998_v59  ;;  %v1522_v46 = vrot.slane %v1520_v38, 5 }
  0x66   : > { %2336 = vmatpush.bf16.msra.mxu2 %v2292_v62 }
  0x67   : > { %v1494_v62 = vrot.slane %v1492_v32, 5  ;;  %v1046_v32 = vshll.u32 %v2781_v54, 16  ;;  %v1523_v54 = vsel %vm2510_vm2, %v2670_v18, %v1522_v46  ;;  %v1966_v18 = vld [vmem:[%s2454_s7 + $0x98] sm:$0x11] }
  0x68   : > { %v1038_v37 = vshll.u32 %v1966_v18, 16 }
  0x69   : > { %1171 = vmatpush.bf16.msra.mxu1 %v2263_v57  ;;  %1667 = vmatpush.bf16.msra.mxu0 %v2291_v9  ;;  %v984_v57 = vrot.slane %v982_v45, 5  ;;  %v1495_v53 = vsel %vm2510_vm2, %v2591_v27, %v1494_v62  ;;  %v1508_v45 = vrot.slane %v1506_v36, 5 }
  0x6a   : > { %2337 = vmatpush.bf16.msra.mxu2 %v2291_v9  ;;  %v1020_v9 = vrot.slane %v1018_v2, 5  ;;  %v1597_v20 = vunpack.c.l.b16 %v1495_v53  ;;  %v1048_v2 = vrot.slane %v1046_v32, 5  ;;  %v1527_v53 = vrot.slane %v1525_v50, 4 }
  0x6b   : > { %v985_v3 = vsel %vm2510_vm2, %v980_v33, %v984_v57  ;;  %v1528_v57 = vshll.u32 %v2093_v10, 16  ;;  %v1040_v38 = vrot.slane %v1038_v37, 5  ;;  %v1074_v32 = vshll.u32 %v2810_v17, 16 }
  0x6c   : > { %462 = vmatmul.bf16.gmra.mxu1 %v1888_v5  ;;  %953 = vmatmul.bf16.gmra.mxu0 %v881_v6  ;;  %v1100_v11 = vunpack.c.l.b16 %v985_v3  ;;  %v1101_v5 = vunpack.c.l.b16 %v999_v4  ;;  %v1003_v6 = vrot.slane %v1001_v63, 4  ;;  %v1604_v34 = vpack.c.b16 %v1597_v20, %v1596_v19  ;;  %v2115_v4 = vld [vmem:[%s2454_s7 + $0xe0] sm:$0xf]  ;;  %v2096_v20 = vld [vmem:[%s2454_s7 + $0xc8] sm:$0x11] }
  0x6d   : > { %v1530_v10 = vrot.slane %v1528_v57, 5  ;;  %v2116_v19 = vor.u32 %v2274_v55, %v2115_v4  ;;  %v1548_v31 = vshll.u32 %v2096_v20, 16 }
  0x6e   : > { %1439 = vmatmul.bf16.vlgmr.msrb.gmra.mxu3 %v1375_v8  ;;  %v1017_v8 = vrot.slane %v1015_v1, 4  ;;  %v1108_v23 = vpack.c.b16 %v1101_v5, %v1100_v11  ;;  %v1045_v1 = vrot.slane %v1043_v41, 4  ;;  %v1968_v5 = vld [vmem:[%s2454_s7 + $0xb8] sm:$0x11]  ;;  %v1071_v41 = vshrl.u32 %v2810_v17, 16 }
  0x6f   : > { %1314 = vmatmul.bf16.vlgmr.msrb.gmra.mxu2 %v2104_v7  ;;  %v1006_v7 = vrot.slane %v1004_v0, 5  ;;  %v1052_v26 = vshll.u32 %v1968_v5, 16 }
  0x70   : > { %v1021_v15 = vor.u32 %v1020_v9, %v1017_v8  ;;  %v2094_v8 = vld [vmem:[%s2454_s7 + $0xa8] sm:$0x11] }
  0x71   : > { %v1007_v27 = vor.u32 %v1006_v7, %v1003_v6  ;;  %v1534_v30 = vshll.u32 %v2094_v8, 16 }
  0x72   : > { %v1022_v43 = vrot.slane %v1021_v15, 4 }
  0x73   : > { %v1008_v42 = vrot.slane %v1007_v27, 4  ;;  %v1531_v27 = vor.u32 %v1530_v10, %v1527_v53 }
  0x74   : > { %v1027_v56 = vsel %vm2510_vm2, %v1022_v43, %v1026_v44  ;;  %v1536_v44 = vrot.slane %v1534_v30, 5 }
  0x75   : > { %v1013_v33 = vsel %vm2510_vm2, %v1008_v42, %v1012_v24  ;;  %v1103_v0 = vunpack.c.l.b16 %v1027_v56  ;;  %v1054_v42 = vrot.slane %v1052_v26, 5  ;;  %v1532_v43 = vrot.slane %v1531_v27, 4 }
  0x76   : > { %v1102_v63 = vunpack.c.l.b16 %v1013_v33 }
  0x77   : > { %v1537_v56 = vsel %vm2510_vm2, %v1532_v43, %v1536_v44 }
  0x78   : > { %v1109_v9 = vpack.c.b16 %v1103_v0, %v1102_v63  ;;  %v1073_v0 = vrot.slane %v1071_v41, 4 }
  0x7c   : > { %467 = vmatmul.bf16.gmra.mxu1 %v1892_v47  ;;  %958 = vmatmul.bf16.gmra.mxu0 %v882_v48  ;;  %v1029_v47 = vshrl.u32 %v2778_v49, 16  ;;  %v1032_v48 = vshll.u32 %v2778_v49, 16  ;;  %v1509_v49 = vsel %vm2510_vm2, %v2593_v29, %v1508_v45  ;;  %v1599_v29 = vunpack.c.l.b16 %v1523_v54 }
  0x7d   : > { %v1598_v3 = vunpack.c.l.b16 %v1509_v49  ;;  %v1550_v45 = vrot.slane %v1548_v31, 5  ;;  %v1600_v54 = vunpack.c.l.b16 %v1537_v56 }
  0x7e   : > { %1444 = vmatmul.bf16.gmra.mxu3 %v1376_v60  ;;  %v1031_v61 = vrot.slane %v1029_v47, 4  ;;  %v1034_v62 = vrot.slane %v1032_v48, 5  ;;  %v1578_v47 = vrot.slane %v1576_v35, 5  ;;  %v1057_v48 = vshrl.u32 %v2807_v13, 16 }
  0x7f   : > { %1319 = vmatmul.bf16.gmra.mxu2 %v2108_v39  ;;  %v2099_v39 = vld [vmem:[%s2454_s7 + $0x100] sm:$0xff]  ;;  %v1605_v21 = vpack.c.b16 %v1599_v29, %v1598_v3  ;;  %v1972_v3 = vld [vmem:[%s2454_s7 + $0xf8] sm:$0x11] }
  0x80   : > { %v1567_v59 = vshrl.u32 %v2099_v39, 16  ;;  %v1570_v60 = vshll.u32 %v2099_v39, 16  ;;  %v1350_v11 = vrot.slane %v2099_v39, 4  ;;  %v1035_v22 = vor.u32 %v1034_v62, %v1031_v61 }
  0x81   : > { %v1060_v39 = vshll.u32 %v2807_v13, 16  ;;  %v1551_v13 = vsel %vm2510_vm2, %v2731_v12, %v1550_v45  ;;  %v1059_v62 = vrot.slane %v1057_v48, 4 }
  0x82   : > { %v1569_v6 = vrot.slane %v1567_v59, 4  ;;  %v1572_v7 = vrot.slane %v1570_v60, 5  ;;  %v1374_v28 = vunpack.c.l.b16 %v1350_v11  ;;  %v1036_v36 = vrot.slane %v1035_v22, 4 }
  0x83   : > { %v1601_v59 = vunpack.c.l.b16 %v1551_v13  ;;  %v1062_v63 = vrot.slane %v1060_v39, 5  ;;  %v1080_v11 = vshll.u32 %v1972_v3, 16 }
  0x84   : > { %v1573_v15 = vor.u32 %v1572_v7, %v1569_v6  ;;  %v1378_v24 = vpack.c.b16 %v1374_v28, %v2632_v51  ;;  %v1041_v33 = vsel %vm2510_vm2, %v1036_v36, %v1040_v38 }
  0x85   : > { %v1104_v57 = vunpack.c.l.b16 %v1041_v33  ;;  %v1606_v29 = vpack.c.b16 %v1601_v59, %v1600_v54  ;;  %v1063_v53 = vor.u32 %v1062_v63, %v1059_v62  ;;  %v1082_v8 = vrot.slane %v1080_v11, 5 }
  0x87   : > { %v1064_v5 = vrot.slane %v1063_v53, 4 }
  0x8c   : > { %1172 = vmatmul.bf16.vlgmr.msra.gmra.mxu1 %v1108_v23  ;;  %1668 = vmatmul.bf16.vlgmr.msra.gmra.mxu0 %v1604_v34  ;;  %v1049_v23 = vor.u32 %v1048_v2, %v1045_v1  ;;  %v1562_v34 = vshll.u32 %v2098_v58, 16  ;;  %v1076_v1 = vrot.slane %v1074_v32, 5  ;;  %v1970_v2 = vld [vmem:[%s2454_s7 + $0xd8] sm:$0x11]  ;;  %s1843_s7 = sshll.u32 %s2378_s12, 3 }
  0x8d   : > { %v1066_v10 = vshll.u32 %v1970_v2, 16  ;;  %p215_p5 = scmp.lt.s32.totalorder %s1843_s7, 15 }
  0x8e   : > { %1449 = vmatmul.bf16.gmra.mxu3 %v1377_v25  ;;  %v1574_v25 = vrot.slane %v1573_v15, 4  ;;  %v1564_v46 = vrot.slane %v1562_v34, 5  ;;  %v1077_v18 = vor.u32 %v1076_v1, %v1073_v0 }
  0x8f   : > { %1324 = vmatmul.bf16.gmra.mxu2 %v2112_v16  ;;  %v1050_v16 = vrot.slane %v1049_v23, 4  ;;  %v1068_v6 = vrot.slane %v1066_v10, 5  ;;  %s2974_s7 = smov (!%p215_p5, %s1843_s7), 15 }
  0x90   : > { %v1565_v17 = vsel %vm2510_vm2, %v2733_v14, %v1564_v46  ;;  %v1579_v50 = vsel %vm2510_vm2, %v1574_v25, %v1578_v47  ;;  %v1078_v7 = vrot.slane %v1077_v18, 4  ;;  %s1844_s12 = sshll.u32 %s2974_s7, 2 }
  0x91   : > { %v1055_v51 = vsel %vm2510_vm2, %v1050_v16, %v1054_v42  ;;  %v1602_v60 = vunpack.c.l.b16 %v1565_v17  ;;  %v1603_v61 = vunpack.c.l.b16 %v1579_v50  ;;  %v1069_v58 = vsel %vm2510_vm2, %v1064_v5, %v1068_v6  ;;  %s2933_s10 = scalar_lea.vmem %s2966_s3, %s1844_s12 }
  0x92   : > { %v1105_v49 = vunpack.c.l.b16 %v1055_v51  ;;  %v1083_v52 = vsel %vm2510_vm2, %v1078_v7, %v1082_v8  ;;  %v1106_v22 = vunpack.c.l.b16 %v1069_v58 }
  0x93   : > { %v1607_v4 = vpack.c.b16 %v1603_v61, %v1602_v60  ;;  %v1107_v37 = vunpack.c.l.b16 %v1083_v52 }
  0x94   : > { %v1110_v12 = vpack.c.b16 %v1105_v49, %v1104_v57 }
  0x95   : > { %v1111_v23 = vpack.c.b16 %v1107_v37, %v1106_v22 }
  0x9c   : > { %1177 = vmatmul.bf16.gmra.mxu1 %v1109_v9  ;;  %1673 = vmatmul.bf16.gmra.mxu0 %v1605_v21 }
  0x9e   : > { %1454 = vmatmul.bf16.gmra.mxu3 %v1378_v24 }
  0x9f   : > { %1329 = vmatmul.bf16.gmra.mxu2 %v2116_v19 }
  0xa9   : > { %v370_v55 = vpop.f32.mrf.mxu1  ;;  %v360_v14 = vpop.f32.mrf.mxu0 }
  0xac   : > { %1182 = vmatmul.bf16.gmra.mxu1 %v1110_v12  ;;  %1678 = vmatmul.bf16.gmra.mxu0 %v1606_v29 }
  0xaf   : > { %1683 = vmatmul.bf16.vlgmr.msra.gmra.mxu2 %v1607_v4 }
  0xb1   : > { %v372_v19 = vpop.f32.mrf.mxu1  ;;  %v362_v20 = vpop.f32.mrf.mxu0 }
  0xb2   : > { %v677_v9 = vpop.f32.mrf.mxu2  ;;  %v819_v21 = vpop.f32.mrf.mxu3 }
  0xb9   : > { %v375_v28 = vpop.f32.mrf.mxu1  ;;  %v365_v27 = vpop.f32.mrf.mxu0 }
  0xba   : > { %v679_v26 = vpop.f32.mrf.mxu2  ;;  %v2898_v30 = vpop.f32.mrf.mxu3 }
  0xbc   : > { %1187 = vmatmul.bf16.gmra.mxu1 %v1111_v23 }
  0xc1   : > { %v377_v31 = vpop.f32.mrf.mxu1  ;;  %v367_v34 = vpop.f32.mrf.mxu0 }
  0xc2   : > { %v682_v15 = vpop.f32.mrf.mxu2  ;;  %v824_v35 = vpop.f32.mrf.mxu3 }
  0xc9   : > { %v453_v38 = vpop.f32.mrf.mxu1  ;;  %v944_v16 = vpop.f32.mrf.mxu0 }
  0xca   : > { %v684_v36 = vpop.f32.mrf.mxu2  ;;  %v454_v42 = vadd.f32 %v453_v38, %v360_v14  ;;  %v2900_v24 = vpop.f32.mrf.mxu3 }
  0xcc   : > { %v697_v40 = vadd.f32 %v677_v9, %v454_v42 }
  0xce   : > { %v839_v43 = vadd.f32 %v819_v21, %v697_v40 }
  0xd0   : > { %v964_v44 = vadd.f32 %v944_v16, %v839_v43 }
  0xd1   : > { %v455_v45 = vpop.f32.mrf.mxu1  ;;  %v946_v46 = vpop.f32.mrf.mxu0 }
  0xd2   : > { %v687_v25 = vpop.f32.mrf.mxu2  ;;  %v456_v47 = vadd.f32 %v455_v45, %v362_v20  ;;  %v829_v39 = vpop.f32.mrf.mxu3 }
  0xd4   : > { %v698_v48 = vadd.f32 %v679_v26, %v456_v47 }
  0xd9   : > { %v458_v32 = vpop.f32.mrf.mxu1  ;;  %v949_v33 = vpop.f32.mrf.mxu0 }
  0xda   : > { %v689_v41 = vpop.f32.mrf.mxu2  ;;  %v459_v51 = vadd.f32 %v458_v32, %v365_v27  ;;  %v2902_v57 = vpop.f32.mrf.mxu3 }
  0xdc   : > { %v699_v56 = vadd.f32 %v682_v15, %v459_v51 }
  0xde   : > { %v841_v13 = vadd.f32 %v824_v35, %v699_v56 }
  0xe0   : > { %v966_v17 = vadd.f32 %v949_v33, %v841_v13 }
  0xe1   : > { %v460_v49 = vpop.f32.mrf.mxu1  ;;  %v2904_v54 = vpop.f32.mrf.mxu0 }
  0xe2   : > { %v692_v50 = vpop.f32.mrf.mxu2  ;;  %v461_v59 = vadd.f32 %v460_v49, %v367_v34  ;;  %v834_v1 = vpop.f32.mrf.mxu3 }
  0xe4   : > { %v700_v60 = vadd.f32 %v684_v36, %v461_v59 }
  0xe6   : > { %v842_v32 = vadd.f32 %v2900_v24, %v700_v60 }
  0xe8   : > { %v967_v59 = vadd.f32 %v2904_v54, %v842_v32 }
  0xe9   : > { %v463_v62 = vpop.f32.mrf.mxu1  ;;  %v954_v63 = vpop.f32.mrf.mxu0 }
  0xea   : > { %v694_v61 = vpop.f32.mrf.mxu2  ;;  %v464_v0 = vadd.f32 %v463_v62, %v370_v55  ;;  %v2912_v18 = vpop.f32.mrf.mxu3 }
  0xec   : > { %v701_v2 = vadd.f32 %v687_v25, %v464_v0 }
  0xee   : > { %v843_v3 = vadd.f32 %v829_v39, %v701_v2 }
  0xf0   : > { %v2906_v12 = vadd.f32 %v954_v63, %v843_v3 }
  0xf1   : > { %v465_v4 = vpop.f32.mrf.mxu1  ;;  %v2908_v14 = vpop.f32.mrf.mxu0 }
  0xf2   : > { %v1315_v29 = vpop.f32.mrf.mxu2  ;;  %v466_v53 = vadd.f32 %v465_v4, %v372_v19  ;;  %v1440_v9 = vpop.f32.mrf.mxu3 }
  0xf4   : > { %v2910_v10 = vadd.f32 %v689_v41, %v466_v53 }
  0xf9   : > { %v468_v5 = vpop.f32.mrf.mxu1  ;;  %v959_v6 = vpop.f32.mrf.mxu0 }
  0xfa   : > { %v1317_v11 = vpop.f32.mrf.mxu2  ;;  %v469_v7 = vadd.f32 %v468_v5, %v375_v28  ;;  %v1442_v37 = vpop.f32.mrf.mxu3  ;;  %v840_v28 = vadd.f32 %v2898_v30, %v698_v48  ;;  %v844_v5 = vadd.f32 %v2902_v57, %v2910_v10 }
  0xfc   : > { %v703_v8 = vadd.f32 %v692_v50, %v469_v7  ;;  %v965_v35 = vadd.f32 %v946_v46, %v840_v28 }
  0xfe   : > { %v845_v55 = vadd.f32 %v834_v1, %v703_v8 }
 0x100   : > { %v2914_v20 = vadd.f32 %v959_v6, %v845_v55 }
 0x101   : > { %v470_v52 = vpop.f32.mrf.mxu1  ;;  %v2916_v21 = vpop.f32.mrf.mxu0 }
 0x102   : > { %v1320_v58 = vpop.f32.mrf.mxu2  ;;  %v471_v22 = vadd.f32 %v470_v52, %v377_v31  ;;  %v1445_v40 = vpop.f32.mrf.mxu3  ;;  %v2925_v31 = vld [vmem:[%s2965_s2] ss:$0 sm:$0xff] }
 0x104   : > { %v2918_v19 = vadd.f32 %v694_v61, %v471_v22 }
 0x109   : > { %v1173_v23 = vpop.f32.mrf.mxu1  ;;  %v1669_v26 = vpop.f32.mrf.mxu0 }
 0x10a   : > { %v1193_v27 = vadd.f32 %v1173_v23, %v964_v44  ;;  %v1322_v15 = vpop.f32.mrf.mxu2  ;;  %v1447_v13 = vpop.f32.mrf.mxu3 }
 0x10c   : > { %v1335_v34 = vadd.f32 %v1315_v29, %v1193_v27 }
 0x10e   : > { %v1460_v36 = vadd.f32 %v1440_v9, %v1335_v34  ;;  %v969_v9 = vadd.f32 %v2908_v14, %v844_v5 }
 0x110   : > { %v1689_v43 = vadd.f32 %v1669_v26, %v1460_v36  ;;  %v846_v36 = vadd.f32 %v2912_v18, %v2918_v19 }
 0x111   : > { %v1175_v38 = vpop.f32.mrf.mxu1  ;;  %v1671_v16 = vpop.f32.mrf.mxu0 }
 0x112   : > { %v1194_v42 = vadd.f32 %v1175_v38, %v965_v35  ;;  %v1325_v44 = vpop.f32.mrf.mxu2  ;;  %v1701_v30 = vadd.f32 %v2925_v31, %v1689_v43  ;;  %v1450_v1 = vpop.f32.mrf.mxu3 }
 0x114   : > { %v1336_v25 = vadd.f32 %v1317_v11, %v1194_v42  ;;  %v1709_v33 = vmax.f32 %v1701_v30, 0.0 }
 0x116   : > { %v1461_v45 = vadd.f32 %v1442_v37, %v1336_v25  ;;  %v971_v25 = vadd.f32 %v2916_v21, %v846_v36 }
 0x118   : > { %v1690_v47 = vadd.f32 %v1671_v16, %v1461_v45 }
 0x119   : > { %v1178_v46 = vpop.f32.mrf.mxu1  ;;  %v1674_v48 = vpop.f32.mrf.mxu0 }
 0x11a   : > { %v1702_v39 = vadd.f32 %v2925_v31, %v1690_v47  ;;  %v1195_v41 = vadd.f32 %v1178_v46, %v966_v17  ;;  %v1327_v49 = vpop.f32.mrf.mxu2  ;;  %v1452_v52 = vpop.f32.mrf.mxu3 }
 0x11c   : > { %v1710_v51 = vmax.f32 %v1702_v39, 0.0  ;;  %v1337_v56 = vadd.f32 %v1320_v58, %v1195_v41 }
 0x11e   : > { %v2302_v50 = vpack.c.bf16 %v1710_v51, %v1709_v33  ;;  %v1462_v61 = vadd.f32 %v1445_v40, %v1337_v56 }
 0x120   : > { %2303 = vst [vmem:[%s2933_s10] sm:$0xff] %v2302_v50   ;;  %v1691_v24 = vadd.f32 %v1674_v48, %v1462_v61 }
 0x121   : > { %v1180_v62 = vpop.f32.mrf.mxu1  ;;  %v1676_v17 = vpop.f32.mrf.mxu0 }
 0x122   : > { %v1196_v63 = vadd.f32 %v1180_v62, %v967_v59  ;;  %v1703_v2 = vadd.f32 %v2925_v31, %v1691_v24  ;;  %v1330_v29 = vpop.f32.mrf.mxu2  ;;  %v1455_v14 = vpop.f32.mrf.mxu3 }
 0x124   : > { %v1338_v60 = vadd.f32 %v1322_v15, %v1196_v63  ;;  %v1711_v6 = vmax.f32 %v1703_v2, 0.0 }
 0x126   : > { %v1463_v0 = vadd.f32 %v1447_v13, %v1338_v60 }
 0x128   : > { %v1692_v3 = vadd.f32 %v1676_v17, %v1463_v0 }
 0x129   : > { %v1183_v4 = vpop.f32.mrf.mxu1  ;;  %v1679_v54 = vpop.f32.mrf.mxu0 }
 0x12a   : > { %v1704_v53 = vadd.f32 %v2925_v31, %v1692_v3  ;;  %v1197_v11 = vadd.f32 %v1183_v4, %v2906_v12  ;;  %v1332_v23 = vpop.f32.mrf.mxu2  ;;  %v1457_v48 = vpop.f32.mrf.mxu3 }
 0x12c   : > { %v1712_v7 = vmax.f32 %v1704_v53, 0.0  ;;  %v1339_v8 = vadd.f32 %v1325_v44, %v1197_v11 }
 0x12e   : > { %v2307_v55 = vpack.c.bf16 %v1712_v7, %v1711_v6  ;;  %v1464_v58 = vadd.f32 %v1450_v1, %v1339_v8 }
 0x130   : > { %2319 = vst [vmem:[%s2933_s10 + $0x8] sm:$0xff] %v2307_v55   ;;  %v1693_v26 = vadd.f32 %v1679_v54, %v1464_v58 }
 0x131   : > { %v1185_v22 = vpop.f32.mrf.mxu1  ;;  %v1681_v12 = vpop.f32.mrf.mxu0 }
 0x132   : > { %v1198_v37 = vadd.f32 %v1185_v22, %v969_v9  ;;  %v1705_v28 = vadd.f32 %v2925_v31, %v1693_v26  ;;  %v1684_v40 = vpop.f32.mrf.mxu2 }
 0x134   : > { %v1340_v27 = vadd.f32 %v1327_v49, %v1198_v37  ;;  %v1713_v38 = vmax.f32 %v1705_v28, 0.0 }
 0x136   : > { %v1465_v15 = vadd.f32 %v1452_v52, %v1340_v27 }
 0x138   : > { %v1694_v57 = vadd.f32 %v1681_v12, %v1465_v15 }
 0x139   : > { %v1188_v10 = vpop.f32.mrf.mxu1 }
 0x13a   : > { %v1706_v34 = vadd.f32 %v2925_v31, %v1694_v57  ;;  %v1199_v35 = vadd.f32 %v1188_v10, %v2914_v20  ;;  %v1686_v39 = vpop.f32.mrf.mxu2 }
 0x13c   : > { %v1714_v16 = vmax.f32 %v1706_v34, 0.0  ;;  %v1341_v42 = vadd.f32 %v1330_v29, %v1199_v35 }
 0x13e   : > { %v2312_v43 = vpack.c.bf16 %v1714_v16, %v1713_v38  ;;  %v1466_v44 = vadd.f32 %v1455_v14, %v1341_v42 }
 0x140   : > { %2320 = vst [vmem:[%s2933_s10 + $0x10] sm:$0xff] %v2312_v43   ;;  %v1695_v47 = vadd.f32 %v1684_v40, %v1466_v44 }
 0x141   : > { %v1190_v45 = vpop.f32.mrf.mxu1 }
 0x142   : > { %v1200_v30 = vadd.f32 %v1190_v45, %v971_v25  ;;  %v1707_v41 = vadd.f32 %v2925_v31, %v1695_v47 }
 0x144   : > { %v1342_v46 = vadd.f32 %v1332_v23, %v1200_v30  ;;  %v1715_v32 = vmax.f32 %v1707_v41, 0.0 }
 0x146   : > { %v1467_v20 = vadd.f32 %v1457_v48, %v1342_v46 }
 0x148   : > { %v1696_v18 = vadd.f32 %v1686_v39, %v1467_v20 }
 0x14a   : > { %v1708_v19 = vadd.f32 %v2925_v31, %v1696_v18 }
 0x14c   : > { %v1716_v33 = vmax.f32 %v1708_v19, 0.0 }
 0x14e   : > { %v2317_v51 = vpack.c.bf16 %v1716_v33, %v1715_v32 }
 0x150   : > { %2321 = vst [vmem:[%s2933_s10 + $0x18] sm:$0xff] %v2317_v51  }
 0x151 PF: > { %s13_s14 = sadd.s32 1, %s2386_s14   ;;  %s2969_s12 = smov %s2382_s13 }
 0x152   : > { %p10_p6 = scmp.ge.s32.totalorder %s13_s14, 4   ;;  %s2970_s13 = smov %s2972_s15 }
 0x154   :  { %12 = sbr.rel (!%p10_p6) target bundleno = 2 (0x2), region = 70 }

// kernel: backbone_base_forward.14
= control target key start
LH: loop header
LB: loop body
LE: loop exit
PB: predicated region body
PF: predicated region fallthrough
CT: control target
= control target key end

     0   :  { %s2752_s15 = smov 0   ;;  %s2754_s16 = smov 0   ;;  %s3403_s0 = inlined_call_operand.vmem [shape: bf16[2,10,10,128], index: 0, kind: input, shape index: {}]   ;;  %s3404_s1 = inlined_call_operand.vmem [shape: bf16[1152,128], index: 1, kind: input, shape index: {}]   ;;  %s3405_s2 = inlined_call_operand.vmem [shape: f32[1,128], index: 2, kind: input, shape index: {}]   ;;  %s3406_s3 = inlined_call_operand.vmem [shape: bf16[128,128], index: 3, kind: input, shape index: {}]   ;;  %s3407_s4 = inlined_call_operand.vmem [shape: bf16[128,128], index: 4, kind: output, shape index: {}]  }
   0x1   :  { %s2756_s17 = smov 0  }
   0x2 LB: > { %s26_s18 = sadd.s32 1, %s2721_s16  ;;  %p2103_p0 = scmp.ge.s32.totalorder %s2725_s17, 1  ;;  %s2725_s17 = sphi %s2756_s17, %s14_s17   ;;  %s2721_s16 = sphi %s2754_s16, %s3413_s16   ;;  %s2717_s15 = sphi %s2752_s15, %s3412_s15  }
   0x3   : > { %p28_p1 = scmp.ge.s32.totalorder %s26_s18, 2  ;;  %p209_p2 = scmp.lt.s32.totalorder %s2725_s17, 3 }
   0x5   : > { %s3415_s18 = smov (%p28_p1, %s26_s18), 0  ;;  %p210_p3 = pnand %p2103_p0, %p209_p2 }
   0x6   : > { %p253_p4 = scmp.lt.s32.totalorder (!%p210_p3), %s2717_s15, 1 }
   0x7   : > { %213 = sbr.rel (%p210_p3) target bundleno = 339 (0x153), region = 36 }
   0xc   : > { %v2554_v0 = vld [vmem:[%s3404_s1 + $0x78] sm:$0xff]  ;;  %v2553_v2 = vld [vmem:[%s3404_s1 + $0x70] sm:$0xff]  ;;  %s254_s25 = scalar_select %p253_p4, %s2717_s15, 1  ;;  %v2552_v6 = vld [vmem:[%s3404_s1 + $0x68] sm:$0xff]  ;;  %vm315_vm0 = vsmask.f32 3328 }
   0xd   : > { %v2562_v1 = vld [vmem:[%s3404_s1 + $0xb8] sm:$0xff]  ;;  %2661 = vmatpush.bf16.msra.mxu1 %v2554_v0  ;;  %510 = vmatpush.bf16.msra.mxu0 %v2554_v0  ;;  %v2561_v3 = vld [vmem:[%s3404_s1 + $0xb0] sm:$0xff]  ;;  %v2560_v7 = vld [vmem:[%s3404_s1 + $0xa8] sm:$0xff]  ;;  %vm316_vm1 = vsmask.f32 7440  ;;  %vm664_vm2 = vcmask 1042432  }
   0xe   : > { %779 = vmatpush.bf16.msra.mxu2 %v2562_v1  ;;  %v2574_v4 = vld [vmem:[%s3404_s1 + $0xf8] sm:$0xff]  ;;  %s2677_s30 = smul.u32 80, %s254_s25  ;;  %v2573_v5 = vld [vmem:[%s3404_s1 + $0xf0] sm:$0xff]  ;;  %v2551_v11 = vld [vmem:[%s3404_s1 + $0x60] sm:$0xff]  ;;  %vm665_vm3 = vcmask 1046532  }
   0xf   : > { %913 = vmatpush.bf16.msra.mxu3 %v2574_v4  ;;  %v2559_v16 = vld [vmem:[%s3404_s1 + $0xa0] sm:$0xff]  ;;  %v2572_v17 = vld [vmem:[%s3404_s1 + $0xe8] sm:$0xff]  ;;  %v2550_v29 = vld [vmem:[%s3404_s1 + $0x58] sm:$0xff] }
  0x10   : > { %s2801_s13 = scalar_lea.vmem %s3403_s0, %s2677_s30  ;;  %v2571_v34 = vld [vmem:[%s3404_s1 + $0xe0] sm:$0xff]  ;;  %v2558_v44 = vld [vmem:[%s3404_s1 + $0x98] sm:$0xff]  ;;  %vm2839_vm4 = vmor %vm315_vm0, %vm316_vm1 }
  0x11   : > { %2662 = vmatpush.bf16.msra.mxu1 %v2553_v2  ;;  %511 = vmatpush.bf16.msra.mxu0 %v2553_v2  ;;  %v287_v8 = vld [vmem:[%s2801_s13 + $0x20] sm:$0xf]  ;;  %v288_v9 = vld [vmem:[%s2801_s13 + $0x28] sm:$0xf]  ;;  %v2806_v10 = vld [vmem:[%s2801_s13 + $0x24] sm:$0x1] }
  0x12   : > { %780 = vmatpush.bf16.msra.mxu2 %v2561_v3  ;;  %v2812_v12 = vld [vmem:[%s2801_s13 + $0x2c] sm:$0x1]  ;;  %v375_v13 = vshrl.u32 %v287_v8, 16  ;;  %v378_v14 = vshll.u32 %v287_v8, 16  ;;  %v389_v15 = vshrl.u32 %v288_v9, 16  ;;  %v392_v18 = vshll.u32 %v288_v9, 16  ;;  %vm2848_vm5 = vmor %vm664_vm2, %vm665_vm3 }
  0x13   : > { %914 = vmatpush.bf16.msra.mxu3 %v2573_v5  ;;  %v283_v19 = vld [vmem:[%s2801_s13] sm:$0xf]  ;;  %v384_v22 = vshll.u32 %v2806_v10, 16  ;;  %v284_v24 = vld [vmem:[%s2801_s13 + $0x8] sm:$0xf]  ;;  %v398_v26 = vshll.u32 %v2812_v12, 16 }
  0x14   : > { %v377_v20 = vrot.slane %v375_v13, 4  ;;  %v380_v21 = vrot.slane %v378_v14, 5  ;;  %v391_v23 = vrot.slane %v389_v15, 4  ;;  %v394_v25 = vrot.slane %v392_v18, 5  ;;  %v307_v27 = vld [vmem:[%s2801_s13 + $0x4] sm:$0x1] }
  0x15   : > { %2663 = vmatpush.bf16.msra.mxu1 %v2552_v6  ;;  %512 = vmatpush.bf16.msra.mxu0 %v2552_v6  ;;  %v308_v28 = vld [vmem:[%s2801_s13 + $0xc] sm:$0x1]  ;;  %v319_v31 = vshrl.u32 %v283_v19, 16  ;;  %v322_v32 = vshll.u32 %v283_v19, 16  ;;  %v328_v35 = vshll.u32 %v307_v27, 16  ;;  %v333_v36 = vshrl.u32 %v284_v24, 16 }
  0x16   : > { %781 = vmatpush.bf16.msra.mxu2 %v2560_v7  ;;  %v381_v30 = vor.u32 %v380_v21, %v377_v20  ;;  %v395_v33 = vor.u32 %v394_v25, %v391_v23  ;;  %v336_v37 = vshll.u32 %v284_v24, 16  ;;  %v640_v38 = vld [vmem:[%s2801_s13] sm:$0xe]  ;;  %v386_v39 = vrot.slane %v384_v22, 5  ;;  %v641_v43 = vld [vmem:[%s2801_s13 + $0x8] sm:$0xe] }
  0x17   : > { %915 = vmatpush.bf16.msra.mxu3 %v2572_v17  ;;  %v321_v40 = vrot.slane %v319_v31, 4  ;;  %v324_v41 = vrot.slane %v322_v32, 5  ;;  %v342_v42 = vshll.u32 %v308_v28, 16  ;;  %v400_v46 = vrot.slane %v398_v26, 5  ;;  %v2570_v56 = vld [vmem:[%s3404_s1 + $0xd8] sm:$0xff]  ;;  %v2549_v60 = vld [vmem:[%s3404_s1 + $0x50] sm:$0xff] }
  0x18   : > { %v382_v45 = vrot.slane %v381_v30, 4  ;;  %v335_v47 = vrot.slane %v333_v36, 4  ;;  %v338_v48 = vrot.slane %v336_v37, 5  ;;  %v396_v50 = vrot.slane %v395_v33, 4  ;;  %v289_v59 = vld [vmem:[%s2801_s13 + $0x30] sm:$0xf] }
  0x19   : > { %2664 = vmatpush.bf16.msra.mxu1 %v2551_v11  ;;  %513 = vmatpush.bf16.msra.mxu0 %v2551_v11  ;;  %v325_v51 = vor.u32 %v324_v41, %v321_v40  ;;  %v2189_v52 = vrot.slane %v640_v38, 9  ;;  %v669_v53 = vrot.slane %v307_v27, 5  ;;  %v330_v54 = vrot.slane %v328_v35, 5  ;;  %v2557_v0 = vld [vmem:[%s3404_s1 + $0x90] sm:$0xff]  ;;  %v290_v3 = vld [vmem:[%s2801_s13 + $0x38] sm:$0xf] }
  0x1a   : > { %782 = vmatpush.bf16.msra.mxu2 %v2559_v16  ;;  %v339_v55 = vor.u32 %v338_v48, %v335_v47  ;;  %v2190_v58 = vrot.slane %v641_v43, 9  ;;  %v344_v62 = vrot.slane %v342_v42, 5  ;;  %v673_v63 = vrot.slane %v308_v28, 5  ;;  %v285_v7 = vld [vmem:[%s2801_s13 + $0x10] sm:$0xf]  ;;  %v2548_v14 = vld [vmem:[%s3404_s1 + $0x48] sm:$0xff] }
  0x1b   : > { %916 = vmatpush.bf16.msra.mxu3 %v2571_v34  ;;  %v326_v61 = vrot.slane %v325_v51, 4  ;;  %v387_v1 = vsel %vm2839_vm4, %v382_v45, %v386_v39  ;;  %v401_v4 = vsel %vm2839_vm4, %v396_v50, %v400_v46  ;;  %v670_v5 = vsel %vm2848_vm5, %v2189_v52, %v669_v53  ;;  %v2569_v11 = vld [vmem:[%s3404_s1 + $0xd0] sm:$0xff]  ;;  %v2556_v19 = vld [vmem:[%s3404_s1 + $0x88] sm:$0xff]  ;;  %v286_v22 = vld [vmem:[%s2801_s13 + $0x18] sm:$0xf] }
  0x1c   : > { %v340_v2 = vrot.slane %v339_v55, 4  ;;  %v403_v6 = vshrl.u32 %v289_v59, 16  ;;  %v674_v9 = vsel %vm2848_vm5, %v2190_v58, %v673_v63  ;;  %v406_v13 = vshll.u32 %v289_v59, 16  ;;  %v2547_v24 = vld [vmem:[%s3404_s1 + $0x40] sm:$0xff]  ;;  %v2568_v31 = vld [vmem:[%s3404_s1 + $0xc8] sm:$0xff]  ;;  %v2582_v45 = vld [vmem:[%s3404_s1 + $0x138] sm:$0xff] }
  0x1d   : > { %2665 = vmatpush.bf16.msra.mxu1 %v2550_v29  ;;  %514 = vmatpush.bf16.msra.mxu0 %v2550_v29  ;;  %v331_v8 = vsel %vm2839_vm4, %v326_v61, %v330_v54  ;;  %v2877_v15 = vunpack.c.l.b16 %v387_v1  ;;  %v417_v17 = vshrl.u32 %v290_v3, 16  ;;  %v451_v18 = vunpack.c.l.b16 %v401_v4  ;;  %v2546_v29 = vld [vmem:[%s3404_s1 + $0x38] sm:$0xff]  ;;  %v2895_v32 = vld [vmem:[%s2801_s13 + $0x34] sm:$0x1]  ;;  %v2555_v42 = vld [vmem:[%s3404_s1 + $0x80] sm:$0xff] }
  0x1e   : > { %783 = vmatpush.bf16.msra.mxu2 %v2558_v44  ;;  %v345_v16 = vsel %vm2839_vm4, %v340_v2, %v344_v62  ;;  %v715_v20 = vunpack.c.l.b16 %v670_v5  ;;  %v420_v21 = vshll.u32 %v290_v3, 16  ;;  %v347_v23 = vshrl.u32 %v285_v7, 16  ;;  %v2898_v36 = vld [vmem:[%s2801_s13 + $0x3c] sm:$0x1]  ;;  %v2905_v43 = vld [vmem:[%s2801_s13 + $0x14] sm:$0x1] }
  0x1f   : > { %917 = vmatpush.bf16.msra.mxu3 %v2570_v56  ;;  %v446_v25 = vunpack.c.l.b16 %v331_v8  ;;  %v716_v26 = vunpack.c.l.b16 %v674_v9  ;;  %v405_v27 = vrot.slane %v403_v6, 4  ;;  %v350_v28 = vshll.u32 %v285_v7, 16  ;;  %v2908_v44 = vld [vmem:[%s2801_s13 + $0x1c] sm:$0x1]  ;;  %v2545_v52 = vld [vmem:[%s3404_s1 + $0x30] sm:$0xff]  ;;  %v2567_v58 = vld [vmem:[%s3404_s1 + $0xc0] sm:$0xff] }
  0x20   : > { %v447_v30 = vunpack.c.l.b16 %v345_v16  ;;  %v408_v33 = vrot.slane %v406_v13, 5  ;;  %v419_v34 = vrot.slane %v417_v17, 4  ;;  %v422_v35 = vrot.slane %v420_v21, 5  ;;  %v2602_v48 = vld [vmem:[%s3404_s1 + $0x1b8] sm:$0xff]  ;;  %v2239_v63 = vld [vmem:[%s2801_s13 + $0x8] sm:$0xf] }
  0x21   : > { %2666 = vmatpush.bf16.msra.mxu1 %v2549_v60  ;;  %515 = vmatpush.bf16.msra.mxu0 %v2549_v60  ;;  %v349_v37 = vrot.slane %v347_v23, 4  ;;  %v352_v38 = vrot.slane %v350_v28, 5  ;;  %v361_v39 = vshrl.u32 %v286_v22, 16  ;;  %v364_v40 = vshll.u32 %v286_v22, 16  ;;  %v2581_v1 = vld [vmem:[%s3404_s1 + $0x130] sm:$0xff]  ;;  %v2610_v2 = vld [vmem:[%s3404_s1 + $0x1f8] sm:$0xff] }
  0x22   : > { %784 = vmatpush.bf16.msra.mxu2 %v2557_v0  ;;  %v456_v41 = vpack.c.b16 %v451_v18, %v2877_v15  ;;  %v723_v46 = vpack.c.b16 %v716_v26, %v715_v20  ;;  %v412_v47 = vshll.u32 %v2895_v32, 16  ;;  %v454_v53 = vpack.c.b16 %v447_v30, %v446_v25  ;;  %v2563_v0 = vld [vmem:[%s2801_s13 + $0xc] sm:$0xf0]  ;;  %v643_v5 = vld [vmem:[%s2801_s13 + $0x18] sm:$0xe]  ;;  %v2580_v25 = vld [vmem:[%s3404_s1 + $0x128] sm:$0xff] }
  0x23   : > { %918 = vmatpush.bf16.msra.mxu3 %v2569_v11  ;;  %v363_v50 = vrot.slane %v361_v39, 4  ;;  %v366_v51 = vrot.slane %v364_v40, 5  ;;  %v409_v54 = vor.u32 %v408_v33, %v405_v27  ;;  %v423_v55 = vor.u32 %v422_v35, %v419_v34  ;;  %v642_v4 = vld [vmem:[%s2801_s13 + $0x10] sm:$0xe]  ;;  %v2285_v13 = vld [vmem:[%s2801_s13 + $0x8] sm:$0xf] }
  0x24   : > { %v426_v56 = vshll.u32 %v2898_v36, 16  ;;  %v353_v59 = vor.u32 %v352_v38, %v349_v37  ;;  %v356_v60 = vshll.u32 %v2905_v43, 16  ;;  %v370_v62 = vshll.u32 %v2908_v44, 16  ;;  %v2601_v6 = vld [vmem:[%s3404_s1 + $0x1b0] sm:$0xff]  ;;  %v2600_v26 = vld [vmem:[%s3404_s1 + $0x1a8] sm:$0xff]  ;;  %v2543_v37 = vld [vmem:[%s3404_s1 + $0x20] sm:$0xff] }
  0x25   : > { %2667 = vmatpush.bf16.msra.mxu1 %v2548_v14  ;;  %516 = vmatpush.bf16.msra.mxu0 %v2548_v14  ;;  %v367_v61 = vor.u32 %v366_v51, %v363_v50  ;;  %v414_v3 = vrot.slane %v412_v47, 5  ;;  %v410_v7 = vrot.slane %v409_v54, 4  ;;  %v424_v8 = vrot.slane %v423_v55, 4  ;;  %v2287_v18 = vld [vmem:[%s2801_s13 + $0x10] sm:$0xf]  ;;  %v2608_v40 = vld [vmem:[%s3404_s1 + $0x1e8] sm:$0xff] }
  0x26   : > { %785 = vmatpush.bf16.msra.mxu2 %v2556_v19  ;;  %v428_v9 = vrot.slane %v426_v56, 5  ;;  %v2240_v11 = vor.u32 %v2563_v0, %v2239_v63  ;;  %v354_v14 = vrot.slane %v353_v59, 4  ;;  %v358_v15 = vrot.slane %v356_v60, 5  ;;  %v2544_v19 = vld [vmem:[%s3404_s1 + $0x28] sm:$0xff]  ;;  %v2542_v55 = vld [vmem:[%s3404_s1 + $0x18] sm:$0xff] }
  0x27   : > { %919 = vmatpush.bf16.msra.mxu3 %v2568_v31  ;;  %v368_v16 = vrot.slane %v367_v61, 4  ;;  %v372_v17 = vrot.slane %v370_v62, 5  ;;  %v2191_v20 = vrot.slane %v642_v4, 9  ;;  %v677_v21 = vrot.slane %v2905_v43, 5  ;;  %v2579_v43 = vld [vmem:[%s3404_s1 + $0x120] sm:$0xff] }
  0x28   : > { %v2192_v22 = vrot.slane %v643_v5, 9  ;;  %v681_v23 = vrot.slane %v2908_v44, 5  ;;  %v415_v27 = vsel %vm2839_vm4, %v410_v7, %v414_v3  ;;  %v429_v28 = vsel %vm2839_vm4, %v424_v8, %v428_v9  ;;  %v2599_v44 = vld [vmem:[%s3404_s1 + $0x1a0] sm:$0xff]  ;;  %v2980_v47 = vld [vmem:[%s2801_s13 + $0xc] sm:$0x1]  ;;  %v2577_v7 = vld [vmem:[%s3404_s1 + $0x110] sm:$0xff] }
  0x29   : > { %2668 = vmatpush.bf16.msra.mxu1 %v2547_v24  ;;  %517 = vmatpush.bf16.msra.mxu0 %v2547_v24  ;;  %v2609_v24 = vld [vmem:[%s3404_s1 + $0x1f0] sm:$0xff]  ;;  %v970_v30 = vshll.u32 %v2285_v13, 16  ;;  %v359_v31 = vsel %vm2839_vm4, %v354_v14, %v358_v15  ;;  %v373_v33 = vsel %vm2839_vm4, %v368_v16, %v372_v17  ;;  %v981_v34 = vshrl.u32 %v2287_v18, 16  ;;  %v2243_v62 = vld [vmem:[%s2801_s13 + $0x18] sm:$0xf] }
  0x2a   : > { %786 = vmatpush.bf16.msra.mxu2 %v2555_v42  ;;  %v984_v35 = vshll.u32 %v2287_v18, 16  ;;  %v678_v38 = vsel %vm2848_vm5, %v2191_v20, %v677_v21  ;;  %v682_v39 = vsel %vm2848_vm5, %v2192_v22, %v681_v23  ;;  %v453_v42 = vunpack.c.l.b16 %v429_v28  ;;  %v2986_v56 = vld [vmem:[%s2801_s13 + $0x14] sm:$0x1]  ;;  %v2564_v63 = vld [vmem:[%s2801_s13 + $0x1c] sm:$0xf0]  ;;  %v2598_v17 = vld [vmem:[%s3404_s1 + $0x198] sm:$0xff] }
  0x2b   : > { %920 = vmatpush.bf16.msra.mxu3 %v2567_v58  ;;  %v972_v50 = vrot.slane %v970_v30, 5  ;;  %v717_v51 = vunpack.c.l.b16 %v678_v38  ;;  %v2578_v58 = vld [vmem:[%s3404_s1 + $0x118] sm:$0xff]  ;;  %v976_v59 = vshll.u32 %v2980_v47, 16  ;;  %v990_v4 = vshll.u32 %v2986_v56, 16  ;;  %v645_v5 = vld [vmem:[%s2801_s13 + $0x28] sm:$0xe] }
  0x2c   : > { %528 = vmatmul.bf16.vlgmr.msra.gmra.mxu1 %v456_v41  ;;  %518 = vmatmul.bf16.vlgmr.msra.gmra.mxu0 %v454_v53  ;;  %v452_v41 = vunpack.c.l.b16 %v415_v27  ;;  %v983_v53 = vrot.slane %v981_v34, 4  ;;  %v986_v54 = vrot.slane %v984_v35, 5  ;;  %v2244_v8 = vor.u32 %v2564_v63, %v2243_v62  ;;  %v2289_v20 = vld [vmem:[%s2801_s13 + $0x18] sm:$0xf]  ;;  %v2607_v21 = vld [vmem:[%s3404_s1 + $0x1e0] sm:$0xff]  ;;  %v2597_v23 = vld [vmem:[%s3404_s1 + $0x190] sm:$0xff] }
  0x2d   : > { %611 = vmatpush.bf16.msrb.mxu1 %v2546_v29  ;;  %1158 = vmatpush.bf16.msrb.mxu0 %v2582_v45  ;;  %v967_v29 = vshrl.u32 %v2285_v13, 16  ;;  %v448_v45 = vunpack.c.l.b16 %v359_v31  ;;  %v978_v9 = vrot.slane %v976_v59, 5  ;;  %v685_v14 = vrot.slane %v2806_v10, 5  ;;  %v2540_v10 = vld [vmem:[%s3404_s1 + $0x8] sm:$0xff]  ;;  %v2291_v22 = vld [vmem:[%s2801_s13 + $0x20] sm:$0xf] }
  0x2e   : > { %1465 = vmatpush.bf16.msrb.mxu2 %v2602_v48  ;;  %921 = vmatmul.bf16.vlgmr.msra.gmra.mxu3 %v2240_v11  ;;  %v457_v60 = vpack.c.b16 %v453_v42, %v452_v41  ;;  %v987_v3 = vor.u32 %v986_v54, %v983_v53  ;;  %v2194_v15 = vrot.slane %v645_v5, 9  ;;  %v689_v16 = vrot.slane %v2812_v12, 5  ;;  %v2576_v12 = vld [vmem:[%s3404_s1 + $0x108] sm:$0xff]  ;;  %v2539_v34 = vld [vmem:[%s3404_s1] sm:$0xff]  ;;  %v2589_v53 = vld [vmem:[%s3404_s1 + $0x170] sm:$0xff] }
  0x2f   : > { %787 = vmatmul.bf16.vlgmr.msra.gmra.mxu2 %v723_v46  ;;  %1710 = vmatpush.bf16.msrb.mxu3 %v2610_v2  ;;  %v449_v46 = vunpack.c.l.b16 %v373_v33  ;;  %v969_v48 = vrot.slane %v967_v29, 4  ;;  %v995_v28 = vshrl.u32 %v2289_v20, 16  ;;  %v998_v30 = vshll.u32 %v2289_v20, 16  ;;  %v2143_v35 = vld [vmem:[%s2801_s13] sm:$0xf] }
  0x30   : > { %v988_v18 = vrot.slane %v987_v3, 4  ;;  %v690_v27 = vsel %vm2848_vm5, %v2194_v15, %v689_v16  ;;  %v1009_v31 = vshrl.u32 %v2291_v22, 16  ;;  %v1012_v33 = vshll.u32 %v2291_v22, 16  ;;  %v2575_v38 = vld [vmem:[%s3404_s1 + $0x100] sm:$0xff]  ;;  %v2565_v62 = vld [vmem:[%s2801_s13 + $0x2c] sm:$0xf0] }
  0x31   : > { %612 = vmatpush.bf16.msrb.mxu1 %v2545_v52  ;;  %1159 = vmatpush.bf16.msrb.mxu0 %v2581_v1  ;;  %v718_v52 = vunpack.c.l.b16 %v682_v39  ;;  %v455_v61 = vpack.c.b16 %v449_v46, %v448_v45  ;;  %v973_v0 = vor.u32 %v972_v50, %v969_v48  ;;  %v644_v1 = vld [vmem:[%s2801_s13 + $0x20] sm:$0xe]  ;;  %v2535_v39 = vld [vmem:[%s2801_s13 + $0x4] sm:$0xf0]  ;;  %v3050_v45 = vld [vmem:[%s3404_s1 + $0x238] sm:$0xff]  ;;  %v997_v48 = vrot.slane %v995_v28, 4 }
  0x32   : > { %1466 = vmatpush.bf16.msrb.mxu2 %v2601_v6  ;;  %v2541_v6 = vld [vmem:[%s3404_s1 + $0x10] sm:$0xff]  ;;  %v2193_v11 = vrot.slane %v644_v1, 9  ;;  %v3053_v46 = vld [vmem:[%s2801_s13 + $0x24] sm:$0x1]  ;;  %v1000_v50 = vrot.slane %v998_v30, 5  ;;  %v2144_v54 = vor.u32 %v2535_v39, %v2143_v35  ;;  %v693_v20 = vrot.slane %v2895_v32, 5 }
  0x33   : > { %1711 = vmatpush.bf16.msrb.mxu3 %v2609_v24  ;;  %v724_v2 = vpack.c.b16 %v718_v52, %v717_v51  ;;  %v974_v13 = vrot.slane %v973_v0, 4  ;;  %v2606_v24 = vld [vmem:[%s3404_s1 + $0x1d8] sm:$0xff]  ;;  %v1011_v51 = vrot.slane %v1009_v31, 4  ;;  %v1014_v52 = vrot.slane %v1012_v33, 5  ;;  %v3066_v1 = vld [vmem:[%s3404_s1 + $0x230] sm:$0xff]  ;;  %v2595_v22 = vld [vmem:[%s3404_s1 + $0x180] sm:$0xff] }
  0x34   : > { %v1018_v59 = vshll.u32 %v3053_v46, 16  ;;  %v1001_v63 = vor.u32 %v1000_v50, %v997_v48  ;;  %v2293_v3 = vld [vmem:[%s2801_s13 + $0x28] sm:$0xf]  ;;  %v647_v5 = vld [vmem:[%s2801_s13 + $0x38] sm:$0xe]  ;;  %v3106_v28 = vld [vmem:[%s3404_s1 + $0x220] sm:$0xff] }
  0x35   : > { %613 = vmatpush.bf16.msrb.mxu1 %v2544_v19  ;;  %1160 = vmatpush.bf16.msrb.mxu0 %v2580_v25  ;;  %v992_v19 = vrot.slane %v990_v4, 5  ;;  %v979_v25 = vsel %vm2839_vm4, %v974_v13, %v978_v9  ;;  %v1015_v0 = vor.u32 %v1014_v52, %v1011_v51  ;;  %v646_v4 = vld [vmem:[%s2801_s13 + $0x30] sm:$0xe]  ;;  %v1023_v15 = vshrl.u32 %v2293_v3, 16  ;;  %v2604_v32 = vld [vmem:[%s3404_s1 + $0x1c8] sm:$0xff]  ;;  %v2586_v31 = vld [vmem:[%s3404_s1 + $0x158] sm:$0xff] }
  0x36   : > { %1467 = vmatpush.bf16.msrb.mxu2 %v2600_v26  ;;  %v686_v26 = vsel %vm2848_vm5, %v2193_v11, %v685_v14  ;;  %v1020_v9 = vrot.slane %v1018_v59, 5  ;;  %v2295_v11 = vld [vmem:[%s2801_s13 + $0x30] sm:$0xf]  ;;  %v1002_v13 = vrot.slane %v1001_v63, 4  ;;  %v1026_v16 = vshll.u32 %v2293_v3, 16 }
  0x37   : > { %1712 = vmatpush.bf16.msrb.mxu3 %v2608_v40  ;;  %v993_v29 = vsel %vm2839_vm4, %v988_v18, %v992_v19  ;;  %v1094_v40 = vunpack.c.l.b16 %v979_v25  ;;  %v719_v42 = vunpack.c.l.b16 %v686_v26  ;;  %v1016_v14 = vrot.slane %v1015_v0, 4  ;;  %v3085_v18 = vld [vmem:[%s3404_s1 + $0x228] sm:$0xff]  ;;  %v3119_v39 = vld [vmem:[%s2801_s13 + $0x34] sm:$0x1]  ;;  %v2439_v51 = vld [vmem:[%s2801_s13 + $0x18] sm:$0xf] }
  0x38   : > { %v1095_v41 = vunpack.c.l.b16 %v993_v29  ;;  %v2195_v19 = vrot.slane %v646_v4, 9  ;;  %v1025_v26 = vrot.slane %v1023_v15, 4  ;;  %v3116_v33 = vld [vmem:[%s2801_s13 + $0x2c] sm:$0x1]  ;;  %v1046_v59 = vshll.u32 %v3119_v39, 16 }
  0x39   : > { %614 = vmatpush.bf16.msrb.mxu1 %v2543_v37  ;;  %1161 = vmatpush.bf16.msrb.mxu0 %v2579_v43  ;;  %v2590_v37 = vld [vmem:[%s3404_s1 + $0x178] sm:$0xff]  ;;  %v720_v43 = vunpack.c.l.b16 %v690_v27  ;;  %v1021_v25 = vsel %vm2839_vm4, %v1016_v14, %v1020_v9  ;;  %v1028_v27 = vrot.slane %v1026_v16, 5  ;;  %v1032_v52 = vshll.u32 %v3116_v33, 16  ;;  %v2566_v63 = vld [vmem:[%s2801_s13 + $0x3c] sm:$0xf0] }
  0x3a   : > { %1468 = vmatpush.bf16.msrb.mxu2 %v2599_v44  ;;  %v3045_v44 = vld [vmem:[%s2801_s13 + $0x1c] sm:$0x1]  ;;  %v694_v29 = vsel %vm2848_vm5, %v2195_v19, %v693_v20  ;;  %v2297_v0 = vld [vmem:[%s2801_s13 + $0x38] sm:$0xf]  ;;  %v1048_v15 = vrot.slane %v1046_v59, 5  ;;  %v2603_v19 = vld [vmem:[%s3404_s1 + $0x1c0] sm:$0xff] }
  0x3b   : > { %1713 = vmatpush.bf16.msrb.mxu3 %v2607_v21  ;;  %v2196_v21 = vrot.slane %v647_v5, 9  ;;  %v1029_v50 = vor.u32 %v1028_v27, %v1025_v26  ;;  %v3137_v5 = vld [vmem:[%s2801_s13 + $0x14] sm:$0x1]  ;;  %v2299_v16 = vld [vmem:[%s2801_s13 + $0x40] sm:$0xf]  ;;  %v1054_v20 = vshll.u32 %v2297_v0, 16 }
  0x3c   : > { %533 = vmatmul.bf16.gmra.mxu1 %v457_v60  ;;  %523 = vmatmul.bf16.gmra.mxu0 %v455_v61  ;;  %v725_v60 = vpack.c.b16 %v720_v43, %v719_v42  ;;  %v2247_v61 = vld [vmem:[%s2801_s13 + $0x28] sm:$0xf]  ;;  %v2536_v42 = vld [vmem:[%s2801_s13 + $0x14] sm:$0xf0]  ;;  %v721_v43 = vunpack.c.l.b16 %v694_v29  ;;  %v3159_v27 = vld [vmem:[%s3404_s1 + $0x210] sm:$0xff] }
  0x3d   : > { %615 = vmatpush.bf16.msrb.mxu1 %v2542_v55  ;;  %1162 = vmatpush.bf16.msrb.mxu0 %v2578_v58  ;;  %v1102_v55 = vpack.c.b16 %v1095_v41, %v1094_v40  ;;  %v1004_v58 = vshll.u32 %v3045_v44, 16  ;;  %v2437_v40 = vld [vmem:[%s2801_s13 + $0x10] sm:$0xf]  ;;  %v1030_v4 = vrot.slane %v1029_v50, 4  ;;  %v2333_v29 = vld [vmem:[%s2801_s13 + $0x8] sm:$0xe] }
  0x3e   : > { %1469 = vmatpush.bf16.msrb.mxu2 %v2598_v17  ;;  %926 = vmatmul.bf16.gmra.mxu3 %v2244_v8  ;;  %v2605_v17 = vld [vmem:[%s3404_s1 + $0x1d0] sm:$0xff] }
  0x3f   : > { %792 = vmatmul.bf16.gmra.mxu2 %v724_v2  ;;  %1714 = vmatpush.bf16.msrb.mxu3 %v2606_v24  ;;  %v2588_v2 = vld [vmem:[%s3404_s1 + $0x168] sm:$0xff]  ;;  %v1006_v8 = vrot.slane %v1004_v58, 5  ;;  %v1040_v24 = vshll.u32 %v2295_v11, 16  ;;  %v2147_v41 = vld [vmem:[%s2801_s13 + $0x10] sm:$0xf] }
  0x41   : > { %616 = vmatpush.bf16.msrb.mxu1 %v2541_v6  ;;  %1163 = vmatpush.bf16.msrb.mxu0 %v2577_v7  ;;  %v2596_v6 = vld [vmem:[%s3404_s1 + $0x188] sm:$0xff]  ;;  %v2248_v7 = vor.u32 %v2565_v62, %v2247_v61  ;;  %v1042_v35 = vrot.slane %v1040_v24, 5  ;;  %v2148_v61 = vor.u32 %v2536_v42, %v2147_v41  ;;  %v3172_v42 = vld [vmem:[%s2801_s13 + $0x3c] sm:$0x1] }
  0x42   : > { %1470 = vmatpush.bf16.msrb.mxu2 %v2597_v23  ;;  %v1037_v23 = vshrl.u32 %v2295_v11, 16 }
  0x43   : > { %1715 = vmatpush.bf16.msrb.mxu3 %v2605_v17  ;;  %v1051_v17 = vshrl.u32 %v2297_v0, 16 }
  0x45   : > { %617 = vmatpush.bf16.msrb.mxu1 %v2540_v10  ;;  %1164 = vmatpush.bf16.msrb.mxu0 %v2576_v12  ;;  %v697_v10 = vrot.slane %v2898_v36, 5  ;;  %v2587_v12 = vld [vmem:[%s3404_s1 + $0x160] sm:$0xff]  ;;  %v1007_v36 = vsel %vm2839_vm4, %v1002_v13, %v1006_v8 }
  0x46   : > { %1471 = vmatpush.bf16.msrb.mxu2 %v2596_v6  ;;  %v1034_v6 = vrot.slane %v1032_v52, 5 }
  0x47   : > { %v698_v30 = vsel %vm2848_vm5, %v2196_v21, %v697_v10  ;;  %1716 = vmatpush.bf16.msrb.mxu3 %v2604_v32  ;;  %v1528_v10 = vshll.u32 %v3137_v5, 16  ;;  %v1225_v32 = vrot.slane %v2986_v56, 5  ;;  %v1053_v56 = vrot.slane %v1051_v17, 4 }
  0x48   : > { %v722_v48 = vunpack.c.l.b16 %v698_v30 }
  0x49   : > { %618 = vmatpush.bf16.msrb.mxu1 %v2539_v34  ;;  %1165 = vmatpush.bf16.msrb.mxu0 %v2575_v38  ;;  %v1039_v34 = vrot.slane %v1037_v23, 4  ;;  %v1097_v38 = vunpack.c.l.b16 %v1021_v25  ;;  %v1221_v23 = vrot.slane %v2980_v47, 5  ;;  %v1068_v25 = vshll.u32 %v2299_v16, 16 }
  0x4a   : > { %1472 = vmatpush.bf16.msrb.mxu2 %v2595_v22  ;;  %v726_v3 = vpack.c.b16 %v722_v48, %v721_v43  ;;  %v1035_v47 = vsel %vm2839_vm4, %v1030_v4, %v1034_v6  ;;  %v2391_v4 = vld [vmem:[%s2801_s13 + $0x10] sm:$0xf] }
  0x4b   : > { %v1043_v58 = vor.u32 %v1042_v35, %v1039_v34  ;;  %1717 = vmatpush.bf16.msrb.mxu3 %v2603_v19  ;;  %v2334_v34 = vld [vmem:[%s2801_s13 + $0x10] sm:$0xe]  ;;  %v2341_v35 = vrot.slane %v2333_v29, 9  ;;  %v1070_v52 = vrot.slane %v1068_v25, 5 }
  0x4c   : > { %619 = vmatmul.bf16.vlgmr.msrb.gmra.mxu1 %v2144_v54  ;;  %1166 = vmatmul.bf16.vlgmr.msrb.gmra.mxu0 %v1102_v55  ;;  %v1522_v54 = vshll.u32 %v2437_v40, 16  ;;  %v1533_v55 = vshrl.u32 %v2439_v51, 16  ;;  %v2342_v41 = vrot.slane %v2334_v34, 9  ;;  %v2611_v34 = vld [vmem:[%s3404_s1 + $0x200] sm:$0xff] }
  0x4d   : > { %1331 = vmatpush.bf16.msra.mxu1 %v2590_v37  ;;  %1883 = vmatpush.bf16.msra.mxu0 %v3050_v45  ;;  %v1096_v37 = vunpack.c.l.b16 %v1007_v36  ;;  %v1044_v14 = vrot.slane %v1043_v58, 4  ;;  %v1065_v36 = vshrl.u32 %v2299_v16, 16  ;;  %v1222_v50 = vsel %vm2848_vm5, %v2341_v35, %v1221_v23  ;;  %v3204_v23 = vld [vmem:[%s2801_s13 + $0x2c] sm:$0x1] }
  0x4e   : > { %931 = vmatmul.bf16.gmra.mxu3 %v2248_v7  ;;  %2669 = vmatpush.bf16.msra.mxu2 %v3050_v45  ;;  %v2251_v45 = vld [vmem:[%s2801_s13 + $0x38] sm:$0xf]  ;;  %v3140_v7 = vld [vmem:[%s2801_s13 + $0x1c] sm:$0x1]  ;;  %v1524_v9 = vrot.slane %v1522_v54, 5  ;;  %v1535_v11 = vrot.slane %v1533_v55, 4  ;;  %v1267_v54 = vunpack.c.l.b16 %v1222_v50  ;;  %v1098_v58 = vunpack.c.l.b16 %v1035_v47 }
  0x4f   : > { %797 = vmatmul.bf16.gmra.mxu2 %v725_v60  ;;  %v2585_v60 = vld [vmem:[%s3404_s1 + $0x150] sm:$0xff]  ;;  %v1103_v62 = vpack.c.b16 %v1097_v38, %v1096_v37  ;;  %v2252_v13 = vor.u32 %v2566_v63, %v2251_v45  ;;  %v1542_v24 = vshll.u32 %v3140_v7, 16  ;;  %v1049_v30 = vsel %vm2839_vm4, %v1044_v14, %v1048_v15  ;;  %v2151_v55 = vld [vmem:[%s2801_s13 + $0x20] sm:$0xf]  ;;  %v2537_v45 = vld [vmem:[%s2801_s13 + $0x24] sm:$0xf0] }
  0x50   : > { %v1056_v37 = vrot.slane %v1054_v20, 5  ;;  %v1099_v59 = vunpack.c.l.b16 %v1049_v30  ;;  %v1060_v63 = vshll.u32 %v3172_v42, 16  ;;  %v2152_v17 = vor.u32 %v2537_v45, %v2151_v55  ;;  %v2155_v55 = vld [vmem:[%s2801_s13 + $0x30] sm:$0xf] }
  0x51   : > { %1332 = vmatpush.bf16.msra.mxu1 %v2589_v53  ;;  %1884 = vmatpush.bf16.msra.mxu0 %v3066_v1  ;;  %v1519_v53 = vshrl.u32 %v2437_v40, 16  ;;  %v1530_v40 = vrot.slane %v1528_v10, 5  ;;  %v1544_v48 = vrot.slane %v1542_v24, 5 }
  0x52   : > { %2670 = vmatpush.bf16.msra.mxu2 %v3066_v1  ;;  %v2584_v1 = vld [vmem:[%s3404_s1 + $0x148] sm:$0xff] }
  0x53   : > { %v1521_v8 = vrot.slane %v1519_v53, 4  ;;  %v1226_v53 = vsel %vm2848_vm5, %v2342_v41, %v1225_v32 }
  0x55   : > { %1333 = vmatpush.bf16.msra.mxu1 %v2588_v2  ;;  %1885 = vmatpush.bf16.msra.mxu0 %v3085_v18  ;;  %v1536_v2 = vshll.u32 %v2439_v51, 16  ;;  %v1525_v21 = vor.u32 %v1524_v9, %v1521_v8  ;;  %v1067_v51 = vrot.slane %v1065_v36, 4 }
  0x56   : > { %2671 = vmatpush.bf16.msra.mxu2 %v3085_v18  ;;  %v2612_v18 = vld [vmem:[%s3404_s1 + $0x208] sm:$0xff] }
  0x57   : > { %v1538_v22 = vrot.slane %v1536_v2, 5  ;;  %v1526_v38 = vrot.slane %v1525_v21, 4  ;;  %v2441_v2 = vld [vmem:[%s2801_s13 + $0x20] sm:$0xf] }
  0x58   : > { %v1547_v9 = vshrl.u32 %v2441_v2, 16 }
  0x59   : > { %1334 = vmatpush.bf16.msra.mxu1 %v2587_v12  ;;  %1886 = vmatpush.bf16.msra.mxu0 %v3106_v28  ;;  %v2614_v12 = vld [vmem:[%s3404_s1 + $0x218] sm:$0xff]  ;;  %v1539_v26 = vor.u32 %v1538_v22, %v1535_v11  ;;  %v1531_v0 = vsel %vm2839_vm4, %v1526_v38, %v1530_v40  ;;  %v1550_v11 = vshll.u32 %v2441_v2, 16  ;;  %v3201_v22 = vld [vmem:[%s2801_s13 + $0x24] sm:$0x1]  ;;  %v2336_v38 = vld [vmem:[%s2801_s13 + $0x20] sm:$0xe] }
  0x5a   : > { %2672 = vmatpush.bf16.msra.mxu2 %v3106_v28  ;;  %v1071_v28 = vor.u32 %v1070_v52, %v1067_v51  ;;  %v1549_v19 = vrot.slane %v1547_v9, 4  ;;  %v1646_v21 = vunpack.c.l.b16 %v1531_v0  ;;  %v1229_v52 = vrot.slane %v3045_v44, 5 }
  0x5b   : > { %v1540_v43 = vrot.slane %v1539_v26, 4  ;;  %v1552_v20 = vrot.slane %v1550_v11, 5  ;;  %v1062_v26 = vrot.slane %v1060_v63, 5  ;;  %v2485_v63 = vld [vmem:[%s2801_s13 + $0x10] sm:$0xe] }
  0x5c   : > { %624 = vmatmul.bf16.gmra.mxu1 %v2148_v61  ;;  %1171 = vmatmul.bf16.gmra.mxu0 %v1103_v62  ;;  %v1268_v61 = vunpack.c.l.b16 %v1226_v53  ;;  %v1057_v62 = vor.u32 %v1056_v37, %v1053_v56  ;;  %v1072_v29 = vrot.slane %v1071_v28, 4  ;;  %v1556_v56 = vshll.u32 %v3201_v22, 16  ;;  %v2335_v37 = vld [vmem:[%s2801_s13 + $0x18] sm:$0xe] }
  0x5d   : > { %1335 = vmatpush.bf16.msra.mxu1 %v2586_v31  ;;  %1887 = vmatpush.bf16.msra.mxu0 %v2614_v12  ;;  %v2583_v31 = vld [vmem:[%s3404_s1 + $0x140] sm:$0xff]  ;;  %v1545_v6 = vsel %vm2839_vm4, %v1540_v43, %v1544_v48  ;;  %v1553_v30 = vor.u32 %v1552_v20, %v1549_v19  ;;  %v2343_v50 = vrot.slane %v2335_v37, 9  ;;  %v2344_v53 = vrot.slane %v2336_v38, 9 }
  0x5e   : > { %936 = vmatmul.bf16.gmra.mxu3 %v2252_v13  ;;  %v3196_v8 = vpack.c.b16 %v1268_v61, %v1267_v54  ;;  %v2591_v13 = vld [vmem:[%s2801_s13 + $0x14] sm:$0xf0]  ;;  %2673 = vmatpush.bf16.msra.mxu2 %v2614_v12  ;;  %v1647_v10 = vunpack.c.l.b16 %v1545_v6  ;;  %v1058_v25 = vrot.slane %v1057_v62, 4  ;;  %v1570_v12 = vshll.u32 %v3204_v23, 16 }
  0x5f   : > { %802 = vmatmul.bf16.gmra.mxu2 %v726_v3  ;;  %v2443_v3 = vld [vmem:[%s2801_s13 + $0x28] sm:$0xf]  ;;  %v2392_v36 = vor.u32 %v2591_v13, %v2391_v4  ;;  %v1558_v43 = vrot.slane %v1556_v56, 5  ;;  %v1233_v54 = vrot.slane %v3053_v46, 5  ;;  %v1773_v62 = vrot.slane %v3137_v5, 5 }
  0x60   : > { %v1561_v15 = vshrl.u32 %v2443_v3, 16  ;;  %v1564_v16 = vshll.u32 %v2443_v3, 16  ;;  %v1063_v40 = vsel %vm2839_vm4, %v1058_v25, %v1062_v26  ;;  %v1572_v48 = vrot.slane %v1570_v12, 5  ;;  %v2486_v3 = vld [vmem:[%s2801_s13 + $0x18] sm:$0xe] }
  0x61   : > { %1336 = vmatpush.bf16.msra.mxu1 %v2585_v60  ;;  %1888 = vmatpush.bf16.msra.mxu0 %v3159_v27  ;;  %v3185_v60 = vld [vmem:[%s2801_s13 + $0x44] sm:$0x1]  ;;  %v1100_v45 = vunpack.c.l.b16 %v1063_v40  ;;  %v1234_v61 = vsel %vm2848_vm5, %v2344_v53, %v1233_v54  ;;  %v2445_v4 = vld [vmem:[%s2801_s13 + $0x30] sm:$0xf]  ;;  %v2447_v6 = vld [vmem:[%s2801_s13 + $0x38] sm:$0xf] }
  0x62   : > { %v1074_v14 = vshll.u32 %v3185_v60, 16  ;;  %v1563_v24 = vrot.slane %v1561_v15, 4  ;;  %v1566_v32 = vrot.slane %v1564_v16, 5  ;;  %2674 = vmatpush.bf16.msra.mxu2 %v3159_v27  ;;  %v1554_v27 = vrot.slane %v1553_v30, 4  ;;  %v2395_v16 = vld [vmem:[%s2801_s13 + $0x20] sm:$0xf] }
  0x63   : > { %v1270_v0 = vunpack.c.l.b16 %v1234_v61  ;;  %v1575_v11 = vshrl.u32 %v2445_v4, 16  ;;  %v1578_v13 = vshll.u32 %v2445_v4, 16  ;;  %v1589_v5 = vshrl.u32 %v2447_v6, 16  ;;  %v2337_v53 = vld [vmem:[%s2801_s13 + $0x28] sm:$0xe] }
  0x64   : > { %v1076_v47 = vrot.slane %v1074_v14, 5  ;;  %v1567_v35 = vor.u32 %v1566_v32, %v1563_v24  ;;  %v1559_v46 = vsel %vm2839_vm4, %v1554_v27, %v1558_v43  ;;  %v1777_v15 = vrot.slane %v3140_v7, 5  ;;  %v2338_v54 = vld [vmem:[%s2801_s13 + $0x30] sm:$0xe]  ;;  %v2487_v4 = vld [vmem:[%s2801_s13 + $0x20] sm:$0xe] }
  0x65   : > { %1337 = vmatpush.bf16.msra.mxu1 %v2584_v1  ;;  %1889 = vmatpush.bf16.msra.mxu0 %v2612_v18  ;;  %v1104_v1 = vpack.c.b16 %v1099_v59, %v1098_v58  ;;  %v1230_v59 = vsel %vm2848_vm5, %v2343_v50, %v1229_v52  ;;  %v1648_v19 = vunpack.c.l.b16 %v1559_v46  ;;  %v1577_v24 = vrot.slane %v1575_v11, 4  ;;  %v2399_v50 = vld [vmem:[%s2801_s13 + $0x30] sm:$0xf]  ;;  %v2488_v11 = vld [vmem:[%s2801_s13 + $0x28] sm:$0xe] }
  0x66   : > { %v1077_v41 = vsel %vm2839_vm4, %v1072_v29, %v1076_v47  ;;  %2675 = vmatpush.bf16.msra.mxu2 %v2612_v18  ;;  %v1568_v51 = vrot.slane %v1567_v35, 4  ;;  %v2538_v18 = vld [vmem:[%s2801_s13 + $0x34] sm:$0xf0]  ;;  %v1269_v44 = vunpack.c.l.b16 %v1230_v59  ;;  %v1580_v32 = vrot.slane %v1578_v13, 5  ;;  %v3241_v29 = vld [vmem:[%s2801_s13 + $0x34] sm:$0x1] }
  0x67   : > { %v1101_v58 = vunpack.c.l.b16 %v1077_v41  ;;  %v2156_v28 = vor.u32 %v2538_v18, %v2155_v55  ;;  %v3244_v47 = vld [vmem:[%s2801_s13 + $0x3c] sm:$0x1]  ;;  %v2449_v55 = vld [vmem:[%s2801_s13 + $0x40] sm:$0xf]  ;;  %v2346_v59 = vrot.slane %v2338_v54, 9  ;;  %v1241_v61 = vrot.slane %v3119_v39, 5 }
  0x68   : > { %v1573_v2 = vsel %vm2839_vm4, %v1568_v51, %v1572_v48  ;;  %v3235_v9 = vpack.c.b16 %v1270_v0, %v1269_v44  ;;  %v1581_v12 = vor.u32 %v1580_v32, %v1577_v24  ;;  %v1598_v35 = vshll.u32 %v3244_v47, 16  ;;  %v2451_v18 = vld [vmem:[%s2801_s13 + $0x48] sm:$0xf] }
  0x69   : > { %1338 = vmatpush.bf16.msra.mxu1 %v2583_v31  ;;  %v1654_v31 = vpack.c.b16 %v1647_v10, %v1646_v21  ;;  %1890 = vmatpush.bf16.msra.mxu0 %v2611_v34  ;;  %v1105_v14 = vpack.c.b16 %v1101_v58, %v1100_v45  ;;  %v1649_v20 = vunpack.c.l.b16 %v1573_v2  ;;  %v2493_v21 = vrot.slane %v2485_v63, 9 }
  0x6a   : > { %2676 = vmatpush.bf16.msra.mxu2 %v2611_v34  ;;  %v2494_v10 = vrot.slane %v2486_v3, 9  ;;  %v1582_v40 = vrot.slane %v1581_v12, 4  ;;  %v1600_v43 = vrot.slane %v1598_v35, 5  ;;  %v2345_v45 = vrot.slane %v2337_v53, 9 }
  0x6b   : > { %v1655_v30 = vpack.c.b16 %v1649_v20, %v1648_v19  ;;  %v1774_v7 = vsel %vm2848_vm5, %v2493_v21, %v1773_v62  ;;  %v1237_v58 = vrot.slane %v3116_v33, 5  ;;  %v2593_v62 = vld [vmem:[%s2801_s13 + $0x34] sm:$0xf0]  ;;  %v1603_v63 = vshrl.u32 %v2449_v55, 16 }
  0x6c   : > { %629 = vmatmul.bf16.gmra.mxu1 %v2152_v17  ;;  %1176 = vmatmul.bf16.gmra.mxu0 %v1104_v1  ;;  %v2592_v17 = vld [vmem:[%s2801_s13 + $0x24] sm:$0xf0]  ;;  %v1592_v1 = vshll.u32 %v2447_v6, 16  ;;  %v1778_v56 = vsel %vm2848_vm5, %v2494_v10, %v1777_v15  ;;  %v1819_v37 = vunpack.c.l.b16 %v1774_v7  ;;  %v1606_v44 = vshll.u32 %v2449_v55, 16  ;;  %v3271_v15 = vld [vmem:[%s2801_s13 + $0x44] sm:$0x1] }
  0x6d   : > { %v2396_v26 = vor.u32 %v2592_v17, %v2395_v16  ;;  %v1820_v38 = vunpack.c.l.b16 %v1778_v56  ;;  %v1617_v0 = vshrl.u32 %v2451_v18, 16  ;;  %v1620_v46 = vshll.u32 %v2451_v18, 16  ;;  %v3274_v16 = vld [vmem:[%s2801_s13 + $0x4c] sm:$0x1] }
  0x6e   : > { %1718 = vmatmul.bf16.vlgmr.msrb.gmra.mxu3 %v1654_v31  ;;  %v1594_v25 = vrot.slane %v1592_v1, 5  ;;  %v1584_v31 = vshll.u32 %v3241_v29, 16  ;;  %v1238_v6 = vsel %vm2848_vm5, %v2345_v45, %v1237_v58  ;;  %v1242_v33 = vsel %vm2848_vm5, %v2346_v59, %v1241_v61  ;;  %v2490_v61 = vld [vmem:[%s2801_s13 + $0x38] sm:$0xe] }
  0x6f   : > { %1473 = vmatmul.bf16.vlgmr.msrb.gmra.mxu2 %v2392_v36  ;;  %v1591_v36 = vrot.slane %v1589_v5, 4  ;;  %v1827_v48 = vpack.c.b16 %v1820_v38, %v1819_v37  ;;  %v1271_v13 = vunpack.c.l.b16 %v1238_v6  ;;  %v1272_v39 = vunpack.c.l.b16 %v1242_v33  ;;  %v2339_v38 = vld [vmem:[%s2801_s13 + $0x38] sm:$0xe] }
  0x70   : > { %v1586_v41 = vrot.slane %v1584_v31, 5  ;;  %v1605_v5 = vrot.slane %v1603_v63, 4  ;;  %v1619_v17 = vrot.slane %v1617_v0, 4  ;;  %v1622_v1 = vrot.slane %v1620_v46, 5  ;;  %v2492_v63 = vld [vmem:[%s2801_s13 + $0x48] sm:$0xe] }
  0x71   : > { %v1595_v34 = vor.u32 %v1594_v25, %v1591_v36  ;;  %v2495_v19 = vrot.slane %v2487_v4, 9  ;;  %v3276_v20 = vpack.c.b16 %v1272_v39, %v1271_v13  ;;  %v1781_v10 = vrot.slane %v3201_v22, 5 }
  0x72   : > { %v1587_v51 = vsel %vm2839_vm4, %v1582_v40, %v1586_v41  ;;  %v2496_v24 = vrot.slane %v2488_v11, 9  ;;  %v1785_v32 = vrot.slane %v3204_v23, 5  ;;  %v1612_v25 = vshll.u32 %v3271_v15, 16  ;;  %v2340_v40 = vld [vmem:[%s2801_s13 + $0x40] sm:$0xe] }
  0x73   : > { %v1596_v27 = vrot.slane %v1595_v34, 4  ;;  %v1650_v2 = vunpack.c.l.b16 %v1587_v51  ;;  %v1782_v7 = vsel %vm2848_vm5, %v2495_v19, %v1781_v10  ;;  %v2347_v41 = vrot.slane %v2339_v38, 9  ;;  %v2594_v51 = vld [vmem:[%s2801_s13 + $0x44] sm:$0xf0] }
  0x74   : > { %v1786_v22 = vsel %vm2848_vm5, %v2496_v24, %v1785_v32  ;;  %v1614_v23 = vrot.slane %v1612_v25, 5  ;;  %v1821_v31 = vunpack.c.l.b16 %v1782_v7  ;;  %v1789_v0 = vrot.slane %v3241_v29, 5 }
  0x75   : > { %v1601_v52 = vsel %vm2839_vm4, %v1596_v27, %v1600_v43  ;;  %v1822_v34 = vunpack.c.l.b16 %v1786_v22  ;;  %v1245_v27 = vrot.slane %v3172_v42, 5  ;;  %v2348_v43 = vrot.slane %v2340_v40, 9  ;;  %v2489_v42 = vld [vmem:[%s2801_s13 + $0x30] sm:$0xe] }
  0x76   : > { %v1651_v3 = vunpack.c.l.b16 %v1601_v52  ;;  %v2498_v46 = vrot.slane %v2490_v61, 9  ;;  %v1801_v4 = vrot.slane %v3274_v16, 5  ;;  %v2500_v33 = vrot.slane %v2492_v63, 9 }
  0x77   : > { %v1828_v52 = vpack.c.b16 %v1822_v34, %v1821_v31  ;;  %v1246_v53 = vsel %vm2848_vm5, %v2347_v41, %v1245_v27 }
  0x78   : > { %v1656_v21 = vpack.c.b16 %v1651_v3, %v1650_v2  ;;  %v1273_v45 = vunpack.c.l.b16 %v1246_v53  ;;  %v1793_v2 = vrot.slane %v3244_v47, 5  ;;  %v1797_v3 = vrot.slane %v3271_v15, 5 }
  0x79   : > { %v1802_v29 = vsel %vm2848_vm5, %v2500_v33, %v1801_v4 }
  0x7c   : > { %634 = vmatmul.bf16.gmra.mxu1 %v2156_v28  ;;  %1181 = vmatmul.bf16.gmra.mxu0 %v1105_v14  ;;  %v1608_v28 = vrot.slane %v1606_v44, 5  ;;  %v2400_v14 = vor.u32 %v2593_v62, %v2399_v50  ;;  %v2403_v50 = vld [vmem:[%s2801_s13 + $0x40] sm:$0xf]  ;;  %v2497_v44 = vrot.slane %v2489_v42, 9 }
  0x7d   : > { %v2404_v59 = vor.u32 %v2594_v51, %v2403_v50  ;;  %v2491_v62 = vld [vmem:[%s2801_s13 + $0x40] sm:$0xe]  ;;  %s2105_s13 = sshll.u32 %s2717_s15, 3 }
  0x7e   : > { %1723 = vmatmul.bf16.gmra.mxu3 %v1655_v30  ;;  %v1609_v36 = vor.u32 %v1608_v28, %v1605_v5  ;;  %v1626_v30 = vshll.u32 %v3274_v16, 16  ;;  %v2499_v6 = vrot.slane %v2491_v62, 9  ;;  %v1790_v11 = vsel %vm2848_vm5, %v2497_v44, %v1789_v0  ;;  %p266_p5 = scmp.lt.s32.totalorder %s2105_s13, 15 }
  0x7f   : > { %1478 = vmatmul.bf16.gmra.mxu2 %v2396_v26  ;;  %v1623_v26 = vor.u32 %v1622_v1, %v1619_v17  ;;  %v1823_v47 = vunpack.c.l.b16 %v1790_v11  ;;  %v1826_v28 = vunpack.c.l.b16 %v1802_v29 }
  0x80   : > { %v1628_v12 = vrot.slane %v1626_v30, 5  ;;  %v1798_v13 = vsel %vm2848_vm5, %v2499_v6, %v1797_v3  ;;  %s3417_s13 = smov (!%p266_p5, %s2105_s13), 15 }
  0x81   : > { %v1624_v56 = vrot.slane %v1623_v26, 4  ;;  %v1825_v5 = vunpack.c.l.b16 %v1798_v13  ;;  %s2106_s20 = sshll.u32 %s3417_s13, 2 }
  0x82   : > { %s3353_s22 = scalar_lea.vmem %s3406_s3, %s2106_s20  ;;  %s3370_s27 = scalar_lea.vmem %s3407_s4, %s2106_s20 }
  0x83   : > { %v1629_v37 = vsel %vm2839_vm4, %v1624_v56, %v1628_v12  ;;  %v1830_v17 = vpack.c.b16 %v1826_v28, %v1825_v5 }
  0x84   : > { %v1653_v55 = vunpack.c.l.b16 %v1629_v37 }
  0x8c   : > { %1339 = vmatmul.bf16.vlgmr.msra.gmra.mxu1 %v3196_v8  ;;  %1891 = vmatmul.bf16.vlgmr.msra.gmra.mxu0 %v1827_v48  ;;  %v1610_v8 = vrot.slane %v1609_v36, 4  ;;  %v1249_v48 = vrot.slane %v3185_v60, 5 }
  0x8e   : > { %1728 = vmatmul.bf16.gmra.mxu3 %v1656_v21  ;;  %v1615_v35 = vsel %vm2839_vm4, %v1610_v8, %v1614_v23  ;;  %v1250_v49 = vsel %vm2848_vm5, %v2348_v43, %v1249_v48 }
  0x8f   : > { %1483 = vmatmul.bf16.gmra.mxu2 %v2400_v14  ;;  %v1652_v54 = vunpack.c.l.b16 %v1615_v35  ;;  %v1274_v58 = vunpack.c.l.b16 %v1250_v49 }
  0x91   : > { %v1278_v18 = vpack.c.b16 %v1274_v58, %v1273_v45  ;;  %v1657_v60 = vpack.c.b16 %v1653_v55, %v1652_v54 }
  0x9c   : > { %1344 = vmatmul.bf16.gmra.mxu1 %v3235_v9  ;;  %1896 = vmatmul.bf16.gmra.mxu0 %v1828_v52  ;;  %v1794_v9 = vsel %vm2848_vm5, %v2498_v46, %v1793_v2 }
  0x9d   : > { %v1824_v39 = vunpack.c.l.b16 %v1794_v9 }
  0x9e   : > { %1733 = vmatmul.bf16.gmra.mxu3 %v1657_v60 }
  0x9f   : > { %1488 = vmatmul.bf16.gmra.mxu2 %v2404_v59  ;;  %v1829_v14 = vpack.c.b16 %v1824_v39, %v1823_v47 }
  0xa9   : > { %v529_v15 = vpop.f32.mrf.mxu1  ;;  %v519_v16 = vpop.f32.mrf.mxu0 }
  0xac   : > { %1349 = vmatmul.bf16.gmra.mxu1 %v3276_v20  ;;  %1901 = vmatmul.bf16.gmra.mxu0 %v1829_v14 }
  0xaf   : > { %1906 = vmatmul.bf16.vlgmr.msra.gmra.mxu2 %v1830_v17 }
  0xb1   : > { %v531_v19 = vpop.f32.mrf.mxu1  ;;  %v521_v21 = vpop.f32.mrf.mxu0 }
  0xb2   : > { %v788_v1 = vpop.f32.mrf.mxu2  ;;  %v922_v10 = vpop.f32.mrf.mxu3 }
  0xb9   : > { %v534_v32 = vpop.f32.mrf.mxu1  ;;  %v524_v57 = vpop.f32.mrf.mxu0 }
  0xba   : > { %v790_v24 = vpop.f32.mrf.mxu2  ;;  %v3319_v36 = vpop.f32.mrf.mxu3 }
  0xbc   : > { %1354 = vmatmul.bf16.gmra.mxu1 %v1278_v18 }
  0xc1   : > { %v536_v26 = vpop.f32.mrf.mxu1  ;;  %v526_v30 = vpop.f32.mrf.mxu0 }
  0xc2   : > { %v793_v25 = vpop.f32.mrf.mxu2  ;;  %v927_v7 = vpop.f32.mrf.mxu3 }
  0xc9   : > { %v620_v8 = vpop.f32.mrf.mxu1  ;;  %v1167_v23 = vpop.f32.mrf.mxu0 }
  0xca   : > { %v795_v22 = vpop.f32.mrf.mxu2  ;;  %v621_v20 = vadd.f32 %v620_v8, %v519_v16  ;;  %v3321_v12 = vpop.f32.mrf.mxu3 }
  0xcc   : > { %v808_v56 = vadd.f32 %v788_v1, %v621_v20  ;;  %v3358_v20 = vld [vmem:[%s3405_s2] ss:$0 sm:$0xff] }
  0xce   : > { %v942_v31 = vadd.f32 %v922_v10, %v808_v56  ;;  %v2620_v56 = vld [vmem:[%s3353_s22] sm:$0xff]  }
  0xd0   : > { %v1187_v34 = vadd.f32 %v1167_v23, %v942_v31 }
  0xd1   : > { %v622_v37 = vpop.f32.mrf.mxu1  ;;  %v1169_v38 = vpop.f32.mrf.mxu0 }
  0xd2   : > { %v798_v35 = vpop.f32.mrf.mxu2  ;;  %v623_v40 = vadd.f32 %v622_v37, %v521_v21  ;;  %v932_v27 = vpop.f32.mrf.mxu3 }
  0xd4   : > { %v809_v41 = vadd.f32 %v790_v24, %v623_v40 }
  0xd9   : > { %v625_v48 = vpop.f32.mrf.mxu1  ;;  %v1172_v50 = vpop.f32.mrf.mxu0 }
  0xda   : > { %v800_v43 = vpop.f32.mrf.mxu2  ;;  %v626_v51 = vadd.f32 %v625_v48, %v524_v57  ;;  %v3325_v55 = vpop.f32.mrf.mxu3 }
  0xdc   : > { %v810_v52 = vadd.f32 %v793_v25, %v626_v51  ;;  %v943_v25 = vadd.f32 %v3319_v36, %v809_v41 }
  0xde   : > { %v944_v53 = vadd.f32 %v927_v7, %v810_v52 }
  0xe0   : > { %v3323_v49 = vadd.f32 %v1172_v50, %v944_v53 }
  0xe1   : > { %v627_v45 = vpop.f32.mrf.mxu1  ;;  %v3327_v58 = vpop.f32.mrf.mxu0 }
  0xe2   : > { %v803_v54 = vpop.f32.mrf.mxu2  ;;  %v628_v59 = vadd.f32 %v627_v45, %v526_v30  ;;  %v937_v60 = vpop.f32.mrf.mxu3 }
  0xe4   : > { %v811_v42 = vadd.f32 %v795_v22, %v628_v59  ;;  %v1188_v22 = vadd.f32 %v1169_v38, %v943_v25  ;;  %v2621_v38 = vunpack.c.l.bf16 %v2620_v56 }
  0xe6   : > { %v945_v53 = vadd.f32 %v3321_v12, %v811_v42 }
  0xe9   : > { %v630_v18 = vpop.f32.mrf.mxu1  ;;  %v1177_v62 = vpop.f32.mrf.mxu0 }
  0xea   : > { %v805_v61 = vpop.f32.mrf.mxu2  ;;  %v631_v63 = vadd.f32 %v630_v18, %v529_v15  ;;  %v3335_v11 = vpop.f32.mrf.mxu3 }
  0xec   : > { %v812_v44 = vadd.f32 %v798_v35, %v631_v63 }
  0xee   : > { %v946_v0 = vadd.f32 %v932_v27, %v812_v44  ;;  %v2622_v27 = vunpack.c.h.bf16 %v2620_v56 }
  0xf0   : > { %v3329_v46 = vadd.f32 %v1177_v62, %v946_v0 }
  0xf1   : > { %v632_v3 = vpop.f32.mrf.mxu1  ;;  %v3331_v4 = vpop.f32.mrf.mxu0 }
  0xf2   : > { %v1474_v2 = vpop.f32.mrf.mxu2  ;;  %v633_v6 = vadd.f32 %v632_v3, %v531_v19  ;;  %v1719_v28 = vpop.f32.mrf.mxu3 }
  0xf4   : > { %v3333_v33 = vadd.f32 %v800_v43, %v633_v6 }
  0xf9   : > { %v635_v13 = vpop.f32.mrf.mxu1  ;;  %v1182_v29 = vpop.f32.mrf.mxu0 }
  0xfa   : > { %v1476_v9 = vpop.f32.mrf.mxu2  ;;  %v636_v47 = vadd.f32 %v635_v13, %v534_v32  ;;  %v1721_v21 = vpop.f32.mrf.mxu3 }
  0xfc   : > { %v814_v39 = vadd.f32 %v803_v54, %v636_v47 }
  0xfe   : > { %v948_v5 = vadd.f32 %v937_v60, %v814_v39  ;;  %v1190_v60 = vadd.f32 %v3327_v58, %v945_v53 }
 0x100   : > { %v3337_v14 = vadd.f32 %v1182_v29, %v948_v5 }
 0x101   : > { %v637_v16 = vpop.f32.mrf.mxu1  ;;  %v3339_v17 = vpop.f32.mrf.mxu0 }
 0x102   : > { %v1479_v15 = vpop.f32.mrf.mxu2  ;;  %v638_v1 = vadd.f32 %v637_v16, %v536_v26  ;;  %v1724_v31 = vpop.f32.mrf.mxu3 }
 0x104   : > { %v3342_v19 = vadd.f32 %v805_v61, %v638_v1 }
 0x109   : > { %v1340_v10 = vpop.f32.mrf.mxu1  ;;  %v1892_v24 = vpop.f32.mrf.mxu0 }
 0x10a   : > { %v1360_v32 = vadd.f32 %v1340_v10, %v1187_v34  ;;  %v1481_v57 = vpop.f32.mrf.mxu2  ;;  %v1726_v59 = vpop.f32.mrf.mxu3 }
 0x10c   : > { %v1494_v30 = vadd.f32 %v1474_v2, %v1360_v32  ;;  %v2655_v2 = vld [vmem:[%s3353_s22 + $0x8] sm:$0xff]  }
 0x10d   : > { %v2626_v39 = vunpack.c.h.bf16 %v2655_v2 }
 0x10e   : > { %v1739_v7 = vadd.f32 %v1719_v28, %v1494_v30 }
 0x110   : > { %v1912_v23 = vadd.f32 %v1892_v24, %v1739_v7 }
 0x111   : > { %v1342_v26 = vpop.f32.mrf.mxu1  ;;  %v1894_v8 = vpop.f32.mrf.mxu0 }
 0x112   : > { %v1361_v36 = vadd.f32 %v1342_v26, %v1188_v22  ;;  %v1484_v35 = vpop.f32.mrf.mxu2  ;;  %v1924_v37 = vadd.f32 %v3358_v20, %v1912_v23  ;;  %v1729_v29 = vpop.f32.mrf.mxu3 }
 0x114   : > { %v1495_v34 = vadd.f32 %v1476_v9, %v1361_v36  ;;  %v1948_v50 = vadd.f32 %v2621_v38, %v1924_v37  ;;  %v2625_v9 = vunpack.c.l.bf16 %v2655_v2 }
 0x116   : > { %v1740_v40 = vadd.f32 %v1721_v21, %v1495_v34  ;;  %v1956_v61 = vmax.f32 %v1948_v50, 0.0  ;;  %v947_v21 = vadd.f32 %v3325_v55, %v3333_v33 }
 0x118   : > { %v1913_v41 = vadd.f32 %v1894_v8, %v1740_v40  ;;  %v1192_v30 = vadd.f32 %v3331_v4, %v947_v21 }
 0x119   : > { %v1345_v43 = vpop.f32.mrf.mxu1  ;;  %v1897_v48 = vpop.f32.mrf.mxu0 }
 0x11a   : > { %v1925_v51 = vadd.f32 %v3358_v20, %v1913_v41  ;;  %v1362_v52 = vadd.f32 %v1345_v43, %v3323_v49  ;;  %v1486_v63 = vpop.f32.mrf.mxu2  ;;  %v1731_v22 = vpop.f32.mrf.mxu3  ;;  %v949_v43 = vadd.f32 %v3335_v11, %v3342_v19 }
 0x11c   : > { %v1949_v54 = vadd.f32 %v2622_v27, %v1925_v51  ;;  %v1496_v45 = vadd.f32 %v1479_v15, %v1362_v52 }
 0x11e   : > { %v1957_v18 = vmax.f32 %v1949_v54, 0.0  ;;  %v1741_v62 = vadd.f32 %v1724_v31, %v1496_v45  ;;  %v1194_v45 = vadd.f32 %v3339_v17, %v949_v43 }
 0x120   : > { %v2638_v49 = vpack.c.bf16 %v1957_v18, %v1956_v61  ;;  %v1914_v42 = vadd.f32 %v1897_v48, %v1741_v62 }
 0x121   : > { %v1347_v44 = vpop.f32.mrf.mxu1  ;;  %v1899_v12 = vpop.f32.mrf.mxu0 }
 0x122   : > { %2639 = vst [vmem:[%s3370_s27] sm:$0xff] %v2638_v49   ;;  %v1363_v0 = vadd.f32 %v1347_v44, %v1190_v60  ;;  %v1926_v6 = vadd.f32 %v3358_v20, %v1914_v42  ;;  %v1489_v5 = vpop.f32.mrf.mxu2  ;;  %v1734_v27 = vpop.f32.mrf.mxu3 }
 0x124   : > { %v1497_v3 = vadd.f32 %v1481_v57, %v1363_v0  ;;  %v1950_v15 = vadd.f32 %v2625_v9, %v1926_v6 }
 0x126   : > { %v1742_v13 = vadd.f32 %v1726_v59, %v1497_v3  ;;  %v1958_v32 = vmax.f32 %v1950_v15, 0.0 }
 0x128   : > { %v1915_v47 = vadd.f32 %v1899_v12, %v1742_v13 }
 0x129   : > { %v1350_v28 = vpop.f32.mrf.mxu1  ;;  %v1902_v1 = vpop.f32.mrf.mxu0 }
 0x12a   : > { %v1927_v58 = vadd.f32 %v3358_v20, %v1915_v47  ;;  %v1364_v16 = vadd.f32 %v1350_v28, %v3329_v46  ;;  %v1491_v36 = vpop.f32.mrf.mxu2  ;;  %v2656_v46 = vld [vmem:[%s3353_s22 + $0x10] sm:$0xff]   ;;  %v1736_v60 = vpop.f32.mrf.mxu3 }
 0x12b   : > { %v2629_v55 = vunpack.c.l.bf16 %v2656_v46  ;;  %v2630_v37 = vunpack.c.h.bf16 %v2656_v46 }
 0x12c   : > { %v1951_v10 = vadd.f32 %v2626_v39, %v1927_v58  ;;  %v1498_v24 = vadd.f32 %v1484_v35, %v1364_v16 }
 0x12e   : > { %v1959_v57 = vmax.f32 %v1951_v10, 0.0  ;;  %v1743_v25 = vadd.f32 %v1729_v29, %v1498_v24 }
 0x130   : > { %v2643_v7 = vpack.c.bf16 %v1959_v57, %v1958_v32  ;;  %v1916_v8 = vadd.f32 %v1902_v1, %v1743_v25 }
 0x131   : > { %v1352_v26 = vpop.f32.mrf.mxu1  ;;  %v1904_v31 = vpop.f32.mrf.mxu0 }
 0x132   : > { %2658 = vst [vmem:[%s3370_s27 + $0x8] sm:$0xff] %v2643_v7   ;;  %v1365_v23 = vadd.f32 %v1352_v26, %v1192_v30  ;;  %v1928_v34 = vadd.f32 %v3358_v20, %v1916_v8  ;;  %v1907_v51 = vpop.f32.mrf.mxu2 }
 0x134   : > { %v1499_v56 = vadd.f32 %v1486_v63, %v1365_v23  ;;  %v1952_v40 = vadd.f32 %v2629_v55, %v1928_v34  ;;  %v2657_v63 = vld [vmem:[%s3353_s22 + $0x18] sm:$0xff]  }
 0x135   : > { %v2633_v11 = vunpack.c.l.bf16 %v2657_v63  ;;  %v2634_v42 = vunpack.c.h.bf16 %v2657_v63 }
 0x136   : > { %v1744_v33 = vadd.f32 %v1731_v22, %v1499_v56  ;;  %v1960_v52 = vmax.f32 %v1952_v40, 0.0 }
 0x138   : > { %v1917_v35 = vadd.f32 %v1904_v31, %v1744_v33 }
 0x139   : > { %v1355_v38 = vpop.f32.mrf.mxu1 }
 0x13a   : > { %v1929_v4 = vadd.f32 %v3358_v20, %v1917_v35  ;;  %v1366_v41 = vadd.f32 %v1355_v38, %v3337_v14  ;;  %v1909_v44 = vpop.f32.mrf.mxu2 }
 0x13c   : > { %v1953_v48 = vadd.f32 %v2630_v37, %v1929_v4  ;;  %v1500_v50 = vadd.f32 %v1489_v5, %v1366_v41 }
 0x13e   : > { %v1961_v53 = vmax.f32 %v1953_v48, 0.0  ;;  %v1745_v54 = vadd.f32 %v1734_v27, %v1500_v50 }
 0x140   : > { %v2648_v59 = vpack.c.bf16 %v1961_v53, %v1960_v52  ;;  %v1918_v18 = vadd.f32 %v1907_v51, %v1745_v54 }
 0x141   : > { %v1357_v61 = vpop.f32.mrf.mxu1 }
 0x142   : > { %2659 = vst [vmem:[%s3370_s27 + $0x10] sm:$0xff] %v2648_v59   ;;  %v1367_v62 = vadd.f32 %v1357_v61, %v1194_v45  ;;  %v1930_v49 = vadd.f32 %v3358_v20, %v1918_v18 }
 0x144   : > { %v1501_v14 = vadd.f32 %v1491_v36, %v1367_v62  ;;  %v1954_v0 = vadd.f32 %v2633_v11, %v1930_v49 }
 0x146   : > { %v1746_v19 = vadd.f32 %v1736_v60, %v1501_v14  ;;  %v1962_v3 = vmax.f32 %v1954_v0, 0.0 }
 0x148   : > { %v1919_v12 = vadd.f32 %v1909_v44, %v1746_v19 }
 0x14a   : > { %v1931_v2 = vadd.f32 %v3358_v20, %v1919_v12 }
 0x14c   : > { %v1955_v17 = vadd.f32 %v2634_v42, %v1931_v2 }
 0x14e   : > { %v1963_v6 = vmax.f32 %v1955_v17, 0.0 }
 0x150   : > { %v2653_v9 = vpack.c.bf16 %v1963_v6, %v1962_v3 }
 0x152   : > { %2660 = vst [vmem:[%s3370_s27 + $0x18] sm:$0xff] %v2653_v9  }
 0x153 PF: > { %s14_s17 = sadd.s32 1, %s2725_s17   ;;  %s3412_s15 = smov %s2721_s16 }
 0x154   : > { %p11_p6 = scmp.ge.s32.totalorder %s14_s17, 4   ;;  %s3413_s16 = smov %s3415_s18 }
 0x156   :  { %13 = sbr.rel (!%p11_p6) target bundleno = 2 (0x2), region = 77 }

// kernel: backbone_base_forward.13
= control target key start
LH: loop header
LB: loop body
LE: loop exit
PB: predicated region body
PF: predicated region fallthrough
CT: control target
= control target key end

     0   :  { %s2627_s12 = smov 0   ;;  %s2629_s13 = smov 0   ;;  %s3259_s0 = inlined_call_operand.vmem [shape: bf16[2,10,10,128], index: 0, kind: input, shape index: {}]   ;;  %s3260_s1 = inlined_call_operand.vmem [shape: bf16[1152,128], index: 1, kind: input, shape index: {}]   ;;  %s3261_s2 = inlined_call_operand.vmem [shape: f32[1,128], index: 2, kind: input, shape index: {}]   ;;  %s3262_s3 = inlined_call_operand.vmem [shape: bf16[128,128], index: 3, kind: output, shape index: {}]  }
   0x1   :  { %s2631_s14 = smov 0  }
   0x2 LB: > { %s25_s15 = sadd.s32 1, %s2601_s13  ;;  %p2004_p0 = scmp.ge.s32.totalorder %s2605_s14, 1  ;;  %s2605_s14 = sphi %s2631_s14, %s13_s14   ;;  %s2601_s13 = sphi %s2629_s13, %s3268_s13   ;;  %s2597_s12 = sphi %s2627_s12, %s3267_s12  }
   0x3   : > { %p27_p1 = scmp.ge.s32.totalorder %s25_s15, 2  ;;  %p168_p2 = scmp.lt.s32.totalorder %s2605_s14, 3 }
   0x5   : > { %s3270_s15 = smov (%p27_p1, %s25_s15), 0  ;;  %p169_p3 = pnand %p2004_p0, %p168_p2 }
   0x6   : > { %p202_p4 = scmp.lt.s32.totalorder (!%p169_p3), %s2597_s12, 1 }
   0x7   : > { %172 = sbr.rel (%p169_p3) target bundleno = 337 (0x151), region = 32 }
   0xc   : > { %v2453_v0 = vld [vmem:[%s3260_s1 + $0x78] sm:$0xff]  ;;  %v2452_v2 = vld [vmem:[%s3260_s1 + $0x70] sm:$0xff]  ;;  %s203_s22 = scalar_select %p202_p4, %s2597_s12, 1  ;;  %v2451_v6 = vld [vmem:[%s3260_s1 + $0x68] sm:$0xff]  ;;  %vm255_vm0 = vsmask.f32 3328 }
   0xd   : > { %v2461_v1 = vld [vmem:[%s3260_s1 + $0xb8] sm:$0xff]  ;;  %2541 = vmatpush.bf16.msra.mxu1 %v2453_v0  ;;  %450 = vmatpush.bf16.msra.mxu0 %v2453_v0  ;;  %v2460_v3 = vld [vmem:[%s3260_s1 + $0xb0] sm:$0xff]  ;;  %v2459_v7 = vld [vmem:[%s3260_s1 + $0xa8] sm:$0xff]  ;;  %vm256_vm1 = vsmask.f32 7440  ;;  %vm604_vm2 = vcmask 1042432  }
   0xe   : > { %719 = vmatpush.bf16.msra.mxu2 %v2461_v1  ;;  %v2473_v4 = vld [vmem:[%s3260_s1 + $0xf8] sm:$0xff]  ;;  %s2557_s27 = smul.u32 80, %s203_s22  ;;  %v2472_v5 = vld [vmem:[%s3260_s1 + $0xf0] sm:$0xff]  ;;  %v2450_v11 = vld [vmem:[%s3260_s1 + $0x60] sm:$0xff]  ;;  %vm605_vm3 = vcmask 1046532  }
   0xf   : > { %853 = vmatpush.bf16.msra.mxu3 %v2473_v4  ;;  %v2458_v16 = vld [vmem:[%s3260_s1 + $0xa0] sm:$0xff]  ;;  %v2471_v17 = vld [vmem:[%s3260_s1 + $0xe8] sm:$0xff]  ;;  %v2449_v29 = vld [vmem:[%s3260_s1 + $0x58] sm:$0xff] }
  0x10   : > { %s2676_s9 = scalar_lea.vmem %s3259_s0, %s2557_s27  ;;  %v2470_v34 = vld [vmem:[%s3260_s1 + $0xe0] sm:$0xff]  ;;  %v2457_v44 = vld [vmem:[%s3260_s1 + $0x98] sm:$0xff]  ;;  %vm2714_vm4 = vmor %vm255_vm0, %vm256_vm1 }
  0x11   : > { %2542 = vmatpush.bf16.msra.mxu1 %v2452_v2  ;;  %451 = vmatpush.bf16.msra.mxu0 %v2452_v2  ;;  %v227_v8 = vld [vmem:[%s2676_s9 + $0x20] sm:$0xf]  ;;  %v228_v9 = vld [vmem:[%s2676_s9 + $0x28] sm:$0xf]  ;;  %v2681_v10 = vld [vmem:[%s2676_s9 + $0x24] sm:$0x1] }
  0x12   : > { %720 = vmatpush.bf16.msra.mxu2 %v2460_v3  ;;  %v2687_v12 = vld [vmem:[%s2676_s9 + $0x2c] sm:$0x1]  ;;  %v315_v13 = vshrl.u32 %v227_v8, 16  ;;  %v318_v14 = vshll.u32 %v227_v8, 16  ;;  %v329_v15 = vshrl.u32 %v228_v9, 16  ;;  %v332_v18 = vshll.u32 %v228_v9, 16  ;;  %vm2723_vm5 = vmor %vm604_vm2, %vm605_vm3 }
  0x13   : > { %854 = vmatpush.bf16.msra.mxu3 %v2472_v5  ;;  %v223_v19 = vld [vmem:[%s2676_s9] sm:$0xf]  ;;  %v324_v22 = vshll.u32 %v2681_v10, 16  ;;  %v224_v24 = vld [vmem:[%s2676_s9 + $0x8] sm:$0xf]  ;;  %v338_v26 = vshll.u32 %v2687_v12, 16 }
  0x14   : > { %v317_v20 = vrot.slane %v315_v13, 4  ;;  %v320_v21 = vrot.slane %v318_v14, 5  ;;  %v331_v23 = vrot.slane %v329_v15, 4  ;;  %v334_v25 = vrot.slane %v332_v18, 5  ;;  %v247_v27 = vld [vmem:[%s2676_s9 + $0x4] sm:$0x1] }
  0x15   : > { %2543 = vmatpush.bf16.msra.mxu1 %v2451_v6  ;;  %452 = vmatpush.bf16.msra.mxu0 %v2451_v6  ;;  %v248_v28 = vld [vmem:[%s2676_s9 + $0xc] sm:$0x1]  ;;  %v259_v31 = vshrl.u32 %v223_v19, 16  ;;  %v262_v32 = vshll.u32 %v223_v19, 16  ;;  %v268_v35 = vshll.u32 %v247_v27, 16  ;;  %v273_v36 = vshrl.u32 %v224_v24, 16 }
  0x16   : > { %721 = vmatpush.bf16.msra.mxu2 %v2459_v7  ;;  %v321_v30 = vor.u32 %v320_v21, %v317_v20  ;;  %v335_v33 = vor.u32 %v334_v25, %v331_v23  ;;  %v276_v37 = vshll.u32 %v224_v24, 16  ;;  %v580_v38 = vld [vmem:[%s2676_s9] sm:$0xe]  ;;  %v326_v39 = vrot.slane %v324_v22, 5  ;;  %v581_v43 = vld [vmem:[%s2676_s9 + $0x8] sm:$0xe] }
  0x17   : > { %855 = vmatpush.bf16.msra.mxu3 %v2471_v17  ;;  %v261_v40 = vrot.slane %v259_v31, 4  ;;  %v264_v41 = vrot.slane %v262_v32, 5  ;;  %v282_v42 = vshll.u32 %v248_v28, 16  ;;  %v340_v46 = vrot.slane %v338_v26, 5  ;;  %v2469_v56 = vld [vmem:[%s3260_s1 + $0xd8] sm:$0xff]  ;;  %v2448_v60 = vld [vmem:[%s3260_s1 + $0x50] sm:$0xff] }
  0x18   : > { %v322_v45 = vrot.slane %v321_v30, 4  ;;  %v275_v47 = vrot.slane %v273_v36, 4  ;;  %v278_v48 = vrot.slane %v276_v37, 5  ;;  %v336_v50 = vrot.slane %v335_v33, 4  ;;  %v229_v59 = vld [vmem:[%s2676_s9 + $0x30] sm:$0xf] }
  0x19   : > { %2544 = vmatpush.bf16.msra.mxu1 %v2450_v11  ;;  %453 = vmatpush.bf16.msra.mxu0 %v2450_v11  ;;  %v265_v51 = vor.u32 %v264_v41, %v261_v40  ;;  %v2088_v52 = vrot.slane %v580_v38, 9  ;;  %v609_v53 = vrot.slane %v247_v27, 5  ;;  %v270_v54 = vrot.slane %v268_v35, 5  ;;  %v2456_v0 = vld [vmem:[%s3260_s1 + $0x90] sm:$0xff]  ;;  %v230_v3 = vld [vmem:[%s2676_s9 + $0x38] sm:$0xf] }
  0x1a   : > { %722 = vmatpush.bf16.msra.mxu2 %v2458_v16  ;;  %v279_v55 = vor.u32 %v278_v48, %v275_v47  ;;  %v2089_v58 = vrot.slane %v581_v43, 9  ;;  %v284_v62 = vrot.slane %v282_v42, 5  ;;  %v613_v63 = vrot.slane %v248_v28, 5  ;;  %v225_v7 = vld [vmem:[%s2676_s9 + $0x10] sm:$0xf]  ;;  %v2447_v14 = vld [vmem:[%s3260_s1 + $0x48] sm:$0xff] }
  0x1b   : > { %856 = vmatpush.bf16.msra.mxu3 %v2470_v34  ;;  %v266_v61 = vrot.slane %v265_v51, 4  ;;  %v327_v1 = vsel %vm2714_vm4, %v322_v45, %v326_v39  ;;  %v341_v4 = vsel %vm2714_vm4, %v336_v50, %v340_v46  ;;  %v610_v5 = vsel %vm2723_vm5, %v2088_v52, %v609_v53  ;;  %v2468_v11 = vld [vmem:[%s3260_s1 + $0xd0] sm:$0xff]  ;;  %v2455_v19 = vld [vmem:[%s3260_s1 + $0x88] sm:$0xff]  ;;  %v226_v22 = vld [vmem:[%s2676_s9 + $0x18] sm:$0xf] }
  0x1c   : > { %v280_v2 = vrot.slane %v279_v55, 4  ;;  %v343_v6 = vshrl.u32 %v229_v59, 16  ;;  %v614_v9 = vsel %vm2723_vm5, %v2089_v58, %v613_v63  ;;  %v346_v13 = vshll.u32 %v229_v59, 16  ;;  %v2446_v24 = vld [vmem:[%s3260_s1 + $0x40] sm:$0xff]  ;;  %v2467_v31 = vld [vmem:[%s3260_s1 + $0xc8] sm:$0xff]  ;;  %v2481_v45 = vld [vmem:[%s3260_s1 + $0x138] sm:$0xff] }
  0x1d   : > { %2545 = vmatpush.bf16.msra.mxu1 %v2449_v29  ;;  %454 = vmatpush.bf16.msra.mxu0 %v2449_v29  ;;  %v271_v8 = vsel %vm2714_vm4, %v266_v61, %v270_v54  ;;  %v2752_v15 = vunpack.c.l.b16 %v327_v1  ;;  %v357_v17 = vshrl.u32 %v230_v3, 16  ;;  %v391_v18 = vunpack.c.l.b16 %v341_v4  ;;  %v2445_v29 = vld [vmem:[%s3260_s1 + $0x38] sm:$0xff]  ;;  %v2770_v32 = vld [vmem:[%s2676_s9 + $0x34] sm:$0x1]  ;;  %v2454_v42 = vld [vmem:[%s3260_s1 + $0x80] sm:$0xff] }
  0x1e   : > { %723 = vmatpush.bf16.msra.mxu2 %v2457_v44  ;;  %v285_v16 = vsel %vm2714_vm4, %v280_v2, %v284_v62  ;;  %v655_v20 = vunpack.c.l.b16 %v610_v5  ;;  %v360_v21 = vshll.u32 %v230_v3, 16  ;;  %v287_v23 = vshrl.u32 %v225_v7, 16  ;;  %v2773_v36 = vld [vmem:[%s2676_s9 + $0x3c] sm:$0x1]  ;;  %v2780_v43 = vld [vmem:[%s2676_s9 + $0x14] sm:$0x1] }
  0x1f   : > { %857 = vmatpush.bf16.msra.mxu3 %v2469_v56  ;;  %v386_v25 = vunpack.c.l.b16 %v271_v8  ;;  %v656_v26 = vunpack.c.l.b16 %v614_v9  ;;  %v345_v27 = vrot.slane %v343_v6, 4  ;;  %v290_v28 = vshll.u32 %v225_v7, 16  ;;  %v2783_v44 = vld [vmem:[%s2676_s9 + $0x1c] sm:$0x1]  ;;  %v2444_v52 = vld [vmem:[%s3260_s1 + $0x30] sm:$0xff]  ;;  %v2466_v58 = vld [vmem:[%s3260_s1 + $0xc0] sm:$0xff] }
  0x20   : > { %v387_v30 = vunpack.c.l.b16 %v285_v16  ;;  %v348_v33 = vrot.slane %v346_v13, 5  ;;  %v359_v34 = vrot.slane %v357_v17, 4  ;;  %v362_v35 = vrot.slane %v360_v21, 5  ;;  %v2501_v48 = vld [vmem:[%s3260_s1 + $0x1b8] sm:$0xff]  ;;  %v2138_v63 = vld [vmem:[%s2676_s9 + $0x8] sm:$0xf] }
  0x21   : > { %2546 = vmatpush.bf16.msra.mxu1 %v2448_v60  ;;  %455 = vmatpush.bf16.msra.mxu0 %v2448_v60  ;;  %v289_v37 = vrot.slane %v287_v23, 4  ;;  %v292_v38 = vrot.slane %v290_v28, 5  ;;  %v301_v39 = vshrl.u32 %v226_v22, 16  ;;  %v304_v40 = vshll.u32 %v226_v22, 16  ;;  %v2480_v1 = vld [vmem:[%s3260_s1 + $0x130] sm:$0xff]  ;;  %v2509_v2 = vld [vmem:[%s3260_s1 + $0x1f8] sm:$0xff] }
  0x22   : > { %724 = vmatpush.bf16.msra.mxu2 %v2456_v0  ;;  %v396_v41 = vpack.c.b16 %v391_v18, %v2752_v15  ;;  %v663_v46 = vpack.c.b16 %v656_v26, %v655_v20  ;;  %v352_v47 = vshll.u32 %v2770_v32, 16  ;;  %v394_v53 = vpack.c.b16 %v387_v30, %v386_v25  ;;  %v2462_v0 = vld [vmem:[%s2676_s9 + $0xc] sm:$0xf0]  ;;  %v583_v5 = vld [vmem:[%s2676_s9 + $0x18] sm:$0xe]  ;;  %v2479_v25 = vld [vmem:[%s3260_s1 + $0x128] sm:$0xff] }
  0x23   : > { %858 = vmatpush.bf16.msra.mxu3 %v2468_v11  ;;  %v303_v50 = vrot.slane %v301_v39, 4  ;;  %v306_v51 = vrot.slane %v304_v40, 5  ;;  %v349_v54 = vor.u32 %v348_v33, %v345_v27  ;;  %v363_v55 = vor.u32 %v362_v35, %v359_v34  ;;  %v582_v4 = vld [vmem:[%s2676_s9 + $0x10] sm:$0xe]  ;;  %v2184_v13 = vld [vmem:[%s2676_s9 + $0x8] sm:$0xf] }
  0x24   : > { %v366_v56 = vshll.u32 %v2773_v36, 16  ;;  %v293_v59 = vor.u32 %v292_v38, %v289_v37  ;;  %v296_v60 = vshll.u32 %v2780_v43, 16  ;;  %v310_v62 = vshll.u32 %v2783_v44, 16  ;;  %v2500_v6 = vld [vmem:[%s3260_s1 + $0x1b0] sm:$0xff]  ;;  %v2499_v26 = vld [vmem:[%s3260_s1 + $0x1a8] sm:$0xff]  ;;  %v2442_v37 = vld [vmem:[%s3260_s1 + $0x20] sm:$0xff] }
  0x25   : > { %2547 = vmatpush.bf16.msra.mxu1 %v2447_v14  ;;  %456 = vmatpush.bf16.msra.mxu0 %v2447_v14  ;;  %v307_v61 = vor.u32 %v306_v51, %v303_v50  ;;  %v354_v3 = vrot.slane %v352_v47, 5  ;;  %v350_v7 = vrot.slane %v349_v54, 4  ;;  %v364_v8 = vrot.slane %v363_v55, 4  ;;  %v2186_v18 = vld [vmem:[%s2676_s9 + $0x10] sm:$0xf]  ;;  %v2507_v40 = vld [vmem:[%s3260_s1 + $0x1e8] sm:$0xff] }
  0x26   : > { %725 = vmatpush.bf16.msra.mxu2 %v2455_v19  ;;  %v368_v9 = vrot.slane %v366_v56, 5  ;;  %v2139_v11 = vor.u32 %v2462_v0, %v2138_v63  ;;  %v294_v14 = vrot.slane %v293_v59, 4  ;;  %v298_v15 = vrot.slane %v296_v60, 5  ;;  %v2443_v19 = vld [vmem:[%s3260_s1 + $0x28] sm:$0xff]  ;;  %v2441_v55 = vld [vmem:[%s3260_s1 + $0x18] sm:$0xff] }
  0x27   : > { %859 = vmatpush.bf16.msra.mxu3 %v2467_v31  ;;  %v308_v16 = vrot.slane %v307_v61, 4  ;;  %v312_v17 = vrot.slane %v310_v62, 5  ;;  %v2090_v20 = vrot.slane %v582_v4, 9  ;;  %v617_v21 = vrot.slane %v2780_v43, 5  ;;  %v2478_v43 = vld [vmem:[%s3260_s1 + $0x120] sm:$0xff] }
  0x28   : > { %v2091_v22 = vrot.slane %v583_v5, 9  ;;  %v621_v23 = vrot.slane %v2783_v44, 5  ;;  %v355_v27 = vsel %vm2714_vm4, %v350_v7, %v354_v3  ;;  %v369_v28 = vsel %vm2714_vm4, %v364_v8, %v368_v9  ;;  %v2498_v44 = vld [vmem:[%s3260_s1 + $0x1a0] sm:$0xff]  ;;  %v2855_v47 = vld [vmem:[%s2676_s9 + $0xc] sm:$0x1]  ;;  %v2476_v7 = vld [vmem:[%s3260_s1 + $0x110] sm:$0xff] }
  0x29   : > { %2548 = vmatpush.bf16.msra.mxu1 %v2446_v24  ;;  %457 = vmatpush.bf16.msra.mxu0 %v2446_v24  ;;  %v2508_v24 = vld [vmem:[%s3260_s1 + $0x1f0] sm:$0xff]  ;;  %v910_v30 = vshll.u32 %v2184_v13, 16  ;;  %v299_v31 = vsel %vm2714_vm4, %v294_v14, %v298_v15  ;;  %v313_v33 = vsel %vm2714_vm4, %v308_v16, %v312_v17  ;;  %v921_v34 = vshrl.u32 %v2186_v18, 16  ;;  %v2142_v62 = vld [vmem:[%s2676_s9 + $0x18] sm:$0xf] }
  0x2a   : > { %726 = vmatpush.bf16.msra.mxu2 %v2454_v42  ;;  %v924_v35 = vshll.u32 %v2186_v18, 16  ;;  %v618_v38 = vsel %vm2723_vm5, %v2090_v20, %v617_v21  ;;  %v622_v39 = vsel %vm2723_vm5, %v2091_v22, %v621_v23  ;;  %v393_v42 = vunpack.c.l.b16 %v369_v28  ;;  %v2861_v56 = vld [vmem:[%s2676_s9 + $0x14] sm:$0x1]  ;;  %v2463_v63 = vld [vmem:[%s2676_s9 + $0x1c] sm:$0xf0]  ;;  %v2497_v17 = vld [vmem:[%s3260_s1 + $0x198] sm:$0xff] }
  0x2b   : > { %860 = vmatpush.bf16.msra.mxu3 %v2466_v58  ;;  %v912_v50 = vrot.slane %v910_v30, 5  ;;  %v657_v51 = vunpack.c.l.b16 %v618_v38  ;;  %v2477_v58 = vld [vmem:[%s3260_s1 + $0x118] sm:$0xff]  ;;  %v916_v59 = vshll.u32 %v2855_v47, 16  ;;  %v930_v4 = vshll.u32 %v2861_v56, 16  ;;  %v585_v5 = vld [vmem:[%s2676_s9 + $0x28] sm:$0xe] }
  0x2c   : > { %468 = vmatmul.bf16.vlgmr.msra.gmra.mxu1 %v396_v41  ;;  %458 = vmatmul.bf16.vlgmr.msra.gmra.mxu0 %v394_v53  ;;  %v392_v41 = vunpack.c.l.b16 %v355_v27  ;;  %v923_v53 = vrot.slane %v921_v34, 4  ;;  %v926_v54 = vrot.slane %v924_v35, 5  ;;  %v2143_v8 = vor.u32 %v2463_v63, %v2142_v62  ;;  %v2188_v20 = vld [vmem:[%s2676_s9 + $0x18] sm:$0xf]  ;;  %v2506_v21 = vld [vmem:[%s3260_s1 + $0x1e0] sm:$0xff]  ;;  %v2496_v23 = vld [vmem:[%s3260_s1 + $0x190] sm:$0xff] }
  0x2d   : > { %551 = vmatpush.bf16.msrb.mxu1 %v2445_v29  ;;  %1098 = vmatpush.bf16.msrb.mxu0 %v2481_v45  ;;  %v907_v29 = vshrl.u32 %v2184_v13, 16  ;;  %v388_v45 = vunpack.c.l.b16 %v299_v31  ;;  %v918_v9 = vrot.slane %v916_v59, 5  ;;  %v625_v14 = vrot.slane %v2681_v10, 5  ;;  %v2439_v10 = vld [vmem:[%s3260_s1 + $0x8] sm:$0xff]  ;;  %v2190_v22 = vld [vmem:[%s2676_s9 + $0x20] sm:$0xf] }
  0x2e   : > { %1405 = vmatpush.bf16.msrb.mxu2 %v2501_v48  ;;  %861 = vmatmul.bf16.vlgmr.msra.gmra.mxu3 %v2139_v11  ;;  %v397_v60 = vpack.c.b16 %v393_v42, %v392_v41  ;;  %v927_v3 = vor.u32 %v926_v54, %v923_v53  ;;  %v2093_v15 = vrot.slane %v585_v5, 9  ;;  %v629_v16 = vrot.slane %v2687_v12, 5  ;;  %v2475_v12 = vld [vmem:[%s3260_s1 + $0x108] sm:$0xff]  ;;  %v2438_v34 = vld [vmem:[%s3260_s1] sm:$0xff]  ;;  %v2488_v53 = vld [vmem:[%s3260_s1 + $0x170] sm:$0xff] }
  0x2f   : > { %727 = vmatmul.bf16.vlgmr.msra.gmra.mxu2 %v663_v46  ;;  %1650 = vmatpush.bf16.msrb.mxu3 %v2509_v2  ;;  %v389_v46 = vunpack.c.l.b16 %v313_v33  ;;  %v909_v48 = vrot.slane %v907_v29, 4  ;;  %v935_v28 = vshrl.u32 %v2188_v20, 16  ;;  %v938_v30 = vshll.u32 %v2188_v20, 16  ;;  %v2042_v35 = vld [vmem:[%s2676_s9] sm:$0xf] }
  0x30   : > { %v928_v18 = vrot.slane %v927_v3, 4  ;;  %v630_v27 = vsel %vm2723_vm5, %v2093_v15, %v629_v16  ;;  %v949_v31 = vshrl.u32 %v2190_v22, 16  ;;  %v952_v33 = vshll.u32 %v2190_v22, 16  ;;  %v2474_v38 = vld [vmem:[%s3260_s1 + $0x100] sm:$0xff]  ;;  %v2464_v62 = vld [vmem:[%s2676_s9 + $0x2c] sm:$0xf0] }
  0x31   : > { %552 = vmatpush.bf16.msrb.mxu1 %v2444_v52  ;;  %1099 = vmatpush.bf16.msrb.mxu0 %v2480_v1  ;;  %v658_v52 = vunpack.c.l.b16 %v622_v39  ;;  %v395_v61 = vpack.c.b16 %v389_v46, %v388_v45  ;;  %v913_v0 = vor.u32 %v912_v50, %v909_v48  ;;  %v584_v1 = vld [vmem:[%s2676_s9 + $0x20] sm:$0xe]  ;;  %v2434_v39 = vld [vmem:[%s2676_s9 + $0x4] sm:$0xf0]  ;;  %v2925_v45 = vld [vmem:[%s3260_s1 + $0x238] sm:$0xff]  ;;  %v937_v48 = vrot.slane %v935_v28, 4 }
  0x32   : > { %1406 = vmatpush.bf16.msrb.mxu2 %v2500_v6  ;;  %v2440_v6 = vld [vmem:[%s3260_s1 + $0x10] sm:$0xff]  ;;  %v2092_v11 = vrot.slane %v584_v1, 9  ;;  %v2928_v46 = vld [vmem:[%s2676_s9 + $0x24] sm:$0x1]  ;;  %v940_v50 = vrot.slane %v938_v30, 5  ;;  %v2043_v54 = vor.u32 %v2434_v39, %v2042_v35  ;;  %v633_v20 = vrot.slane %v2770_v32, 5 }
  0x33   : > { %1651 = vmatpush.bf16.msrb.mxu3 %v2508_v24  ;;  %v664_v2 = vpack.c.b16 %v658_v52, %v657_v51  ;;  %v914_v13 = vrot.slane %v913_v0, 4  ;;  %v2505_v24 = vld [vmem:[%s3260_s1 + $0x1d8] sm:$0xff]  ;;  %v951_v51 = vrot.slane %v949_v31, 4  ;;  %v954_v52 = vrot.slane %v952_v33, 5  ;;  %v2941_v1 = vld [vmem:[%s3260_s1 + $0x230] sm:$0xff]  ;;  %v2494_v22 = vld [vmem:[%s3260_s1 + $0x180] sm:$0xff] }
  0x34   : > { %v958_v59 = vshll.u32 %v2928_v46, 16  ;;  %v941_v63 = vor.u32 %v940_v50, %v937_v48  ;;  %v2192_v3 = vld [vmem:[%s2676_s9 + $0x28] sm:$0xf]  ;;  %v587_v5 = vld [vmem:[%s2676_s9 + $0x38] sm:$0xe]  ;;  %v2981_v28 = vld [vmem:[%s3260_s1 + $0x220] sm:$0xff] }
  0x35   : > { %553 = vmatpush.bf16.msrb.mxu1 %v2443_v19  ;;  %1100 = vmatpush.bf16.msrb.mxu0 %v2479_v25  ;;  %v932_v19 = vrot.slane %v930_v4, 5  ;;  %v919_v25 = vsel %vm2714_vm4, %v914_v13, %v918_v9  ;;  %v955_v0 = vor.u32 %v954_v52, %v951_v51  ;;  %v586_v4 = vld [vmem:[%s2676_s9 + $0x30] sm:$0xe]  ;;  %v963_v15 = vshrl.u32 %v2192_v3, 16  ;;  %v2503_v32 = vld [vmem:[%s3260_s1 + $0x1c8] sm:$0xff]  ;;  %v2485_v31 = vld [vmem:[%s3260_s1 + $0x158] sm:$0xff] }
  0x36   : > { %1407 = vmatpush.bf16.msrb.mxu2 %v2499_v26  ;;  %v626_v26 = vsel %vm2723_vm5, %v2092_v11, %v625_v14  ;;  %v960_v9 = vrot.slane %v958_v59, 5  ;;  %v2194_v11 = vld [vmem:[%s2676_s9 + $0x30] sm:$0xf]  ;;  %v942_v13 = vrot.slane %v941_v63, 4  ;;  %v966_v16 = vshll.u32 %v2192_v3, 16 }
  0x37   : > { %1652 = vmatpush.bf16.msrb.mxu3 %v2507_v40  ;;  %v933_v29 = vsel %vm2714_vm4, %v928_v18, %v932_v19  ;;  %v1034_v40 = vunpack.c.l.b16 %v919_v25  ;;  %v659_v42 = vunpack.c.l.b16 %v626_v26  ;;  %v956_v14 = vrot.slane %v955_v0, 4  ;;  %v2960_v18 = vld [vmem:[%s3260_s1 + $0x228] sm:$0xff]  ;;  %v2994_v39 = vld [vmem:[%s2676_s9 + $0x34] sm:$0x1]  ;;  %v2338_v51 = vld [vmem:[%s2676_s9 + $0x18] sm:$0xf] }
  0x38   : > { %v1035_v41 = vunpack.c.l.b16 %v933_v29  ;;  %v2094_v19 = vrot.slane %v586_v4, 9  ;;  %v965_v26 = vrot.slane %v963_v15, 4  ;;  %v2991_v33 = vld [vmem:[%s2676_s9 + $0x2c] sm:$0x1]  ;;  %v986_v59 = vshll.u32 %v2994_v39, 16 }
  0x39   : > { %554 = vmatpush.bf16.msrb.mxu1 %v2442_v37  ;;  %1101 = vmatpush.bf16.msrb.mxu0 %v2478_v43  ;;  %v2489_v37 = vld [vmem:[%s3260_s1 + $0x178] sm:$0xff]  ;;  %v660_v43 = vunpack.c.l.b16 %v630_v27  ;;  %v961_v25 = vsel %vm2714_vm4, %v956_v14, %v960_v9  ;;  %v968_v27 = vrot.slane %v966_v16, 5  ;;  %v972_v52 = vshll.u32 %v2991_v33, 16  ;;  %v2465_v63 = vld [vmem:[%s2676_s9 + $0x3c] sm:$0xf0] }
  0x3a   : > { %1408 = vmatpush.bf16.msrb.mxu2 %v2498_v44  ;;  %v2920_v44 = vld [vmem:[%s2676_s9 + $0x1c] sm:$0x1]  ;;  %v634_v29 = vsel %vm2723_vm5, %v2094_v19, %v633_v20  ;;  %v2196_v0 = vld [vmem:[%s2676_s9 + $0x38] sm:$0xf]  ;;  %v988_v15 = vrot.slane %v986_v59, 5  ;;  %v2502_v19 = vld [vmem:[%s3260_s1 + $0x1c0] sm:$0xff] }
  0x3b   : > { %1653 = vmatpush.bf16.msrb.mxu3 %v2506_v21  ;;  %v2095_v21 = vrot.slane %v587_v5, 9  ;;  %v969_v50 = vor.u32 %v968_v27, %v965_v26  ;;  %v3012_v5 = vld [vmem:[%s2676_s9 + $0x14] sm:$0x1]  ;;  %v2198_v16 = vld [vmem:[%s2676_s9 + $0x40] sm:$0xf]  ;;  %v994_v20 = vshll.u32 %v2196_v0, 16 }
  0x3c   : > { %473 = vmatmul.bf16.gmra.mxu1 %v397_v60  ;;  %463 = vmatmul.bf16.gmra.mxu0 %v395_v61  ;;  %v665_v60 = vpack.c.b16 %v660_v43, %v659_v42  ;;  %v2146_v61 = vld [vmem:[%s2676_s9 + $0x28] sm:$0xf]  ;;  %v2435_v42 = vld [vmem:[%s2676_s9 + $0x14] sm:$0xf0]  ;;  %v661_v43 = vunpack.c.l.b16 %v634_v29  ;;  %v3034_v27 = vld [vmem:[%s3260_s1 + $0x210] sm:$0xff] }
  0x3d   : > { %555 = vmatpush.bf16.msrb.mxu1 %v2441_v55  ;;  %1102 = vmatpush.bf16.msrb.mxu0 %v2477_v58  ;;  %v1042_v55 = vpack.c.b16 %v1035_v41, %v1034_v40  ;;  %v944_v58 = vshll.u32 %v2920_v44, 16  ;;  %v2336_v40 = vld [vmem:[%s2676_s9 + $0x10] sm:$0xf]  ;;  %v970_v4 = vrot.slane %v969_v50, 4  ;;  %v2232_v29 = vld [vmem:[%s2676_s9 + $0x8] sm:$0xe] }
  0x3e   : > { %1409 = vmatpush.bf16.msrb.mxu2 %v2497_v17  ;;  %866 = vmatmul.bf16.gmra.mxu3 %v2143_v8  ;;  %v2504_v17 = vld [vmem:[%s3260_s1 + $0x1d0] sm:$0xff] }
  0x3f   : > { %732 = vmatmul.bf16.gmra.mxu2 %v664_v2  ;;  %1654 = vmatpush.bf16.msrb.mxu3 %v2505_v24  ;;  %v2487_v2 = vld [vmem:[%s3260_s1 + $0x168] sm:$0xff]  ;;  %v946_v8 = vrot.slane %v944_v58, 5  ;;  %v980_v24 = vshll.u32 %v2194_v11, 16  ;;  %v2046_v41 = vld [vmem:[%s2676_s9 + $0x10] sm:$0xf] }
  0x41   : > { %556 = vmatpush.bf16.msrb.mxu1 %v2440_v6  ;;  %1103 = vmatpush.bf16.msrb.mxu0 %v2476_v7  ;;  %v2495_v6 = vld [vmem:[%s3260_s1 + $0x188] sm:$0xff]  ;;  %v2147_v7 = vor.u32 %v2464_v62, %v2146_v61  ;;  %v982_v35 = vrot.slane %v980_v24, 5  ;;  %v2047_v61 = vor.u32 %v2435_v42, %v2046_v41  ;;  %v3047_v42 = vld [vmem:[%s2676_s9 + $0x3c] sm:$0x1] }
  0x42   : > { %1410 = vmatpush.bf16.msrb.mxu2 %v2496_v23  ;;  %v977_v23 = vshrl.u32 %v2194_v11, 16 }
  0x43   : > { %1655 = vmatpush.bf16.msrb.mxu3 %v2504_v17  ;;  %v991_v17 = vshrl.u32 %v2196_v0, 16 }
  0x45   : > { %557 = vmatpush.bf16.msrb.mxu1 %v2439_v10  ;;  %1104 = vmatpush.bf16.msrb.mxu0 %v2475_v12  ;;  %v637_v10 = vrot.slane %v2773_v36, 5  ;;  %v2486_v12 = vld [vmem:[%s3260_s1 + $0x160] sm:$0xff]  ;;  %v947_v36 = vsel %vm2714_vm4, %v942_v13, %v946_v8 }
  0x46   : > { %1411 = vmatpush.bf16.msrb.mxu2 %v2495_v6  ;;  %v974_v6 = vrot.slane %v972_v52, 5 }
  0x47   : > { %v638_v30 = vsel %vm2723_vm5, %v2095_v21, %v637_v10  ;;  %1656 = vmatpush.bf16.msrb.mxu3 %v2503_v32  ;;  %v1468_v10 = vshll.u32 %v3012_v5, 16  ;;  %v1165_v32 = vrot.slane %v2861_v56, 5  ;;  %v993_v56 = vrot.slane %v991_v17, 4 }
  0x48   : > { %v662_v48 = vunpack.c.l.b16 %v638_v30 }
  0x49   : > { %558 = vmatpush.bf16.msrb.mxu1 %v2438_v34  ;;  %1105 = vmatpush.bf16.msrb.mxu0 %v2474_v38  ;;  %v979_v34 = vrot.slane %v977_v23, 4  ;;  %v1037_v38 = vunpack.c.l.b16 %v961_v25  ;;  %v1161_v23 = vrot.slane %v2855_v47, 5  ;;  %v1008_v25 = vshll.u32 %v2198_v16, 16 }
  0x4a   : > { %1412 = vmatpush.bf16.msrb.mxu2 %v2494_v22  ;;  %v666_v3 = vpack.c.b16 %v662_v48, %v661_v43  ;;  %v975_v47 = vsel %vm2714_vm4, %v970_v4, %v974_v6  ;;  %v2290_v4 = vld [vmem:[%s2676_s9 + $0x10] sm:$0xf] }
  0x4b   : > { %v983_v58 = vor.u32 %v982_v35, %v979_v34  ;;  %1657 = vmatpush.bf16.msrb.mxu3 %v2502_v19  ;;  %v2233_v34 = vld [vmem:[%s2676_s9 + $0x10] sm:$0xe]  ;;  %v2240_v35 = vrot.slane %v2232_v29, 9  ;;  %v1010_v52 = vrot.slane %v1008_v25, 5 }
  0x4c   : > { %559 = vmatmul.bf16.vlgmr.msrb.gmra.mxu1 %v2043_v54  ;;  %1106 = vmatmul.bf16.vlgmr.msrb.gmra.mxu0 %v1042_v55  ;;  %v1462_v54 = vshll.u32 %v2336_v40, 16  ;;  %v1473_v55 = vshrl.u32 %v2338_v51, 16  ;;  %v2241_v41 = vrot.slane %v2233_v34, 9  ;;  %v2510_v34 = vld [vmem:[%s3260_s1 + $0x200] sm:$0xff] }
  0x4d   : > { %1271 = vmatpush.bf16.msra.mxu1 %v2489_v37  ;;  %1823 = vmatpush.bf16.msra.mxu0 %v2925_v45  ;;  %v1036_v37 = vunpack.c.l.b16 %v947_v36  ;;  %v984_v14 = vrot.slane %v983_v58, 4  ;;  %v1005_v36 = vshrl.u32 %v2198_v16, 16  ;;  %v1162_v50 = vsel %vm2723_vm5, %v2240_v35, %v1161_v23  ;;  %v3079_v23 = vld [vmem:[%s2676_s9 + $0x2c] sm:$0x1] }
  0x4e   : > { %871 = vmatmul.bf16.gmra.mxu3 %v2147_v7  ;;  %2549 = vmatpush.bf16.msra.mxu2 %v2925_v45  ;;  %v2150_v45 = vld [vmem:[%s2676_s9 + $0x38] sm:$0xf]  ;;  %v3015_v7 = vld [vmem:[%s2676_s9 + $0x1c] sm:$0x1]  ;;  %v1464_v9 = vrot.slane %v1462_v54, 5  ;;  %v1475_v11 = vrot.slane %v1473_v55, 4  ;;  %v1207_v54 = vunpack.c.l.b16 %v1162_v50  ;;  %v1038_v58 = vunpack.c.l.b16 %v975_v47 }
  0x4f   : > { %737 = vmatmul.bf16.gmra.mxu2 %v665_v60  ;;  %v2484_v60 = vld [vmem:[%s3260_s1 + $0x150] sm:$0xff]  ;;  %v1043_v62 = vpack.c.b16 %v1037_v38, %v1036_v37  ;;  %v2151_v13 = vor.u32 %v2465_v63, %v2150_v45  ;;  %v1482_v24 = vshll.u32 %v3015_v7, 16  ;;  %v989_v30 = vsel %vm2714_vm4, %v984_v14, %v988_v15  ;;  %v2050_v55 = vld [vmem:[%s2676_s9 + $0x20] sm:$0xf]  ;;  %v2436_v45 = vld [vmem:[%s2676_s9 + $0x24] sm:$0xf0] }
  0x50   : > { %v996_v37 = vrot.slane %v994_v20, 5  ;;  %v1039_v59 = vunpack.c.l.b16 %v989_v30  ;;  %v1000_v63 = vshll.u32 %v3047_v42, 16  ;;  %v2051_v17 = vor.u32 %v2436_v45, %v2050_v55  ;;  %v2054_v55 = vld [vmem:[%s2676_s9 + $0x30] sm:$0xf] }
  0x51   : > { %1272 = vmatpush.bf16.msra.mxu1 %v2488_v53  ;;  %1824 = vmatpush.bf16.msra.mxu0 %v2941_v1  ;;  %v1459_v53 = vshrl.u32 %v2336_v40, 16  ;;  %v1470_v40 = vrot.slane %v1468_v10, 5  ;;  %v1484_v48 = vrot.slane %v1482_v24, 5 }
  0x52   : > { %2550 = vmatpush.bf16.msra.mxu2 %v2941_v1  ;;  %v2483_v1 = vld [vmem:[%s3260_s1 + $0x148] sm:$0xff] }
  0x53   : > { %v1461_v8 = vrot.slane %v1459_v53, 4  ;;  %v1166_v53 = vsel %vm2723_vm5, %v2241_v41, %v1165_v32 }
  0x55   : > { %1273 = vmatpush.bf16.msra.mxu1 %v2487_v2  ;;  %1825 = vmatpush.bf16.msra.mxu0 %v2960_v18  ;;  %v1476_v2 = vshll.u32 %v2338_v51, 16  ;;  %v1465_v21 = vor.u32 %v1464_v9, %v1461_v8  ;;  %v1007_v51 = vrot.slane %v1005_v36, 4 }
  0x56   : > { %2551 = vmatpush.bf16.msra.mxu2 %v2960_v18  ;;  %v2511_v18 = vld [vmem:[%s3260_s1 + $0x208] sm:$0xff] }
  0x57   : > { %v1478_v22 = vrot.slane %v1476_v2, 5  ;;  %v1466_v38 = vrot.slane %v1465_v21, 4  ;;  %v2340_v2 = vld [vmem:[%s2676_s9 + $0x20] sm:$0xf] }
  0x58   : > { %v1487_v9 = vshrl.u32 %v2340_v2, 16 }
  0x59   : > { %1274 = vmatpush.bf16.msra.mxu1 %v2486_v12  ;;  %1826 = vmatpush.bf16.msra.mxu0 %v2981_v28  ;;  %v2513_v12 = vld [vmem:[%s3260_s1 + $0x218] sm:$0xff]  ;;  %v1479_v26 = vor.u32 %v1478_v22, %v1475_v11  ;;  %v1471_v0 = vsel %vm2714_vm4, %v1466_v38, %v1470_v40  ;;  %v1490_v11 = vshll.u32 %v2340_v2, 16  ;;  %v3076_v22 = vld [vmem:[%s2676_s9 + $0x24] sm:$0x1]  ;;  %v2235_v38 = vld [vmem:[%s2676_s9 + $0x20] sm:$0xe] }
  0x5a   : > { %2552 = vmatpush.bf16.msra.mxu2 %v2981_v28  ;;  %v1011_v28 = vor.u32 %v1010_v52, %v1007_v51  ;;  %v1489_v19 = vrot.slane %v1487_v9, 4  ;;  %v1586_v21 = vunpack.c.l.b16 %v1471_v0  ;;  %v1169_v52 = vrot.slane %v2920_v44, 5 }
  0x5b   : > { %v1480_v43 = vrot.slane %v1479_v26, 4  ;;  %v1492_v20 = vrot.slane %v1490_v11, 5  ;;  %v1002_v26 = vrot.slane %v1000_v63, 5  ;;  %v2384_v63 = vld [vmem:[%s2676_s9 + $0x10] sm:$0xe] }
  0x5c   : > { %564 = vmatmul.bf16.gmra.mxu1 %v2047_v61  ;;  %1111 = vmatmul.bf16.gmra.mxu0 %v1043_v62  ;;  %v1208_v61 = vunpack.c.l.b16 %v1166_v53  ;;  %v997_v62 = vor.u32 %v996_v37, %v993_v56  ;;  %v1012_v29 = vrot.slane %v1011_v28, 4  ;;  %v1496_v56 = vshll.u32 %v3076_v22, 16  ;;  %v2234_v37 = vld [vmem:[%s2676_s9 + $0x18] sm:$0xe] }
  0x5d   : > { %1275 = vmatpush.bf16.msra.mxu1 %v2485_v31  ;;  %1827 = vmatpush.bf16.msra.mxu0 %v2513_v12  ;;  %v2482_v31 = vld [vmem:[%s3260_s1 + $0x140] sm:$0xff]  ;;  %v1485_v6 = vsel %vm2714_vm4, %v1480_v43, %v1484_v48  ;;  %v1493_v30 = vor.u32 %v1492_v20, %v1489_v19  ;;  %v2242_v50 = vrot.slane %v2234_v37, 9  ;;  %v2243_v53 = vrot.slane %v2235_v38, 9 }
  0x5e   : > { %876 = vmatmul.bf16.gmra.mxu3 %v2151_v13  ;;  %v3071_v8 = vpack.c.b16 %v1208_v61, %v1207_v54  ;;  %v2490_v13 = vld [vmem:[%s2676_s9 + $0x14] sm:$0xf0]  ;;  %2553 = vmatpush.bf16.msra.mxu2 %v2513_v12  ;;  %v1587_v10 = vunpack.c.l.b16 %v1485_v6  ;;  %v998_v25 = vrot.slane %v997_v62, 4  ;;  %v1510_v12 = vshll.u32 %v3079_v23, 16 }
  0x5f   : > { %742 = vmatmul.bf16.gmra.mxu2 %v666_v3  ;;  %v2342_v3 = vld [vmem:[%s2676_s9 + $0x28] sm:$0xf]  ;;  %v2291_v36 = vor.u32 %v2490_v13, %v2290_v4  ;;  %v1498_v43 = vrot.slane %v1496_v56, 5  ;;  %v1173_v54 = vrot.slane %v2928_v46, 5  ;;  %v1713_v62 = vrot.slane %v3012_v5, 5 }
  0x60   : > { %v1501_v15 = vshrl.u32 %v2342_v3, 16  ;;  %v1504_v16 = vshll.u32 %v2342_v3, 16  ;;  %v1003_v40 = vsel %vm2714_vm4, %v998_v25, %v1002_v26  ;;  %v1512_v48 = vrot.slane %v1510_v12, 5  ;;  %v2385_v3 = vld [vmem:[%s2676_s9 + $0x18] sm:$0xe] }
  0x61   : > { %1276 = vmatpush.bf16.msra.mxu1 %v2484_v60  ;;  %1828 = vmatpush.bf16.msra.mxu0 %v3034_v27  ;;  %v3060_v60 = vld [vmem:[%s2676_s9 + $0x44] sm:$0x1]  ;;  %v1040_v45 = vunpack.c.l.b16 %v1003_v40  ;;  %v1174_v61 = vsel %vm2723_vm5, %v2243_v53, %v1173_v54  ;;  %v2344_v4 = vld [vmem:[%s2676_s9 + $0x30] sm:$0xf]  ;;  %v2346_v6 = vld [vmem:[%s2676_s9 + $0x38] sm:$0xf] }
  0x62   : > { %v1014_v14 = vshll.u32 %v3060_v60, 16  ;;  %v1503_v24 = vrot.slane %v1501_v15, 4  ;;  %v1506_v32 = vrot.slane %v1504_v16, 5  ;;  %2554 = vmatpush.bf16.msra.mxu2 %v3034_v27  ;;  %v1494_v27 = vrot.slane %v1493_v30, 4  ;;  %v2294_v16 = vld [vmem:[%s2676_s9 + $0x20] sm:$0xf] }
  0x63   : > { %v1210_v0 = vunpack.c.l.b16 %v1174_v61  ;;  %v1515_v11 = vshrl.u32 %v2344_v4, 16  ;;  %v1518_v13 = vshll.u32 %v2344_v4, 16  ;;  %v1529_v5 = vshrl.u32 %v2346_v6, 16  ;;  %v2236_v53 = vld [vmem:[%s2676_s9 + $0x28] sm:$0xe] }
  0x64   : > { %v1016_v47 = vrot.slane %v1014_v14, 5  ;;  %v1507_v35 = vor.u32 %v1506_v32, %v1503_v24  ;;  %v1499_v46 = vsel %vm2714_vm4, %v1494_v27, %v1498_v43  ;;  %v1717_v15 = vrot.slane %v3015_v7, 5  ;;  %v2237_v54 = vld [vmem:[%s2676_s9 + $0x30] sm:$0xe]  ;;  %v2386_v4 = vld [vmem:[%s2676_s9 + $0x20] sm:$0xe] }
  0x65   : > { %1277 = vmatpush.bf16.msra.mxu1 %v2483_v1  ;;  %1829 = vmatpush.bf16.msra.mxu0 %v2511_v18  ;;  %v1044_v1 = vpack.c.b16 %v1039_v59, %v1038_v58  ;;  %v1170_v59 = vsel %vm2723_vm5, %v2242_v50, %v1169_v52  ;;  %v1588_v19 = vunpack.c.l.b16 %v1499_v46  ;;  %v1517_v24 = vrot.slane %v1515_v11, 4  ;;  %v2298_v50 = vld [vmem:[%s2676_s9 + $0x30] sm:$0xf]  ;;  %v2387_v11 = vld [vmem:[%s2676_s9 + $0x28] sm:$0xe] }
  0x66   : > { %v1017_v41 = vsel %vm2714_vm4, %v1012_v29, %v1016_v47  ;;  %2555 = vmatpush.bf16.msra.mxu2 %v2511_v18  ;;  %v1508_v51 = vrot.slane %v1507_v35, 4  ;;  %v2437_v18 = vld [vmem:[%s2676_s9 + $0x34] sm:$0xf0]  ;;  %v1209_v44 = vunpack.c.l.b16 %v1170_v59  ;;  %v1520_v32 = vrot.slane %v1518_v13, 5  ;;  %v3116_v29 = vld [vmem:[%s2676_s9 + $0x34] sm:$0x1] }
  0x67   : > { %v1041_v58 = vunpack.c.l.b16 %v1017_v41  ;;  %v2055_v28 = vor.u32 %v2437_v18, %v2054_v55  ;;  %v3119_v47 = vld [vmem:[%s2676_s9 + $0x3c] sm:$0x1]  ;;  %v2348_v55 = vld [vmem:[%s2676_s9 + $0x40] sm:$0xf]  ;;  %v2245_v59 = vrot.slane %v2237_v54, 9  ;;  %v1181_v61 = vrot.slane %v2994_v39, 5 }
  0x68   : > { %v1513_v2 = vsel %vm2714_vm4, %v1508_v51, %v1512_v48  ;;  %v3110_v9 = vpack.c.b16 %v1210_v0, %v1209_v44  ;;  %v1521_v12 = vor.u32 %v1520_v32, %v1517_v24  ;;  %v1538_v35 = vshll.u32 %v3119_v47, 16  ;;  %v2350_v18 = vld [vmem:[%s2676_s9 + $0x48] sm:$0xf] }
  0x69   : > { %1278 = vmatpush.bf16.msra.mxu1 %v2482_v31  ;;  %v1594_v31 = vpack.c.b16 %v1587_v10, %v1586_v21  ;;  %1830 = vmatpush.bf16.msra.mxu0 %v2510_v34  ;;  %v1045_v14 = vpack.c.b16 %v1041_v58, %v1040_v45  ;;  %v1589_v20 = vunpack.c.l.b16 %v1513_v2  ;;  %v2392_v21 = vrot.slane %v2384_v63, 9 }
  0x6a   : > { %2556 = vmatpush.bf16.msra.mxu2 %v2510_v34  ;;  %v2393_v10 = vrot.slane %v2385_v3, 9  ;;  %v1522_v40 = vrot.slane %v1521_v12, 4  ;;  %v1540_v43 = vrot.slane %v1538_v35, 5  ;;  %v2244_v45 = vrot.slane %v2236_v53, 9 }
  0x6b   : > { %v1595_v30 = vpack.c.b16 %v1589_v20, %v1588_v19  ;;  %v1714_v7 = vsel %vm2723_vm5, %v2392_v21, %v1713_v62  ;;  %v1177_v58 = vrot.slane %v2991_v33, 5  ;;  %v2492_v62 = vld [vmem:[%s2676_s9 + $0x34] sm:$0xf0]  ;;  %v1543_v63 = vshrl.u32 %v2348_v55, 16 }
  0x6c   : > { %569 = vmatmul.bf16.gmra.mxu1 %v2051_v17  ;;  %1116 = vmatmul.bf16.gmra.mxu0 %v1044_v1  ;;  %v2491_v17 = vld [vmem:[%s2676_s9 + $0x24] sm:$0xf0]  ;;  %v1532_v1 = vshll.u32 %v2346_v6, 16  ;;  %v1718_v56 = vsel %vm2723_vm5, %v2393_v10, %v1717_v15  ;;  %v1759_v37 = vunpack.c.l.b16 %v1714_v7  ;;  %v1546_v44 = vshll.u32 %v2348_v55, 16  ;;  %v3146_v15 = vld [vmem:[%s2676_s9 + $0x44] sm:$0x1] }
  0x6d   : > { %v2295_v26 = vor.u32 %v2491_v17, %v2294_v16  ;;  %v1760_v38 = vunpack.c.l.b16 %v1718_v56  ;;  %v1557_v0 = vshrl.u32 %v2350_v18, 16  ;;  %v1560_v46 = vshll.u32 %v2350_v18, 16  ;;  %v3149_v16 = vld [vmem:[%s2676_s9 + $0x4c] sm:$0x1] }
  0x6e   : > { %1658 = vmatmul.bf16.vlgmr.msrb.gmra.mxu3 %v1594_v31  ;;  %v1534_v25 = vrot.slane %v1532_v1, 5  ;;  %v1524_v31 = vshll.u32 %v3116_v29, 16  ;;  %v1178_v6 = vsel %vm2723_vm5, %v2244_v45, %v1177_v58  ;;  %v1182_v33 = vsel %vm2723_vm5, %v2245_v59, %v1181_v61  ;;  %v2389_v61 = vld [vmem:[%s2676_s9 + $0x38] sm:$0xe] }
  0x6f   : > { %1413 = vmatmul.bf16.vlgmr.msrb.gmra.mxu2 %v2291_v36  ;;  %v1531_v36 = vrot.slane %v1529_v5, 4  ;;  %v1767_v48 = vpack.c.b16 %v1760_v38, %v1759_v37  ;;  %v1211_v13 = vunpack.c.l.b16 %v1178_v6  ;;  %v1212_v39 = vunpack.c.l.b16 %v1182_v33  ;;  %v2238_v38 = vld [vmem:[%s2676_s9 + $0x38] sm:$0xe] }
  0x70   : > { %v1526_v41 = vrot.slane %v1524_v31, 5  ;;  %v1545_v5 = vrot.slane %v1543_v63, 4  ;;  %v1559_v17 = vrot.slane %v1557_v0, 4  ;;  %v1562_v1 = vrot.slane %v1560_v46, 5  ;;  %v2391_v63 = vld [vmem:[%s2676_s9 + $0x48] sm:$0xe] }
  0x71   : > { %v1535_v34 = vor.u32 %v1534_v25, %v1531_v36  ;;  %v2394_v19 = vrot.slane %v2386_v4, 9  ;;  %v3151_v20 = vpack.c.b16 %v1212_v39, %v1211_v13  ;;  %v1721_v10 = vrot.slane %v3076_v22, 5 }
  0x72   : > { %v1527_v51 = vsel %vm2714_vm4, %v1522_v40, %v1526_v41  ;;  %v2395_v24 = vrot.slane %v2387_v11, 9  ;;  %v1725_v32 = vrot.slane %v3079_v23, 5  ;;  %v1552_v25 = vshll.u32 %v3146_v15, 16  ;;  %v2239_v40 = vld [vmem:[%s2676_s9 + $0x40] sm:$0xe] }
  0x73   : > { %v1536_v27 = vrot.slane %v1535_v34, 4  ;;  %v1590_v2 = vunpack.c.l.b16 %v1527_v51  ;;  %v1722_v7 = vsel %vm2723_vm5, %v2394_v19, %v1721_v10  ;;  %v2246_v41 = vrot.slane %v2238_v38, 9  ;;  %v2493_v51 = vld [vmem:[%s2676_s9 + $0x44] sm:$0xf0] }
  0x74   : > { %v1726_v22 = vsel %vm2723_vm5, %v2395_v24, %v1725_v32  ;;  %v1554_v23 = vrot.slane %v1552_v25, 5  ;;  %v1761_v31 = vunpack.c.l.b16 %v1722_v7  ;;  %v1729_v0 = vrot.slane %v3116_v29, 5 }
  0x75   : > { %v1541_v52 = vsel %vm2714_vm4, %v1536_v27, %v1540_v43  ;;  %v1762_v34 = vunpack.c.l.b16 %v1726_v22  ;;  %v1185_v27 = vrot.slane %v3047_v42, 5  ;;  %v2247_v43 = vrot.slane %v2239_v40, 9  ;;  %v2388_v42 = vld [vmem:[%s2676_s9 + $0x30] sm:$0xe] }
  0x76   : > { %v1591_v3 = vunpack.c.l.b16 %v1541_v52  ;;  %v2397_v46 = vrot.slane %v2389_v61, 9  ;;  %v1741_v4 = vrot.slane %v3149_v16, 5  ;;  %v2399_v33 = vrot.slane %v2391_v63, 9 }
  0x77   : > { %v1768_v52 = vpack.c.b16 %v1762_v34, %v1761_v31  ;;  %v1186_v53 = vsel %vm2723_vm5, %v2246_v41, %v1185_v27 }
  0x78   : > { %v1596_v21 = vpack.c.b16 %v1591_v3, %v1590_v2  ;;  %v1213_v45 = vunpack.c.l.b16 %v1186_v53  ;;  %v1733_v2 = vrot.slane %v3119_v47, 5  ;;  %v1737_v3 = vrot.slane %v3146_v15, 5 }
  0x79   : > { %v1742_v29 = vsel %vm2723_vm5, %v2399_v33, %v1741_v4 }
  0x7c   : > { %574 = vmatmul.bf16.gmra.mxu1 %v2055_v28  ;;  %1121 = vmatmul.bf16.gmra.mxu0 %v1045_v14  ;;  %v1548_v28 = vrot.slane %v1546_v44, 5  ;;  %v2299_v14 = vor.u32 %v2492_v62, %v2298_v50  ;;  %v2302_v50 = vld [vmem:[%s2676_s9 + $0x40] sm:$0xf]  ;;  %v2396_v44 = vrot.slane %v2388_v42, 9 }
  0x7d   : > { %v2303_v59 = vor.u32 %v2493_v51, %v2302_v50  ;;  %v2390_v62 = vld [vmem:[%s2676_s9 + $0x40] sm:$0xe]  ;;  %s2006_s9 = sshll.u32 %s2597_s12, 3 }
  0x7e   : > { %1663 = vmatmul.bf16.gmra.mxu3 %v1595_v30  ;;  %v1549_v36 = vor.u32 %v1548_v28, %v1545_v5  ;;  %v1566_v30 = vshll.u32 %v3149_v16, 16  ;;  %v2398_v6 = vrot.slane %v2390_v62, 9  ;;  %v1730_v11 = vsel %vm2723_vm5, %v2396_v44, %v1729_v0  ;;  %p215_p5 = scmp.lt.s32.totalorder %s2006_s9, 15 }
  0x7f   : > { %1418 = vmatmul.bf16.gmra.mxu2 %v2295_v26  ;;  %v1563_v26 = vor.u32 %v1562_v1, %v1559_v17  ;;  %v1763_v47 = vunpack.c.l.b16 %v1730_v11  ;;  %v1766_v28 = vunpack.c.l.b16 %v1742_v29 }
  0x80   : > { %v1568_v12 = vrot.slane %v1566_v30, 5  ;;  %v1738_v13 = vsel %vm2723_vm5, %v2398_v6, %v1737_v3  ;;  %s3272_s9 = smov (!%p215_p5, %s2006_s9), 15 }
  0x81   : > { %v1564_v56 = vrot.slane %v1563_v26, 4  ;;  %v1765_v5 = vunpack.c.l.b16 %v1738_v13  ;;  %s2007_s12 = sshll.u32 %s3272_s9, 2 }
  0x82   : > { %s3229_s10 = scalar_lea.vmem %s3262_s3, %s2007_s12 }
  0x83   : > { %v1569_v37 = vsel %vm2714_vm4, %v1564_v56, %v1568_v12  ;;  %v1770_v17 = vpack.c.b16 %v1766_v28, %v1765_v5 }
  0x84   : > { %v1593_v55 = vunpack.c.l.b16 %v1569_v37 }
  0x8c   : > { %1279 = vmatmul.bf16.vlgmr.msra.gmra.mxu1 %v3071_v8  ;;  %1831 = vmatmul.bf16.vlgmr.msra.gmra.mxu0 %v1767_v48  ;;  %v1550_v8 = vrot.slane %v1549_v36, 4  ;;  %v1189_v48 = vrot.slane %v3060_v60, 5 }
  0x8e   : > { %1668 = vmatmul.bf16.gmra.mxu3 %v1596_v21  ;;  %v1555_v35 = vsel %vm2714_vm4, %v1550_v8, %v1554_v23  ;;  %v1190_v49 = vsel %vm2723_vm5, %v2247_v43, %v1189_v48 }
  0x8f   : > { %1423 = vmatmul.bf16.gmra.mxu2 %v2299_v14  ;;  %v1592_v54 = vunpack.c.l.b16 %v1555_v35  ;;  %v1214_v58 = vunpack.c.l.b16 %v1190_v49 }
  0x91   : > { %v1218_v18 = vpack.c.b16 %v1214_v58, %v1213_v45  ;;  %v1597_v60 = vpack.c.b16 %v1593_v55, %v1592_v54 }
  0x9c   : > { %1284 = vmatmul.bf16.gmra.mxu1 %v3110_v9  ;;  %1836 = vmatmul.bf16.gmra.mxu0 %v1768_v52  ;;  %v1734_v9 = vsel %vm2723_vm5, %v2397_v46, %v1733_v2 }
  0x9d   : > { %v1764_v39 = vunpack.c.l.b16 %v1734_v9 }
  0x9e   : > { %1673 = vmatmul.bf16.gmra.mxu3 %v1597_v60 }
  0x9f   : > { %1428 = vmatmul.bf16.gmra.mxu2 %v2303_v59  ;;  %v1769_v14 = vpack.c.b16 %v1764_v39, %v1763_v47 }
  0xa9   : > { %v469_v15 = vpop.f32.mrf.mxu1  ;;  %v459_v16 = vpop.f32.mrf.mxu0 }
  0xac   : > { %1289 = vmatmul.bf16.gmra.mxu1 %v3151_v20  ;;  %1841 = vmatmul.bf16.gmra.mxu0 %v1769_v14 }
  0xaf   : > { %1846 = vmatmul.bf16.vlgmr.msra.gmra.mxu2 %v1770_v17 }
  0xb1   : > { %v471_v19 = vpop.f32.mrf.mxu1  ;;  %v461_v21 = vpop.f32.mrf.mxu0 }
  0xb2   : > { %v728_v1 = vpop.f32.mrf.mxu2  ;;  %v862_v10 = vpop.f32.mrf.mxu3 }
  0xb9   : > { %v474_v32 = vpop.f32.mrf.mxu1  ;;  %v464_v57 = vpop.f32.mrf.mxu0 }
  0xba   : > { %v730_v24 = vpop.f32.mrf.mxu2  ;;  %v3194_v36 = vpop.f32.mrf.mxu3 }
  0xbc   : > { %1294 = vmatmul.bf16.gmra.mxu1 %v1218_v18 }
  0xc1   : > { %v476_v26 = vpop.f32.mrf.mxu1  ;;  %v466_v30 = vpop.f32.mrf.mxu0 }
  0xc2   : > { %v733_v25 = vpop.f32.mrf.mxu2  ;;  %v867_v7 = vpop.f32.mrf.mxu3 }
  0xc9   : > { %v560_v8 = vpop.f32.mrf.mxu1  ;;  %v1107_v23 = vpop.f32.mrf.mxu0 }
  0xca   : > { %v735_v22 = vpop.f32.mrf.mxu2  ;;  %v561_v20 = vadd.f32 %v560_v8, %v459_v16  ;;  %v3196_v12 = vpop.f32.mrf.mxu3 }
  0xcc   : > { %v748_v56 = vadd.f32 %v728_v1, %v561_v20 }
  0xce   : > { %v882_v31 = vadd.f32 %v862_v10, %v748_v56 }
  0xd0   : > { %v1127_v34 = vadd.f32 %v1107_v23, %v882_v31 }
  0xd1   : > { %v562_v37 = vpop.f32.mrf.mxu1  ;;  %v1109_v38 = vpop.f32.mrf.mxu0 }
  0xd2   : > { %v738_v35 = vpop.f32.mrf.mxu2  ;;  %v563_v40 = vadd.f32 %v562_v37, %v461_v21  ;;  %v872_v27 = vpop.f32.mrf.mxu3 }
  0xd4   : > { %v749_v41 = vadd.f32 %v730_v24, %v563_v40 }
  0xd9   : > { %v565_v48 = vpop.f32.mrf.mxu1  ;;  %v1112_v50 = vpop.f32.mrf.mxu0 }
  0xda   : > { %v740_v43 = vpop.f32.mrf.mxu2  ;;  %v566_v51 = vadd.f32 %v565_v48, %v464_v57  ;;  %v3198_v55 = vpop.f32.mrf.mxu3 }
  0xdc   : > { %v750_v52 = vadd.f32 %v733_v25, %v566_v51 }
  0xde   : > { %v884_v53 = vadd.f32 %v867_v7, %v750_v52 }
  0xe0   : > { %v1129_v49 = vadd.f32 %v1112_v50, %v884_v53 }
  0xe1   : > { %v567_v45 = vpop.f32.mrf.mxu1  ;;  %v3200_v58 = vpop.f32.mrf.mxu0 }
  0xe2   : > { %v743_v54 = vpop.f32.mrf.mxu2  ;;  %v568_v59 = vadd.f32 %v567_v45, %v466_v30  ;;  %v877_v60 = vpop.f32.mrf.mxu3 }
  0xe4   : > { %v751_v42 = vadd.f32 %v735_v22, %v568_v59 }
  0xe6   : > { %v885_v48 = vadd.f32 %v3196_v12, %v751_v42 }
  0xe8   : > { %v1130_v59 = vadd.f32 %v3200_v58, %v885_v48 }
  0xe9   : > { %v570_v18 = vpop.f32.mrf.mxu1  ;;  %v1117_v62 = vpop.f32.mrf.mxu0 }
  0xea   : > { %v745_v61 = vpop.f32.mrf.mxu2  ;;  %v571_v63 = vadd.f32 %v570_v18, %v469_v15  ;;  %v3208_v11 = vpop.f32.mrf.mxu3 }
  0xec   : > { %v752_v44 = vadd.f32 %v738_v35, %v571_v63 }
  0xee   : > { %v886_v0 = vadd.f32 %v872_v27, %v752_v44 }
  0xf0   : > { %v3202_v46 = vadd.f32 %v1117_v62, %v886_v0 }
  0xf1   : > { %v572_v3 = vpop.f32.mrf.mxu1  ;;  %v3204_v4 = vpop.f32.mrf.mxu0 }
  0xf2   : > { %v1414_v2 = vpop.f32.mrf.mxu2  ;;  %v573_v6 = vadd.f32 %v572_v3, %v471_v19  ;;  %v1659_v28 = vpop.f32.mrf.mxu3 }
  0xf4   : > { %v3206_v33 = vadd.f32 %v740_v43, %v573_v6 }
  0xf9   : > { %v575_v13 = vpop.f32.mrf.mxu1  ;;  %v1122_v29 = vpop.f32.mrf.mxu0 }
  0xfa   : > { %v1416_v9 = vpop.f32.mrf.mxu2  ;;  %v576_v47 = vadd.f32 %v575_v13, %v474_v32  ;;  %v1661_v21 = vpop.f32.mrf.mxu3  ;;  %v883_v32 = vadd.f32 %v3194_v36, %v749_v41  ;;  %v887_v13 = vadd.f32 %v3198_v55, %v3206_v33 }
  0xfc   : > { %v754_v39 = vadd.f32 %v743_v54, %v576_v47  ;;  %v1128_v7 = vadd.f32 %v1109_v38, %v883_v32 }
  0xfe   : > { %v888_v5 = vadd.f32 %v877_v60, %v754_v39 }
 0x100   : > { %v3210_v14 = vadd.f32 %v1122_v29, %v888_v5 }
 0x101   : > { %v577_v16 = vpop.f32.mrf.mxu1  ;;  %v3212_v17 = vpop.f32.mrf.mxu0 }
 0x102   : > { %v1419_v15 = vpop.f32.mrf.mxu2  ;;  %v578_v1 = vadd.f32 %v577_v16, %v476_v26  ;;  %v1664_v56 = vpop.f32.mrf.mxu3  ;;  %v3221_v26 = vld [vmem:[%s3261_s2] ss:$0 sm:$0xff] }
 0x104   : > { %v3214_v19 = vadd.f32 %v745_v61, %v578_v1 }
 0x109   : > { %v1280_v10 = vpop.f32.mrf.mxu1  ;;  %v1832_v24 = vpop.f32.mrf.mxu0 }
 0x10a   : > { %v1300_v57 = vadd.f32 %v1280_v10, %v1127_v34  ;;  %v1421_v25 = vpop.f32.mrf.mxu2  ;;  %v1666_v53 = vpop.f32.mrf.mxu3 }
 0x10c   : > { %v1434_v30 = vadd.f32 %v1414_v2, %v1300_v57 }
 0x10e   : > { %v1679_v22 = vadd.f32 %v1659_v28, %v1434_v30  ;;  %v1132_v28 = vadd.f32 %v3204_v4, %v887_v13 }
 0x110   : > { %v1852_v31 = vadd.f32 %v1832_v24, %v1679_v22  ;;  %v889_v22 = vadd.f32 %v3208_v11, %v3214_v19 }
 0x111   : > { %v1282_v8 = vpop.f32.mrf.mxu1  ;;  %v1834_v23 = vpop.f32.mrf.mxu0 }
 0x112   : > { %v1301_v20 = vadd.f32 %v1282_v8, %v1128_v7  ;;  %v1424_v34 = vpop.f32.mrf.mxu2  ;;  %v1864_v36 = vadd.f32 %v3221_v26, %v1852_v31  ;;  %v1669_v60 = vpop.f32.mrf.mxu3 }
 0x114   : > { %v1435_v35 = vadd.f32 %v1416_v9, %v1301_v20  ;;  %v1872_v50 = vmax.f32 %v1864_v36, 0.0 }
 0x116   : > { %v1680_v37 = vadd.f32 %v1661_v21, %v1435_v35  ;;  %v1134_v35 = vadd.f32 %v3212_v17, %v889_v22 }
 0x118   : > { %v1853_v40 = vadd.f32 %v1834_v23, %v1680_v37 }
 0x119   : > { %v1285_v38 = vpop.f32.mrf.mxu1  ;;  %v1837_v41 = vpop.f32.mrf.mxu0 }
 0x11a   : > { %v1865_v27 = vadd.f32 %v3221_v26, %v1853_v40  ;;  %v1302_v43 = vadd.f32 %v1285_v38, %v1129_v49  ;;  %v1426_v45 = vpop.f32.mrf.mxu2  ;;  %v1671_v16 = vpop.f32.mrf.mxu3 }
 0x11c   : > { %v1873_v51 = vmax.f32 %v1865_v27, 0.0  ;;  %v1436_v52 = vadd.f32 %v1419_v15, %v1302_v43 }
 0x11e   : > { %v2521_v54 = vpack.c.bf16 %v1873_v51, %v1872_v50  ;;  %v1681_v61 = vadd.f32 %v1664_v56, %v1436_v52 }
 0x120   : > { %2522 = vst [vmem:[%s3229_s10] sm:$0xff] %v2521_v54   ;;  %v1854_v12 = vadd.f32 %v1837_v41, %v1681_v61 }
 0x121   : > { %v1287_v18 = vpop.f32.mrf.mxu1  ;;  %v1839_v49 = vpop.f32.mrf.mxu0 }
 0x122   : > { %v1303_v62 = vadd.f32 %v1287_v18, %v1130_v59  ;;  %v1866_v44 = vadd.f32 %v3221_v26, %v1854_v12  ;;  %v1429_v2 = vpop.f32.mrf.mxu2  ;;  %v1674_v4 = vpop.f32.mrf.mxu3 }
 0x124   : > { %v1437_v42 = vadd.f32 %v1421_v25, %v1303_v62  ;;  %v1874_v29 = vmax.f32 %v1866_v44, 0.0 }
 0x126   : > { %v1682_v63 = vadd.f32 %v1666_v53, %v1437_v42 }
 0x128   : > { %v1855_v0 = vadd.f32 %v1839_v49, %v1682_v63 }
 0x129   : > { %v1290_v3 = vpop.f32.mrf.mxu1  ;;  %v1842_v58 = vpop.f32.mrf.mxu0 }
 0x12a   : > { %v1867_v6 = vadd.f32 %v3221_v26, %v1855_v0  ;;  %v1304_v9 = vadd.f32 %v1290_v3, %v3202_v46  ;;  %v1431_v10 = vpop.f32.mrf.mxu2  ;;  %v1676_v41 = vpop.f32.mrf.mxu3 }
 0x12c   : > { %v1875_v47 = vmax.f32 %v1867_v6, 0.0  ;;  %v1438_v39 = vadd.f32 %v1424_v34, %v1304_v9 }
 0x12e   : > { %v2526_v5 = vpack.c.bf16 %v1875_v47, %v1874_v29  ;;  %v1683_v15 = vadd.f32 %v1669_v60, %v1438_v39 }
 0x130   : > { %2538 = vst [vmem:[%s3229_s10 + $0x8] sm:$0xff] %v2526_v5   ;;  %v1856_v24 = vadd.f32 %v1842_v58, %v1683_v15 }
 0x131   : > { %v1292_v1 = vpop.f32.mrf.mxu1  ;;  %v1844_v46 = vpop.f32.mrf.mxu0 }
 0x132   : > { %v1305_v21 = vadd.f32 %v1292_v1, %v1132_v28  ;;  %v1868_v32 = vadd.f32 %v3221_v26, %v1856_v24  ;;  %v1847_v56 = vpop.f32.mrf.mxu2 }
 0x134   : > { %v1439_v57 = vadd.f32 %v1426_v45, %v1305_v21  ;;  %v1876_v8 = vmax.f32 %v1868_v32, 0.0 }
 0x136   : > { %v1684_v25 = vadd.f32 %v1671_v16, %v1439_v57 }
 0x138   : > { %v1857_v55 = vadd.f32 %v1844_v46, %v1684_v25 }
 0x139   : > { %v1295_v33 = vpop.f32.mrf.mxu1 }
 0x13a   : > { %v1869_v30 = vadd.f32 %v3221_v26, %v1857_v55  ;;  %v1306_v7 = vadd.f32 %v1295_v33, %v3210_v14  ;;  %v1849_v27 = vpop.f32.mrf.mxu2 }
 0x13c   : > { %v1877_v23 = vmax.f32 %v1869_v30, 0.0  ;;  %v1440_v20 = vadd.f32 %v1429_v2, %v1306_v7 }
 0x13e   : > { %v2531_v31 = vpack.c.bf16 %v1877_v23, %v1876_v8  ;;  %v1685_v34 = vadd.f32 %v1674_v4, %v1440_v20 }
 0x140   : > { %2539 = vst [vmem:[%s3229_s10 + $0x10] sm:$0xff] %v2531_v31   ;;  %v1858_v40 = vadd.f32 %v1847_v56, %v1685_v34 }
 0x141   : > { %v1297_v37 = vpop.f32.mrf.mxu1 }
 0x142   : > { %v1307_v36 = vadd.f32 %v1297_v37, %v1134_v35  ;;  %v1870_v43 = vadd.f32 %v3221_v26, %v1858_v40 }
 0x144   : > { %v1441_v38 = vadd.f32 %v1431_v10, %v1307_v36  ;;  %v1878_v48 = vmax.f32 %v1870_v43, 0.0 }
 0x146   : > { %v1686_v14 = vadd.f32 %v1676_v41, %v1441_v38 }
 0x148   : > { %v1859_v11 = vadd.f32 %v1849_v27, %v1686_v14 }
 0x14a   : > { %v1871_v19 = vadd.f32 %v3221_v26, %v1859_v11 }
 0x14c   : > { %v1879_v50 = vmax.f32 %v1871_v19, 0.0 }
 0x14e   : > { %v2536_v51 = vpack.c.bf16 %v1879_v50, %v1878_v48 }
 0x150   : > { %2540 = vst [vmem:[%s3229_s10 + $0x18] sm:$0xff] %v2536_v51  }
 0x151 PF: > { %s13_s14 = sadd.s32 1, %s2605_s14   ;;  %s3267_s12 = smov %s2601_s13 }
 0x152   : > { %p10_p6 = scmp.ge.s32.totalorder %s13_s14, 4   ;;  %s3268_s13 = smov %s3270_s15 }
 0x154   :  { %12 = sbr.rel (!%p10_p6) target bundleno = 2 (0x2), region = 70 }

// kernel: backbone_base_forward.16
= control target key start
LH: loop header
LB: loop body
LE: loop exit
PB: predicated region body
PF: predicated region fallthrough
CT: control target
= control target key end

     0   :  { %s1927_s12 = smov 0   ;;  %s1929_s13 = smov 0   ;;  %s2317_s0 = inlined_call_operand.vmem [shape: bf16[2,10,9,256], index: 0, kind: input, shape index: {}]   ;;  %s2318_s1 = inlined_call_operand.vmem [shape: bf16[1152,128], index: 1, kind: input, shape index: {}]   ;;  %s2319_s2 = inlined_call_operand.vmem [shape: f32[1,128], index: 2, kind: input, shape index: {}]   ;;  %s2320_s3 = inlined_call_operand.vmem [shape: bf16[64,128], index: 3, kind: output, shape index: {}]  }
   0x1   :  { %s1931_s14 = smov 0  }
   0x2 LB: > { %s25_s15 = sadd.s32 1, %s1901_s13  ;;  %p1426_p0 = scmp.ge.s32.totalorder %s1905_s14, 1  ;;  %s1905_s14 = sphi %s1931_s14, %s13_s14   ;;  %s1901_s13 = sphi %s1929_s13, %s2324_s13   ;;  %s1897_s12 = sphi %s1927_s12, %s2323_s12  }
   0x3   : > { %p27_p1 = scmp.ge.s32.totalorder %s25_s15, 2  ;;  %p168_p2 = scmp.lt.s32.totalorder %s1905_s14, 3 }
   0x5   : > { %s2326_s15 = smov (%p27_p1, %s25_s15), 0  ;;  %p169_p3 = pnand %p1426_p0, %p168_p2 }
   0x6   : > { %p202_p4 = scmp.lt.s32.totalorder (!%p169_p3), %s1897_s12, 1  ;;  %s1428_s4 = sshll.u32 (!%p169_p3), %s1897_s12, 2 }
   0x7   : > { %172 = sbr.rel (%p169_p3) target bundleno = 253 (0xfd), region = 32  ;;  %p215_p5 = scmp.lt.s32.totalorder (!%p169_p3), %s1428_s4, 7 }
   0xc   : > { %v1777_v0 = vld [vmem:[%s2318_s1 + $0x78] sm:$0xff]  ;;  %v1776_v4 = vld [vmem:[%s2318_s1 + $0x70] sm:$0xff]  ;;  %s203_s28 = scalar_select %p202_p4, %s1897_s12, 1  ;;  %v1775_v8 = vld [vmem:[%s2318_s1 + $0x68] sm:$0xff]  ;;  %vm421_vm0 = vsmask.f32 3328 }
   0xd   : > { %v1769_v1 = vld [vmem:[%s2318_s1 + $0x38] sm:$0xff]  ;;  %327 = vmatpush.bf16.msra.mxu0 %v1777_v0  ;;  %v1768_v5 = vld [vmem:[%s2318_s1 + $0x30] sm:$0xff]  ;;  %v1767_v9 = vld [vmem:[%s2318_s1 + $0x28] sm:$0xff]  ;;  %vm422_vm1 = vsmask.f32 7440  ;;  %s2328_s4 = smov (!%p215_p5, %s1428_s4), 7 }
   0xe   : > { %v1785_v2 = vld [vmem:[%s2318_s1 + $0xb8] sm:$0xff]  ;;  %402 = vmatpush.bf16.msra.mxu1 %v1769_v1  ;;  %v1784_v6 = vld [vmem:[%s2318_s1 + $0xb0] sm:$0xff]  ;;  %s1857_s6 = smul.u32 160, %s203_s28  ;;  %v1783_v10 = vld [vmem:[%s2318_s1 + $0xa8] sm:$0xff]  ;;  %s1429_s12 = sshll.u32 %s2328_s4, 2 }
   0xf   : > { %v1795_v3 = vld [vmem:[%s2318_s1 + $0xf8] sm:$0xff]  ;;  %552 = vmatpush.bf16.msra.mxu2 %v1785_v2  ;;  %v1794_v7 = vld [vmem:[%s2318_s1 + $0xf0] sm:$0xff]  ;;  %v1793_v11 = vld [vmem:[%s2318_s1 + $0xe8] sm:$0xff]  ;;  %s221_s9 = scalar_lea.vmem %s2320_s3, %s1429_s12 }
  0x10   : > { %660 = vmatpush.bf16.msra.mxu3 %v1795_v3  ;;  %s1988_s21 = scalar_lea.vmem %s2317_s0, %s1857_s6  ;;  %v1774_v12 = vld [vmem:[%s2318_s1 + $0x60] sm:$0xff]  ;;  %v1773_v26 = vld [vmem:[%s2318_s1 + $0x58] sm:$0xff]  ;;  %v1772_v36 = vld [vmem:[%s2318_s1 + $0x50] sm:$0xff] }
  0x11   : > { %328 = vmatpush.bf16.msra.mxu0 %v1776_v4  ;;  %v1766_v13 = vld [vmem:[%s2318_s1 + $0x20] sm:$0xff]  ;;  %v224_v24 = vld [vmem:[%s1988_s21 + $0x8] sm:$0x11]  ;;  %v1765_v27 = vld [vmem:[%s2318_s1 + $0x18] sm:$0xff] }
  0x12   : > { %403 = vmatpush.bf16.msra.mxu1 %v1768_v5  ;;  %v1997_v14 = vld [vmem:[%s1988_s21] sm:$0xff]  ;;  %v226_v25 = vld [vmem:[%s1988_s21 + $0x28] sm:$0x11]  ;;  %v1781_v30 = vld [vmem:[%s2318_s1 + $0x98] sm:$0xff]  ;;  %v434_v33 = vshll.u32 %v224_v24, 16 }
  0x13   : > { %553 = vmatpush.bf16.msra.mxu2 %v1784_v6  ;;  %v1782_v15 = vld [vmem:[%s2318_s1 + $0xa0] sm:$0xff]  ;;  %v425_v18 = vshrl.u32 %v1997_v14, 16  ;;  %v428_v19 = vshll.u32 %v1997_v14, 16  ;;  %v1791_v31 = vld [vmem:[%s2318_s1 + $0xd8] sm:$0xff]  ;;  %v448_v34 = vshll.u32 %v226_v25, 16  ;;  %v1764_v37 = vld [vmem:[%s2318_s1 + $0x10] sm:$0xff] }
  0x14   : > { %661 = vmatpush.bf16.msra.mxu3 %v1794_v7  ;;  %v1792_v16 = vld [vmem:[%s2318_s1 + $0xe0] sm:$0xff]  ;;  %v1780_v38 = vld [vmem:[%s2318_s1 + $0x90] sm:$0xff]  ;;  %v436_v41 = vrot.slane %v434_v33, 5  ;;  %v251_v44 = vrot.slane %v1997_v14, 4  ;;  %vm2039_vm2 = vmor %vm421_vm0, %vm422_vm1 }
  0x15   : > { %329 = vmatpush.bf16.msra.mxu0 %v1775_v8  ;;  %v225_v17 = vld [vmem:[%s1988_s21 + $0x20] sm:$0xff]  ;;  %v427_v22 = vrot.slane %v425_v18, 4  ;;  %v430_v23 = vrot.slane %v428_v19, 5  ;;  %v1790_v39 = vld [vmem:[%s2318_s1 + $0xd0] sm:$0xff]  ;;  %v450_v43 = vrot.slane %v448_v34, 5  ;;  %v1771_v50 = vld [vmem:[%s2318_s1 + $0x48] sm:$0xff] }
  0x16   : > { %404 = vmatpush.bf16.msra.mxu1 %v1767_v9  ;;  %v439_v20 = vshrl.u32 %v225_v17, 16  ;;  %v442_v21 = vshll.u32 %v225_v17, 16  ;;  %v252_v45 = vrot.slane %v225_v17, 4  ;;  %v2044_v47 = vld [vmem:[%s1988_s21 + $0x40] sm:$0xff]  ;;  %v1763_v51 = vld [vmem:[%s2318_s1 + $0x8] sm:$0xff]  ;;  %v271_v61 = vunpack.c.l.b16 %v251_v44  ;;  %v1829_v24 = vld [vmem:[%s2318_s1 + $0x1f8] sm:$0xff] }
  0x17   : > { %554 = vmatpush.bf16.msra.mxu2 %v1783_v10  ;;  %v431_v32 = vor.u32 %v430_v23, %v427_v22  ;;  %v2047_v48 = vld [vmem:[%s1988_s21 + $0x60] sm:$0xff]  ;;  %v453_v49 = vshrl.u32 %v2044_v47, 16  ;;  %v456_v52 = vshll.u32 %v2044_v47, 16  ;;  %v1779_v55 = vld [vmem:[%s2318_s1 + $0x88] sm:$0xff]  ;;  %v1821_v23 = vld [vmem:[%s2318_s1 + $0x1b8] sm:$0xff] }
  0x18   : > { %662 = vmatpush.bf16.msra.mxu3 %v1793_v11  ;;  %v441_v28 = vrot.slane %v439_v20, 4  ;;  %v444_v29 = vrot.slane %v442_v21, 5  ;;  %v467_v53 = vshrl.u32 %v2047_v48, 16  ;;  %v470_v54 = vshll.u32 %v2047_v48, 16  ;;  %v1789_v56 = vld [vmem:[%s2318_s1 + $0xc8] sm:$0xff]  ;;  %v1770_v59 = vld [vmem:[%s2318_s1 + $0x40] sm:$0xff] }
  0x19   : > { %330 = vmatpush.bf16.msra.mxu0 %v1774_v12  ;;  %v432_v40 = vrot.slane %v431_v32, 4  ;;  %v1762_v60 = vld [vmem:[%s2318_s1] sm:$0xff]  ;;  %v2076_v62 = vunpack.c.l.b16 %v252_v45  ;;  %v455_v1 = vrot.slane %v453_v49, 4  ;;  %v458_v2 = vrot.slane %v456_v52, 5  ;;  %v228_v8 = vld [vmem:[%s1988_s21 + $0x48] sm:$0x11] }
  0x1a   : > { %405 = vmatpush.bf16.msra.mxu1 %v1766_v13  ;;  %v445_v35 = vor.u32 %v444_v29, %v441_v28  ;;  %v1464_v63 = vld [vmem:[%s1988_s21] sm:$0xf]  ;;  %v469_v3 = vrot.slane %v467_v53, 4  ;;  %v472_v4 = vrot.slane %v470_v54, 5  ;;  %v230_v9 = vld [vmem:[%s1988_s21 + $0x68] sm:$0x11] }
  0x1b   : > { %555 = vmatpush.bf16.msra.mxu2 %v1782_v15  ;;  %v437_v57 = vsel %vm2039_vm2, %v432_v40, %v436_v41  ;;  %v1760_v0 = vld [vmem:[%s1988_s21 + $0x1c] sm:$0xf0]  ;;  %v1544_v11 = vld [vmem:[%s1988_s21 + $0x10] sm:$0xf]  ;;  %v275_v13 = vpack.c.b16 %v2076_v62, %v271_v61  ;;  %v1803_v15 = vld [vmem:[%s2318_s1 + $0x138] sm:$0xff]  ;;  %v459_v17 = vor.u32 %v458_v2, %v455_v1  ;;  %v462_v18 = vshll.u32 %v228_v8, 16 }
  0x1c   : > { %663 = vmatpush.bf16.msra.mxu3 %v1792_v16  ;;  %v2034_v42 = vrot.slane %v445_v35, 4  ;;  %v1778_v5 = vld [vmem:[%s2318_s1 + $0x80] sm:$0xff]  ;;  %v496_v6 = vunpack.c.l.b16 %v437_v57  ;;  %v1786_v12 = vld [vmem:[%s1988_s21 + $0x2c] sm:$0xf0]  ;;  %v1465_v14 = vor.u32 %v1760_v0, %v1464_v63  ;;  %v1811_v16 = vld [vmem:[%s2318_s1 + $0x178] sm:$0xff]  ;;  %v473_v19 = vor.u32 %v472_v4, %v469_v3 }
  0x1d   : > { %331 = vmatpush.bf16.msra.mxu0 %v1773_v26  ;;  %v1788_v10 = vld [vmem:[%s2318_s1 + $0xc0] sm:$0xff]  ;;  %v476_v20 = vshll.u32 %v230_v9, 16  ;;  %v1545_v22 = vor.u32 %v1786_v12, %v1544_v11  ;;  %v1802_v25 = vld [vmem:[%s2318_s1 + $0x130] sm:$0xff]  ;;  %v464_v28 = vrot.slane %v462_v18, 5  ;;  %v1801_v35 = vld [vmem:[%s2318_s1 + $0x128] sm:$0xff] }
  0x1e   : > { %406 = vmatpush.bf16.msra.mxu1 %v1765_v27  ;;  %v451_v58 = vsel %vm2039_vm2, %v2034_v42, %v450_v43  ;;  %v1810_v26 = vld [vmem:[%s2318_s1 + $0x170] sm:$0xff]  ;;  %v2109_v27 = vrot.slane %v459_v17, 4  ;;  %v2111_v29 = vrot.slane %v473_v19, 4  ;;  %v1800_v49 = vld [vmem:[%s2318_s1 + $0x120] sm:$0xff]  ;;  %v1535_v2 = vld [vmem:[%s1988_s21 + $0x18] sm:$0x11] }
  0x1f   : > { %556 = vmatpush.bf16.msra.mxu2 %v1781_v30  ;;  %v497_v7 = vunpack.c.l.b16 %v451_v58  ;;  %v478_v30 = vrot.slane %v476_v20, 5  ;;  %v1828_v32 = vld [vmem:[%s2318_s1 + $0x1f0] sm:$0xff]  ;;  %v1468_v54 = vld [vmem:[%s1988_s21 + $0x40] sm:$0xf]  ;;  %v1537_v3 = vld [vmem:[%s1988_s21 + $0x38] sm:$0x11] }
  0x20   : > { %664 = vmatpush.bf16.msra.mxu3 %v1791_v31  ;;  %v1820_v31 = vld [vmem:[%s2318_s1 + $0x1b0] sm:$0xff]  ;;  %v1826_v1 = vld [vmem:[%s2318_s1 + $0x1e0] sm:$0xff]  ;;  %v1799_v4 = vld [vmem:[%s2318_s1 + $0x118] sm:$0xff]  ;;  %v792_v11 = vshll.u32 %v1535_v2, 16 }
  0x21   : > { %332 = vmatpush.bf16.msra.mxu0 %v1772_v36  ;;  %v500_v21 = vpack.c.b16 %v497_v7, %v496_v6  ;;  %v2120_v33 = vld [vmem:[%s1988_s21 + $0x10] sm:$0xff]  ;;  %v1809_v36 = vld [vmem:[%s2318_s1 + $0x168] sm:$0xff]  ;;  %v479_v40 = vsel %vm2039_vm2, %v2111_v29, %v478_v30  ;;  %v1541_v2 = vld [vmem:[%s1988_s21 + $0x78] sm:$0x11] }
  0x22   : > { %407 = vmatpush.bf16.msra.mxu1 %v1764_v37  ;;  %v2123_v34 = vld [vmem:[%s1988_s21 + $0x30] sm:$0xff]  ;;  %v253_v37 = vrot.slane %v2044_v47, 4  ;;  %v783_v41 = vshrl.u32 %v2120_v33, 16  ;;  %v786_v43 = vshll.u32 %v2120_v33, 16  ;;  %v1819_v47 = vld [vmem:[%s2318_s1 + $0x1a8] sm:$0xff]  ;;  %v499_v57 = vunpack.c.l.b16 %v479_v40  ;;  %v1796_v40 = vld [vmem:[%s2318_s1 + $0x100] sm:$0xff] }
  0x23   : > { %557 = vmatpush.bf16.msra.mxu2 %v1780_v38  ;;  %v254_v38 = vrot.slane %v2047_v48, 4  ;;  %v797_v44 = vshrl.u32 %v2123_v34, 16  ;;  %v800_v45 = vshll.u32 %v2123_v34, 16  ;;  %v1827_v48 = vld [vmem:[%s2318_s1 + $0x1e8] sm:$0xff]  ;;  %v1548_v58 = vld [vmem:[%s1988_s21 + $0x50] sm:$0xf] }
  0x24   : > { %665 = vmatpush.bf16.msra.mxu3 %v1790_v39  ;;  %v465_v39 = vsel %vm2039_vm2, %v2109_v27, %v464_v28  ;;  %v2158_v52 = vunpack.c.l.b16 %v253_v37  ;;  %v788_v61 = vrot.slane %v786_v43, 5  ;;  %v1806_v17 = vld [vmem:[%s2318_s1 + $0x150] sm:$0xff]  ;;  %v794_v20 = vrot.slane %v792_v11, 5  ;;  %v1797_v30 = vld [vmem:[%s2318_s1 + $0x108] sm:$0xff] }
  0x25   : > { %333 = vmatpush.bf16.msra.mxu0 %v1771_v50  ;;  %v1808_v50 = vld [vmem:[%s2318_s1 + $0x160] sm:$0xff]  ;;  %v2160_v53 = vunpack.c.l.b16 %v254_v38  ;;  %v799_v63 = vrot.slane %v797_v44, 4  ;;  %v802_v0 = vrot.slane %v800_v45, 5  ;;  %v2192_v18 = vld [vmem:[%s1988_s21 + $0x50] sm:$0xff] }
  0x26   : > { %408 = vmatpush.bf16.msra.mxu1 %v1763_v51  ;;  %v1818_v51 = vld [vmem:[%s2318_s1 + $0x1a0] sm:$0xff]  ;;  %v2203_v28 = vld [vmem:[%s1988_s21 + $0x70] sm:$0xff] }
  0x27   : > { %558 = vmatpush.bf16.msra.mxu2 %v1779_v55  ;;  %v1761_v55 = vld [vmem:[%s1988_s21 + $0x5c] sm:$0xf0]  ;;  %v276_v6 = vpack.c.b16 %v2160_v53, %v2158_v52  ;;  %v803_v12 = vor.u32 %v802_v0, %v799_v63  ;;  %v825_v38 = vshrl.u32 %v2203_v28, 16 }
  0x28   : > { %666 = vmatpush.bf16.msra.mxu3 %v1789_v56  ;;  %v498_v56 = vunpack.c.l.b16 %v465_v39  ;;  %v1469_v7 = vor.u32 %v1761_v55, %v1468_v54  ;;  %v828_v39 = vshll.u32 %v2203_v28, 16  ;;  %v1656_v45 = vld [vmem:[%s1988_s21 + $0x20] sm:$0xf] }
  0x29   : > { %334 = vmatpush.bf16.msra.mxu0 %v1770_v59  ;;  %v1787_v59 = vld [vmem:[%s1988_s21 + $0x6c] sm:$0xf0]  ;;  %v1812_v55 = vld [vmem:[%s1988_s21 + $0x3c] sm:$0xf0] }
  0x2a   : > { %409 = vmatpush.bf16.msra.mxu1 %v1762_v60  ;;  %v785_v60 = vrot.slane %v783_v41, 4  ;;  %v501_v8 = vpack.c.b16 %v499_v57, %v498_v56  ;;  %v1549_v9 = vor.u32 %v1787_v59, %v1548_v58  ;;  %v1804_v41 = vld [vmem:[%s2318_s1 + $0x140] sm:$0xff]  ;;  %v1837_v56 = vld [vmem:[%s2318_s1 + $0x238] sm:$0xff]  ;;  %v827_v59 = vrot.slane %v825_v38, 4 }
  0x2b   : > { %559 = vmatpush.bf16.msra.mxu2 %v1778_v5  ;;  %v1807_v5 = vld [vmem:[%s2318_s1 + $0x158] sm:$0xff]  ;;  %v1814_v63 = vld [vmem:[%s2318_s1 + $0x180] sm:$0xff] }
  0x2c   : > { %667 = vmatpush.bf16.msra.mxu3 %v1788_v10  ;;  %335 = vmatmul.bf16.vlgmr.msra.gmra.mxu0 %v275_v13  ;;  %v789_v10 = vor.u32 %v788_v61, %v785_v60  ;;  %v806_v13 = vshll.u32 %v1537_v3, 16  ;;  %v830_v60 = vrot.slane %v828_v39, 5  ;;  %v1539_v61 = vld [vmem:[%s1988_s21 + $0x58] sm:$0x11]  ;;  %v1822_v0 = vld [vmem:[%s2318_s1 + $0x1c0] sm:$0xff] }
  0x2d   : > { %759 = vmatpush.bf16.msrb.mxu0 %v1803_v15  ;;  %410 = vmatmul.bf16.vlgmr.msra.gmra.mxu1 %v1465_v14  ;;  %v1817_v14 = vld [vmem:[%s2318_s1 + $0x198] sm:$0xff] }
  0x2e   : > { %910 = vmatpush.bf16.msrb.mxu1 %v1811_v16  ;;  %560 = vmatmul.bf16.vlgmr.msra.gmra.mxu2 %v500_v21  ;;  %v1825_v15 = vld [vmem:[%s2318_s1 + $0x1d8] sm:$0xff]  ;;  %v1798_v16 = vld [vmem:[%s2318_s1 + $0x110] sm:$0xff]  ;;  %v790_v19 = vrot.slane %v789_v10, 4  ;;  %v804_v21 = vrot.slane %v803_v12, 4  ;;  %v831_v12 = vor.u32 %v830_v60, %v827_v59  ;;  %v1830_v59 = vld [vmem:[%s2318_s1 + $0x200] sm:$0xff] }
  0x2f   : > { %668 = vmatmul.bf16.vlgmr.msra.gmra.mxu3 %v1545_v22  ;;  %1018 = vmatpush.bf16.msrb.mxu2 %v1821_v23  ;;  %v808_v22 = vrot.slane %v806_v13, 5  ;;  %v1816_v23 = vld [vmem:[%s2318_s1 + $0x190] sm:$0xff]  ;;  %v834_v13 = vshll.u32 %v1541_v2, 16  ;;  %v1833_v39 = vld [vmem:[%s2318_s1 + $0x218] sm:$0xff] }
  0x30   : > { %1117 = vmatpush.bf16.msrb.mxu3 %v1829_v24  ;;  %v1824_v24 = vld [vmem:[%s2318_s1 + $0x1d0] sm:$0xff] }
  0x31   : > { %760 = vmatpush.bf16.msrb.mxu0 %v1802_v25  ;;  %v683_v25 = vrot.slane %v2120_v33, 4  ;;  %v1815_v33 = vld [vmem:[%s2318_s1 + $0x188] sm:$0xff]  ;;  %v809_v37 = vsel %vm2039_vm2, %v804_v21, %v808_v22  ;;  %v685_v21 = vrot.slane %v2192_v18, 4  ;;  %v686_v22 = vrot.slane %v2203_v28, 4 }
  0x32   : > { %911 = vmatpush.bf16.msrb.mxu1 %v1810_v26  ;;  %v684_v26 = vrot.slane %v2123_v34, 4  ;;  %v1823_v34 = vld [vmem:[%s2318_s1 + $0x1c8] sm:$0xff]  ;;  %v855_v54 = vunpack.c.l.b16 %v809_v37 }
  0x33   : > { %1019 = vmatpush.bf16.msrb.mxu2 %v1820_v31  ;;  %v1805_v31 = vld [vmem:[%s2318_s1 + $0x148] sm:$0xff]  ;;  %v703_v43 = vunpack.c.l.b16 %v683_v25 }
  0x34   : > { %1118 = vmatpush.bf16.msrb.mxu3 %v1828_v32  ;;  %v811_v32 = vshrl.u32 %v2192_v18, 16  ;;  %v704_v44 = vunpack.c.l.b16 %v684_v26 }
  0x35   : > { %761 = vmatpush.bf16.msrb.mxu0 %v1801_v35  ;;  %v814_v35 = vshll.u32 %v2192_v18, 16  ;;  %v705_v18 = vunpack.c.l.b16 %v685_v21 }
  0x36   : > { %912 = vmatpush.bf16.msrb.mxu1 %v1809_v36  ;;  %v795_v36 = vsel %vm2039_vm2, %v790_v19, %v794_v20  ;;  %v1652_v19 = vld [vmem:[%s1988_s21 + $0x80] sm:$0xff]  ;;  %v1835_v20 = vld [vmem:[%s2318_s1 + $0x228] sm:$0xff] }
  0x37   : > { %1020 = vmatpush.bf16.msrb.mxu2 %v1819_v47  ;;  %v813_v47 = vrot.slane %v811_v32, 4  ;;  %v1183_v26 = vshrl.u32 %v1652_v19, 16  ;;  %v706_v32 = vunpack.c.l.b16 %v686_v22 }
  0x38   : > { %1119 = vmatpush.bf16.msrb.mxu3 %v1827_v48  ;;  %v816_v48 = vrot.slane %v814_v35, 5 }
  0x39   : > { %762 = vmatpush.bf16.msrb.mxu0 %v1800_v49  ;;  %v1647_v49 = vld [vmem:[%s1988_s21 + $0x28] sm:$0x11]  ;;  %v1185_v37 = vrot.slane %v1183_v26, 4 }
  0x3a   : > { %913 = vmatpush.bf16.msrb.mxu1 %v1808_v50  ;;  %v1649_v50 = vld [vmem:[%s1988_s21 + $0x48] sm:$0x11]  ;;  %v1150_v57 = vshll.u32 %v1647_v49, 16 }
  0x3b   : > { %1021 = vmatpush.bf16.msrb.mxu2 %v1818_v51  ;;  %v854_v51 = vunpack.c.l.b16 %v795_v36  ;;  %v1164_v58 = vshll.u32 %v1649_v50, 16 }
  0x3c   : > { %1120 = vmatpush.bf16.msrb.mxu3 %v1826_v1  ;;  %340 = vmatmul.bf16.gmra.mxu0 %v276_v6  ;;  %v707_v1 = vpack.c.b16 %v704_v44, %v703_v43  ;;  %v1152_v3 = vrot.slane %v1150_v57, 5  ;;  %v1065_v6 = vpack.c.b16 %v2158_v52, %v2076_v62  ;;  %v1836_v62 = vld [vmem:[%s2318_s1 + $0x230] sm:$0xff]  ;;  %v708_v43 = vpack.c.b16 %v706_v32, %v705_v18 }
  0x3d   : > { %763 = vmatpush.bf16.msrb.mxu0 %v1799_v4  ;;  %415 = vmatmul.bf16.gmra.mxu1 %v1469_v7  ;;  %v1166_v4 = vrot.slane %v1164_v58, 5  ;;  %v817_v7 = vor.u32 %v816_v48, %v813_v47 }
  0x3e   : > { %914 = vmatpush.bf16.msrb.mxu1 %v1807_v5  ;;  %565 = vmatmul.bf16.gmra.mxu2 %v501_v8  ;;  %v1657_v5 = vor.u32 %v1812_v55, %v1656_v45  ;;  %v858_v8 = vpack.c.b16 %v855_v54, %v854_v51  ;;  %v1153_v10 = vsel %vm2039_vm2, %v2034_v42, %v1152_v3  ;;  %v1832_v51 = vld [vmem:[%s2318_s1 + $0x210] sm:$0xff] }
  0x3f   : > { %673 = vmatmul.bf16.gmra.mxu3 %v1549_v9  ;;  %1022 = vmatpush.bf16.msrb.mxu2 %v1817_v14  ;;  %v820_v9 = vshll.u32 %v1539_v61, 16  ;;  %v1167_v11 = vsel %vm2039_vm2, %v2109_v27, %v1166_v4  ;;  %v2254_v14 = vunpack.c.l.b16 %v1153_v10  ;;  %v818_v27 = vrot.slane %v817_v7, 4 }
  0x40   : > { %1121 = vmatpush.bf16.msrb.mxu3 %v1825_v15  ;;  %v2256_v15 = vunpack.c.l.b16 %v1167_v11 }
  0x41   : > { %764 = vmatpush.bf16.msrb.mxu0 %v1798_v16  ;;  %v822_v52 = vrot.slane %v820_v9, 5  ;;  %v832_v16 = vrot.slane %v831_v12, 4 }
  0x42   : > { %915 = vmatpush.bf16.msrb.mxu1 %v1806_v17  ;;  %v1216_v42 = vpack.c.b16 %v2256_v15, %v2254_v14  ;;  %v836_v17 = vrot.slane %v834_v13, 5 }
  0x43   : > { %1023 = vmatpush.bf16.msrb.mxu2 %v1816_v23  ;;  %v1044_v23 = vrot.slane %v1652_v19, 4 }
  0x44   : > { %1122 = vmatpush.bf16.msrb.mxu3 %v1824_v24  ;;  %v823_v24 = vsel %vm2039_vm2, %v818_v27, %v822_v52  ;;  %v837_v25 = vsel %vm2039_vm2, %v832_v16, %v836_v17 }
  0x45   : > { %765 = vmatpush.bf16.msrb.mxu0 %v1797_v30  ;;  %v1186_v30 = vshll.u32 %v1652_v19, 16  ;;  %v856_v28 = vunpack.c.l.b16 %v823_v24  ;;  %v857_v35 = vunpack.c.l.b16 %v837_v25  ;;  %v1064_v36 = vunpack.c.l.b16 %v1044_v23 }
  0x46   : > { %916 = vmatpush.bf16.msrb.mxu1 %v1805_v31  ;;  %v1834_v31 = vld [vmem:[%s2318_s1 + $0x220] sm:$0xff] }
  0x47   : > { %1024 = vmatpush.bf16.msrb.mxu2 %v1815_v33  ;;  %v1660_v33 = vld [vmem:[%s1988_s21 + $0x60] sm:$0xf]  ;;  %v1188_v38 = vrot.slane %v1186_v30, 5  ;;  %v859_v44 = vpack.c.b16 %v857_v35, %v856_v28  ;;  %v1066_v47 = vpack.c.b16 %v1064_v36, %v2160_v53  ;;  %v1831_v53 = vld [vmem:[%s2318_s1 + $0x208] sm:$0xff] }
  0x48   : > { %1123 = vmatpush.bf16.msrb.mxu3 %v1823_v34  ;;  %v1813_v34 = vld [vmem:[%s1988_s21 + $0x7c] sm:$0xf0] }
  0x49   : > { %766 = vmatpush.bf16.msrb.mxu0 %v1796_v40  ;;  %v1651_v40 = vld [vmem:[%s1988_s21 + $0x68] sm:$0x11]  ;;  %v1661_v45 = vor.u32 %v1813_v34, %v1660_v33  ;;  %v1189_v48 = vor.u32 %v1188_v38, %v1185_v37 }
  0x4a   : > { %917 = vmatpush.bf16.msrb.mxu1 %v1804_v41  ;;  %v1653_v41 = vld [vmem:[%s1988_s21 + $0x88] sm:$0x11]  ;;  %v1178_v49 = vshll.u32 %v1651_v40, 16 }
  0x4b   : > { %1025 = vmatpush.bf16.msrb.mxu2 %v1814_v63  ;;  %v1192_v50 = vshll.u32 %v1653_v41, 16  ;;  %v1190_v54 = vrot.slane %v1189_v48, 4 }
  0x4c   : > { %1124 = vmatpush.bf16.msrb.mxu3 %v1822_v0  ;;  %767 = vmatmul.bf16.vlgmr.msrb.gmra.mxu0 %v707_v1  ;;  %v1180_v55 = vrot.slane %v1178_v49, 5 }
  0x4d   : > { %1268 = vmatpush.bf16.msra.mxu0 %v1837_v56  ;;  %918 = vmatmul.bf16.vlgmr.msrb.gmra.mxu1 %v858_v8 }
  0x4e   : > { %1849 = vmatpush.bf16.msra.mxu1 %v1837_v56  ;;  %1026 = vmatmul.bf16.vlgmr.msrb.gmra.mxu2 %v1657_v5  ;;  %v1194_v56 = vrot.slane %v1192_v50, 5  ;;  %v1181_v57 = vsel %vm2039_vm2, %v2111_v29, %v1180_v55 }
  0x4f   : > { %1125 = vmatmul.bf16.vlgmr.msrb.gmra.mxu3 %v1065_v6  ;;  %v1214_v60 = vunpack.c.l.b16 %v1181_v57 }
  0x50   : > { %v1195_v58 = vsel %vm2039_vm2, %v1190_v54, %v1194_v56 }
  0x51   : > { %1269 = vmatpush.bf16.msra.mxu0 %v1836_v62  ;;  %v1215_v61 = vunpack.c.l.b16 %v1195_v58 }
  0x52   : > { %1850 = vmatpush.bf16.msra.mxu1 %v1836_v62 }
  0x53   : > { %v1217_v63 = vpack.c.b16 %v1215_v61, %v1214_v60 }
  0x55   : > { %1270 = vmatpush.bf16.msra.mxu0 %v1835_v20 }
  0x56   : > { %1851 = vmatpush.bf16.msra.mxu1 %v1835_v20 }
  0x59   : > { %1271 = vmatpush.bf16.msra.mxu0 %v1834_v31 }
  0x5a   : > { %1852 = vmatpush.bf16.msra.mxu1 %v1834_v31 }
  0x5c   : > { %772 = vmatmul.bf16.gmra.mxu0 %v708_v43 }
  0x5d   : > { %1272 = vmatpush.bf16.msra.mxu0 %v1833_v39  ;;  %923 = vmatmul.bf16.gmra.mxu1 %v859_v44 }
  0x5e   : > { %1853 = vmatpush.bf16.msra.mxu1 %v1833_v39  ;;  %1031 = vmatmul.bf16.gmra.mxu2 %v1661_v45 }
  0x5f   : > { %1130 = vmatmul.bf16.gmra.mxu3 %v1066_v47 }
  0x61   : > { %1273 = vmatpush.bf16.msra.mxu0 %v1832_v51 }
  0x62   : > { %1854 = vmatpush.bf16.msra.mxu1 %v1832_v51 }
  0x65   : > { %1274 = vmatpush.bf16.msra.mxu0 %v1831_v53 }
  0x66   : > { %1855 = vmatpush.bf16.msra.mxu1 %v1831_v53 }
  0x69   : > { %1275 = vmatpush.bf16.msra.mxu0 %v1830_v59 }
  0x6a   : > { %1856 = vmatpush.bf16.msra.mxu1 %v1830_v59  ;;  %v1882_v59 = vld [vmem:[%s2319_s2] ss:$0 sm:$0xff] }
  0x6c   : > { %1276 = vmatmul.bf16.vlgmr.msra.gmra.mxu0 %v1216_v42 }
  0x6d   : > { %1281 = vmatmul.bf16.vlgmr.msra.gmra.mxu1 %v1217_v63  ;;  %v1303_v63 = vlaneseq }
  0xa9   : > { %v336_v29 = vpop.f32.mrf.mxu0 }
  0xaa   : > { %v411_v0 = vpop.f32.mrf.mxu1 }
  0xab   : > { %v412_v16 = vadd.f32 %v411_v0, %v336_v29 }
  0xb1   : > { %v561_v46 = vpop.f32.mrf.mxu2  ;;  %v338_v2 = vpop.f32.mrf.mxu0 }
  0xb2   : > { %v669_v1 = vpop.f32.mrf.mxu3  ;;  %v413_v3 = vpop.f32.mrf.mxu1  ;;  %v571_v23 = vadd.f32 %v561_v46, %v412_v16 }
  0xb3   : > { %v414_v26 = vadd.f32 %v413_v3, %v338_v2  ;;  %v1304_v2 = vshrl.u32 %v1303_v63, 7 }
  0xb4   : > { %v679_v25 = vadd.f32 %v669_v1, %v571_v23 }
  0xb5   : > { %vm1305_vm3 = vcmp.lt.s32.totalorder %v1304_v2, 4 }
  0xb9   : > { %v563_v4 = vpop.f32.mrf.mxu2  ;;  %v341_v6 = vpop.f32.mrf.mxu0 }
  0xba   : > { %v671_v5 = vpop.f32.mrf.mxu3  ;;  %v416_v7 = vpop.f32.mrf.mxu1  ;;  %v572_v18 = vadd.f32 %v563_v4, %v414_v26 }
  0xbb   : > { %v417_v17 = vadd.f32 %v416_v7, %v341_v6 }
  0xbc   : > { %v680_v38 = vadd.f32 %v671_v5, %v572_v18 }
  0xc1   : > { %v566_v8 = vpop.f32.mrf.mxu2  ;;  %v343_v10 = vpop.f32.mrf.mxu0 }
  0xc2   : > { %v674_v9 = vpop.f32.mrf.mxu3  ;;  %v418_v11 = vpop.f32.mrf.mxu1  ;;  %v573_v24 = vadd.f32 %v566_v8, %v417_v17 }
  0xc3   : > { %v419_v31 = vadd.f32 %v418_v11, %v343_v10 }
  0xc4   : > { %v681_v30 = vadd.f32 %v674_v9, %v573_v24 }
  0xc9   : > { %v568_v12 = vpop.f32.mrf.mxu2  ;;  %v768_v62 = vpop.f32.mrf.mxu0 }
  0xca   : > { %v676_v13 = vpop.f32.mrf.mxu3  ;;  %v919_v14 = vpop.f32.mrf.mxu1  ;;  %v574_v32 = vadd.f32 %v568_v12, %v419_v31  ;;  %v778_v28 = vadd.f32 %v768_v62, %v679_v25 }
  0xcc   : > { %v682_v39 = vadd.f32 %v676_v13, %v574_v32  ;;  %v929_v40 = vadd.f32 %v919_v14, %v778_v28 }
  0xd1   : > { %v1027_v15 = vpop.f32.mrf.mxu2  ;;  %v770_v27 = vpop.f32.mrf.mxu0 }
  0xd2   : > { %v1126_v42 = vpop.f32.mrf.mxu3  ;;  %v921_v52 = vpop.f32.mrf.mxu1  ;;  %v1037_v43 = vadd.f32 %v1027_v15, %v929_v40  ;;  %v779_v44 = vadd.f32 %v770_v27, %v680_v38 }
  0xd4   : > { %v1136_v51 = vadd.f32 %v1126_v42, %v1037_v43  ;;  %v930_v54 = vadd.f32 %v921_v52, %v779_v44 }
  0xd9   : > { %v1029_v19 = vpop.f32.mrf.mxu2  ;;  %v773_v21 = vpop.f32.mrf.mxu0 }
  0xda   : > { %v1128_v20 = vpop.f32.mrf.mxu3  ;;  %v924_v22 = vpop.f32.mrf.mxu1  ;;  %v780_v35 = vadd.f32 %v773_v21, %v681_v30  ;;  %v1038_v53 = vadd.f32 %v1029_v19, %v930_v54 }
  0xdc   : > { %v931_v41 = vadd.f32 %v924_v22, %v780_v35  ;;  %v1137_v29 = vadd.f32 %v1128_v20, %v1038_v53 }
  0xe1   : > { %v1032_v33 = vpop.f32.mrf.mxu2  ;;  %v775_v34 = vpop.f32.mrf.mxu0 }
  0xe2   : > { %v926_v36 = vpop.f32.mrf.mxu1  ;;  %v1131_v37 = vpop.f32.mrf.mxu3  ;;  %v1039_v45 = vadd.f32 %v1032_v33, %v931_v41  ;;  %v781_v47 = vadd.f32 %v775_v34, %v682_v39 }
  0xe4   : > { %v1138_v55 = vadd.f32 %v1131_v37, %v1039_v45  ;;  %v932_v56 = vadd.f32 %v926_v36, %v781_v47 }
  0xe9   : > { %v1034_v48 = vpop.f32.mrf.mxu2  ;;  %v1277_v49 = vpop.f32.mrf.mxu0 }
  0xea   : > { %v1282_v50 = vpop.f32.mrf.mxu1  ;;  %v1040_v57 = vadd.f32 %v1034_v48, %v932_v56  ;;  %v1287_v58 = vadd.f32 %v1277_v49, %v1136_v51  ;;  %v1133_v61 = vpop.f32.mrf.mxu3 }
  0xeb   : > { %v1289_v60 = vadd.f32 %v1282_v50, %v1138_v55 }
  0xec   : > { %v1139_v0 = vadd.f32 %v1133_v61, %v1040_v57  ;;  %v1295_v46 = vadd.f32 %v1882_v59, %v1287_v58 }
  0xed   : > { %v1297_v1 = vadd.f32 %v1882_v59, %v1289_v60 }
  0xee   : > { %v1299_v7 = vmax.f32 %v1295_v46, 0.0 }
  0xef   : > { %v1301_v8 = vmax.f32 %v1297_v1, 0.0 }
  0xf0   : > { %v1306_v13 = vsel %vm1305_vm3, %v1299_v7, 0.0 }
  0xf1   : > { %v1279_v3 = vpop.f32.mrf.mxu0  ;;  %v1308_v62 = vsel %vm1305_vm3, %v1301_v8, 0.0 }
  0xf2   : > { %v1284_v4 = vpop.f32.mrf.mxu1  ;;  %v1288_v5 = vadd.f32 %v1279_v3, %v1137_v29 }
  0xf3   : > { %v1290_v6 = vadd.f32 %v1284_v4, %v1139_v0 }
  0xf4   : > { %v1296_v9 = vadd.f32 %v1882_v59, %v1288_v5 }
  0xf5   : > { %v1298_v10 = vadd.f32 %v1882_v59, %v1290_v6 }
  0xf6   : > { %v1300_v11 = vmax.f32 %v1296_v9, 0.0 }
  0xf7   : > { %v1302_v12 = vmax.f32 %v1298_v10, 0.0 }
  0xf8   : > { %v1307_v14 = vsel %vm1305_vm3, %v1300_v11, 0.0 }
  0xf9   : > { %v1309_v15 = vsel %vm1305_vm3, %v1302_v12, 0.0  ;;  %v1841_v42 = vpack.c.bf16 %v1307_v14, %v1306_v13 }
  0xfa   : > { %v1846_v27 = vpack.c.bf16 %v1309_v15, %v1308_v62 }
  0xfb   : > { %1842 = vst [vmem:[%s221_s9] sm:$0xff] %v1841_v42  }
  0xfc   : > { %1848 = vst [vmem:[%s221_s9 + $0x8] sm:$0xff] %v1846_v27  }
  0xfd PF: > { %s13_s14 = sadd.s32 1, %s1905_s14   ;;  %s2323_s12 = smov %s1901_s13 }
  0xfe   : > { %p10_p6 = scmp.ge.s32.totalorder %s13_s14, 4   ;;  %s2324_s13 = smov %s2326_s15 }
 0x100   :  { %12 = sbr.rel (!%p10_p6) target bundleno = 2 (0x2), region = 70 }

// kernel: backbone_base_forward.15
= control target key start
LH: loop header
LB: loop body
LE: loop exit
PB: predicated region body
PF: predicated region fallthrough
CT: control target
= control target key end

     0   :  { %s595_s12 = smov 0   ;;  %s597_s13 = smov 0   ;;  %s660_s0 = inlined_call_operand.vmem [shape: bf16[2,8,8,256], index: 0, kind: input, shape index: {}]   ;;  %s661_s1 = inlined_call_operand.vmem [shape: bf16[128,128], index: 1, kind: input, shape index: {}]   ;;  %s662_s2 = inlined_call_operand.vmem [shape: f32[1,128], index: 2, kind: input, shape index: {}]   ;;  %s663_s3 = inlined_call_operand.vmem [shape: bf16[64,128], index: 3, kind: output, shape index: {}]  }
   0x1   :  { %s599_s14 = smov 0  }
   0x2 LB: > { %s25_s15 = sadd.s32 1, %s569_s13  ;;  %p449_p0 = scmp.ge.s32.totalorder %s573_s14, 1  ;;  %s573_s14 = sphi %s599_s14, %s13_s14   ;;  %s569_s13 = sphi %s597_s13, %s665_s13   ;;  %s565_s12 = sphi %s595_s12, %s664_s12  }
   0x3   : > { %p27_p1 = scmp.ge.s32.totalorder %s25_s15, 2  ;;  %p168_p2 = scmp.lt.s32.totalorder %s573_s14, 3 }
   0x5   : > { %s667_s15 = smov (%p27_p1, %s25_s15), 0  ;;  %p169_p3 = pnand %p449_p0, %p168_p2 }
   0x6   : > { %p202_p4 = scmp.lt.s32.totalorder (!%p169_p3), %s565_s12, 1  ;;  %s452_s10 = sshll.u32 (!%p169_p3), %s565_s12, 2 }
   0x7   : > { %172 = sbr.rel (%p169_p3) target bundleno = 185 (0xb9), region = 32  ;;  %p215_p5 = scmp.lt.s32.totalorder (!%p169_p3), %s452_s10, 7 }
   0xc   : > { %v506_v0 = vld [vmem:[%s661_s1 + $0x38] sm:$0xff]  ;;  %v505_v1 = vld [vmem:[%s661_s1 + $0x30] sm:$0xff]  ;;  %v504_v2 = vld [vmem:[%s661_s1 + $0x28] sm:$0xff]  ;;  %s203_s26 = scalar_select %p202_p4, %s565_s12, 1  ;;  %v326_v15 = vlaneseq }
   0xd   : > { %307 = vmatpush.bf16.msra.mxu0 %v506_v0  ;;  %518 = vmatpush.bf16.msra.mxu1 %v506_v0  ;;  %v503_v3 = vld [vmem:[%s661_s1 + $0x20] sm:$0xff]  ;;  %v502_v4 = vld [vmem:[%s661_s1 + $0x18] sm:$0xff]  ;;  %v501_v5 = vld [vmem:[%s661_s1 + $0x10] sm:$0xff]  ;;  %s669_s10 = smov (!%p215_p5, %s452_s10), 7 }
   0xe   : > { %s496_s29 = sshll.u32 %s203_s26, 6  ;;  %v500_v6 = vld [vmem:[%s661_s1 + $0x8] sm:$0xff]  ;;  %v499_v7 = vld [vmem:[%s661_s1] sm:$0xff]  ;;  %v327_v18 = vshrl.u32 %v326_v15, 7  ;;  %s453_s17 = sshll.u32 %s669_s10, 2 }
   0xf   : > { %s206_s7 = scalar_lea.vmem %s660_s0, %s496_s29  ;;  %v550_v17 = vld [vmem:[%s662_s2] ss:$0 sm:$0xff]  ;;  %s221_s19 = scalar_lea.vmem %s663_s3, %s453_s17 }
  0x10   : > { %v456_v8 = vld [vmem:[%s206_s7] sm:$0xf]  ;;  %v497_v9 = vld [vmem:[%s206_s7 + $0xc] sm:$0xf0]  ;;  %vm328_vm0 = vcmp.lt.s32.totalorder %v327_v18, 4 }
  0x11   : > { %308 = vmatpush.bf16.msra.mxu0 %v505_v1  ;;  %519 = vmatpush.bf16.msra.mxu1 %v505_v1  ;;  %v460_v10 = vld [vmem:[%s206_s7 + $0x20] sm:$0xf]  ;;  %v498_v11 = vld [vmem:[%s206_s7 + $0x2c] sm:$0xf0]  ;;  %v457_v12 = vor.u32 %v497_v9, %v456_v8 }
  0x12   : > { %v461_v13 = vor.u32 %v498_v11, %v460_v10 }
  0x15   : > { %309 = vmatpush.bf16.msra.mxu0 %v504_v2  ;;  %520 = vmatpush.bf16.msra.mxu1 %v504_v2 }
  0x19   : > { %310 = vmatpush.bf16.msra.mxu0 %v503_v3  ;;  %521 = vmatpush.bf16.msra.mxu1 %v503_v3 }
  0x1d   : > { %311 = vmatpush.bf16.msra.mxu0 %v502_v4  ;;  %522 = vmatpush.bf16.msra.mxu1 %v502_v4 }
  0x21   : > { %312 = vmatpush.bf16.msra.mxu0 %v501_v5  ;;  %523 = vmatpush.bf16.msra.mxu1 %v501_v5 }
  0x25   : > { %313 = vmatpush.bf16.msra.mxu0 %v500_v6  ;;  %524 = vmatpush.bf16.msra.mxu1 %v500_v6 }
  0x29   : > { %314 = vmatpush.bf16.msra.mxu0 %v499_v7  ;;  %525 = vmatpush.bf16.msra.mxu1 %v499_v7 }
  0x2c   : > { %315 = vmatmul.bf16.vlgmr.msra.gmra.mxu0 %v457_v12  ;;  %320 = vmatmul.bf16.vlgmr.msra.gmra.mxu1 %v461_v13 }
  0xa9   : > { %v316_v14 = vpop.f32.mrf.mxu0  ;;  %v321_v16 = vpop.f32.mrf.mxu1 }
  0xaa   : > { %v317_v19 = vadd.f32 %v550_v17, %v316_v14  ;;  %v322_v20 = vadd.f32 %v550_v17, %v321_v16 }
  0xac   : > { %v329_v25 = vsel %vm328_vm0, %v317_v19, 0.0  ;;  %v331_v26 = vsel %vm328_vm0, %v322_v20, 0.0 }
  0xb1   : > { %v318_v21 = vpop.f32.mrf.mxu0  ;;  %v323_v22 = vpop.f32.mrf.mxu1 }
  0xb2   : > { %v319_v23 = vadd.f32 %v550_v17, %v318_v21  ;;  %v324_v24 = vadd.f32 %v550_v17, %v323_v22 }
  0xb4   : > { %v330_v27 = vsel %vm328_vm0, %v319_v23, 0.0  ;;  %v332_v28 = vsel %vm328_vm0, %v324_v24, 0.0 }
  0xb5   : > { %v510_v29 = vpack.c.bf16 %v330_v27, %v329_v25  ;;  %v515_v30 = vpack.c.bf16 %v332_v28, %v331_v26 }
  0xb7   : > { %511 = vst [vmem:[%s221_s19] sm:$0xff] %v510_v29  }
  0xb8   : > { %517 = vst [vmem:[%s221_s19 + $0x8] sm:$0xff] %v515_v30  }
  0xb9 PF: > { %s13_s14 = sadd.s32 1, %s573_s14   ;;  %s664_s12 = smov %s569_s13 }
  0xba   : > { %p10_p6 = scmp.ge.s32.totalorder %s13_s14, 4   ;;  %s665_s13 = smov %s667_s15 }
  0xbc   :  { %12 = sbr.rel (!%p10_p6) target bundleno = 2 (0x2), region = 68 }

// kernel: backbone_base_forward.17
= control target key start
LH: loop header
LB: loop body
LE: loop exit
PB: predicated region body
PF: predicated region fallthrough
CT: control target
= control target key end

     0   :  { %s2141_s15 = smov 0   ;;  %s2143_s16 = smov 0   ;;  %s2550_s0 = inlined_call_operand.vmem [shape: bf16[2,6,10,128], index: 0, kind: input, shape index: {}]   ;;  %s2551_s1 = inlined_call_operand.vmem [shape: bf16[1152,128], index: 1, kind: input, shape index: {}]   ;;  %s2552_s2 = inlined_call_operand.vmem [shape: f32[1,128], index: 2, kind: input, shape index: {}]   ;;  %s2553_s3 = inlined_call_operand.vmem [shape: bf16[64,128], index: 3, kind: input, shape index: {}]   ;;  %s2554_s4 = inlined_call_operand.vmem [shape: bf16[64,128], index: 4, kind: output, shape index: {}]  }
   0x1   :  { %s2145_s17 = smov 0  }
   0x2 LB: > { %s26_s18 = sadd.s32 1, %s2110_s16  ;;  %p1596_p0 = scmp.ge.s32.totalorder %s2114_s17, 1  ;;  %s2114_s17 = sphi %s2145_s17, %s14_s17   ;;  %s2110_s16 = sphi %s2143_s16, %s2560_s16   ;;  %s2106_s15 = sphi %s2141_s15, %s2559_s15  }
   0x3   : > { %p28_p1 = scmp.ge.s32.totalorder %s26_s18, 2  ;;  %p209_p2 = scmp.lt.s32.totalorder %s2114_s17, 3 }
   0x5   : > { %s2562_s18 = smov (%p28_p1, %s26_s18), 0  ;;  %p210_p3 = pnand %p1596_p0, %p209_p2 }
   0x6   : > { %p253_p4 = scmp.lt.s32.totalorder (!%p210_p3), %s2106_s15, 1  ;;  %s1598_s14 = sshll.u32 (!%p210_p3), %s2106_s15, 2 }
   0x7   : > { %213 = sbr.rel (%p210_p3) target bundleno = 255 (0xff), region = 36  ;;  %p266_p5 = scmp.lt.s32.totalorder (!%p210_p3), %s1598_s14, 7 }
   0xc   : > { %v1977_v0 = vld [vmem:[%s2551_s1 + $0x78] sm:$0xff]  ;;  %v1976_v4 = vld [vmem:[%s2551_s1 + $0x70] sm:$0xff]  ;;  %s254_s5 = scalar_select %p253_p4, %s2106_s15, 1  ;;  %v1975_v8 = vld [vmem:[%s2551_s1 + $0x68] sm:$0xff]  ;;  %vm307_vm0 = vsmask.f32 3328 }
   0xd   : > { %v1969_v1 = vld [vmem:[%s2551_s1 + $0x38] sm:$0xff]  ;;  %438 = vmatpush.bf16.msra.mxu0 %v1977_v0  ;;  %v1968_v5 = vld [vmem:[%s2551_s1 + $0x30] sm:$0xff]  ;;  %v1967_v9 = vld [vmem:[%s2551_s1 + $0x28] sm:$0xff]  ;;  %vm308_vm1 = vsmask.f32 7440  ;;  %vm548_vm2 = vcmask 1042432  }
   0xe   : > { %v1985_v2 = vld [vmem:[%s2551_s1 + $0xb8] sm:$0xff]  ;;  %517 = vmatpush.bf16.msra.mxu1 %v1969_v1  ;;  %v1984_v6 = vld [vmem:[%s2551_s1 + $0xb0] sm:$0xff]  ;;  %s2066_s10 = smul.u32 48, %s254_s5  ;;  %v1983_v10 = vld [vmem:[%s2551_s1 + $0xa8] sm:$0xff]  ;;  %vm549_vm3 = vcmask 1046532   ;;  %s2564_s14 = smov (!%p266_p5, %s1598_s14), 7 }
   0xf   : > { %v1995_v3 = vld [vmem:[%s2551_s1 + $0xf8] sm:$0xff]  ;;  %639 = vmatpush.bf16.msra.mxu2 %v1985_v2  ;;  %v1994_v7 = vld [vmem:[%s2551_s1 + $0xf0] sm:$0xff]  ;;  %v1993_v11 = vld [vmem:[%s2551_s1 + $0xe8] sm:$0xff]  ;;  %s1599_s15 = sshll.u32 %s2564_s14, 2 }
  0x10   : > { %743 = vmatpush.bf16.msra.mxu3 %v1995_v3  ;;  %s2202_s25 = scalar_lea.vmem %s2550_s0, %s2066_s10  ;;  %v1974_v12 = vld [vmem:[%s2551_s1 + $0x60] sm:$0xff]  ;;  %v1973_v25 = vld [vmem:[%s2551_s1 + $0x58] sm:$0xff]  ;;  %v1972_v39 = vld [vmem:[%s2551_s1 + $0x50] sm:$0xff]  ;;  %s272_s21 = scalar_lea.vmem %s2553_s3, %s1599_s15 }
  0x11   : > { %439 = vmatpush.bf16.msra.mxu0 %v1976_v4  ;;  %v1966_v13 = vld [vmem:[%s2551_s1 + $0x20] sm:$0xff]  ;;  %v284_v17 = vld [vmem:[%s2202_s25 + $0x8] sm:$0xf]  ;;  %v304_v19 = vld [vmem:[%s2202_s25 + $0xc] sm:$0x1]  ;;  %s281_s27 = scalar_lea.vmem %s2554_s4, %s1599_s15 }
  0x12   : > { %518 = vmatpush.bf16.msra.mxu1 %v1968_v5  ;;  %v1982_v14 = vld [vmem:[%s2551_s1 + $0xa0] sm:$0xff]  ;;  %v325_v22 = vshrl.u32 %v284_v17, 16  ;;  %v328_v24 = vshll.u32 %v284_v17, 16  ;;  %v1965_v26 = vld [vmem:[%s2551_s1 + $0x18] sm:$0xff]  ;;  %v334_v30 = vshll.u32 %v304_v19, 16  ;;  %v1964_v40 = vld [vmem:[%s2551_s1 + $0x10] sm:$0xff] }
  0x13   : > { %640 = vmatpush.bf16.msra.mxu2 %v1984_v6  ;;  %v1992_v15 = vld [vmem:[%s2551_s1 + $0xe0] sm:$0xff]  ;;  %v1981_v31 = vld [vmem:[%s2551_s1 + $0x98] sm:$0xff]  ;;  %v537_v36 = vld [vmem:[%s2202_s25 + $0x8] sm:$0xe]  ;;  %v557_v51 = vrot.slane %v304_v19, 5 }
  0x14   : > { %744 = vmatpush.bf16.msra.mxu3 %v1994_v7  ;;  %v283_v16 = vld [vmem:[%s2202_s25] sm:$0xf]  ;;  %v303_v18 = vld [vmem:[%s2202_s25 + $0x4] sm:$0x1]  ;;  %v327_v29 = vrot.slane %v325_v22, 4  ;;  %v1991_v32 = vld [vmem:[%s2551_s1 + $0xd8] sm:$0xff] }
  0x15   : > { %440 = vmatpush.bf16.msra.mxu0 %v1975_v8  ;;  %v311_v20 = vshrl.u32 %v283_v16, 16  ;;  %v314_v21 = vshll.u32 %v283_v16, 16  ;;  %v320_v23 = vshll.u32 %v303_v18, 16  ;;  %v330_v33 = vrot.slane %v328_v24, 5  ;;  %v536_v34 = vld [vmem:[%s2202_s25] sm:$0xe]  ;;  %vm2242_vm4 = vmor %vm307_vm0, %vm308_vm1 }
  0x16   : > { %519 = vmatpush.bf16.msra.mxu1 %v1967_v9  ;;  %v336_v43 = vrot.slane %v334_v30, 5  ;;  %v1674_v44 = vrot.slane %v536_v34, 9  ;;  %v553_v45 = vrot.slane %v303_v18, 5  ;;  %v1980_v46 = vld [vmem:[%s2551_s1 + $0x90] sm:$0xff]  ;;  %vm2254_vm5 = vmor %vm548_vm2, %vm549_vm3  ;;  %v1675_v50 = vrot.slane %v537_v36, 9  ;;  %v1971_v54 = vld [vmem:[%s2551_s1 + $0x48] sm:$0xff] }
  0x17   : > { %641 = vmatpush.bf16.msra.mxu2 %v1983_v10  ;;  %v313_v27 = vrot.slane %v311_v20, 4  ;;  %v316_v28 = vrot.slane %v314_v21, 5  ;;  %v322_v37 = vrot.slane %v320_v23, 5  ;;  %v331_v38 = vor.u32 %v330_v33, %v327_v29  ;;  %v1990_v47 = vld [vmem:[%s2551_s1 + $0xd0] sm:$0xff]  ;;  %v1963_v55 = vld [vmem:[%s2551_s1 + $0x8] sm:$0xff]  ;;  %v1970_v5 = vld [vmem:[%s2551_s1 + $0x40] sm:$0xff] }
  0x18   : > { %745 = vmatpush.bf16.msra.mxu3 %v1993_v11  ;;  %v285_v53 = vld [vmem:[%s2202_s25 + $0x10] sm:$0xf]  ;;  %v554_v57 = vsel %vm2254_vm5, %v1674_v44, %v553_v45  ;;  %v286_v58 = vld [vmem:[%s2202_s25 + $0x18] sm:$0xf]  ;;  %v1979_v59 = vld [vmem:[%s2551_s1 + $0x88] sm:$0xff]  ;;  %v558_v61 = vsel %vm2254_vm5, %v1675_v50, %v557_v51 }
  0x19   : > { %441 = vmatpush.bf16.msra.mxu0 %v1974_v12  ;;  %v317_v35 = vor.u32 %v316_v28, %v313_v27  ;;  %v332_v48 = vrot.slane %v331_v38, 4  ;;  %v1989_v60 = vld [vmem:[%s2551_s1 + $0xc8] sm:$0xff]  ;;  %v339_v62 = vshrl.u32 %v285_v53, 16  ;;  %v342_v63 = vshll.u32 %v285_v53, 16  ;;  %v2281_v2 = vld [vmem:[%s2202_s25 + $0x14] sm:$0x1] }
  0x1a   : > { %520 = vmatpush.bf16.msra.mxu1 %v1966_v13  ;;  %v353_v0 = vshrl.u32 %v286_v58, 16  ;;  %v2284_v3 = vld [vmem:[%s2202_s25 + $0x1c] sm:$0x1]  ;;  %v356_v4 = vshll.u32 %v286_v58, 16  ;;  %v1962_v6 = vld [vmem:[%s2551_s1] sm:$0xff]  ;;  %v584_v16 = vunpack.c.l.b16 %v558_v61  ;;  %v348_v20 = vshll.u32 %v2281_v2, 16 }
  0x1b   : > { %642 = vmatpush.bf16.msra.mxu2 %v1982_v14  ;;  %v318_v42 = vrot.slane %v317_v35, 4  ;;  %v337_v56 = vsel %vm2242_vm4, %v332_v48, %v336_v43  ;;  %v1978_v7 = vld [vmem:[%s2551_s1 + $0x80] sm:$0xff]  ;;  %v341_v9 = vrot.slane %v339_v62, 4  ;;  %v344_v10 = vrot.slane %v342_v63, 5  ;;  %v1960_v14 = vld [vmem:[%s2202_s25 + $0x4] sm:$0xf0] }
  0x1c   : > { %746 = vmatpush.bf16.msra.mxu3 %v1992_v15  ;;  %v383_v8 = vunpack.c.l.b16 %v337_v56  ;;  %v355_v11 = vrot.slane %v353_v0, 4  ;;  %v1988_v12 = vld [vmem:[%s2551_s1 + $0xc0] sm:$0xff]  ;;  %v583_v15 = vunpack.c.l.b16 %v554_v57  ;;  %v358_v17 = vrot.slane %v356_v4, 5  ;;  %v1716_v18 = vld [vmem:[%s2202_s25 + $0x8] sm:$0xf]  ;;  %v2003_v22 = vld [vmem:[%s2551_s1 + $0x138] sm:$0xff] }
  0x1d   : > { %442 = vmatpush.bf16.msra.mxu0 %v1973_v25  ;;  %v323_v52 = vsel %vm2242_vm4, %v318_v42, %v322_v37  ;;  %v1636_v13 = vld [vmem:[%s2202_s25] sm:$0xf]  ;;  %v1986_v19 = vld [vmem:[%s2202_s25 + $0xc] sm:$0xf0]  ;;  %v362_v21 = vshll.u32 %v2284_v3, 16  ;;  %v2011_v23 = vld [vmem:[%s2551_s1 + $0x178] sm:$0xff]  ;;  %v345_v24 = vor.u32 %v344_v10, %v341_v9 }
  0x1e   : > { %521 = vmatpush.bf16.msra.mxu1 %v1965_v26  ;;  %v382_v1 = vunpack.c.l.b16 %v323_v52  ;;  %v359_v25 = vor.u32 %v358_v17, %v355_v11  ;;  %v538_v26 = vld [vmem:[%s2202_s25 + $0x10] sm:$0xe]  ;;  %v1637_v28 = vor.u32 %v1960_v14, %v1636_v13  ;;  %v539_v29 = vld [vmem:[%s2202_s25 + $0x18] sm:$0xe]  ;;  %v587_v30 = vpack.c.b16 %v584_v16, %v583_v15  ;;  %v1754_v45 = vld [vmem:[%s2202_s25 + $0x8] sm:$0xf] }
  0x1f   : > { %643 = vmatpush.bf16.msra.mxu2 %v1981_v31  ;;  %v1717_v31 = vor.u32 %v1986_v19, %v1716_v18  ;;  %v2029_v33 = vld [vmem:[%s2551_s1 + $0x1f8] sm:$0xff]  ;;  %v350_v34 = vrot.slane %v348_v20, 5  ;;  %v364_v35 = vrot.slane %v362_v21, 5  ;;  %v1676_v36 = vrot.slane %v538_v26, 9  ;;  %v2002_v38 = vld [vmem:[%s2551_s1 + $0x130] sm:$0xff]  ;;  %v2001_v51 = vld [vmem:[%s2551_s1 + $0x128] sm:$0xff] }
  0x20   : > { %747 = vmatpush.bf16.msra.mxu3 %v1991_v32  ;;  %v386_v27 = vpack.c.b16 %v383_v8, %v382_v1  ;;  %v2021_v32 = vld [vmem:[%s2551_s1 + $0x1b8] sm:$0xff]  ;;  %v561_v37 = vrot.slane %v2281_v2, 5  ;;  %v360_v42 = vrot.slane %v359_v25, 4  ;;  %v1677_v43 = vrot.slane %v539_v29, 9  ;;  %v2028_v48 = vld [vmem:[%s2551_s1 + $0x1f0] sm:$0xff]  ;;  %v2009_v52 = vld [vmem:[%s2551_s1 + $0x168] sm:$0xff] }
  0x21   : > { %443 = vmatpush.bf16.msra.mxu0 %v1972_v39  ;;  %v2010_v39 = vld [vmem:[%s2551_s1 + $0x170] sm:$0xff]  ;;  %v565_v44 = vrot.slane %v2284_v3, 5  ;;  %v775_v56 = vshrl.u32 %v1754_v45, 16  ;;  %v778_v57 = vshll.u32 %v1754_v45, 16  ;;  %v2027_v61 = vld [vmem:[%s2551_s1 + $0x1e8] sm:$0xff]  ;;  %v2000_v63 = vld [vmem:[%s2551_s1 + $0x120] sm:$0xff] }
  0x22   : > { %522 = vmatpush.bf16.msra.mxu1 %v1964_v40  ;;  %v346_v40 = vrot.slane %v345_v24, 4  ;;  %v562_v50 = vsel %vm2254_vm5, %v1676_v36, %v561_v37  ;;  %v1878_v62 = vld [vmem:[%s2202_s25 + $0x10] sm:$0xf]  ;;  %v2008_v0 = vld [vmem:[%s2551_s1 + $0x160] sm:$0xff]  ;;  %v1880_v1 = vld [vmem:[%s2202_s25 + $0x18] sm:$0xf] }
  0x23   : > { %644 = vmatpush.bf16.msra.mxu2 %v1980_v46  ;;  %v1756_v46 = vld [vmem:[%s2202_s25 + $0x10] sm:$0xf]  ;;  %v1161_v2 = vshrl.u32 %v1878_v62, 16  ;;  %v1164_v3 = vshll.u32 %v1878_v62, 16  ;;  %v585_v8 = vunpack.c.l.b16 %v562_v50  ;;  %v2365_v10 = vld [vmem:[%s2202_s25 + $0xc] sm:$0x1] }
  0x24   : > { %748 = vmatpush.bf16.msra.mxu3 %v1990_v47  ;;  %v2020_v47 = vld [vmem:[%s2551_s1 + $0x1b0] sm:$0xff]  ;;  %v351_v53 = vsel %vm2242_vm4, %v346_v40, %v350_v34  ;;  %v789_v58 = vshrl.u32 %v1756_v46, 16  ;;  %v2018_v11 = vld [vmem:[%s2551_s1 + $0x1a0] sm:$0xff]  ;;  %v777_v14 = vrot.slane %v775_v56, 4  ;;  %v780_v15 = vrot.slane %v778_v57, 5  ;;  %v1999_v18 = vld [vmem:[%s2551_s1 + $0x118] sm:$0xff] }
  0x25   : > { %444 = vmatpush.bf16.msra.mxu0 %v1971_v54  ;;  %v365_v54 = vsel %vm2242_vm4, %v360_v42, %v364_v35  ;;  %v384_v4 = vunpack.c.l.b16 %v351_v53  ;;  %v2374_v13 = vld [vmem:[%s2202_s25 + $0x14] sm:$0x1]  ;;  %v1720_v19 = vld [vmem:[%s2202_s25 + $0x18] sm:$0xf]  ;;  %v1163_v20 = vrot.slane %v1161_v2, 4  ;;  %v1166_v21 = vrot.slane %v1164_v3, 5 }
  0x26   : > { %523 = vmatpush.bf16.msra.mxu1 %v1963_v55  ;;  %v566_v55 = vsel %vm2254_vm5, %v1677_v43, %v565_v44  ;;  %v791_v16 = vrot.slane %v789_v58, 4  ;;  %v1987_v24 = vld [vmem:[%s2202_s25 + $0x1c] sm:$0xf0]  ;;  %v2007_v25 = vld [vmem:[%s2551_s1 + $0x158] sm:$0xff]  ;;  %v2385_v26 = vld [vmem:[%s2202_s25 + $0x14] sm:$0x1]  ;;  %v781_v34 = vor.u32 %v780_v15, %v777_v14 }
  0x27   : > { %645 = vmatpush.bf16.msra.mxu2 %v1979_v59  ;;  %v792_v59 = vshll.u32 %v1756_v46, 16  ;;  %v586_v9 = vunpack.c.l.b16 %v566_v55  ;;  %v2390_v29 = vld [vmem:[%s2202_s25 + $0x1c] sm:$0x1]  ;;  %v1794_v36 = vld [vmem:[%s2202_s25 + $0x8] sm:$0xe]  ;;  %v1167_v40 = vor.u32 %v1166_v21, %v1163_v20  ;;  %v1170_v42 = vshll.u32 %v2385_v26, 16 }
  0x28   : > { %749 = vmatpush.bf16.msra.mxu3 %v1989_v60  ;;  %v2019_v60 = vld [vmem:[%s2551_s1 + $0x1a8] sm:$0xff]  ;;  %v2017_v43 = vld [vmem:[%s2551_s1 + $0x198] sm:$0xff]  ;;  %v1184_v46 = vshll.u32 %v2390_v29, 16  ;;  %v939_v53 = vrot.slane %v2365_v10, 5  ;;  %v782_v55 = vrot.slane %v781_v34, 4  ;;  %v943_v58 = vrot.slane %v2374_v13, 5 }
  0x29   : > { %445 = vmatpush.bf16.msra.mxu0 %v1970_v5  ;;  %v385_v5 = vunpack.c.l.b16 %v365_v54  ;;  %v794_v17 = vrot.slane %v792_v59, 5  ;;  %v588_v37 = vpack.c.b16 %v586_v9, %v585_v8  ;;  %v2025_v44 = vld [vmem:[%s2551_s1 + $0x1d8] sm:$0xff]  ;;  %v2016_v54 = vld [vmem:[%s2551_s1 + $0x190] sm:$0xff]  ;;  %v1168_v59 = vrot.slane %v1167_v40, 4  ;;  %v1760_v2 = vld [vmem:[%s2202_s25 + $0x20] sm:$0xf] }
  0x2a   : > { %524 = vmatpush.bf16.msra.mxu1 %v1962_v6  ;;  %v1640_v6 = vld [vmem:[%s2202_s25 + $0x10] sm:$0xf]  ;;  %v2005_v3 = vld [vmem:[%s2551_s1 + $0x148] sm:$0xff]  ;;  %v820_v14 = vshll.u32 %v1760_v2, 16  ;;  %v1996_v21 = vld [vmem:[%s2551_s1 + $0x100] sm:$0xff] }
  0x2b   : > { %646 = vmatpush.bf16.msra.mxu2 %v1978_v7  ;;  %v1961_v7 = vld [vmem:[%s2202_s25 + $0x14] sm:$0xf0]  ;;  %v795_v35 = vor.u32 %v794_v17, %v791_v16  ;;  %v2024_v62 = vld [vmem:[%s2551_s1 + $0x1d0] sm:$0xff]  ;;  %v2015_v15 = vld [vmem:[%s2551_s1 + $0x188] sm:$0xff] }
  0x2c   : > { %750 = vmatpush.bf16.msra.mxu3 %v1988_v12  ;;  %446 = vmatmul.bf16.vlgmr.msra.gmra.mxu0 %v386_v27  ;;  %v2026_v12 = vld [vmem:[%s2551_s1 + $0x1e0] sm:$0xff]  ;;  %v784_v27 = vshll.u32 %v2365_v10, 16  ;;  %v2023_v16 = vld [vmem:[%s2551_s1 + $0x1c8] sm:$0xff]  ;;  %v1759_v34 = vld [vmem:[%s2202_s25 + $0x1c] sm:$0x1] }
  0x2d   : > { %902 = vmatpush.bf16.msrb.mxu0 %v2003_v22  ;;  %525 = vmatmul.bf16.vlgmr.msra.gmra.mxu1 %v1637_v28  ;;  %v1175_v22 = vshrl.u32 %v1880_v1, 16  ;;  %v798_v28 = vshll.u32 %v2374_v13, 16  ;;  %v796_v56 = vrot.slane %v795_v35, 4  ;;  %v817_v13 = vshrl.u32 %v1760_v2, 16 }
  0x2e   : > { %1025 = vmatpush.bf16.msrb.mxu1 %v2011_v23  ;;  %647 = vmatmul.bf16.vlgmr.msra.gmra.mxu2 %v587_v30  ;;  %v1178_v23 = vshll.u32 %v1880_v1, 16  ;;  %v786_v50 = vrot.slane %v784_v27, 5  ;;  %v1186_v1 = vrot.slane %v1184_v46, 5  ;;  %v2014_v27 = vld [vmem:[%s2551_s1 + $0x180] sm:$0xff] }
  0x2f   : > { %751 = vmatmul.bf16.vlgmr.msra.gmra.mxu3 %v1717_v31  ;;  %1129 = vmatpush.bf16.msrb.mxu2 %v2021_v32  ;;  %v1177_v30 = vrot.slane %v1175_v22, 4  ;;  %v387_v32 = vpack.c.b16 %v385_v5, %v384_v4  ;;  %v1882_v5 = vld [vmem:[%s2202_s25 + $0x20] sm:$0xf]  ;;  %v819_v40 = vrot.slane %v817_v13, 4 }
  0x30   : > { %1288 = vmatpush.bf16.msrb.mxu3 %v2029_v33  ;;  %v1180_v31 = vrot.slane %v1178_v23, 5  ;;  %v1641_v33 = vor.u32 %v1961_v7, %v1640_v6  ;;  %v1884_v6 = vld [vmem:[%s2202_s25 + $0x28] sm:$0xf]  ;;  %v787_v7 = vsel %vm2242_vm4, %v782_v55, %v786_v50  ;;  %v2004_v22 = vld [vmem:[%s2551_s1 + $0x140] sm:$0xff]  ;;  %v2467_v50 = vld [vmem:[%s2202_s25 + $0x2c] sm:$0x1] }
  0x31   : > { %903 = vmatpush.bf16.msrb.mxu0 %v2002_v38  ;;  %v1721_v38 = vor.u32 %v1987_v24, %v1720_v19  ;;  %v1192_v19 = vshll.u32 %v1882_v5, 16  ;;  %v1203_v20 = vshrl.u32 %v1884_v6, 16 }
  0x32   : > { %1026 = vmatpush.bf16.msrb.mxu1 %v2010_v39  ;;  %v1795_v39 = vld [vmem:[%s2202_s25 + $0x10] sm:$0xe]  ;;  %v1181_v45 = vor.u32 %v1180_v31, %v1177_v30 }
  0x33   : > { %1130 = vmatpush.bf16.msrb.mxu2 %v2020_v47  ;;  %v1998_v47 = vld [vmem:[%s2551_s1 + $0x110] sm:$0xff]  ;;  %v1799_v57 = vrot.slane %v1795_v39, 9  ;;  %v1205_v46 = vrot.slane %v1203_v20, 4 }
  0x34   : > { %1289 = vmatpush.bf16.msrb.mxu3 %v2028_v48  ;;  %v2006_v48 = vld [vmem:[%s2551_s1 + $0x150] sm:$0xff] }
  0x35   : > { %904 = vmatpush.bf16.msrb.mxu0 %v2001_v51  ;;  %v800_v51 = vrot.slane %v798_v28, 5  ;;  %v944_v9 = vsel %vm2254_vm5, %v1799_v57, %v943_v58  ;;  %v846_v28 = vunpack.c.l.b16 %v787_v7  ;;  %v1840_v31 = vld [vmem:[%s2202_s25 + $0x10] sm:$0xf] }
  0x36   : > { %1027 = vmatpush.bf16.msrb.mxu1 %v2009_v52  ;;  %v1798_v52 = vrot.slane %v1794_v36, 9  ;;  %v970_v24 = vunpack.c.l.b16 %v944_v9  ;;  %v2022_v36 = vld [vmem:[%s2551_s1 + $0x1c0] sm:$0xff] }
  0x37   : > { %1131 = vmatpush.bf16.msrb.mxu2 %v2019_v60  ;;  %v1172_v60 = vrot.slane %v1170_v42, 5  ;;  %v801_v8 = vsel %vm2242_vm4, %v796_v56, %v800_v51  ;;  %v822_v42 = vrot.slane %v820_v14, 5 }
  0x38   : > { %1290 = vmatpush.bf16.msrb.mxu3 %v2027_v61  ;;  %v1758_v61 = vld [vmem:[%s2202_s25 + $0x18] sm:$0xf]  ;;  %v940_v4 = vsel %vm2254_vm5, %v1798_v52, %v939_v53  ;;  %v847_v30 = vunpack.c.l.b16 %v801_v8  ;;  %v812_v53 = vshll.u32 %v1759_v34, 16 }
  0x39   : > { %905 = vmatpush.bf16.msrb.mxu0 %v2000_v63  ;;  %v1997_v63 = vld [vmem:[%s2551_s1 + $0x108] sm:$0xff]  ;;  %v803_v10 = vshrl.u32 %v1758_v61, 16  ;;  %v969_v23 = vunpack.c.l.b16 %v940_v4  ;;  %v823_v58 = vor.u32 %v822_v42, %v819_v40  ;;  %v1325_v42 = vrot.slane %v2385_v26, 5 }
  0x3a   : > { %1028 = vmatpush.bf16.msrb.mxu1 %v2008_v0  ;;  %v1182_v0 = vrot.slane %v1181_v45, 4  ;;  %v1194_v45 = vrot.slane %v1192_v19, 5  ;;  %v850_v51 = vpack.c.b16 %v847_v30, %v846_v28  ;;  %v814_v2 = vrot.slane %v812_v53, 5  ;;  %v2034_v19 = vld [vmem:[%s2551_s1 + $0x220] sm:$0xff]  ;;  %v1921_v40 = vld [vmem:[%s2202_s25 + $0x28] sm:$0xe] }
  0x3b   : > { %1132 = vmatpush.bf16.msrb.mxu2 %v2018_v11  ;;  %v1173_v11 = vsel %vm2242_vm4, %v1168_v59, %v1172_v60  ;;  %v805_v35 = vrot.slane %v803_v10, 4  ;;  %v973_v52 = vpack.c.b16 %v970_v24, %v969_v23  ;;  %v1796_v59 = vld [vmem:[%s2202_s25 + $0x18] sm:$0xe]  ;;  %v2036_v60 = vld [vmem:[%s2551_s1 + $0x230] sm:$0xff]  ;;  %v824_v7 = vrot.slane %v823_v58, 4  ;;  %v2035_v10 = vld [vmem:[%s2551_s1 + $0x228] sm:$0xff] }
  0x3c   : > { %1291 = vmatpush.bf16.msrb.mxu3 %v2026_v12  ;;  %451 = vmatmul.bf16.gmra.mxu0 %v387_v32  ;;  %v806_v12 = vshll.u32 %v1758_v61, 16  ;;  %v1187_v17 = vsel %vm2242_vm4, %v1182_v0, %v1186_v1  ;;  %v2037_v32 = vld [vmem:[%s2551_s1 + $0x238] sm:$0xff]  ;;  %v1797_v61 = vld [vmem:[%s2202_s25 + $0x20] sm:$0xe]  ;;  %v1212_v1 = vshll.u32 %v2467_v50, 16  ;;  %v1800_v4 = vrot.slane %v1796_v59, 9 }
  0x3d   : > { %906 = vmatpush.bf16.msrb.mxu0 %v1999_v18  ;;  %530 = vmatmul.bf16.gmra.mxu1 %v1641_v33  ;;  %v1189_v18 = vshrl.u32 %v1882_v5, 16  ;;  %v1232_v33 = vunpack.c.l.b16 %v1173_v11  ;;  %v947_v5 = vrot.slane %v1759_v34, 5  ;;  %v1801_v8 = vrot.slane %v1797_v61, 9  ;;  %v1844_v30 = vld [vmem:[%s2202_s25 + $0x20] sm:$0xf]  ;;  %v2031_v26 = vld [vmem:[%s2551_s1 + $0x208] sm:$0xff] }
  0x3e   : > { %1029 = vmatpush.bf16.msrb.mxu1 %v2007_v25  ;;  %652 = vmatmul.bf16.gmra.mxu2 %v588_v37  ;;  %v1206_v25 = vshll.u32 %v1884_v6, 16  ;;  %v1233_v37 = vunpack.c.l.b16 %v1187_v17  ;;  %v808_v39 = vrot.slane %v806_v12, 5  ;;  %v1214_v14 = vrot.slane %v1212_v1, 5 }
  0x3f   : > { %756 = vmatmul.bf16.gmra.mxu3 %v1721_v38  ;;  %1133 = vmatpush.bf16.msrb.mxu2 %v2017_v43  ;;  %v1761_v38 = vld [vmem:[%s2202_s25 + $0x24] sm:$0x1]  ;;  %v2012_v43 = vld [vmem:[%s2202_s25 + $0x14] sm:$0xf0]  ;;  %v948_v17 = vsel %vm2254_vm5, %v1800_v4, %v947_v5 }
  0x40   : > { %1292 = vmatpush.bf16.msrb.mxu3 %v2025_v44  ;;  %v1191_v44 = vrot.slane %v1189_v18, 4  ;;  %v1841_v55 = vor.u32 %v2012_v43, %v1840_v31  ;;  %v1236_v56 = vpack.c.b16 %v1233_v37, %v1232_v33  ;;  %v809_v57 = vor.u32 %v808_v39, %v805_v35  ;;  %v2013_v31 = vld [vmem:[%s2202_s25 + $0x24] sm:$0xf0]  ;;  %v1918_v37 = vld [vmem:[%s2202_s25 + $0x10] sm:$0xe] }
  0x41   : > { %907 = vmatpush.bf16.msrb.mxu0 %v1998_v47  ;;  %v1208_v47 = vrot.slane %v1206_v25, 5  ;;  %v951_v9 = vrot.slane %v1761_v38, 5  ;;  %v971_v24 = vunpack.c.l.b16 %v948_v17  ;;  %v1845_v34 = vor.u32 %v2013_v31, %v1844_v30  ;;  %v1920_v39 = vld [vmem:[%s2202_s25 + $0x20] sm:$0xe] }
  0x42   : > { %1030 = vmatpush.bf16.msrb.mxu1 %v2006_v48  ;;  %v2464_v48 = vld [vmem:[%s2202_s25 + $0x24] sm:$0x1]  ;;  %v810_v6 = vrot.slane %v809_v57, 4  ;;  %v1329_v43 = vrot.slane %v2390_v29, 5 }
  0x43   : > { %1134 = vmatpush.bf16.msrb.mxu2 %v2016_v54  ;;  %v826_v54 = vshll.u32 %v1761_v38, 16  ;;  %v1209_v0 = vor.u32 %v1208_v47, %v1205_v46  ;;  %v952_v18 = vsel %vm2254_vm5, %v1801_v8, %v951_v9  ;;  %v1919_v38 = vld [vmem:[%s2202_s25 + $0x18] sm:$0xe]  ;;  %v1922_v46 = vrot.slane %v1918_v37, 9 }
  0x44   : > { %1293 = vmatpush.bf16.msrb.mxu3 %v2024_v62  ;;  %v1195_v62 = vor.u32 %v1194_v45, %v1191_v44  ;;  %v972_v25 = vunpack.c.l.b16 %v952_v18  ;;  %v1333_v44 = vrot.slane %v2464_v48, 5  ;;  %v1337_v45 = vrot.slane %v2467_v50, 5 }
  0x45   : > { %908 = vmatpush.bf16.msrb.mxu0 %v1997_v63  ;;  %v1198_v63 = vshll.u32 %v2464_v48, 16  ;;  %v1210_v13 = vrot.slane %v1209_v0, 4  ;;  %v1923_v47 = vrot.slane %v1919_v38, 9  ;;  %v1326_v29 = vsel %vm2254_vm5, %v1922_v46, %v1325_v42 }
  0x46   : > { %1031 = vmatpush.bf16.msrb.mxu1 %v2005_v3  ;;  %v828_v3 = vrot.slane %v826_v54, 5  ;;  %v1196_v11 = vrot.slane %v1195_v62, 4  ;;  %v974_v33 = vpack.c.b16 %v972_v25, %v971_v24  ;;  %v2030_v54 = vld [vmem:[%s2551_s1 + $0x200] sm:$0xff] }
  0x47   : > { %1135 = vmatpush.bf16.msrb.mxu2 %v2015_v15  ;;  %v1200_v12 = vrot.slane %v1198_v63, 5  ;;  %v815_v15 = vsel %vm2242_vm4, %v810_v6, %v814_v2  ;;  %v1330_v48 = vsel %vm2254_vm5, %v1923_v47, %v1329_v43 }
  0x48   : > { %1294 = vmatpush.bf16.msrb.mxu3 %v2023_v16  ;;  %v829_v16 = vsel %vm2242_vm4, %v824_v7, %v828_v3 }
  0x49   : > { %909 = vmatpush.bf16.msrb.mxu0 %v1996_v21  ;;  %v1201_v20 = vsel %vm2242_vm4, %v1196_v11, %v1200_v12  ;;  %v1215_v21 = vsel %vm2242_vm4, %v1210_v13, %v1214_v14  ;;  %v849_v23 = vunpack.c.l.b16 %v829_v16 }
  0x4a   : > { %1032 = vmatpush.bf16.msrb.mxu1 %v2004_v22  ;;  %v848_v22 = vunpack.c.l.b16 %v815_v15  ;;  %v1235_v28 = vunpack.c.l.b16 %v1215_v21 }
  0x4b   : > { %1136 = vmatpush.bf16.msrb.mxu2 %v2014_v27  ;;  %v1234_v27 = vunpack.c.l.b16 %v1201_v20 }
  0x4c   : > { %1295 = vmatpush.bf16.msrb.mxu3 %v2022_v36  ;;  %910 = vmatmul.bf16.vlgmr.msrb.gmra.mxu0 %v850_v51  ;;  %v851_v41 = vpack.c.b16 %v849_v23, %v848_v22  ;;  %v2032_v36 = vld [vmem:[%s2551_s1 + $0x210] sm:$0xff]  ;;  %v1924_v51 = vrot.slane %v1920_v39, 9 }
  0x4d   : > { %1411 = vmatpush.bf16.msra.mxu0 %v2037_v32  ;;  %1033 = vmatmul.bf16.vlgmr.msrb.gmra.mxu1 %v973_v52  ;;  %v1237_v35 = vpack.c.b16 %v1235_v28, %v1234_v27  ;;  %v1925_v52 = vrot.slane %v1921_v40, 9 }
  0x4e   : > { %2058 = vmatpush.bf16.msra.mxu1 %v2037_v32  ;;  %1137 = vmatmul.bf16.vlgmr.msrb.gmra.mxu2 %v1841_v55  ;;  %v2033_v32 = vld [vmem:[%s2551_s1 + $0x218] sm:$0xff]  ;;  %v1334_v50 = vsel %vm2254_vm5, %v1924_v51, %v1333_v44  ;;  %v1355_v55 = vunpack.c.l.b16 %v1326_v29 }
  0x4f   : > { %1296 = vmatmul.bf16.vlgmr.msrb.gmra.mxu3 %v1236_v56  ;;  %v1338_v53 = vsel %vm2254_vm5, %v1925_v52, %v1337_v45  ;;  %v1356_v56 = vunpack.c.l.b16 %v1330_v48  ;;  %v1357_v57 = vunpack.c.l.b16 %v1334_v50 }
  0x50   : > { %v1358_v58 = vunpack.c.l.b16 %v1338_v53 }
  0x51   : > { %1412 = vmatpush.bf16.msra.mxu0 %v2036_v60  ;;  %v1359_v59 = vpack.c.b16 %v1356_v56, %v1355_v55  ;;  %v2091_v55 = vld [vmem:[%s2552_s2] ss:$0 sm:$0xff] }
  0x52   : > { %2059 = vmatpush.bf16.msra.mxu1 %v2036_v60  ;;  %v1360_v60 = vpack.c.b16 %v1358_v58, %v1357_v57  ;;  %v2039_v57 = vld [vmem:[%s272_s21] sm:$0xff]   ;;  %v2056_v58 = vld [vmem:[%s272_s21 + $0x8] sm:$0xff]  }
  0x55   : > { %1413 = vmatpush.bf16.msra.mxu0 %v2035_v10 }
  0x56   : > { %2060 = vmatpush.bf16.msra.mxu1 %v2035_v10 }
  0x59   : > { %1414 = vmatpush.bf16.msra.mxu0 %v2034_v19 }
  0x5a   : > { %2061 = vmatpush.bf16.msra.mxu1 %v2034_v19 }
  0x5c   : > { %915 = vmatmul.bf16.gmra.mxu0 %v851_v41 }
  0x5d   : > { %1415 = vmatpush.bf16.msra.mxu0 %v2033_v32  ;;  %1038 = vmatmul.bf16.gmra.mxu1 %v974_v33 }
  0x5e   : > { %2062 = vmatpush.bf16.msra.mxu1 %v2033_v32  ;;  %1142 = vmatmul.bf16.gmra.mxu2 %v1845_v34 }
  0x5f   : > { %1301 = vmatmul.bf16.gmra.mxu3 %v1237_v35 }
  0x61   : > { %1416 = vmatpush.bf16.msra.mxu0 %v2032_v36 }
  0x62   : > { %2063 = vmatpush.bf16.msra.mxu1 %v2032_v36 }
  0x65   : > { %1417 = vmatpush.bf16.msra.mxu0 %v2031_v26 }
  0x66   : > { %2064 = vmatpush.bf16.msra.mxu1 %v2031_v26 }
  0x69   : > { %1418 = vmatpush.bf16.msra.mxu0 %v2030_v54 }
  0x6a   : > { %2065 = vmatpush.bf16.msra.mxu1 %v2030_v54 }
  0x6c   : > { %1419 = vmatmul.bf16.vlgmr.msra.gmra.mxu0 %v1359_v59 }
  0x6d   : > { %1424 = vmatmul.bf16.vlgmr.msra.gmra.mxu1 %v1360_v60 }
  0xa9   : > { %v447_v61 = vpop.f32.mrf.mxu0 }
  0xaa   : > { %v526_v62 = vpop.f32.mrf.mxu1 }
  0xab   : > { %v527_v18 = vadd.f32 %v526_v62, %v447_v61 }
  0xb1   : > { %v648_v49 = vpop.f32.mrf.mxu2  ;;  %v449_v0 = vpop.f32.mrf.mxu0 }
  0xb2   : > { %v752_v63 = vpop.f32.mrf.mxu3  ;;  %v528_v1 = vpop.f32.mrf.mxu1  ;;  %v658_v20 = vadd.f32 %v648_v49, %v527_v18  ;;  %v2040_v49 = vunpack.c.l.bf16 %v2039_v57 }
  0xb3   : > { %v529_v30 = vadd.f32 %v528_v1, %v449_v0  ;;  %v2044_v0 = vunpack.c.l.bf16 %v2056_v58  ;;  %v1458_v1 = vlaneseq }
  0xb4   : > { %v762_v27 = vadd.f32 %v752_v63, %v658_v20 }
  0xb9   : > { %v650_v2 = vpop.f32.mrf.mxu2  ;;  %v452_v4 = vpop.f32.mrf.mxu0 }
  0xba   : > { %v754_v3 = vpop.f32.mrf.mxu3  ;;  %v531_v5 = vpop.f32.mrf.mxu1  ;;  %v659_v33 = vadd.f32 %v650_v2, %v529_v30 }
  0xbb   : > { %v532_v19 = vadd.f32 %v531_v5, %v452_v4  ;;  %v2041_v5 = vunpack.c.h.bf16 %v2039_v57 }
  0xbc   : > { %v763_v42 = vadd.f32 %v754_v3, %v659_v33 }
  0xc1   : > { %v653_v6 = vpop.f32.mrf.mxu2  ;;  %v454_v8 = vpop.f32.mrf.mxu0 }
  0xc2   : > { %v757_v7 = vpop.f32.mrf.mxu3  ;;  %v533_v9 = vpop.f32.mrf.mxu1  ;;  %v660_v21 = vadd.f32 %v653_v6, %v532_v19 }
  0xc3   : > { %v534_v31 = vadd.f32 %v533_v9, %v454_v8 }
  0xc4   : > { %v764_v28 = vadd.f32 %v757_v7, %v660_v21  ;;  %v2045_v7 = vunpack.c.h.bf16 %v2056_v58 }
  0xc9   : > { %v655_v10 = vpop.f32.mrf.mxu2  ;;  %v911_v12 = vpop.f32.mrf.mxu0 }
  0xca   : > { %v759_v11 = vpop.f32.mrf.mxu3  ;;  %v1034_v13 = vpop.f32.mrf.mxu1  ;;  %v921_v32 = vadd.f32 %v911_v12, %v762_v27  ;;  %v661_v34 = vadd.f32 %v655_v10, %v534_v31  ;;  %v1459_v12 = vshrl.u32 %v1458_v1, 7 }
  0xcc   : > { %v1044_v38 = vadd.f32 %v1034_v13, %v921_v32  ;;  %v765_v43 = vadd.f32 %v759_v11, %v661_v34  ;;  %vm1460_vm6 = vcmp.lt.s32.totalorder %v1459_v12, 4 }
  0xd1   : > { %v1138_v14 = vpop.f32.mrf.mxu2  ;;  %v913_v16 = vpop.f32.mrf.mxu0 }
  0xd2   : > { %v1297_v15 = vpop.f32.mrf.mxu3  ;;  %v1036_v17 = vpop.f32.mrf.mxu1  ;;  %v1148_v44 = vadd.f32 %v1138_v14, %v1044_v38  ;;  %v922_v46 = vadd.f32 %v913_v16, %v763_v42 }
  0xd4   : > { %v1307_v51 = vadd.f32 %v1297_v15, %v1148_v44  ;;  %v1045_v50 = vadd.f32 %v1036_v17, %v922_v46 }
  0xd9   : > { %v1140_v22 = vpop.f32.mrf.mxu2  ;;  %v916_v24 = vpop.f32.mrf.mxu0 }
  0xda   : > { %v1299_v23 = vpop.f32.mrf.mxu3  ;;  %v1039_v25 = vpop.f32.mrf.mxu1  ;;  %v923_v41 = vadd.f32 %v916_v24, %v764_v28  ;;  %v1149_v59 = vadd.f32 %v1140_v22, %v1045_v50 }
  0xdc   : > { %v1046_v39 = vadd.f32 %v1039_v25, %v923_v41  ;;  %v1308_v2 = vadd.f32 %v1299_v23, %v1149_v59 }
  0xe1   : > { %v1143_v35 = vpop.f32.mrf.mxu2  ;;  %v918_v36 = vpop.f32.mrf.mxu0 }
  0xe2   : > { %v1041_v37 = vpop.f32.mrf.mxu1  ;;  %v1302_v40 = vpop.f32.mrf.mxu3  ;;  %v1150_v45 = vadd.f32 %v1143_v35, %v1046_v39  ;;  %v924_v47 = vadd.f32 %v918_v36, %v765_v43 }
  0xe4   : > { %v1309_v52 = vadd.f32 %v1302_v40, %v1150_v45  ;;  %v1047_v53 = vadd.f32 %v1041_v37, %v924_v47 }
  0xe9   : > { %v1145_v26 = vpop.f32.mrf.mxu2  ;;  %v1420_v29 = vpop.f32.mrf.mxu0 }
  0xea   : > { %v1425_v48 = vpop.f32.mrf.mxu1  ;;  %v1430_v54 = vadd.f32 %v1420_v29, %v1307_v51  ;;  %v1151_v60 = vadd.f32 %v1145_v26, %v1047_v53  ;;  %v1304_v61 = vpop.f32.mrf.mxu3 }
  0xeb   : > { %v1432_v56 = vadd.f32 %v1425_v48, %v1309_v52 }
  0xec   : > { %v1438_v62 = vadd.f32 %v2091_v55, %v1430_v54  ;;  %v1310_v3 = vadd.f32 %v1304_v61, %v1151_v60 }
  0xed   : > { %v1440_v63 = vadd.f32 %v2091_v55, %v1432_v56 }
  0xee   : > { %v1450_v8 = vadd.f32 %v2040_v49, %v1438_v62 }
  0xef   : > { %v1452_v9 = vadd.f32 %v2044_v0, %v1440_v63 }
  0xf0   : > { %v1454_v15 = vmax.f32 %v1450_v8, 0.0 }
  0xf1   : > { %v1422_v4 = vpop.f32.mrf.mxu0  ;;  %v1456_v16 = vmax.f32 %v1452_v9, 0.0 }
  0xf2   : > { %v1427_v6 = vpop.f32.mrf.mxu1  ;;  %v1431_v10 = vadd.f32 %v1422_v4, %v1308_v2  ;;  %v1461_v21 = vsel %vm1460_vm6, %v1454_v15, 0.0 }
  0xf3   : > { %v1433_v11 = vadd.f32 %v1427_v6, %v1310_v3  ;;  %v1463_v22 = vsel %vm1460_vm6, %v1456_v16, 0.0 }
  0xf4   : > { %v1439_v13 = vadd.f32 %v2091_v55, %v1431_v10 }
  0xf5   : > { %v1441_v14 = vadd.f32 %v2091_v55, %v1433_v11 }
  0xf6   : > { %v1451_v17 = vadd.f32 %v2041_v5, %v1439_v13 }
  0xf7   : > { %v1453_v18 = vadd.f32 %v2045_v7, %v1441_v14 }
  0xf8   : > { %v1455_v19 = vmax.f32 %v1451_v17, 0.0 }
  0xf9   : > { %v1457_v20 = vmax.f32 %v1453_v18, 0.0 }
  0xfa   : > { %v1462_v23 = vsel %vm1460_vm6, %v1455_v19, 0.0 }
  0xfb   : > { %v1464_v24 = vsel %vm1460_vm6, %v1457_v20, 0.0  ;;  %v2049_v25 = vpack.c.bf16 %v1462_v23, %v1461_v21 }
  0xfc   : > { %v2054_v27 = vpack.c.bf16 %v1464_v24, %v1463_v22 }
  0xfd   : > { %2050 = vst [vmem:[%s281_s27] sm:$0xff] %v2049_v25  }
  0xfe   : > { %2057 = vst [vmem:[%s281_s27 + $0x8] sm:$0xff] %v2054_v27  }
  0xff PF: > { %s14_s17 = sadd.s32 1, %s2114_s17   ;;  %s2559_s15 = smov %s2110_s16 }
 0x100   : > { %p11_p6 = scmp.ge.s32.totalorder %s14_s17, 4   ;;  %s2560_s16 = smov %s2562_s18 }
 0x102   :  { %13 = sbr.rel (!%p11_p6) target bundleno = 2 (0x2), region = 77 }

// kernel: backbone_base_forward.18
= control target key start
LH: loop header
LB: loop body
LE: loop exit
PB: predicated region body
PF: predicated region fallthrough
CT: control target
= control target key end

     0   :  { %s557_s12 = smov 0   ;;  %s559_s13 = smov 0   ;;  %s622_s0 = inlined_call_operand.vmem [shape: bf16[2,4,8,256], index: 0, kind: input, shape index: {}]   ;;  %s623_s1 = inlined_call_operand.vmem [shape: bf16[128,128], index: 1, kind: input, shape index: {}]   ;;  %s624_s2 = inlined_call_operand.vmem [shape: f32[1,128], index: 2, kind: input, shape index: {}]   ;;  %s625_s3 = inlined_call_operand.vmem [shape: bf16[32,128], index: 3, kind: output, shape index: {}]  }
   0x1   :  { %s561_s14 = smov 0  }
   0x2 LB: > { %s25_s15 = sadd.s32 1, %s531_s13  ;;  %p430_p0 = scmp.ge.s32.totalorder %s535_s14, 1  ;;  %s535_s14 = sphi %s561_s14, %s13_s14   ;;  %s531_s13 = sphi %s559_s13, %s627_s13   ;;  %s527_s12 = sphi %s557_s12, %s626_s12  }
   0x3   : > { %p27_p1 = scmp.ge.s32.totalorder %s25_s15, 2  ;;  %p168_p2 = scmp.lt.s32.totalorder %s535_s14, 3 }
   0x5   : > { %s629_s15 = smov (%p27_p1, %s25_s15), 0  ;;  %p169_p3 = pnand %p430_p0, %p168_p2 }
   0x6   : > { %p202_p4 = scmp.lt.s32.totalorder (!%p169_p3), %s527_s12, 1  ;;  %s433_s10 = sshll.u32 (!%p169_p3), %s527_s12, 1 }
   0x7   : > { %172 = sbr.rel (%p169_p3) target bundleno = 184 (0xb8), region = 32  ;;  %p215_p5 = scmp.lt.s32.totalorder (!%p169_p3), %s433_s10, 3 }
   0xc   : > { %v482_v0 = vld [vmem:[%s623_s1 + $0x38] sm:$0xff]  ;;  %v481_v1 = vld [vmem:[%s623_s1 + $0x30] sm:$0xff]  ;;  %v480_v2 = vld [vmem:[%s623_s1 + $0x28] sm:$0xff]  ;;  %s203_s26 = scalar_select %p202_p4, %s527_s12, 1  ;;  %v313_v12 = vlaneseq }
   0xd   : > { %299 = vmatpush.bf16.msra.mxu0 %v482_v0  ;;  %v479_v3 = vld [vmem:[%s623_s1 + $0x20] sm:$0xff]  ;;  %v478_v4 = vld [vmem:[%s623_s1 + $0x18] sm:$0xff]  ;;  %v477_v5 = vld [vmem:[%s623_s1 + $0x10] sm:$0xff]  ;;  %s631_s10 = smov (!%p215_p5, %s433_s10), 3 }
   0xe   : > { %s473_s29 = sshll.u32 %s203_s26, 5  ;;  %v476_v6 = vld [vmem:[%s623_s1 + $0x8] sm:$0xff]  ;;  %v475_v7 = vld [vmem:[%s623_s1] sm:$0xff]  ;;  %v314_v14 = vshrl.u32 %v313_v12, 7  ;;  %s434_s17 = sshll.u32 %s631_s10, 2 }
   0xf   : > { %s206_s7 = scalar_lea.vmem %s622_s0, %s473_s29  ;;  %v512_v13 = vld [vmem:[%s624_s2] ss:$0 sm:$0xff]  ;;  %s221_s20 = scalar_lea.vmem %s625_s3, %s434_s17 }
  0x10   : > { %v437_v8 = vld [vmem:[%s206_s7] sm:$0xf]  ;;  %v474_v9 = vld [vmem:[%s206_s7 + $0xc] sm:$0xf0]  ;;  %vm315_vm0 = vcmp.lt.s32.totalorder %v314_v14, 2 }
  0x11   : > { %300 = vmatpush.bf16.msra.mxu0 %v481_v1  ;;  %v438_v10 = vor.u32 %v474_v9, %v437_v8 }
  0x15   : > { %301 = vmatpush.bf16.msra.mxu0 %v480_v2 }
  0x19   : > { %302 = vmatpush.bf16.msra.mxu0 %v479_v3 }
  0x1d   : > { %303 = vmatpush.bf16.msra.mxu0 %v478_v4 }
  0x21   : > { %304 = vmatpush.bf16.msra.mxu0 %v477_v5 }
  0x25   : > { %305 = vmatpush.bf16.msra.mxu0 %v476_v6 }
  0x29   : > { %306 = vmatpush.bf16.msra.mxu0 %v475_v7 }
  0x2c   : > { %307 = vmatmul.bf16.vlgmr.msra.gmra.mxu0 %v438_v10 }
  0xa9   : > { %v308_v11 = vpop.f32.mrf.mxu0 }
  0xaa   : > { %v309_v15 = vadd.f32 %v512_v13, %v308_v11 }
  0xac   : > { %v316_v18 = vsel %vm315_vm0, %v309_v15, 0.0 }
  0xb1   : > { %v310_v16 = vpop.f32.mrf.mxu0 }
  0xb2   : > { %v311_v17 = vadd.f32 %v512_v13, %v310_v16 }
  0xb4   : > { %v317_v19 = vsel %vm315_vm0, %v311_v17, 0.0 }
  0xb5   : > { %v486_v20 = vpack.c.bf16 %v317_v19, %v316_v18 }
  0xb7   : > { %487 = vst [vmem:[%s221_s20] sm:$0xff] %v486_v20  }
  0xb8 PF: > { %s13_s14 = sadd.s32 1, %s535_s14   ;;  %s626_s12 = smov %s531_s13 }
  0xb9   : > { %p10_p6 = scmp.ge.s32.totalorder %s13_s14, 4   ;;  %s627_s13 = smov %s629_s15 }
  0xbb   :  { %12 = sbr.rel (!%p10_p6) target bundleno = 2 (0x2), region = 68 }

// kernel: backbone_base_forward.19
= control target key start
LH: loop header
LB: loop body
LE: loop exit
PB: predicated region body
PF: predicated region fallthrough
CT: control target
= control target key end

     0   :  { %s1677_s12 = smov 0   ;;  %s1679_s13 = smov 0   ;;  %s1987_s0 = inlined_call_operand.vmem [shape: bf16[2,6,9,256], index: 0, kind: input, shape index: {}]   ;;  %s1988_s1 = inlined_call_operand.vmem [shape: bf16[1152,128], index: 1, kind: input, shape index: {}]   ;;  %s1989_s2 = inlined_call_operand.vmem [shape: f32[1,128], index: 2, kind: input, shape index: {}]   ;;  %s1990_s3 = inlined_call_operand.vmem [shape: bf16[32,128], index: 3, kind: output, shape index: {}]  }
   0x1   :  { %s1681_s14 = smov 0  }
   0x2 LB: > { %s25_s15 = sadd.s32 1, %s1651_s13  ;;  %p1213_p0 = scmp.ge.s32.totalorder %s1655_s14, 1  ;;  %s1655_s14 = sphi %s1681_s14, %s13_s14   ;;  %s1651_s13 = sphi %s1679_s13, %s1994_s13   ;;  %s1647_s12 = sphi %s1677_s12, %s1993_s12  }
   0x3   : > { %p27_p1 = scmp.ge.s32.totalorder %s25_s15, 2  ;;  %p168_p2 = scmp.lt.s32.totalorder %s1655_s14, 3 }
   0x5   : > { %s1996_s15 = smov (%p27_p1, %s25_s15), 0  ;;  %p169_p3 = pnand %p1213_p0, %p168_p2 }
   0x6   : > { %p202_p4 = scmp.lt.s32.totalorder (!%p169_p3), %s1647_s12, 1  ;;  %s1215_s4 = sshll.u32 (!%p169_p3), %s1647_s12, 1 }
   0x7   : > { %172 = sbr.rel (%p169_p3) target bundleno = 252 (0xfc), region = 32  ;;  %p215_p5 = scmp.lt.s32.totalorder (!%p169_p3), %s1215_s4, 3 }
   0xc   : > { %v1543_v0 = vld [vmem:[%s1988_s1 + $0x78] sm:$0xff]  ;;  %v1542_v4 = vld [vmem:[%s1988_s1 + $0x70] sm:$0xff]  ;;  %s203_s5 = scalar_select %p202_p4, %s1647_s12, 1  ;;  %v1541_v8 = vld [vmem:[%s1988_s1 + $0x68] sm:$0xff]  ;;  %vm395_vm0 = vsmask.f32 3328 }
   0xd   : > { %v1551_v1 = vld [vmem:[%s1988_s1 + $0xb8] sm:$0xff]  ;;  %315 = vmatpush.bf16.msra.mxu0 %v1543_v0  ;;  %v1550_v5 = vld [vmem:[%s1988_s1 + $0xb0] sm:$0xff]  ;;  %v1549_v9 = vld [vmem:[%s1988_s1 + $0xa8] sm:$0xff]  ;;  %vm396_vm1 = vsmask.f32 7440  ;;  %s1998_s4 = smov (!%p215_p5, %s1215_s4), 3 }
   0xe   : > { %v1535_v2 = vld [vmem:[%s1988_s1 + $0x38] sm:$0xff]  ;;  %494 = vmatpush.bf16.msra.mxu2 %v1551_v1  ;;  %v1534_v6 = vld [vmem:[%s1988_s1 + $0x30] sm:$0xff]  ;;  %v1533_v10 = vld [vmem:[%s1988_s1 + $0x28] sm:$0xff]  ;;  %s1607_s18 = smul.u32 96, %s203_s5  ;;  %s1216_s7 = sshll.u32 %s1998_s4, 2 }
   0xf   : > { %v1560_v3 = vld [vmem:[%s1988_s1 + $0xf8] sm:$0xff]  ;;  %381 = vmatpush.bf16.msra.mxu1 %v1535_v2  ;;  %v1559_v7 = vld [vmem:[%s1988_s1 + $0xf0] sm:$0xff]  ;;  %v1558_v11 = vld [vmem:[%s1988_s1 + $0xe8] sm:$0xff]  ;;  %s221_s9 = scalar_lea.vmem %s1990_s3, %s1216_s7 }
  0x10   : > { %585 = vmatpush.bf16.msra.mxu3 %v1560_v3  ;;  %v1540_v12 = vld [vmem:[%s1988_s1 + $0x60] sm:$0xff]  ;;  %s1750_s29 = scalar_lea.vmem %s1987_s0, %s1607_s18  ;;  %v1539_v16 = vld [vmem:[%s1988_s1 + $0x58] sm:$0xff]  ;;  %v1538_v23 = vld [vmem:[%s1988_s1 + $0x50] sm:$0xff] }
  0x11   : > { %316 = vmatpush.bf16.msra.mxu0 %v1542_v4  ;;  %v1548_v13 = vld [vmem:[%s1988_s1 + $0xa0] sm:$0xff]  ;;  %v1547_v17 = vld [vmem:[%s1988_s1 + $0x98] sm:$0xff]  ;;  %v224_v22 = vld [vmem:[%s1750_s29 + $0x8] sm:$0x11] }
  0x12   : > { %495 = vmatpush.bf16.msra.mxu2 %v1550_v5  ;;  %v1532_v14 = vld [vmem:[%s1988_s1 + $0x20] sm:$0xff]  ;;  %v1531_v18 = vld [vmem:[%s1988_s1 + $0x18] sm:$0xff]  ;;  %v1546_v24 = vld [vmem:[%s1988_s1 + $0x90] sm:$0xff]  ;;  %v408_v32 = vshll.u32 %v224_v22, 16 }
  0x13   : > { %382 = vmatpush.bf16.msra.mxu1 %v1534_v6  ;;  %v1557_v15 = vld [vmem:[%s1988_s1 + $0xe0] sm:$0xff]  ;;  %v1556_v19 = vld [vmem:[%s1988_s1 + $0xd8] sm:$0xff]  ;;  %v226_v27 = vld [vmem:[%s1750_s29 + $0x28] sm:$0x11] }
  0x14   : > { %586 = vmatpush.bf16.msra.mxu3 %v1559_v7  ;;  %v223_v20 = vld [vmem:[%s1750_s29] sm:$0xff]  ;;  %v1530_v28 = vld [vmem:[%s1988_s1 + $0x10] sm:$0xff]  ;;  %v422_v33 = vshll.u32 %v226_v27, 16  ;;  %v410_v39 = vrot.slane %v408_v32, 5  ;;  %v1537_v40 = vld [vmem:[%s1988_s1 + $0x48] sm:$0xff] }
  0x15   : > { %317 = vmatpush.bf16.msra.mxu0 %v1541_v8  ;;  %v225_v21 = vld [vmem:[%s1750_s29 + $0x20] sm:$0xff]  ;;  %v399_v25 = vshrl.u32 %v223_v20, 16  ;;  %v402_v26 = vshll.u32 %v223_v20, 16  ;;  %v1555_v29 = vld [vmem:[%s1988_s1 + $0xd0] sm:$0xff]  ;;  %v1545_v41 = vld [vmem:[%s1988_s1 + $0x88] sm:$0xff]  ;;  %v245_v42 = vrot.slane %v223_v20, 4 }
  0x16   : > { %496 = vmatpush.bf16.msra.mxu2 %v1549_v9  ;;  %v413_v30 = vshrl.u32 %v225_v21, 16  ;;  %v416_v31 = vshll.u32 %v225_v21, 16  ;;  %v246_v43 = vrot.slane %v225_v21, 4  ;;  %vm1786_vm2 = vmor %vm395_vm0, %vm396_vm1  ;;  %v424_v46 = vrot.slane %v422_v33, 5  ;;  %v1529_v47 = vld [vmem:[%s1988_s1 + $0x8] sm:$0xff]  ;;  %v1536_v51 = vld [vmem:[%s1988_s1 + $0x40] sm:$0xff] }
  0x17   : > { %383 = vmatpush.bf16.msra.mxu1 %v1533_v10  ;;  %v401_v34 = vrot.slane %v399_v25, 4  ;;  %v404_v35 = vrot.slane %v402_v26, 5  ;;  %v1554_v48 = vld [vmem:[%s1988_s1 + $0xc8] sm:$0xff]  ;;  %v1544_v53 = vld [vmem:[%s1988_s1 + $0x80] sm:$0xff]  ;;  %v1568_v54 = vld [vmem:[%s1988_s1 + $0x138] sm:$0xff]  ;;  %v263_v56 = vunpack.c.l.b16 %v245_v42 }
  0x18   : > { %587 = vmatpush.bf16.msra.mxu3 %v1558_v11  ;;  %v415_v36 = vrot.slane %v413_v30, 4  ;;  %v418_v37 = vrot.slane %v416_v31, 5  ;;  %v1585_v55 = vld [vmem:[%s1988_s1 + $0x1b8] sm:$0xff]  ;;  %v1812_v57 = vunpack.c.l.b16 %v246_v43  ;;  %v1528_v60 = vld [vmem:[%s1988_s1] sm:$0xff]  ;;  %v1323_v3 = vld [vmem:[%s1750_s29 + $0x10] sm:$0xf] }
  0x19   : > { %318 = vmatpush.bf16.msra.mxu0 %v1540_v12  ;;  %v405_v38 = vor.u32 %v404_v35, %v401_v34  ;;  %v1553_v61 = vld [vmem:[%s1988_s1 + $0xc0] sm:$0xff]  ;;  %v1576_v62 = vld [vmem:[%s1988_s1 + $0x178] sm:$0xff]  ;;  %v1552_v4 = vld [vmem:[%s1750_s29 + $0x2c] sm:$0xf0] }
  0x1a   : > { %497 = vmatpush.bf16.msra.mxu2 %v1548_v13  ;;  %v419_v45 = vor.u32 %v418_v37, %v415_v36  ;;  %v1593_v0 = vld [vmem:[%s1988_s1 + $0x1f8] sm:$0xff]  ;;  %v1251_v1 = vld [vmem:[%s1750_s29] sm:$0xf]  ;;  %v265_v5 = vpack.c.b16 %v1812_v57, %v263_v56  ;;  %v1567_v7 = vld [vmem:[%s1988_s1 + $0x130] sm:$0xff]  ;;  %v1324_v10 = vor.u32 %v1552_v4, %v1323_v3 }
  0x1b   : > { %384 = vmatpush.bf16.msra.mxu1 %v1532_v14  ;;  %v406_v49 = vrot.slane %v405_v38, 4  ;;  %v1527_v2 = vld [vmem:[%s1750_s29 + $0x1c] sm:$0xf0]  ;;  %v1584_v8 = vld [vmem:[%s1988_s1 + $0x1b0] sm:$0xff]  ;;  %v1318_v31 = vld [vmem:[%s1750_s29 + $0x18] sm:$0x11] }
  0x1c   : > { %588 = vmatpush.bf16.msra.mxu3 %v1557_v15  ;;  %v1796_v50 = vrot.slane %v419_v45, 4  ;;  %v1252_v9 = vor.u32 %v1527_v2, %v1251_v1  ;;  %v1575_v11 = vld [vmem:[%s1988_s1 + $0x170] sm:$0xff]  ;;  %v1566_v15 = vld [vmem:[%s1988_s1 + $0x128] sm:$0xff]  ;;  %v1573_v25 = vld [vmem:[%s1988_s1 + $0x160] sm:$0xff]  ;;  %v697_v38 = vshll.u32 %v1318_v31, 16 }
  0x1d   : > { %319 = vmatpush.bf16.msra.mxu0 %v1539_v16  ;;  %v411_v52 = vsel %vm1786_vm2, %v406_v49, %v410_v39  ;;  %v1592_v12 = vld [vmem:[%s1988_s1 + $0x1f0] sm:$0xff]  ;;  %v1583_v16 = vld [vmem:[%s1988_s1 + $0x1a8] sm:$0xff]  ;;  %v1590_v26 = vld [vmem:[%s1988_s1 + $0x1e0] sm:$0xff] }
  0x1e   : > { %498 = vmatpush.bf16.msra.mxu2 %v1547_v17  ;;  %v425_v58 = vsel %vm1786_vm2, %v1796_v50, %v424_v46  ;;  %v442_v59 = vunpack.c.l.b16 %v411_v52  ;;  %v1847_v13 = vld [vmem:[%s1750_s29 + $0x10] sm:$0xff]  ;;  %v1574_v17 = vld [vmem:[%s1988_s1 + $0x168] sm:$0xff]  ;;  %v1320_v32 = vld [vmem:[%s1750_s29 + $0x38] sm:$0x11] }
  0x1f   : > { %385 = vmatpush.bf16.msra.mxu1 %v1531_v18  ;;  %v443_v63 = vunpack.c.l.b16 %v425_v58  ;;  %v1850_v14 = vld [vmem:[%s1750_s29 + $0x30] sm:$0xff]  ;;  %v1591_v18 = vld [vmem:[%s1988_s1 + $0x1e8] sm:$0xff]  ;;  %v691_v20 = vshll.u32 %v1847_v13, 16  ;;  %v1564_v33 = vld [vmem:[%s1988_s1 + $0x118] sm:$0xff]  ;;  %v601_v52 = vrot.slane %v1847_v13, 4 }
  0x20   : > { %589 = vmatpush.bf16.msra.mxu3 %v1556_v19  ;;  %v688_v19 = vshrl.u32 %v1847_v13, 16  ;;  %v702_v21 = vshrl.u32 %v1850_v14, 16  ;;  %v705_v22 = vshll.u32 %v1850_v14, 16  ;;  %v1581_v34 = vld [vmem:[%s1988_s1 + $0x198] sm:$0xff]  ;;  %v1580_v42 = vld [vmem:[%s1988_s1 + $0x190] sm:$0xff]  ;;  %v1570_v58 = vld [vmem:[%s1988_s1 + $0x148] sm:$0xff] }
  0x21   : > { %320 = vmatpush.bf16.msra.mxu0 %v1538_v23  ;;  %v444_v6 = vpack.c.b16 %v443_v63, %v442_v59  ;;  %v1565_v23 = vld [vmem:[%s1988_s1 + $0x120] sm:$0xff]  ;;  %v1572_v35 = vld [vmem:[%s1988_s1 + $0x158] sm:$0xff]  ;;  %v1571_v43 = vld [vmem:[%s1988_s1 + $0x150] sm:$0xff]  ;;  %v619_v63 = vunpack.c.l.b16 %v601_v52 }
  0x22   : > { %499 = vmatpush.bf16.msra.mxu2 %v1546_v24  ;;  %v1582_v24 = vld [vmem:[%s1988_s1 + $0x1a0] sm:$0xff]  ;;  %v690_v27 = vrot.slane %v688_v19, 4  ;;  %v707_v30 = vrot.slane %v705_v22, 5  ;;  %v1589_v36 = vld [vmem:[%s1988_s1 + $0x1d8] sm:$0xff]  ;;  %v1588_v45 = vld [vmem:[%s1988_s1 + $0x1d0] sm:$0xff] }
  0x23   : > { %386 = vmatpush.bf16.msra.mxu1 %v1530_v28  ;;  %v693_v28 = vrot.slane %v691_v20, 5  ;;  %v1587_v59 = vld [vmem:[%s1988_s1 + $0x1c8] sm:$0xff]  ;;  %v1578_v1 = vld [vmem:[%s1988_s1 + $0x180] sm:$0xff]  ;;  %v1601_v4 = vld [vmem:[%s1988_s1 + $0x238] sm:$0xff] }
  0x24   : > { %590 = vmatpush.bf16.msra.mxu3 %v1555_v29  ;;  %v704_v29 = vrot.slane %v702_v21, 4  ;;  %v1427_v2 = vld [vmem:[%s1750_s29 + $0x20] sm:$0xf]  ;;  %v1422_v20 = vld [vmem:[%s1750_s29 + $0x28] sm:$0x11] }
  0x25   : > { %321 = vmatpush.bf16.msra.mxu0 %v1537_v40  ;;  %v694_v37 = vor.u32 %v693_v28, %v690_v27  ;;  %v711_v40 = vshll.u32 %v1320_v32, 16  ;;  %v1577_v3 = vld [vmem:[%s1750_s29 + $0x3c] sm:$0xf0]  ;;  %v1424_v21 = vld [vmem:[%s1750_s29 + $0x48] sm:$0x11]  ;;  %v1596_v27 = vld [vmem:[%s1988_s1 + $0x210] sm:$0xff] }
  0x26   : > { %500 = vmatpush.bf16.msra.mxu2 %v1545_v41  ;;  %v708_v39 = vor.u32 %v707_v30, %v704_v29  ;;  %v1563_v41 = vld [vmem:[%s1988_s1 + $0x110] sm:$0xff]  ;;  %v1598_v19 = vld [vmem:[%s1988_s1 + $0x220] sm:$0xff]  ;;  %v1595_v30 = vld [vmem:[%s1988_s1 + $0x208] sm:$0xff] }
  0x27   : > { %387 = vmatpush.bf16.msra.mxu1 %v1529_v47  ;;  %v695_v46 = vrot.slane %v694_v37, 4  ;;  %v699_v47 = vrot.slane %v697_v38, 5  ;;  %v713_v49 = vrot.slane %v711_v40, 5 }
  0x28   : > { %591 = vmatpush.bf16.msra.mxu3 %v1554_v48  ;;  %v709_v48 = vrot.slane %v708_v39, 4 }
  0x29   : > { %322 = vmatpush.bf16.msra.mxu0 %v1536_v51  ;;  %v1423_v51 = vld [vmem:[%s1750_s29 + $0x40] sm:$0xff] }
  0x2a   : > { %501 = vmatpush.bf16.msra.mxu2 %v1544_v53  ;;  %v602_v53 = vrot.slane %v1850_v14, 4  ;;  %v891_v56 = vrot.slane %v1423_v51, 4  ;;  %v1600_v14 = vld [vmem:[%s1988_s1 + $0x230] sm:$0xff] }
  0x2b   : > { %388 = vmatpush.bf16.msra.mxu1 %v1528_v60  ;;  %v700_v60 = vsel %vm1786_vm2, %v695_v46, %v699_v47 }
  0x2c   : > { %592 = vmatpush.bf16.msra.mxu3 %v1553_v61  ;;  %323 = vmatmul.bf16.vlgmr.msra.gmra.mxu0 %v265_v5  ;;  %v714_v61 = vsel %vm1786_vm2, %v709_v48, %v713_v49  ;;  %v731_v5 = vunpack.c.l.b16 %v700_v60 }
  0x2d   : > { %671 = vmatpush.bf16.msrb.mxu0 %v1568_v54  ;;  %502 = vmatmul.bf16.vlgmr.msra.gmra.mxu2 %v444_v6  ;;  %v1562_v54 = vld [vmem:[%s1988_s1 + $0x108] sm:$0xff]  ;;  %v732_v6 = vunpack.c.l.b16 %v714_v61 }
  0x2e   : > { %874 = vmatpush.bf16.msrb.mxu2 %v1585_v55  ;;  %389 = vmatmul.bf16.vlgmr.msra.gmra.mxu1 %v1252_v9  ;;  %v1579_v55 = vld [vmem:[%s1988_s1 + $0x188] sm:$0xff]  ;;  %v1586_v9 = vld [vmem:[%s1988_s1 + $0x1c0] sm:$0xff] }
  0x2f   : > { %783 = vmatpush.bf16.msrb.mxu1 %v1576_v62  ;;  %593 = vmatmul.bf16.vlgmr.msra.gmra.mxu3 %v1324_v10  ;;  %v1561_v62 = vld [vmem:[%s1988_s1 + $0x100] sm:$0xff] }
  0x30   : > { %960 = vmatpush.bf16.msrb.mxu3 %v1593_v0  ;;  %v620_v0 = vunpack.c.l.b16 %v602_v53 }
  0x31   : > { %672 = vmatpush.bf16.msrb.mxu0 %v1567_v7  ;;  %v909_v7 = vunpack.c.l.b16 %v891_v56 }
  0x32   : > { %875 = vmatpush.bf16.msrb.mxu2 %v1584_v8  ;;  %v1569_v8 = vld [vmem:[%s1988_s1 + $0x140] sm:$0xff]  ;;  %v621_v10 = vpack.c.b16 %v620_v0, %v619_v63 }
  0x33   : > { %784 = vmatpush.bf16.msrb.mxu1 %v1575_v11  ;;  %v1428_v11 = vor.u32 %v1577_v3, %v1427_v2  ;;  %v910_v13 = vpack.c.b16 %v909_v7, %v1812_v57 }
  0x34   : > { %961 = vmatpush.bf16.msrb.mxu3 %v1592_v12  ;;  %v733_v12 = vpack.c.b16 %v732_v6, %v731_v5  ;;  %v1096_v6 = vlaneseq }
  0x35   : > { %673 = vmatpush.bf16.msrb.mxu0 %v1566_v15  ;;  %v991_v15 = vshrl.u32 %v1423_v51, 16 }
  0x36   : > { %876 = vmatpush.bf16.msrb.mxu2 %v1583_v16  ;;  %v994_v16 = vshll.u32 %v1423_v51, 16 }
  0x37   : > { %785 = vmatpush.bf16.msrb.mxu1 %v1574_v17  ;;  %v1599_v17 = vld [vmem:[%s1988_s1 + $0x228] sm:$0xff]  ;;  %v993_v57 = vrot.slane %v991_v15, 4 }
  0x38   : > { %962 = vmatpush.bf16.msrb.mxu3 %v1591_v18  ;;  %v996_v18 = vrot.slane %v994_v16, 5 }
  0x39   : > { %674 = vmatpush.bf16.msrb.mxu0 %v1565_v23  ;;  %v1597_v23 = vld [vmem:[%s1988_s1 + $0x218] sm:$0xff] }
  0x3a   : > { %877 = vmatpush.bf16.msrb.mxu2 %v1582_v24  ;;  %v997_v22 = vor.u32 %v996_v18, %v993_v57  ;;  %v986_v24 = vshll.u32 %v1422_v20, 16 }
  0x3b   : > { %786 = vmatpush.bf16.msrb.mxu1 %v1573_v25  ;;  %v1000_v25 = vshll.u32 %v1424_v21, 16 }
  0x3c   : > { %963 = vmatpush.bf16.msrb.mxu3 %v1590_v26  ;;  %v998_v26 = vrot.slane %v997_v22, 4  ;;  %v988_v28 = vrot.slane %v986_v24, 5 }
  0x3d   : > { %675 = vmatpush.bf16.msrb.mxu0 %v1564_v33  ;;  %v1002_v29 = vrot.slane %v1000_v25, 5 }
  0x3e   : > { %878 = vmatpush.bf16.msrb.mxu2 %v1581_v34  ;;  %v989_v31 = vsel %vm1786_vm2, %v1796_v50, %v988_v28 }
  0x3f   : > { %787 = vmatpush.bf16.msrb.mxu1 %v1572_v35  ;;  %v1003_v32 = vsel %vm1786_vm2, %v998_v26, %v1002_v29  ;;  %v1020_v33 = vunpack.c.l.b16 %v989_v31  ;;  %v1594_v35 = vld [vmem:[%s1988_s1 + $0x200] sm:$0xff] }
  0x40   : > { %964 = vmatpush.bf16.msrb.mxu3 %v1589_v36  ;;  %v1021_v34 = vunpack.c.l.b16 %v1003_v32 }
  0x41   : > { %676 = vmatpush.bf16.msrb.mxu0 %v1563_v41 }
  0x42   : > { %879 = vmatpush.bf16.msrb.mxu2 %v1580_v42  ;;  %v1022_v36 = vpack.c.b16 %v1021_v34, %v1020_v33 }
  0x43   : > { %788 = vmatpush.bf16.msrb.mxu1 %v1571_v43 }
  0x44   : > { %965 = vmatpush.bf16.msrb.mxu3 %v1588_v45 }
  0x45   : > { %677 = vmatpush.bf16.msrb.mxu0 %v1562_v54 }
  0x46   : > { %880 = vmatpush.bf16.msrb.mxu2 %v1579_v55 }
  0x47   : > { %789 = vmatpush.bf16.msrb.mxu1 %v1570_v58 }
  0x48   : > { %966 = vmatpush.bf16.msrb.mxu3 %v1587_v59 }
  0x49   : > { %678 = vmatpush.bf16.msrb.mxu0 %v1561_v62 }
  0x4a   : > { %881 = vmatpush.bf16.msrb.mxu2 %v1578_v1 }
  0x4b   : > { %790 = vmatpush.bf16.msrb.mxu1 %v1569_v8 }
  0x4c   : > { %967 = vmatpush.bf16.msrb.mxu3 %v1586_v9  ;;  %679 = vmatmul.bf16.vlgmr.msrb.gmra.mxu0 %v621_v10  ;;  %v1097_v9 = vshrl.u32 %v1096_v6, 7 }
  0x4d   : > { %1072 = vmatpush.bf16.msra.mxu0 %v1601_v4  ;;  %882 = vmatmul.bf16.vlgmr.msrb.gmra.mxu2 %v1428_v11  ;;  %v1632_v4 = vld [vmem:[%s1989_s2] ss:$0 sm:$0xff] }
  0x4e   : > { %791 = vmatmul.bf16.vlgmr.msrb.gmra.mxu1 %v733_v12  ;;  %vm1098_vm3 = vcmp.lt.s32.totalorder %v1097_v9, 2 }
  0x4f   : > { %968 = vmatmul.bf16.vlgmr.msrb.gmra.mxu3 %v910_v13 }
  0x51   : > { %1073 = vmatpush.bf16.msra.mxu0 %v1600_v14 }
  0x55   : > { %1074 = vmatpush.bf16.msra.mxu0 %v1599_v17 }
  0x59   : > { %1075 = vmatpush.bf16.msra.mxu0 %v1598_v19 }
  0x5d   : > { %1076 = vmatpush.bf16.msra.mxu0 %v1597_v23 }
  0x61   : > { %1077 = vmatpush.bf16.msra.mxu0 %v1596_v27 }
  0x65   : > { %1078 = vmatpush.bf16.msra.mxu0 %v1595_v30 }
  0x69   : > { %1079 = vmatpush.bf16.msra.mxu0 %v1594_v35 }
  0x6c   : > { %1080 = vmatmul.bf16.vlgmr.msra.gmra.mxu0 %v1022_v36 }
  0xa9   : > { %v324_v37 = vpop.f32.mrf.mxu0 }
  0xab   : > { %v390_v38 = vpop.f32.mrf.mxu1 }
  0xac   : > { %v391_v42 = vadd.f32 %v390_v38, %v324_v37 }
  0xb0   : > { %v503_v39 = vpop.f32.mrf.mxu2 }
  0xb1   : > { %v326_v40 = vpop.f32.mrf.mxu0  ;;  %v508_v44 = vadd.f32 %v503_v39, %v391_v42 }
  0xb2   : > { %v594_v41 = vpop.f32.mrf.mxu3 }
  0xb3   : > { %v392_v50 = vpop.f32.mrf.mxu1  ;;  %v599_v47 = vadd.f32 %v594_v41, %v508_v44 }
  0xb4   : > { %v393_v48 = vadd.f32 %v392_v50, %v326_v40 }
  0xb8   : > { %v505_v43 = vpop.f32.mrf.mxu2 }
  0xb9   : > { %v509_v53 = vadd.f32 %v505_v43, %v393_v48 }
  0xba   : > { %v596_v46 = vpop.f32.mrf.mxu3 }
  0xbb   : > { %v600_v58 = vadd.f32 %v596_v46, %v509_v53 }
  0xc9   : > { %v680_v45 = vpop.f32.mrf.mxu0 }
  0xca   : > { %v685_v51 = vadd.f32 %v680_v45, %v599_v47 }
  0xcb   : > { %v792_v49 = vpop.f32.mrf.mxu1 }
  0xcc   : > { %v797_v55 = vadd.f32 %v792_v49, %v685_v51 }
  0xd0   : > { %v883_v52 = vpop.f32.mrf.mxu2 }
  0xd1   : > { %v682_v54 = vpop.f32.mrf.mxu0  ;;  %v888_v59 = vadd.f32 %v883_v52, %v797_v55 }
  0xd2   : > { %v969_v56 = vpop.f32.mrf.mxu3  ;;  %v686_v60 = vadd.f32 %v682_v54, %v600_v58 }
  0xd3   : > { %v794_v61 = vpop.f32.mrf.mxu1  ;;  %v974_v0 = vadd.f32 %v969_v56, %v888_v59 }
  0xd4   : > { %v798_v1 = vadd.f32 %v794_v61, %v686_v60 }
  0xd8   : > { %v885_v62 = vpop.f32.mrf.mxu2 }
  0xd9   : > { %v889_v2 = vadd.f32 %v885_v62, %v798_v1 }
  0xda   : > { %v971_v5 = vpop.f32.mrf.mxu3 }
  0xdb   : > { %v975_v7 = vadd.f32 %v971_v5, %v889_v2 }
  0xe9   : > { %v1081_v63 = vpop.f32.mrf.mxu0 }
  0xea   : > { %v1086_v3 = vadd.f32 %v1081_v63, %v974_v0 }
  0xec   : > { %v1092_v8 = vadd.f32 %v1632_v4, %v1086_v3 }
  0xee   : > { %v1094_v12 = vmax.f32 %v1092_v8, 0.0 }
  0xf0   : > { %v1099_v15 = vsel %vm1098_vm3, %v1094_v12, 0.0 }
  0xf1   : > { %v1083_v10 = vpop.f32.mrf.mxu0 }
  0xf2   : > { %v1087_v11 = vadd.f32 %v1083_v10, %v975_v7 }
  0xf4   : > { %v1093_v13 = vadd.f32 %v1632_v4, %v1087_v11 }
  0xf6   : > { %v1095_v14 = vmax.f32 %v1093_v13, 0.0 }
  0xf8   : > { %v1100_v16 = vsel %vm1098_vm3, %v1095_v14, 0.0 }
  0xf9   : > { %v1605_v17 = vpack.c.bf16 %v1100_v16, %v1099_v15 }
  0xfb   : > { %1606 = vst [vmem:[%s221_s9] sm:$0xff] %v1605_v17  }
  0xfc PF: > { %s13_s14 = sadd.s32 1, %s1655_s14   ;;  %s1993_s12 = smov %s1651_s13 }
  0xfd   : > { %p10_p6 = scmp.ge.s32.totalorder %s13_s14, 4   ;;  %s1994_s13 = smov %s1996_s15 }
  0xff   :  { %12 = sbr.rel (!%p10_p6) target bundleno = 2 (0x2), region = 70 }

// kernel: backbone_base_forward.21
= control target key start
LH: loop header
LB: loop body
LE: loop exit
PB: predicated region body
PF: predicated region fallthrough
CT: control target
= control target key end

     0   :  { %s529_s12 = smov 0   ;;  %s531_s13 = smov 0   ;;  %s589_s0 = inlined_call_operand.vmem [shape: bf16[2,2,8,256], index: 0, kind: input, shape index: {}]   ;;  %s590_s1 = inlined_call_operand.vmem [shape: bf16[128,128], index: 1, kind: input, shape index: {}]   ;;  %s591_s2 = inlined_call_operand.vmem [shape: f32[1,128], index: 2, kind: input, shape index: {}]   ;;  %s592_s3 = inlined_call_operand.vmem [shape: bf16[16,128], index: 3, kind: output, shape index: {}]  }
   0x1   :  { %s533_s14 = smov 0  }
   0x2 LB: > { %s25_s15 = sadd.s32 1, %s503_s13  ;;  %p413_p0 = scmp.ge.s32.totalorder %s507_s14, 1  ;;  %s507_s14 = sphi %s533_s14, %s13_s14   ;;  %s503_s13 = sphi %s531_s13, %s594_s13   ;;  %s499_s12 = sphi %s529_s12, %s593_s12  }
   0x3   : > { %p27_p1 = scmp.ge.s32.totalorder %s25_s15, 2  ;;  %p168_p2 = scmp.lt.s32.totalorder %s507_s14, 3 }
   0x5   : > { %s596_s15 = smov (%p27_p1, %s25_s15), 0  ;;  %p169_p3 = pnand %p413_p0, %p168_p2 }
   0x6   : > { %p201_p4 = scmp.lt.s32.totalorder (!%p169_p3), %s499_s12, 1 }
   0x7   : > { %172 = sbr.rel (%p169_p3) target bundleno = 178 (0xb2), region = 32 }
   0xc   : > { %v459_v0 = vld [vmem:[%s590_s1 + $0x38] sm:$0xff]  ;;  %v458_v1 = vld [vmem:[%s590_s1 + $0x30] sm:$0xff]  ;;  %v457_v2 = vld [vmem:[%s590_s1 + $0x28] sm:$0xff]  ;;  %s598_s12 = smov (!%p201_p4, %s499_s12), 1  ;;  %v302_v9 = vlaneseq }
   0xd   : > { %289 = vmatpush.bf16.msra.mxu0 %v459_v0  ;;  %v456_v3 = vld [vmem:[%s590_s1 + $0x20] sm:$0xff]  ;;  %v455_v4 = vld [vmem:[%s590_s1 + $0x18] sm:$0xff]  ;;  %v454_v5 = vld [vmem:[%s590_s1 + $0x10] sm:$0xff]  ;;  %s451_s30 = sshll.u32 %s598_s12, 4  ;;  %s416_s11 = sshll.u32 %s598_s12, 2 }
   0xe   : > { %v453_v6 = vld [vmem:[%s590_s1 + $0x8] sm:$0xff]  ;;  %v452_v7 = vld [vmem:[%s590_s1] sm:$0xff]  ;;  %s205_s8 = scalar_lea.vmem %s589_s0, %s451_s30  ;;  %v303_v10 = vshrl.u32 %v302_v9, 7  ;;  %s219_s18 = scalar_lea.vmem %s592_s3, %s416_s11 }
   0xf   : > { %v220_v8 = vld [vmem:[%s205_s8] sm:$0xff] }
  0x10   : > { %v484_v11 = vld [vmem:[%s591_s2] ss:$0 sm:$0xff]  ;;  %vm304_vm0 = vcmp.lt.s32.totalorder %v303_v10, 1 }
  0x11   : > { %290 = vmatpush.bf16.msra.mxu0 %v458_v1 }
  0x15   : > { %291 = vmatpush.bf16.msra.mxu0 %v457_v2 }
  0x19   : > { %292 = vmatpush.bf16.msra.mxu0 %v456_v3 }
  0x1d   : > { %293 = vmatpush.bf16.msra.mxu0 %v455_v4 }
  0x21   : > { %294 = vmatpush.bf16.msra.mxu0 %v454_v5 }
  0x25   : > { %295 = vmatpush.bf16.msra.mxu0 %v453_v6 }
  0x29   : > { %296 = vmatpush.bf16.msra.mxu0 %v452_v7 }
  0x2c   : > { %297 = vmatmul.bf16.vlgmr.msra.gmra.mxu0 %v220_v8 }
  0xa9   : > { %v298_v12 = vpop.f32.mrf.mxu0 }
  0xaa   : > { %v299_v13 = vadd.f32 %v484_v11, %v298_v12 }
  0xac   : > { %v305_v14 = vsel %vm304_vm0, %v299_v13, 0.0 }
  0xad   : > { %v306_v15 = vpack.c.bf16 %v305_v14, %v305_v14 }
  0xaf   : > { %307 = vst [vmem:[%s219_s18] sm:$0xf] %v306_v15 }
  0xb1   : > { %v300_v16 = vpop.f32.mrf.mxu0 }
  0xb2 PF: > { %s13_s14 = sadd.s32 1, %s507_s14   ;;  %s593_s12 = smov %s503_s13 }
  0xb3   : > { %p10_p5 = scmp.ge.s32.totalorder %s13_s14, 4   ;;  %s594_s13 = smov %s596_s15 }
  0xb5   :  { %12 = sbr.rel (!%p10_p5) target bundleno = 2 (0x2), region = 68 }

// kernel: backbone_base_forward.22
= control target key start
LH: loop header
LB: loop body
LE: loop exit
PB: predicated region body
PF: predicated region fallthrough
CT: control target
= control target key end

     0   :  { %s1545_s12 = smov 0   ;;  %s1547_s13 = smov 0   ;;  %s1816_s0 = inlined_call_operand.vmem [shape: bf16[2,4,9,256], index: 0, kind: input, shape index: {}]   ;;  %s1817_s1 = inlined_call_operand.vmem [shape: bf16[1152,128], index: 1, kind: input, shape index: {}]   ;;  %s1818_s2 = inlined_call_operand.vmem [shape: f32[1,128], index: 2, kind: input, shape index: {}]   ;;  %s1819_s3 = inlined_call_operand.vmem [shape: bf16[16,128], index: 3, kind: output, shape index: {}]  }
   0x1   :  { %s1549_s14 = smov 0  }
   0x2 LB: > { %s25_s15 = sadd.s32 1, %s1519_s13  ;;  %p1090_p0 = scmp.ge.s32.totalorder %s1523_s14, 1  ;;  %s1523_s14 = sphi %s1549_s14, %s13_s14   ;;  %s1519_s13 = sphi %s1547_s13, %s1821_s13   ;;  %s1515_s12 = sphi %s1545_s12, %s1820_s12  }
   0x3   : > { %p27_p1 = scmp.ge.s32.totalorder %s25_s15, 2  ;;  %p168_p2 = scmp.lt.s32.totalorder %s1523_s14, 3 }
   0x5   : > { %s1823_s15 = smov (%p27_p1, %s25_s15), 0  ;;  %p169_p3 = pnand %p1090_p0, %p168_p2 }
   0x6   : > { %p201_p4 = scmp.lt.s32.totalorder (!%p169_p3), %s1515_s12, 1 }
   0x7   : > { %172 = sbr.rel (%p169_p3) target bundleno = 244 (0xf4), region = 32 }
   0xc   : > { %v1417_v0 = vld [vmem:[%s1817_s1 + $0x78] sm:$0xff]  ;;  %v1416_v4 = vld [vmem:[%s1817_s1 + $0x70] sm:$0xff]  ;;  %s1825_s12 = smov (!%p201_p4, %s1515_s12), 1  ;;  %v1415_v8 = vld [vmem:[%s1817_s1 + $0x68] sm:$0xff] }
   0xd   : > { %v1425_v1 = vld [vmem:[%s1817_s1 + $0xb8] sm:$0xff]  ;;  %305 = vmatpush.bf16.msra.mxu0 %v1417_v0  ;;  %v1424_v5 = vld [vmem:[%s1817_s1 + $0xb0] sm:$0xff]  ;;  %v1423_v9 = vld [vmem:[%s1817_s1 + $0xa8] sm:$0xff]  ;;  %s1400_s17 = sshll.u32 %s1825_s12, 6  ;;  %s1093_s5 = sshll.u32 %s1825_s12, 2 }
   0xe   : > { %v1434_v2 = vld [vmem:[%s1817_s1 + $0xf8] sm:$0xff]  ;;  %455 = vmatpush.bf16.msra.mxu2 %v1425_v1  ;;  %v1433_v6 = vld [vmem:[%s1817_s1 + $0xf0] sm:$0xff]  ;;  %v1432_v10 = vld [vmem:[%s1817_s1 + $0xe8] sm:$0xff]  ;;  %s1617_s28 = scalar_lea.vmem %s1816_s0, %s1400_s17  ;;  %s219_s8 = scalar_lea.vmem %s1819_s3, %s1093_s5 }
   0xf   : > { %v1409_v3 = vld [vmem:[%s1817_s1 + $0x38] sm:$0xff]  ;;  %536 = vmatpush.bf16.msra.mxu3 %v1434_v2  ;;  %v1408_v7 = vld [vmem:[%s1817_s1 + $0x30] sm:$0xff]  ;;  %v1407_v11 = vld [vmem:[%s1817_s1 + $0x28] sm:$0xff] }
  0x10   : > { %366 = vmatpush.bf16.msra.mxu1 %v1409_v3  ;;  %v1414_v12 = vld [vmem:[%s1817_s1 + $0x60] sm:$0xff]  ;;  %v1413_v16 = vld [vmem:[%s1817_s1 + $0x58] sm:$0xff]  ;;  %v1401_v21 = vld [vmem:[%s1617_s28 + $0x4] sm:$0x10] }
  0x11   : > { %306 = vmatpush.bf16.msra.mxu0 %v1416_v4  ;;  %v1422_v13 = vld [vmem:[%s1817_s1 + $0xa0] sm:$0xff]  ;;  %v1421_v17 = vld [vmem:[%s1817_s1 + $0x98] sm:$0xff]  ;;  %v1412_v22 = vld [vmem:[%s1817_s1 + $0x50] sm:$0xff] }
  0x12   : > { %456 = vmatpush.bf16.msra.mxu2 %v1424_v5  ;;  %v1431_v14 = vld [vmem:[%s1817_s1 + $0xe0] sm:$0xff]  ;;  %v1430_v18 = vld [vmem:[%s1817_s1 + $0xd8] sm:$0xff]  ;;  %v1420_v23 = vld [vmem:[%s1817_s1 + $0x90] sm:$0xff] }
  0x13   : > { %537 = vmatpush.bf16.msra.mxu3 %v1433_v6  ;;  %v1406_v15 = vld [vmem:[%s1817_s1 + $0x20] sm:$0xff]  ;;  %v1405_v19 = vld [vmem:[%s1817_s1 + $0x18] sm:$0xff]  ;;  %v1429_v25 = vld [vmem:[%s1817_s1 + $0xd0] sm:$0xff] }
  0x14   : > { %367 = vmatpush.bf16.msra.mxu1 %v1408_v7  ;;  %v1160_v20 = vld [vmem:[%s1617_s28] sm:$0xf]  ;;  %v1404_v26 = vld [vmem:[%s1817_s1 + $0x10] sm:$0xff]  ;;  %v1411_v27 = vld [vmem:[%s1817_s1 + $0x48] sm:$0xff] }
  0x15   : > { %307 = vmatpush.bf16.msra.mxu0 %v1415_v8  ;;  %v1161_v24 = vor.u32 %v1401_v21, %v1160_v20  ;;  %v1419_v28 = vld [vmem:[%s1817_s1 + $0x88] sm:$0xff]  ;;  %v1410_v32 = vld [vmem:[%s1817_s1 + $0x40] sm:$0xff]  ;;  %v1442_v36 = vld [vmem:[%s1817_s1 + $0x138] sm:$0xff] }
  0x16   : > { %457 = vmatpush.bf16.msra.mxu2 %v1423_v9  ;;  %v1428_v30 = vld [vmem:[%s1817_s1 + $0xc8] sm:$0xff]  ;;  %v1418_v33 = vld [vmem:[%s1817_s1 + $0x80] sm:$0xff]  ;;  %v1459_v37 = vld [vmem:[%s1817_s1 + $0x1b8] sm:$0xff] }
  0x17   : > { %538 = vmatpush.bf16.msra.mxu3 %v1432_v10  ;;  %v402_v29 = vshll.u32 %v1161_v24, 16  ;;  %v1403_v31 = vld [vmem:[%s1817_s1 + $0x8] sm:$0xff]  ;;  %v400_v34 = vshrl.u32 %v1161_v24, 16  ;;  %v220_v38 = vld [vmem:[%s1617_s28] sm:$0xff]  ;;  %v1467_v41 = vld [vmem:[%s1817_s1 + $0x1f8] sm:$0xff] }
  0x18   : > { %368 = vmatpush.bf16.msra.mxu1 %v1407_v11  ;;  %v1427_v39 = vld [vmem:[%s1817_s1 + $0xc0] sm:$0xff]  ;;  %v1450_v42 = vld [vmem:[%s1817_s1 + $0x178] sm:$0xff]  ;;  %v239_v44 = vrot.slane %v220_v38, 4  ;;  %v1441_v45 = vld [vmem:[%s1817_s1 + $0x130] sm:$0xff] }
  0x19   : > { %308 = vmatpush.bf16.msra.mxu0 %v1414_v12  ;;  %v404_v35 = vrot.slane %v402_v29, 1  ;;  %v1402_v40 = vld [vmem:[%s1817_s1] sm:$0xff]  ;;  %v1458_v46 = vld [vmem:[%s1817_s1 + $0x1b0] sm:$0xff]  ;;  %v1440_v50 = vld [vmem:[%s1817_s1 + $0x128] sm:$0xff] }
  0x1a   : > { %458 = vmatpush.bf16.msra.mxu2 %v1422_v13  ;;  %v1466_v47 = vld [vmem:[%s1817_s1 + $0x1f0] sm:$0xff]  ;;  %v1457_v51 = vld [vmem:[%s1817_s1 + $0x1a8] sm:$0xff]  ;;  %v1439_v54 = vld [vmem:[%s1817_s1 + $0x120] sm:$0xff] }
  0x1b   : > { %539 = vmatpush.bf16.msra.mxu3 %v1431_v14  ;;  %v405_v43 = vor.u32 %v404_v35, %v400_v34  ;;  %v1449_v48 = vld [vmem:[%s1817_s1 + $0x170] sm:$0xff]  ;;  %v1465_v52 = vld [vmem:[%s1817_s1 + $0x1e8] sm:$0xff]  ;;  %v1456_v55 = vld [vmem:[%s1817_s1 + $0x1a0] sm:$0xff] }
  0x1c   : > { %369 = vmatpush.bf16.msra.mxu1 %v1406_v15  ;;  %v1695_v49 = vld [vmem:[%s1617_s28 + $0x10] sm:$0xff]  ;;  %v1448_v53 = vld [vmem:[%s1817_s1 + $0x168] sm:$0xff]  ;;  %v1464_v56 = vld [vmem:[%s1817_s1 + $0x1e0] sm:$0xff] }
  0x1d   : > { %309 = vmatpush.bf16.msra.mxu0 %v1413_v16  ;;  %v1447_v57 = vld [vmem:[%s1817_s1 + $0x160] sm:$0xff]  ;;  %v1438_v58 = vld [vmem:[%s1817_s1 + $0x118] sm:$0xff]  ;;  %v1262_v62 = vld [vmem:[%s1617_s28 + $0x10] sm:$0xf] }
  0x1e   : > { %459 = vmatpush.bf16.msra.mxu2 %v1421_v17  ;;  %v1455_v59 = vld [vmem:[%s1817_s1 + $0x198] sm:$0xff]  ;;  %v1437_v0 = vld [vmem:[%s1817_s1 + $0x110] sm:$0xff]  ;;  %v1436_v5 = vld [vmem:[%s1817_s1 + $0x108] sm:$0xff] }
  0x1f   : > { %540 = vmatpush.bf16.msra.mxu3 %v1430_v18  ;;  %v1463_v60 = vld [vmem:[%s1817_s1 + $0x1d8] sm:$0xff]  ;;  %v1454_v1 = vld [vmem:[%s1817_s1 + $0x190] sm:$0xff]  ;;  %v1453_v6 = vld [vmem:[%s1817_s1 + $0x188] sm:$0xff]  ;;  %v551_v18 = vrot.slane %v1695_v49, 4 }
  0x20   : > { %370 = vmatpush.bf16.msra.mxu1 %v1405_v19  ;;  %v1446_v61 = vld [vmem:[%s1817_s1 + $0x158] sm:$0xff]  ;;  %v1462_v2 = vld [vmem:[%s1817_s1 + $0x1d0] sm:$0xff]  ;;  %v1461_v7 = vld [vmem:[%s1817_s1 + $0x1c8] sm:$0xff] }
  0x21   : > { %310 = vmatpush.bf16.msra.mxu0 %v1412_v22  ;;  %v1426_v63 = vld [vmem:[%s1617_s28 + $0x14] sm:$0x10]  ;;  %v1445_v3 = vld [vmem:[%s1817_s1 + $0x150] sm:$0xff]  ;;  %v1444_v8 = vld [vmem:[%s1817_s1 + $0x148] sm:$0xff] }
  0x22   : > { %460 = vmatpush.bf16.msra.mxu2 %v1420_v23  ;;  %v1263_v4 = vor.u32 %v1426_v63, %v1262_v62  ;;  %v1435_v10 = vld [vmem:[%s1817_s1 + $0x100] sm:$0xff]  ;;  %v1475_v12 = vld [vmem:[%s1817_s1 + $0x238] sm:$0xff]  ;;  %v1474_v20 = vld [vmem:[%s1817_s1 + $0x230] sm:$0xff] }
  0x23   : > { %541 = vmatpush.bf16.msra.mxu3 %v1429_v25  ;;  %v1452_v11 = vld [vmem:[%s1817_s1 + $0x180] sm:$0xff]  ;;  %v1473_v22 = vld [vmem:[%s1817_s1 + $0x228] sm:$0xff]  ;;  %v1471_v24 = vld [vmem:[%s1817_s1 + $0x218] sm:$0xff] }
  0x24   : > { %371 = vmatpush.bf16.msra.mxu1 %v1404_v26  ;;  %v654_v9 = vshll.u32 %v1263_v4, 16  ;;  %v1460_v13 = vld [vmem:[%s1817_s1 + $0x1c0] sm:$0xff]  ;;  %v652_v16 = vshrl.u32 %v1263_v4, 16  ;;  %v1451_v26 = vld [vmem:[%s1617_s28 + $0x24] sm:$0x10] }
  0x25   : > { %311 = vmatpush.bf16.msra.mxu0 %v1411_v27  ;;  %v1296_v14 = vld [vmem:[%s1617_s28 + $0x20] sm:$0xff] }
  0x26   : > { %461 = vmatpush.bf16.msra.mxu2 %v1419_v28  ;;  %v1443_v15 = vld [vmem:[%s1817_s1 + $0x140] sm:$0xff]  ;;  %v656_v17 = vrot.slane %v654_v9, 1  ;;  %v803_v19 = vrot.slane %v1296_v14, 4  ;;  %v1470_v28 = vld [vmem:[%s1817_s1 + $0x210] sm:$0xff] }
  0x27   : > { %542 = vmatpush.bf16.msra.mxu3 %v1428_v30  ;;  %v1472_v23 = vld [vmem:[%s1817_s1 + $0x220] sm:$0xff]  ;;  %v1469_v30 = vld [vmem:[%s1817_s1 + $0x208] sm:$0xff] }
  0x28   : > { %372 = vmatpush.bf16.msra.mxu1 %v1403_v31  ;;  %v657_v21 = vor.u32 %v656_v17, %v652_v16  ;;  %v1364_v25 = vld [vmem:[%s1617_s28 + $0x20] sm:$0xf] }
  0x29   : > { %312 = vmatpush.bf16.msra.mxu0 %v1410_v32  ;;  %v1365_v27 = vor.u32 %v1451_v26, %v1364_v25 }
  0x2a   : > { %462 = vmatpush.bf16.msra.mxu2 %v1418_v33  ;;  %v1468_v33 = vld [vmem:[%s1817_s1 + $0x200] sm:$0xff] }
  0x2b   : > { %543 = vmatpush.bf16.msra.mxu3 %v1427_v39  ;;  %v906_v29 = vshll.u32 %v1365_v27, 16  ;;  %v904_v31 = vshrl.u32 %v1365_v27, 16 }
  0x2c   : > { %373 = vmatpush.bf16.msra.mxu1 %v1402_v40  ;;  %313 = vmatmul.bf16.vlgmr.msra.gmra.mxu0 %v239_v44 }
  0x2d   : > { %617 = vmatpush.bf16.msrb.mxu0 %v1442_v36  ;;  %463 = vmatmul.bf16.vlgmr.msra.gmra.mxu2 %v405_v43  ;;  %v908_v32 = vrot.slane %v906_v29, 1 }
  0x2e   : > { %788 = vmatpush.bf16.msrb.mxu2 %v1459_v37  ;;  %544 = vmatmul.bf16.vlgmr.msra.gmra.mxu3 %v1695_v49 }
  0x2f   : > { %869 = vmatpush.bf16.msrb.mxu3 %v1467_v41  ;;  %374 = vmatmul.bf16.vlgmr.msra.gmra.mxu1 %v220_v38  ;;  %v909_v34 = vor.u32 %v908_v32, %v904_v31 }
  0x30   : > { %707 = vmatpush.bf16.msrb.mxu1 %v1450_v42 }
  0x31   : > { %618 = vmatpush.bf16.msrb.mxu0 %v1441_v45 }
  0x32   : > { %789 = vmatpush.bf16.msrb.mxu2 %v1458_v46 }
  0x33   : > { %870 = vmatpush.bf16.msrb.mxu3 %v1466_v47 }
  0x34   : > { %708 = vmatpush.bf16.msrb.mxu1 %v1449_v48 }
  0x35   : > { %619 = vmatpush.bf16.msrb.mxu0 %v1440_v50 }
  0x36   : > { %790 = vmatpush.bf16.msrb.mxu2 %v1457_v51 }
  0x37   : > { %871 = vmatpush.bf16.msrb.mxu3 %v1465_v52 }
  0x38   : > { %709 = vmatpush.bf16.msrb.mxu1 %v1448_v53 }
  0x39   : > { %620 = vmatpush.bf16.msrb.mxu0 %v1439_v54 }
  0x3a   : > { %791 = vmatpush.bf16.msrb.mxu2 %v1456_v55 }
  0x3b   : > { %872 = vmatpush.bf16.msrb.mxu3 %v1464_v56 }
  0x3c   : > { %710 = vmatpush.bf16.msrb.mxu1 %v1447_v57  ;;  %v979_v57 = vlaneseq }
  0x3d   : > { %621 = vmatpush.bf16.msrb.mxu0 %v1438_v58 }
  0x3e   : > { %792 = vmatpush.bf16.msrb.mxu2 %v1455_v59  ;;  %v1500_v59 = vld [vmem:[%s1818_s2] ss:$0 sm:$0xff] }
  0x3f   : > { %873 = vmatpush.bf16.msrb.mxu3 %v1463_v60 }
  0x40   : > { %711 = vmatpush.bf16.msrb.mxu1 %v1446_v61  ;;  %v980_v61 = vshrl.u32 %v979_v57, 7 }
  0x41   : > { %622 = vmatpush.bf16.msrb.mxu0 %v1437_v0 }
  0x42   : > { %793 = vmatpush.bf16.msrb.mxu2 %v1454_v1  ;;  %vm981_vm0 = vcmp.lt.s32.totalorder %v980_v61, 1 }
  0x43   : > { %874 = vmatpush.bf16.msrb.mxu3 %v1462_v2 }
  0x44   : > { %712 = vmatpush.bf16.msrb.mxu1 %v1445_v3 }
  0x45   : > { %623 = vmatpush.bf16.msrb.mxu0 %v1436_v5 }
  0x46   : > { %794 = vmatpush.bf16.msrb.mxu2 %v1453_v6 }
  0x47   : > { %875 = vmatpush.bf16.msrb.mxu3 %v1461_v7 }
  0x48   : > { %713 = vmatpush.bf16.msrb.mxu1 %v1444_v8 }
  0x49   : > { %624 = vmatpush.bf16.msrb.mxu0 %v1435_v10 }
  0x4a   : > { %795 = vmatpush.bf16.msrb.mxu2 %v1452_v11 }
  0x4b   : > { %876 = vmatpush.bf16.msrb.mxu3 %v1460_v13 }
  0x4c   : > { %714 = vmatpush.bf16.msrb.mxu1 %v1443_v15  ;;  %625 = vmatmul.bf16.vlgmr.msrb.gmra.mxu0 %v551_v18 }
  0x4d   : > { %959 = vmatpush.bf16.msra.mxu0 %v1475_v12  ;;  %796 = vmatmul.bf16.vlgmr.msrb.gmra.mxu2 %v1296_v14 }
  0x4e   : > { %877 = vmatmul.bf16.vlgmr.msrb.gmra.mxu3 %v803_v19 }
  0x4f   : > { %715 = vmatmul.bf16.vlgmr.msrb.gmra.mxu1 %v657_v21 }
  0x51   : > { %960 = vmatpush.bf16.msra.mxu0 %v1474_v20 }
  0x55   : > { %961 = vmatpush.bf16.msra.mxu0 %v1473_v22 }
  0x59   : > { %962 = vmatpush.bf16.msra.mxu0 %v1472_v23 }
  0x5d   : > { %963 = vmatpush.bf16.msra.mxu0 %v1471_v24 }
  0x61   : > { %964 = vmatpush.bf16.msra.mxu0 %v1470_v28 }
  0x65   : > { %965 = vmatpush.bf16.msra.mxu0 %v1469_v30 }
  0x69   : > { %966 = vmatpush.bf16.msra.mxu0 %v1468_v33 }
  0x6c   : > { %967 = vmatmul.bf16.vlgmr.msra.gmra.mxu0 %v909_v34 }
  0xa9   : > { %v314_v35 = vpop.f32.mrf.mxu0 }
  0xac   : > { %v375_v36 = vpop.f32.mrf.mxu1 }
  0xad   : > { %v376_v45 = vadd.f32 %v375_v36, %v314_v35 }
  0xb0   : > { %v464_v37 = vpop.f32.mrf.mxu2 }
  0xb1   : > { %v545_v38 = vpop.f32.mrf.mxu3  ;;  %v316_v39 = vpop.f32.mrf.mxu0  ;;  %v468_v47 = vadd.f32 %v464_v37, %v376_v45 }
  0xb3   : > { %v549_v51 = vadd.f32 %v545_v38, %v468_v47 }
  0xb4   : > { %v377_v40 = vpop.f32.mrf.mxu1 }
  0xb8   : > { %v466_v41 = vpop.f32.mrf.mxu2 }
  0xb9   : > { %v547_v42 = vpop.f32.mrf.mxu3 }
  0xc9   : > { %v626_v43 = vpop.f32.mrf.mxu0 }
  0xca   : > { %v630_v53 = vadd.f32 %v626_v43, %v549_v51 }
  0xcc   : > { %v716_v44 = vpop.f32.mrf.mxu1 }
  0xcd   : > { %v720_v55 = vadd.f32 %v716_v44, %v630_v53 }
  0xd0   : > { %v797_v46 = vpop.f32.mrf.mxu2 }
  0xd1   : > { %v878_v48 = vpop.f32.mrf.mxu3  ;;  %v628_v49 = vpop.f32.mrf.mxu0  ;;  %v801_v56 = vadd.f32 %v797_v46, %v720_v55 }
  0xd3   : > { %v882_v58 = vadd.f32 %v878_v48, %v801_v56 }
  0xd4   : > { %v718_v50 = vpop.f32.mrf.mxu1 }
  0xd8   : > { %v799_v52 = vpop.f32.mrf.mxu2 }
  0xd9   : > { %v880_v54 = vpop.f32.mrf.mxu3 }
  0xe9   : > { %v968_v60 = vpop.f32.mrf.mxu0 }
  0xea   : > { %v972_v62 = vadd.f32 %v968_v60, %v882_v58 }
  0xec   : > { %v977_v63 = vadd.f32 %v1500_v59, %v972_v62 }
  0xee   : > { %v978_v0 = vmax.f32 %v977_v63, 0.0 }
  0xf0   : > { %v982_v1 = vsel %vm981_vm0, %v978_v0, 0.0 }
  0xf1   : > { %v983_v2 = vpack.c.bf16 %v982_v1, %v982_v1  ;;  %v970_v3 = vpop.f32.mrf.mxu0 }
  0xf3   : > { %984 = vst [vmem:[%s219_s8] sm:$0xf] %v983_v2 }
  0xf4 PF: > { %s13_s14 = sadd.s32 1, %s1523_s14   ;;  %s1820_s12 = smov %s1519_s13 }
  0xf5   : > { %p10_p5 = scmp.ge.s32.totalorder %s13_s14, 4   ;;  %s1821_s13 = smov %s1823_s15 }
  0xf7   :  { %12 = sbr.rel (!%p10_p5) target bundleno = 2 (0x2), region = 70 }

// kernel: backbone_base_forward.20
= control target key start
LH: loop header
LB: loop body
LE: loop exit
PB: predicated region body
PF: predicated region fallthrough
CT: control target
= control target key end

     0   :  { %s1827_s15 = smov 0   ;;  %s1829_s16 = smov 0   ;;  %s2160_s0 = inlined_call_operand.vmem [shape: bf16[2,4,10,128], index: 0, kind: input, shape index: {}]   ;;  %s2161_s1 = inlined_call_operand.vmem [shape: bf16[1152,128], index: 1, kind: input, shape index: {}]   ;;  %s2162_s2 = inlined_call_operand.vmem [shape: f32[1,128], index: 2, kind: input, shape index: {}]   ;;  %s2163_s3 = inlined_call_operand.vmem [shape: bf16[32,128], index: 3, kind: input, shape index: {}]   ;;  %s2164_s4 = inlined_call_operand.vmem [shape: bf16[32,128], index: 4, kind: output, shape index: {}]  }
   0x1   :  { %s1831_s17 = smov 0  }
   0x2 LB: > { %s26_s18 = sadd.s32 1, %s1796_s16  ;;  %p1337_p0 = scmp.ge.s32.totalorder %s1800_s17, 1  ;;  %s1800_s17 = sphi %s1831_s17, %s14_s17   ;;  %s1796_s16 = sphi %s1829_s16, %s2170_s16   ;;  %s1792_s15 = sphi %s1827_s15, %s2169_s15  }
   0x3   : > { %p28_p1 = scmp.ge.s32.totalorder %s26_s18, 2  ;;  %p209_p2 = scmp.lt.s32.totalorder %s1800_s17, 3 }
   0x5   : > { %s2172_s18 = smov (%p28_p1, %s26_s18), 0  ;;  %p210_p3 = pnand %p1337_p0, %p209_p2 }
   0x6   : > { %p253_p4 = scmp.lt.s32.totalorder (!%p210_p3), %s1792_s15, 1  ;;  %s1340_s14 = sshll.u32 (!%p210_p3), %s1792_s15, 1 }
   0x7   : > { %213 = sbr.rel (%p210_p3) target bundleno = 254 (0xfe), region = 36  ;;  %p266_p5 = scmp.lt.s32.totalorder (!%p210_p3), %s1340_s14, 3 }
   0xc   : > { %v1685_v0 = vld [vmem:[%s2161_s1 + $0x78] sm:$0xff]  ;;  %v1684_v4 = vld [vmem:[%s2161_s1 + $0x70] sm:$0xff]  ;;  %v1683_v8 = vld [vmem:[%s2161_s1 + $0x68] sm:$0xff]  ;;  %s254_s13 = scalar_select %p253_p4, %s1792_s15, 1  ;;  %vm303_vm0 = vsmask.f32 3328 }
   0xd   : > { %v1693_v1 = vld [vmem:[%s2161_s1 + $0xb8] sm:$0xff]  ;;  %402 = vmatpush.bf16.msra.mxu0 %v1685_v0  ;;  %v1692_v5 = vld [vmem:[%s2161_s1 + $0xb0] sm:$0xff]  ;;  %v1691_v9 = vld [vmem:[%s2161_s1 + $0xa8] sm:$0xff]  ;;  %vm490_vm1 = vcmask 1042432   ;;  %vm491_vm2 = vcmask 1046532   ;;  %s2174_s14 = smov (!%p266_p5, %s1340_s14), 3 }
   0xe   : > { %v1677_v2 = vld [vmem:[%s2161_s1 + $0x38] sm:$0xff]  ;;  %569 = vmatpush.bf16.msra.mxu2 %v1693_v1  ;;  %v1676_v6 = vld [vmem:[%s2161_s1 + $0x30] sm:$0xff]  ;;  %v1675_v10 = vld [vmem:[%s2161_s1 + $0x28] sm:$0xff]  ;;  %s1668_s26 = sshll.u32 %s254_s13, 5  ;;  %vm304_vm3 = vsmask.f32 7440 }
   0xf   : > { %v1702_v3 = vld [vmem:[%s2161_s1 + $0xf8] sm:$0xff]  ;;  %470 = vmatpush.bf16.msra.mxu1 %v1677_v2  ;;  %v1701_v7 = vld [vmem:[%s2161_s1 + $0xf0] sm:$0xff]  ;;  %v1700_v11 = vld [vmem:[%s2161_s1 + $0xe8] sm:$0xff]  ;;  %s1900_s7 = scalar_lea.vmem %s2160_s0, %s1668_s26  ;;  %s1341_s19 = sshll.u32 %s2174_s14, 2 }
  0x10   : > { %658 = vmatpush.bf16.msra.mxu3 %v1702_v3  ;;  %v1682_v12 = vld [vmem:[%s2161_s1 + $0x60] sm:$0xff]  ;;  %v1681_v16 = vld [vmem:[%s2161_s1 + $0x58] sm:$0xff]  ;;  %v1680_v20 = vld [vmem:[%s2161_s1 + $0x50] sm:$0xff]  ;;  %s272_s21 = scalar_lea.vmem %s2163_s3, %s1341_s19  ;;  %s281_s26 = scalar_lea.vmem %s2164_s4, %s1341_s19 }
  0x11   : > { %403 = vmatpush.bf16.msra.mxu0 %v1684_v4  ;;  %v1690_v13 = vld [vmem:[%s2161_s1 + $0xa0] sm:$0xff]  ;;  %v1689_v17 = vld [vmem:[%s2161_s1 + $0x98] sm:$0xff]  ;;  %v1688_v21 = vld [vmem:[%s2161_s1 + $0x90] sm:$0xff] }
  0x12   : > { %570 = vmatpush.bf16.msra.mxu2 %v1692_v5  ;;  %v1674_v14 = vld [vmem:[%s2161_s1 + $0x20] sm:$0xff]  ;;  %v1673_v18 = vld [vmem:[%s2161_s1 + $0x18] sm:$0xff]  ;;  %v284_v23 = vld [vmem:[%s1900_s7 + $0x8] sm:$0xf] }
  0x13   : > { %471 = vmatpush.bf16.msra.mxu1 %v1676_v6  ;;  %v1699_v15 = vld [vmem:[%s2161_s1 + $0xe0] sm:$0xff]  ;;  %v1698_v19 = vld [vmem:[%s2161_s1 + $0xd8] sm:$0xff]  ;;  %v1672_v25 = vld [vmem:[%s2161_s1 + $0x10] sm:$0xff]  ;;  %v321_v30 = vshrl.u32 %v284_v23, 16  ;;  %v324_v31 = vshll.u32 %v284_v23, 16 }
  0x14   : > { %659 = vmatpush.bf16.msra.mxu3 %v1701_v7  ;;  %v283_v22 = vld [vmem:[%s1900_s7] sm:$0xf]  ;;  %v301_v24 = vld [vmem:[%s1900_s7 + $0x4] sm:$0x1]  ;;  %v302_v26 = vld [vmem:[%s1900_s7 + $0xc] sm:$0x1] }
  0x15   : > { %404 = vmatpush.bf16.msra.mxu0 %v1683_v8  ;;  %v307_v27 = vshrl.u32 %v283_v22, 16  ;;  %v310_v28 = vshll.u32 %v283_v22, 16  ;;  %v316_v29 = vshll.u32 %v301_v24, 16  ;;  %v330_v32 = vshll.u32 %v302_v26, 16  ;;  %v484_v33 = vld [vmem:[%s1900_s7] sm:$0xe]  ;;  %vm1934_vm4 = vmor %vm490_vm1, %vm491_vm2 }
  0x16   : > { %571 = vmatpush.bf16.msra.mxu2 %v1691_v9  ;;  %v485_v34 = vld [vmem:[%s1900_s7 + $0x8] sm:$0xe]  ;;  %v1697_v35 = vld [vmem:[%s2161_s1 + $0xd0] sm:$0xff]  ;;  %v323_v38 = vrot.slane %v321_v30, 4  ;;  %v326_v39 = vrot.slane %v324_v31, 5  ;;  %v1412_v41 = vrot.slane %v484_v33, 9  ;;  %vm1946_vm5 = vmor %vm303_vm0, %vm304_vm3 }
  0x17   : > { %472 = vmatpush.bf16.msra.mxu1 %v1675_v10  ;;  %v309_v36 = vrot.slane %v307_v27, 4  ;;  %v312_v37 = vrot.slane %v310_v28, 5  ;;  %v495_v42 = vrot.slane %v301_v24, 5  ;;  %v318_v44 = vrot.slane %v316_v29, 5  ;;  %v1679_v47 = vld [vmem:[%s2161_s1 + $0x48] sm:$0xff]  ;;  %v1678_v59 = vld [vmem:[%s2161_s1 + $0x40] sm:$0xff] }
  0x18   : > { %660 = vmatpush.bf16.msra.mxu3 %v1700_v11  ;;  %v1413_v45 = vrot.slane %v485_v34, 9  ;;  %v499_v46 = vrot.slane %v302_v26, 5  ;;  %v1687_v48 = vld [vmem:[%s2161_s1 + $0x88] sm:$0xff]  ;;  %v327_v50 = vor.u32 %v326_v39, %v323_v38  ;;  %v332_v51 = vrot.slane %v330_v32, 5  ;;  %v1686_v60 = vld [vmem:[%s2161_s1 + $0x80] sm:$0xff]  ;;  %v1710_v61 = vld [vmem:[%s2161_s1 + $0x138] sm:$0xff] }
  0x19   : > { %405 = vmatpush.bf16.msra.mxu0 %v1682_v12  ;;  %v313_v43 = vor.u32 %v312_v37, %v309_v36  ;;  %v1671_v52 = vld [vmem:[%s2161_s1 + $0x8] sm:$0xff]  ;;  %v496_v55 = vsel %vm1934_vm4, %v1412_v41, %v495_v42  ;;  %v1727_v2 = vld [vmem:[%s2161_s1 + $0x1b8] sm:$0xff]  ;;  %v1670_v3 = vld [vmem:[%s2161_s1] sm:$0xff] }
  0x1a   : > { %572 = vmatpush.bf16.msra.mxu2 %v1690_v13  ;;  %v1696_v53 = vld [vmem:[%s2161_s1 + $0xc8] sm:$0xff]  ;;  %v500_v56 = vsel %vm1934_vm4, %v1413_v45, %v499_v46  ;;  %v328_v57 = vrot.slane %v327_v50, 4  ;;  %v517_v0 = vunpack.c.l.b16 %v496_v55  ;;  %v1695_v4 = vld [vmem:[%s2161_s1 + $0xc0] sm:$0xff]  ;;  %v1718_v6 = vld [vmem:[%s2161_s1 + $0x178] sm:$0xff] }
  0x1b   : > { %473 = vmatpush.bf16.msra.mxu1 %v1674_v14  ;;  %v314_v54 = vrot.slane %v313_v43, 4  ;;  %v518_v1 = vunpack.c.l.b16 %v500_v56  ;;  %v1735_v7 = vld [vmem:[%s2161_s1 + $0x1f8] sm:$0xff]  ;;  %v1378_v8 = vld [vmem:[%s1900_s7] sm:$0xf]  ;;  %v1669_v9 = vld [vmem:[%s1900_s7 + $0x4] sm:$0xf0] }
  0x1c   : > { %661 = vmatpush.bf16.msra.mxu3 %v1699_v15  ;;  %v333_v62 = vsel %vm1946_vm5, %v328_v57, %v332_v51  ;;  %v1450_v10 = vld [vmem:[%s1900_s7 + $0x8] sm:$0xf]  ;;  %v1694_v11 = vld [vmem:[%s1900_s7 + $0xc] sm:$0xf0]  ;;  %v1596_v23 = vld [vmem:[%s1900_s7 + $0x18] sm:$0xf] }
  0x1d   : > { %406 = vmatpush.bf16.msra.mxu0 %v1681_v16  ;;  %v319_v58 = vsel %vm1946_vm5, %v314_v54, %v318_v44  ;;  %v351_v5 = vunpack.c.l.b16 %v333_v62  ;;  %v519_v13 = vpack.c.b16 %v518_v1, %v517_v0  ;;  %v1709_v14 = vld [vmem:[%s2161_s1 + $0x130] sm:$0xff]  ;;  %v1379_v16 = vor.u32 %v1669_v9, %v1378_v8  ;;  %v1708_v24 = vld [vmem:[%s2161_s1 + $0x128] sm:$0xff]  ;;  %v1707_v36 = vld [vmem:[%s2161_s1 + $0x120] sm:$0xff] }
  0x1e   : > { %573 = vmatpush.bf16.msra.mxu2 %v1689_v17  ;;  %v350_v63 = vunpack.c.l.b16 %v319_v58  ;;  %v1726_v15 = vld [vmem:[%s2161_s1 + $0x1b0] sm:$0xff]  ;;  %v1451_v17 = vor.u32 %v1694_v11, %v1450_v10  ;;  %v1716_v30 = vld [vmem:[%s2161_s1 + $0x168] sm:$0xff]  ;;  %v996_v34 = vshrl.u32 %v1596_v23, 16  ;;  %v1724_v37 = vld [vmem:[%s2161_s1 + $0x1a0] sm:$0xff] }
  0x1f   : > { %474 = vmatpush.bf16.msra.mxu1 %v1673_v18  ;;  %v1484_v18 = vld [vmem:[%s1900_s7 + $0x8] sm:$0xf]  ;;  %v1594_v22 = vld [vmem:[%s1900_s7 + $0x10] sm:$0xf]  ;;  %v1485_v43 = vld [vmem:[%s1900_s7 + $0xc] sm:$0x1] }
  0x20   : > { %662 = vmatpush.bf16.msra.mxu3 %v1698_v19  ;;  %v352_v12 = vpack.c.b16 %v351_v5, %v350_v63  ;;  %v1486_v19 = vld [vmem:[%s1900_s7 + $0x10] sm:$0xf]  ;;  %v679_v26 = vshrl.u32 %v1484_v18, 16  ;;  %v682_v27 = vshll.u32 %v1484_v18, 16  ;;  %v1733_v31 = vld [vmem:[%s2161_s1 + $0x1e8] sm:$0xff]  ;;  %v982_v32 = vshrl.u32 %v1594_v22, 16 }
  0x21   : > { %407 = vmatpush.bf16.msra.mxu0 %v1680_v20  ;;  %v1717_v20 = vld [vmem:[%s2161_s1 + $0x170] sm:$0xff]  ;;  %v693_v28 = vshrl.u32 %v1486_v19, 16  ;;  %v696_v29 = vshll.u32 %v1486_v19, 16  ;;  %v985_v33 = vshll.u32 %v1594_v22, 16  ;;  %v1715_v45 = vld [vmem:[%s2161_s1 + $0x160] sm:$0xff]  ;;  %v998_v50 = vrot.slane %v996_v34, 4 }
  0x22   : > { %574 = vmatpush.bf16.msra.mxu2 %v1688_v21  ;;  %v1734_v21 = vld [vmem:[%s2161_s1 + $0x1f0] sm:$0xff]  ;;  %v681_v38 = vrot.slane %v679_v26, 4  ;;  %v684_v39 = vrot.slane %v682_v27, 5  ;;  %v1732_v46 = vld [vmem:[%s2161_s1 + $0x1e0] sm:$0xff]  ;;  %v1706_v54 = vld [vmem:[%s2161_s1 + $0x118] sm:$0xff]  ;;  %v688_v57 = vshll.u32 %v1485_v43, 16 }
  0x23   : > { %475 = vmatpush.bf16.msra.mxu1 %v1672_v25  ;;  %v1725_v25 = vld [vmem:[%s2161_s1 + $0x1a8] sm:$0xff]  ;;  %v695_v41 = vrot.slane %v693_v28, 4  ;;  %v698_v42 = vrot.slane %v696_v29, 5  ;;  %v1487_v44 = vld [vmem:[%s1900_s7 + $0x14] sm:$0x1]  ;;  %v1723_v55 = vld [vmem:[%s2161_s1 + $0x198] sm:$0xff] }
  0x24   : > { %663 = vmatpush.bf16.msra.mxu3 %v1697_v35  ;;  %v999_v35 = vshll.u32 %v1596_v23, 16  ;;  %v685_v56 = vor.u32 %v684_v39, %v681_v38  ;;  %v1520_v62 = vld [vmem:[%s1900_s7 + $0x8] sm:$0xe]  ;;  %v1521_v63 = vld [vmem:[%s1900_s7 + $0x10] sm:$0xe]  ;;  %v798_v11 = vrot.slane %v1485_v43, 5 }
  0x25   : > { %408 = vmatpush.bf16.msra.mxu0 %v1679_v47  ;;  %v984_v47 = vrot.slane %v982_v32, 4  ;;  %v699_v58 = vor.u32 %v698_v42, %v695_v41  ;;  %v1722_v5 = vld [vmem:[%s2161_s1 + $0x190] sm:$0xff]  ;;  %v1522_v10 = vrot.slane %v1520_v62, 9  ;;  %v1729_v26 = vld [vmem:[%s2161_s1 + $0x1c8] sm:$0xff]  ;;  %v1711_v41 = vld [vmem:[%s2161_s1 + $0x140] sm:$0xff] }
  0x26   : > { %575 = vmatpush.bf16.msra.mxu2 %v1687_v48  ;;  %v987_v48 = vrot.slane %v985_v33, 5  ;;  %v1001_v51 = vrot.slane %v999_v35, 5  ;;  %v1720_v33 = vld [vmem:[%s2161_s1 + $0x180] sm:$0xff]  ;;  %v1560_v34 = vld [vmem:[%s1900_s7 + $0x10] sm:$0xf] }
  0x27   : > { %476 = vmatpush.bf16.msra.mxu1 %v1671_v52  ;;  %v2035_v52 = vld [vmem:[%s1900_s7 + $0x14] sm:$0x1]  ;;  %v700_v8 = vrot.slane %v699_v58, 4  ;;  %v1719_v35 = vld [vmem:[%s1900_s7 + $0x14] sm:$0xf0]  ;;  %v1728_v42 = vld [vmem:[%s2161_s1 + $0x1c0] sm:$0xff] }
  0x28   : > { %664 = vmatpush.bf16.msra.mxu3 %v1696_v53  ;;  %v2038_v53 = vld [vmem:[%s1900_s7 + $0x1c] sm:$0x1]  ;;  %v988_v0 = vor.u32 %v987_v48, %v984_v47  ;;  %v991_v1 = vshll.u32 %v2035_v52, 16  ;;  %v1742_v47 = vld [vmem:[%s2161_s1 + $0x230] sm:$0xff]  ;;  %v1741_v48 = vld [vmem:[%s2161_s1 + $0x228] sm:$0xff] }
  0x29   : > { %409 = vmatpush.bf16.msra.mxu0 %v1678_v59  ;;  %v702_v59 = vshll.u32 %v1487_v44, 16  ;;  %v1738_v58 = vld [vmem:[%s2161_s1 + $0x210] sm:$0xff] }
  0x2a   : > { %576 = vmatpush.bf16.msra.mxu2 %v1686_v60  ;;  %v1714_v60 = vld [vmem:[%s2161_s1 + $0x158] sm:$0xff] }
  0x2b   : > { %477 = vmatpush.bf16.msra.mxu1 %v1670_v3  ;;  %v1005_v3 = vshll.u32 %v2038_v53, 16  ;;  %v704_v9 = vrot.slane %v702_v59, 5 }
  0x2c   : > { %665 = vmatpush.bf16.msra.mxu3 %v1695_v4  ;;  %410 = vmatmul.bf16.vlgmr.msra.gmra.mxu0 %v352_v12  ;;  %v1705_v4 = vld [vmem:[%s2161_s1 + $0x110] sm:$0xff]  ;;  %v1523_v12 = vrot.slane %v1521_v63, 9 }
  0x2d   : > { %774 = vmatpush.bf16.msrb.mxu0 %v1710_v61  ;;  %577 = vmatmul.bf16.vlgmr.msra.gmra.mxu2 %v519_v13  ;;  %v1731_v61 = vld [vmem:[%s2161_s1 + $0x1d8] sm:$0xff]  ;;  %v802_v13 = vrot.slane %v1487_v44, 5  ;;  %v1007_v19 = vrot.slane %v1005_v3, 5  ;;  %v705_v23 = vsel %vm1946_vm5, %v700_v8, %v704_v9  ;;  %v1561_v44 = vor.u32 %v1719_v35, %v1560_v34 }
  0x2e   : > { %961 = vmatpush.bf16.msrb.mxu2 %v1727_v2  ;;  %478 = vmatmul.bf16.vlgmr.msra.gmra.mxu1 %v1379_v16  ;;  %v1002_v2 = vor.u32 %v1001_v51, %v998_v50  ;;  %v989_v16 = vrot.slane %v988_v0, 4  ;;  %v723_v32 = vunpack.c.l.b16 %v705_v23  ;;  %v1740_v50 = vld [vmem:[%s2161_s1 + $0x220] sm:$0xff]  ;;  %v1739_v51 = vld [vmem:[%s2161_s1 + $0x218] sm:$0xff] }
  0x2f   : > { %872 = vmatpush.bf16.msrb.mxu1 %v1718_v6  ;;  %666 = vmatmul.bf16.vlgmr.msra.gmra.mxu3 %v1451_v17  ;;  %v686_v6 = vrot.slane %v685_v56, 4  ;;  %v993_v17 = vrot.slane %v991_v1, 5  ;;  %v803_v27 = vsel %vm1934_vm4, %v1523_v12, %v802_v13  ;;  %v1101_v56 = vrot.slane %v2035_v52, 5  ;;  %v1736_v0 = vld [vmem:[%s2161_s1 + $0x200] sm:$0xff] }
  0x30   : > { %1077 = vmatpush.bf16.msrb.mxu3 %v1735_v7  ;;  %v690_v7 = vrot.slane %v688_v57, 5  ;;  %v1003_v18 = vrot.slane %v1002_v2, 4  ;;  %v1105_v57 = vrot.slane %v2038_v53, 5 }
  0x31   : > { %775 = vmatpush.bf16.msrb.mxu0 %v1709_v14  ;;  %v1713_v14 = vld [vmem:[%s2161_s1 + $0x150] sm:$0xff]  ;;  %v994_v28 = vsel %vm1946_vm5, %v989_v16, %v993_v17 }
  0x32   : > { %962 = vmatpush.bf16.msrb.mxu2 %v1726_v15  ;;  %v1730_v15 = vld [vmem:[%s2161_s1 + $0x1d0] sm:$0xff]  ;;  %v691_v22 = vsel %vm1946_vm5, %v686_v6, %v690_v7  ;;  %v1008_v29 = vsel %vm1946_vm5, %v1003_v18, %v1007_v19  ;;  %v1025_v38 = vunpack.c.l.b16 %v994_v28 }
  0x33   : > { %873 = vmatpush.bf16.msrb.mxu1 %v1717_v20  ;;  %v1704_v20 = vld [vmem:[%s2161_s1 + $0x108] sm:$0xff]  ;;  %v1026_v39 = vunpack.c.l.b16 %v1008_v29 }
  0x34   : > { %1078 = vmatpush.bf16.msrb.mxu3 %v1734_v21  ;;  %v1721_v21 = vld [vmem:[%s2161_s1 + $0x188] sm:$0xff] }
  0x35   : > { %776 = vmatpush.bf16.msrb.mxu0 %v1708_v24  ;;  %v799_v24 = vsel %vm1934_vm4, %v1522_v10, %v798_v11 }
  0x36   : > { %963 = vmatpush.bf16.msrb.mxu2 %v1725_v25  ;;  %v1712_v25 = vld [vmem:[%s2161_s1 + $0x148] sm:$0xff]  ;;  %v820_v49 = vunpack.c.l.b16 %v799_v24 }
  0x37   : > { %874 = vmatpush.bf16.msrb.mxu1 %v1716_v30  ;;  %v1703_v30 = vld [vmem:[%s2161_s1 + $0x100] sm:$0xff] }
  0x38   : > { %1079 = vmatpush.bf16.msrb.mxu3 %v1733_v31  ;;  %v722_v31 = vunpack.c.l.b16 %v691_v22 }
  0x39   : > { %777 = vmatpush.bf16.msrb.mxu0 %v1707_v36  ;;  %v1743_v36 = vld [vmem:[%s2161_s1 + $0x238] sm:$0xff] }
  0x3a   : > { %964 = vmatpush.bf16.msrb.mxu2 %v1724_v37  ;;  %v821_v37 = vunpack.c.l.b16 %v803_v27  ;;  %v724_v43 = vpack.c.b16 %v723_v32, %v722_v31  ;;  %v1745_v31 = vld [vmem:[%s272_s21] sm:$0xff]  }
  0x3b   : > { %875 = vmatpush.bf16.msrb.mxu1 %v1715_v45  ;;  %v1746_v35 = vunpack.c.l.bf16 %v1745_v31 }
  0x3c   : > { %1080 = vmatpush.bf16.msrb.mxu3 %v1732_v46  ;;  %v822_v45 = vpack.c.b16 %v821_v37, %v820_v49  ;;  %v1027_v46 = vpack.c.b16 %v1026_v39, %v1025_v38 }
  0x3d   : > { %778 = vmatpush.bf16.msrb.mxu0 %v1706_v54  ;;  %v1630_v54 = vld [vmem:[%s1900_s7 + $0x10] sm:$0xe] }
  0x3e   : > { %965 = vmatpush.bf16.msrb.mxu2 %v1723_v55  ;;  %v1631_v55 = vld [vmem:[%s1900_s7 + $0x18] sm:$0xe]  ;;  %v1632_v59 = vrot.slane %v1630_v54, 9 }
  0x3f   : > { %876 = vmatpush.bf16.msrb.mxu1 %v1714_v60  ;;  %v1633_v60 = vrot.slane %v1631_v55, 9 }
  0x40   : > { %1081 = vmatpush.bf16.msrb.mxu3 %v1731_v61  ;;  %v1737_v61 = vld [vmem:[%s2161_s1 + $0x208] sm:$0xff]  ;;  %v1102_v62 = vsel %vm1934_vm4, %v1632_v59, %v1101_v56 }
  0x41   : > { %779 = vmatpush.bf16.msrb.mxu0 %v1705_v4  ;;  %v1106_v52 = vsel %vm1934_vm4, %v1633_v60, %v1105_v57  ;;  %v1123_v63 = vunpack.c.l.b16 %v1102_v62 }
  0x42   : > { %966 = vmatpush.bf16.msrb.mxu2 %v1722_v5  ;;  %v1124_v53 = vunpack.c.l.b16 %v1106_v52 }
  0x43   : > { %877 = vmatpush.bf16.msrb.mxu1 %v1713_v14 }
  0x44   : > { %1082 = vmatpush.bf16.msrb.mxu3 %v1730_v15  ;;  %v1125_v1 = vpack.c.b16 %v1124_v53, %v1123_v63 }
  0x45   : > { %780 = vmatpush.bf16.msrb.mxu0 %v1704_v20 }
  0x46   : > { %967 = vmatpush.bf16.msrb.mxu2 %v1721_v21 }
  0x47   : > { %878 = vmatpush.bf16.msrb.mxu1 %v1712_v25 }
  0x48   : > { %1083 = vmatpush.bf16.msrb.mxu3 %v1729_v26 }
  0x49   : > { %781 = vmatpush.bf16.msrb.mxu0 %v1703_v30  ;;  %v1777_v30 = vld [vmem:[%s2162_s2] ss:$0 sm:$0xff] }
  0x4a   : > { %968 = vmatpush.bf16.msrb.mxu2 %v1720_v33 }
  0x4b   : > { %879 = vmatpush.bf16.msrb.mxu1 %v1711_v41  ;;  %v1747_v41 = vunpack.c.h.bf16 %v1745_v31 }
  0x4c   : > { %1084 = vmatpush.bf16.msrb.mxu3 %v1728_v42  ;;  %782 = vmatmul.bf16.vlgmr.msrb.gmra.mxu0 %v724_v43 }
  0x4d   : > { %1175 = vmatpush.bf16.msra.mxu0 %v1743_v36  ;;  %969 = vmatmul.bf16.vlgmr.msrb.gmra.mxu2 %v1561_v44  ;;  %v1205_v36 = vlaneseq }
  0x4e   : > { %880 = vmatmul.bf16.vlgmr.msrb.gmra.mxu1 %v822_v45 }
  0x4f   : > { %1085 = vmatmul.bf16.vlgmr.msrb.gmra.mxu3 %v1027_v46  ;;  %v1206_v42 = vshrl.u32 %v1205_v36, 7 }
  0x51   : > { %1176 = vmatpush.bf16.msra.mxu0 %v1742_v47  ;;  %vm1207_vm6 = vcmp.lt.s32.totalorder %v1206_v42, 2 }
  0x55   : > { %1177 = vmatpush.bf16.msra.mxu0 %v1741_v48 }
  0x59   : > { %1178 = vmatpush.bf16.msra.mxu0 %v1740_v50 }
  0x5d   : > { %1179 = vmatpush.bf16.msra.mxu0 %v1739_v51 }
  0x61   : > { %1180 = vmatpush.bf16.msra.mxu0 %v1738_v58 }
  0x65   : > { %1181 = vmatpush.bf16.msra.mxu0 %v1737_v61 }
  0x69   : > { %1182 = vmatpush.bf16.msra.mxu0 %v1736_v0 }
  0x6c   : > { %1183 = vmatmul.bf16.vlgmr.msra.gmra.mxu0 %v1125_v1 }
  0xa9   : > { %v411_v2 = vpop.f32.mrf.mxu0 }
  0xab   : > { %v479_v3 = vpop.f32.mrf.mxu1 }
  0xac   : > { %v480_v7 = vadd.f32 %v479_v3, %v411_v2 }
  0xb0   : > { %v578_v4 = vpop.f32.mrf.mxu2 }
  0xb1   : > { %v413_v5 = vpop.f32.mrf.mxu0  ;;  %v583_v40 = vadd.f32 %v578_v4, %v480_v7 }
  0xb2   : > { %v667_v6 = vpop.f32.mrf.mxu3 }
  0xb3   : > { %v481_v8 = vpop.f32.mrf.mxu1  ;;  %v672_v11 = vadd.f32 %v667_v6, %v583_v40 }
  0xb4   : > { %v482_v13 = vadd.f32 %v481_v8, %v413_v5 }
  0xb8   : > { %v580_v9 = vpop.f32.mrf.mxu2 }
  0xb9   : > { %v584_v17 = vadd.f32 %v580_v9, %v482_v13 }
  0xba   : > { %v669_v12 = vpop.f32.mrf.mxu3 }
  0xbb   : > { %v673_v21 = vadd.f32 %v669_v12, %v584_v17 }
  0xc9   : > { %v783_v10 = vpop.f32.mrf.mxu0 }
  0xca   : > { %v788_v14 = vadd.f32 %v783_v10, %v672_v11 }
  0xcb   : > { %v881_v15 = vpop.f32.mrf.mxu1 }
  0xcc   : > { %v886_v18 = vadd.f32 %v881_v15, %v788_v14 }
  0xd0   : > { %v970_v16 = vpop.f32.mrf.mxu2 }
  0xd1   : > { %v785_v19 = vpop.f32.mrf.mxu0  ;;  %v975_v22 = vadd.f32 %v970_v16, %v886_v18 }
  0xd2   : > { %v1086_v20 = vpop.f32.mrf.mxu3  ;;  %v789_v23 = vadd.f32 %v785_v19, %v673_v21 }
  0xd3   : > { %v883_v24 = vpop.f32.mrf.mxu1  ;;  %v1091_v25 = vadd.f32 %v1086_v20, %v975_v22 }
  0xd4   : > { %v887_v28 = vadd.f32 %v883_v24, %v789_v23 }
  0xd8   : > { %v972_v26 = vpop.f32.mrf.mxu2 }
  0xd9   : > { %v976_v32 = vadd.f32 %v972_v26, %v887_v28 }
  0xda   : > { %v1088_v33 = vpop.f32.mrf.mxu3 }
  0xdb   : > { %v1092_v49 = vadd.f32 %v1088_v33, %v976_v32 }
  0xe9   : > { %v1184_v27 = vpop.f32.mrf.mxu0 }
  0xea   : > { %v1189_v29 = vadd.f32 %v1184_v27, %v1091_v25 }
  0xec   : > { %v1195_v34 = vadd.f32 %v1777_v30, %v1189_v29 }
  0xee   : > { %v1201_v38 = vadd.f32 %v1746_v35, %v1195_v34 }
  0xf0   : > { %v1203_v44 = vmax.f32 %v1201_v38, 0.0 }
  0xf1   : > { %v1186_v37 = vpop.f32.mrf.mxu0 }
  0xf2   : > { %v1190_v39 = vadd.f32 %v1186_v37, %v1092_v49  ;;  %v1208_v47 = vsel %vm1207_vm6, %v1203_v44, 0.0 }
  0xf4   : > { %v1196_v43 = vadd.f32 %v1777_v30, %v1190_v39 }
  0xf6   : > { %v1202_v45 = vadd.f32 %v1747_v41, %v1196_v43 }
  0xf8   : > { %v1204_v46 = vmax.f32 %v1202_v45, 0.0 }
  0xfa   : > { %v1209_v48 = vsel %vm1207_vm6, %v1204_v46, 0.0 }
  0xfb   : > { %v1751_v50 = vpack.c.bf16 %v1209_v48, %v1208_v47 }
  0xfd   : > { %1752 = vst [vmem:[%s281_s26] sm:$0xff] %v1751_v50  }
  0xfe PF: > { %s14_s17 = sadd.s32 1, %s1800_s17   ;;  %s2169_s15 = smov %s1796_s16 }
  0xff   : > { %p11_p6 = scmp.ge.s32.totalorder %s14_s17, 4   ;;  %s2170_s16 = smov %s2172_s18 }
 0x101   :  { %13 = sbr.rel (!%p11_p6) target bundleno = 2 (0x2), region = 77 }

// kernel: backbone_base_forward.23
= control target key start
LH: loop header
LB: loop body
LE: loop exit
PB: predicated region body
PF: predicated region fallthrough
CT: control target
= control target key end

     0   :  { %s1626_s15 = smov 0   ;;  %s1628_s16 = smov 0   ;;  %s1905_s0 = inlined_call_operand.vmem [shape: bf16[2,3,10,128], index: 0, kind: input, shape index: {}]   ;;  %s1906_s1 = inlined_call_operand.vmem [shape: bf16[1152,128], index: 1, kind: input, shape index: {}]   ;;  %s1907_s2 = inlined_call_operand.vmem [shape: f32[1,128], index: 2, kind: input, shape index: {}]   ;;  %s1908_s3 = inlined_call_operand.vmem [shape: bf16[16,128], index: 3, kind: input, shape index: {}]   ;;  %s1909_s4 = inlined_call_operand.vmem [shape: bf16[16,128], index: 4, kind: output, shape index: {}]  }
   0x1   :  { %s1630_s17 = smov 0  }
   0x2 LB: > { %s26_s18 = sadd.s32 1, %s1595_s16  ;;  %p1177_p0 = scmp.ge.s32.totalorder %s1599_s17, 1  ;;  %s1599_s17 = sphi %s1630_s17, %s14_s17   ;;  %s1595_s16 = sphi %s1628_s16, %s1911_s16   ;;  %s1591_s15 = sphi %s1626_s15, %s1910_s15  }
   0x3   : > { %p28_p1 = scmp.ge.s32.totalorder %s26_s18, 2  ;;  %p207_p2 = scmp.lt.s32.totalorder %s1599_s17, 3 }
   0x5   : > { %s1913_s18 = smov (%p28_p1, %s26_s18), 0  ;;  %p208_p3 = pnand %p1177_p0, %p207_p2 }
   0x6   : > { %p249_p4 = scmp.lt.s32.totalorder (!%p208_p3), %s1591_s15, 1 }
   0x7   : > { %211 = sbr.rel (%p208_p3) target bundleno = 246 (0xf6), region = 36 }
   0xc   : > { %v1494_v0 = vld [vmem:[%s1906_s1 + $0x78] sm:$0xff]  ;;  %v1493_v4 = vld [vmem:[%s1906_s1 + $0x70] sm:$0xff]  ;;  %s1915_s15 = smov (!%p249_p4, %s1591_s15), 1  ;;  %v1492_v8 = vld [vmem:[%s1906_s1 + $0x68] sm:$0xff] }
   0xd   : > { %v1502_v1 = vld [vmem:[%s1906_s1 + $0xb8] sm:$0xff]  ;;  %370 = vmatpush.bf16.msra.mxu0 %v1494_v0  ;;  %v1501_v5 = vld [vmem:[%s1906_s1 + $0xb0] sm:$0xff]  ;;  %v1500_v9 = vld [vmem:[%s1906_s1 + $0xa8] sm:$0xff]  ;;  %s1551_s21 = smul.u32 24, %s1915_s15 }
   0xe   : > { %v1510_v2 = vld [vmem:[%s1906_s1 + $0xf8] sm:$0xff]  ;;  %514 = vmatpush.bf16.msra.mxu2 %v1502_v1  ;;  %v1509_v6 = vld [vmem:[%s1906_s1 + $0xf0] sm:$0xff]  ;;  %v1508_v10 = vld [vmem:[%s1906_s1 + $0xe8] sm:$0xff] }
   0xf   : > { %v1486_v3 = vld [vmem:[%s1906_s1 + $0x38] sm:$0xff]  ;;  %594 = vmatpush.bf16.msra.mxu3 %v1510_v2  ;;  %v1485_v7 = vld [vmem:[%s1906_s1 + $0x30] sm:$0xff]  ;;  %v1484_v11 = vld [vmem:[%s1906_s1 + $0x28] sm:$0xff]  ;;  %s1698_s6 = scalar_lea.vmem %s1905_s0, %s1551_s21 }
  0x10   : > { %431 = vmatpush.bf16.msra.mxu1 %v1486_v3  ;;  %v1491_v12 = vld [vmem:[%s1906_s1 + $0x60] sm:$0xff]  ;;  %v1490_v16 = vld [vmem:[%s1906_s1 + $0x58] sm:$0xff]  ;;  %v1489_v23 = vld [vmem:[%s1906_s1 + $0x50] sm:$0xff] }
  0x11   : > { %371 = vmatpush.bf16.msra.mxu0 %v1493_v4  ;;  %v1499_v13 = vld [vmem:[%s1906_s1 + $0xa0] sm:$0xff]  ;;  %v1498_v17 = vld [vmem:[%s1906_s1 + $0x98] sm:$0xff]  ;;  %v1497_v24 = vld [vmem:[%s1906_s1 + $0x90] sm:$0xff] }
  0x12   : > { %515 = vmatpush.bf16.msra.mxu2 %v1501_v5  ;;  %v1507_v14 = vld [vmem:[%s1906_s1 + $0xe0] sm:$0xff]  ;;  %v1506_v18 = vld [vmem:[%s1906_s1 + $0xd8] sm:$0xff]  ;;  %v1505_v25 = vld [vmem:[%s1906_s1 + $0xd0] sm:$0xff] }
  0x13   : > { %595 = vmatpush.bf16.msra.mxu3 %v1509_v6  ;;  %v1483_v15 = vld [vmem:[%s1906_s1 + $0x20] sm:$0xff]  ;;  %v1482_v19 = vld [vmem:[%s1906_s1 + $0x18] sm:$0xff]  ;;  %v1481_v27 = vld [vmem:[%s1906_s1 + $0x10] sm:$0xff] }
  0x14   : > { %432 = vmatpush.bf16.msra.mxu1 %v1485_v7  ;;  %v292_v20 = vld [vmem:[%s1698_s6 + $0x4] sm:$0x1]  ;;  %v275_v22 = vld [vmem:[%s1698_s6] sm:$0xf]  ;;  %v1488_v30 = vld [vmem:[%s1906_s1 + $0x48] sm:$0xff] }
  0x15   : > { %372 = vmatpush.bf16.msra.mxu0 %v1492_v8  ;;  %v312_v21 = vunpack.c.l.b16 %v292_v20  ;;  %v311_v26 = vunpack.c.l.b16 %v275_v22  ;;  %v444_v28 = vld [vmem:[%s1698_s6] sm:$0xe]  ;;  %v1496_v31 = vld [vmem:[%s1906_s1 + $0x88] sm:$0xff]  ;;  %v1518_v41 = vld [vmem:[%s1906_s1 + $0x138] sm:$0xff] }
  0x16   : > { %516 = vmatpush.bf16.msra.mxu2 %v1500_v9  ;;  %v462_v32 = vunpack.c.l.b16 %v444_v28  ;;  %v1504_v34 = vld [vmem:[%s1906_s1 + $0xc8] sm:$0xff]  ;;  %v1487_v36 = vld [vmem:[%s1906_s1 + $0x40] sm:$0xff]  ;;  %v1534_v42 = vld [vmem:[%s1906_s1 + $0x1b8] sm:$0xff] }
  0x17   : > { %596 = vmatpush.bf16.msra.mxu3 %v1508_v10  ;;  %v313_v29 = vpack.c.b16 %v312_v21, %v311_v26  ;;  %v1480_v35 = vld [vmem:[%s1906_s1 + $0x8] sm:$0xff]  ;;  %v1495_v37 = vld [vmem:[%s1906_s1 + $0x80] sm:$0xff]  ;;  %v1542_v45 = vld [vmem:[%s1906_s1 + $0x1f8] sm:$0xff] }
  0x18   : > { %433 = vmatpush.bf16.msra.mxu1 %v1484_v11  ;;  %v463_v38 = vpack.c.b16 %v312_v21, %v462_v32  ;;  %v1503_v43 = vld [vmem:[%s1906_s1 + $0xc0] sm:$0xff]  ;;  %v1526_v46 = vld [vmem:[%s1906_s1 + $0x178] sm:$0xff]  ;;  %v1517_v49 = vld [vmem:[%s1906_s1 + $0x130] sm:$0xff] }
  0x19   : > { %373 = vmatpush.bf16.msra.mxu0 %v1491_v12  ;;  %v317_v33 = vshll.u32 %v313_v29, 16  ;;  %v315_v39 = vshrl.u32 %v313_v29, 16  ;;  %v1479_v44 = vld [vmem:[%s1906_s1] sm:$0xff]  ;;  %v1533_v50 = vld [vmem:[%s1906_s1 + $0x1b0] sm:$0xff]  ;;  %v1277_v53 = vld [vmem:[%s1698_s6 + $0x8] sm:$0xf] }
  0x1a   : > { %517 = vmatpush.bf16.msra.mxu2 %v1499_v13  ;;  %v464_v47 = vrot.slane %v463_v38, 1  ;;  %v1541_v51 = vld [vmem:[%s1906_s1 + $0x1f0] sm:$0xff]  ;;  %v1516_v54 = vld [vmem:[%s1906_s1 + $0x128] sm:$0xff]  ;;  %v1515_v58 = vld [vmem:[%s1906_s1 + $0x120] sm:$0xff] }
  0x1b   : > { %597 = vmatpush.bf16.msra.mxu3 %v1507_v14  ;;  %v319_v40 = vrot.slane %v317_v33, 1  ;;  %v1525_v52 = vld [vmem:[%s1906_s1 + $0x170] sm:$0xff]  ;;  %v1532_v55 = vld [vmem:[%s1906_s1 + $0x1a8] sm:$0xff]  ;;  %v1531_v59 = vld [vmem:[%s1906_s1 + $0x1a0] sm:$0xff] }
  0x1c   : > { %434 = vmatpush.bf16.msra.mxu1 %v1483_v15  ;;  %v1540_v56 = vld [vmem:[%s1906_s1 + $0x1e8] sm:$0xff]  ;;  %v1539_v62 = vld [vmem:[%s1906_s1 + $0x1e0] sm:$0xff]  ;;  %v1410_v0 = vld [vmem:[%s1698_s6 + $0x10] sm:$0xf] }
  0x1d   : > { %374 = vmatpush.bf16.msra.mxu0 %v1490_v16  ;;  %v320_v48 = vor.u32 %v319_v40, %v315_v39  ;;  %v1524_v57 = vld [vmem:[%s1906_s1 + $0x168] sm:$0xff]  ;;  %v1523_v63 = vld [vmem:[%s1906_s1 + $0x160] sm:$0xff]  ;;  %v1804_v1 = vld [vmem:[%s1698_s6 + $0x14] sm:$0x1]  ;;  %v885_v6 = vunpack.c.l.b16 %v1410_v0 }
  0x1e   : > { %518 = vmatpush.bf16.msra.mxu2 %v1498_v17  ;;  %v1310_v60 = vld [vmem:[%s1698_s6 + $0x8] sm:$0xf]  ;;  %v1311_v61 = vld [vmem:[%s1698_s6 + $0xc] sm:$0x1]  ;;  %v1514_v4 = vld [vmem:[%s1906_s1 + $0x118] sm:$0xff]  ;;  %v886_v7 = vunpack.c.l.b16 %v1804_v1 }
  0x1f   : > { %598 = vmatpush.bf16.msra.mxu3 %v1506_v18  ;;  %v628_v2 = vunpack.c.l.b16 %v1310_v60  ;;  %v629_v3 = vunpack.c.l.b16 %v1311_v61  ;;  %v1530_v5 = vld [vmem:[%s1906_s1 + $0x198] sm:$0xff]  ;;  %v1513_v11 = vld [vmem:[%s1906_s1 + $0x110] sm:$0xff]  ;;  %v1344_v17 = vld [vmem:[%s1698_s6 + $0x8] sm:$0xe] }
  0x20   : > { %435 = vmatpush.bf16.msra.mxu1 %v1482_v19  ;;  %v1538_v8 = vld [vmem:[%s1906_s1 + $0x1d8] sm:$0xff]  ;;  %v1529_v12 = vld [vmem:[%s1906_s1 + $0x190] sm:$0xff]  ;;  %v887_v13 = vpack.c.b16 %v886_v7, %v885_v6  ;;  %v1512_v18 = vld [vmem:[%s1906_s1 + $0x108] sm:$0xff] }
  0x21   : > { %375 = vmatpush.bf16.msra.mxu0 %v1489_v23  ;;  %v1522_v9 = vld [vmem:[%s1906_s1 + $0x158] sm:$0xff]  ;;  %v630_v10 = vpack.c.b16 %v629_v3, %v628_v2  ;;  %v1537_v14 = vld [vmem:[%s1906_s1 + $0x1d0] sm:$0xff]  ;;  %v1528_v19 = vld [vmem:[%s1906_s1 + $0x188] sm:$0xff]  ;;  %v719_v23 = vunpack.c.l.b16 %v1344_v17 }
  0x22   : > { %519 = vmatpush.bf16.msra.mxu2 %v1497_v24  ;;  %v1521_v15 = vld [vmem:[%s1906_s1 + $0x150] sm:$0xff]  ;;  %v891_v20 = vshll.u32 %v887_v13, 16  ;;  %v1536_v21 = vld [vmem:[%s1906_s1 + $0x1c8] sm:$0xff]  ;;  %v1511_v26 = vld [vmem:[%s1906_s1 + $0x100] sm:$0xff]  ;;  %v889_v29 = vshrl.u32 %v887_v13, 16 }
  0x23   : > { %599 = vmatpush.bf16.msra.mxu3 %v1505_v25  ;;  %v634_v16 = vshll.u32 %v630_v10, 16  ;;  %v632_v24 = vshrl.u32 %v630_v10, 16  ;;  %v1550_v28 = vld [vmem:[%s1906_s1 + $0x238] sm:$0xff]  ;;  %v1519_v32 = vld [vmem:[%s1906_s1 + $0x140] sm:$0xff]  ;;  %v720_v33 = vpack.c.b16 %v629_v3, %v719_v23  ;;  %v1548_v39 = vld [vmem:[%s1906_s1 + $0x228] sm:$0xff] }
  0x24   : > { %436 = vmatpush.bf16.msra.mxu1 %v1481_v27  ;;  %v1527_v27 = vld [vmem:[%s1906_s1 + $0x180] sm:$0xff] }
  0x25   : > { %376 = vmatpush.bf16.msra.mxu0 %v1488_v30  ;;  %v636_v25 = vrot.slane %v634_v16, 1  ;;  %v893_v30 = vrot.slane %v891_v20, 1  ;;  %v721_v38 = vrot.slane %v720_v33, 1  ;;  %v1547_v40 = vld [vmem:[%s1906_s1 + $0x220] sm:$0xff] }
  0x26   : > { %520 = vmatpush.bf16.msra.mxu2 %v1496_v31  ;;  %v1535_v31 = vld [vmem:[%s1906_s1 + $0x1c0] sm:$0xff] }
  0x27   : > { %600 = vmatpush.bf16.msra.mxu3 %v1504_v34  ;;  %v637_v34 = vor.u32 %v636_v25, %v632_v24  ;;  %v1576_v10 = vld [vmem:[%s1907_s2] ss:$0 sm:$0xff] }
  0x28   : > { %437 = vmatpush.bf16.msra.mxu1 %v1480_v35  ;;  %v1377_v35 = vld [vmem:[%s1698_s6 + $0x10] sm:$0xf] }
  0x29   : > { %377 = vmatpush.bf16.msra.mxu0 %v1487_v36  ;;  %v1549_v36 = vld [vmem:[%s1906_s1 + $0x230] sm:$0xff] }
  0x2a   : > { %521 = vmatpush.bf16.msra.mxu2 %v1495_v37  ;;  %v894_v37 = vor.u32 %v893_v30, %v889_v29 }
  0x2b   : > { %601 = vmatpush.bf16.msra.mxu3 %v1503_v43  ;;  %v1444_v43 = vld [vmem:[%s1698_s6 + $0x10] sm:$0xe]  ;;  %s1179_s6 = sshll.u32 %s1915_s15, 2 }
  0x2c   : > { %438 = vmatpush.bf16.msra.mxu1 %v1479_v44  ;;  %378 = vmatmul.bf16.vlgmr.msra.gmra.mxu0 %v320_v48  ;;  %v976_v44 = vunpack.c.l.b16 %v1444_v43  ;;  %s267_s20 = scalar_lea.vmem %s1908_s3, %s1179_s6  ;;  %s274_s24 = scalar_lea.vmem %s1909_s4, %s1179_s6 }
  0x2d   : > { %687 = vmatpush.bf16.msrb.mxu0 %v1518_v41  ;;  %522 = vmatmul.bf16.vlgmr.msra.gmra.mxu2 %v464_v47  ;;  %v1546_v41 = vld [vmem:[%s1906_s1 + $0x218] sm:$0xff]  ;;  %v1543_v47 = vld [vmem:[%s1906_s1 + $0x200] sm:$0xff] }
  0x2e   : > { %851 = vmatpush.bf16.msrb.mxu2 %v1534_v42  ;;  %602 = vmatmul.bf16.vlgmr.msra.gmra.mxu3 %v1277_v53  ;;  %v1545_v42 = vld [vmem:[%s1906_s1 + $0x210] sm:$0xff] }
  0x2f   : > { %944 = vmatpush.bf16.msrb.mxu3 %v1542_v45  ;;  %439 = vmatmul.bf16.vlgmr.msra.gmra.mxu1 %v275_v22  ;;  %v1520_v22 = vld [vmem:[%s1906_s1 + $0x148] sm:$0xff] }
  0x30   : > { %771 = vmatpush.bf16.msrb.mxu1 %v1526_v46  ;;  %v1544_v45 = vld [vmem:[%s1906_s1 + $0x208] sm:$0xff]  ;;  %v977_v46 = vpack.c.b16 %v886_v7, %v976_v44  ;;  %v1047_v7 = vld [vmem:[%s267_s20] sm:$0xf] }
  0x31   : > { %688 = vmatpush.bf16.msrb.mxu0 %v1517_v49  ;;  %v1048_v13 = vunpack.c.l.bf16 %v1047_v7 }
  0x32   : > { %852 = vmatpush.bf16.msrb.mxu2 %v1533_v50  ;;  %v978_v48 = vrot.slane %v977_v46, 1 }
  0x33   : > { %945 = vmatpush.bf16.msrb.mxu3 %v1541_v51 }
  0x34   : > { %772 = vmatpush.bf16.msrb.mxu1 %v1525_v52 }
  0x35   : > { %689 = vmatpush.bf16.msrb.mxu0 %v1516_v54 }
  0x36   : > { %853 = vmatpush.bf16.msrb.mxu2 %v1532_v55 }
  0x37   : > { %946 = vmatpush.bf16.msrb.mxu3 %v1540_v56 }
  0x38   : > { %773 = vmatpush.bf16.msrb.mxu1 %v1524_v57 }
  0x39   : > { %690 = vmatpush.bf16.msrb.mxu0 %v1515_v58 }
  0x3a   : > { %854 = vmatpush.bf16.msrb.mxu2 %v1531_v59 }
  0x3b   : > { %947 = vmatpush.bf16.msrb.mxu3 %v1539_v62 }
  0x3c   : > { %774 = vmatpush.bf16.msrb.mxu1 %v1523_v63 }
  0x3d   : > { %691 = vmatpush.bf16.msrb.mxu0 %v1514_v4 }
  0x3e   : > { %855 = vmatpush.bf16.msrb.mxu2 %v1530_v5 }
  0x3f   : > { %948 = vmatpush.bf16.msrb.mxu3 %v1538_v8  ;;  %v1051_v8 = vlaneseq }
  0x40   : > { %775 = vmatpush.bf16.msrb.mxu1 %v1522_v9 }
  0x41   : > { %692 = vmatpush.bf16.msrb.mxu0 %v1513_v11 }
  0x42   : > { %856 = vmatpush.bf16.msrb.mxu2 %v1529_v12 }
  0x43   : > { %949 = vmatpush.bf16.msrb.mxu3 %v1537_v14  ;;  %v1052_v14 = vshrl.u32 %v1051_v8, 7 }
  0x44   : > { %776 = vmatpush.bf16.msrb.mxu1 %v1521_v15 }
  0x45   : > { %693 = vmatpush.bf16.msrb.mxu0 %v1512_v18  ;;  %vm1053_vm0 = vcmp.lt.s32.totalorder %v1052_v14, 1 }
  0x46   : > { %857 = vmatpush.bf16.msrb.mxu2 %v1528_v19 }
  0x47   : > { %950 = vmatpush.bf16.msrb.mxu3 %v1536_v21 }
  0x48   : > { %777 = vmatpush.bf16.msrb.mxu1 %v1520_v22 }
  0x49   : > { %694 = vmatpush.bf16.msrb.mxu0 %v1511_v26 }
  0x4a   : > { %858 = vmatpush.bf16.msrb.mxu2 %v1527_v27 }
  0x4b   : > { %951 = vmatpush.bf16.msrb.mxu3 %v1535_v31 }
  0x4c   : > { %778 = vmatpush.bf16.msrb.mxu1 %v1519_v32  ;;  %695 = vmatmul.bf16.vlgmr.msrb.gmra.mxu0 %v637_v34 }
  0x4d   : > { %1028 = vmatpush.bf16.msra.mxu0 %v1550_v28  ;;  %859 = vmatmul.bf16.vlgmr.msrb.gmra.mxu2 %v1377_v35 }
  0x4e   : > { %952 = vmatmul.bf16.vlgmr.msrb.gmra.mxu3 %v894_v37 }
  0x4f   : > { %779 = vmatmul.bf16.vlgmr.msrb.gmra.mxu1 %v721_v38 }
  0x51   : > { %1029 = vmatpush.bf16.msra.mxu0 %v1549_v36 }
  0x55   : > { %1030 = vmatpush.bf16.msra.mxu0 %v1548_v39 }
  0x59   : > { %1031 = vmatpush.bf16.msra.mxu0 %v1547_v40 }
  0x5d   : > { %1032 = vmatpush.bf16.msra.mxu0 %v1546_v41 }
  0x61   : > { %1033 = vmatpush.bf16.msra.mxu0 %v1545_v42 }
  0x65   : > { %1034 = vmatpush.bf16.msra.mxu0 %v1544_v45 }
  0x69   : > { %1035 = vmatpush.bf16.msra.mxu0 %v1543_v47 }
  0x6c   : > { %1036 = vmatmul.bf16.vlgmr.msra.gmra.mxu0 %v978_v48 }
  0xa9   : > { %v379_v49 = vpop.f32.mrf.mxu0 }
  0xac   : > { %v440_v50 = vpop.f32.mrf.mxu1 }
  0xad   : > { %v441_v59 = vadd.f32 %v440_v50, %v379_v49 }
  0xb0   : > { %v523_v51 = vpop.f32.mrf.mxu2 }
  0xb1   : > { %v603_v52 = vpop.f32.mrf.mxu3  ;;  %v381_v53 = vpop.f32.mrf.mxu0  ;;  %v527_v61 = vadd.f32 %v523_v51, %v441_v59 }
  0xb3   : > { %v607_v1 = vadd.f32 %v603_v52, %v527_v61 }
  0xb4   : > { %v442_v54 = vpop.f32.mrf.mxu1 }
  0xb8   : > { %v525_v55 = vpop.f32.mrf.mxu2 }
  0xb9   : > { %v605_v56 = vpop.f32.mrf.mxu3 }
  0xc9   : > { %v696_v57 = vpop.f32.mrf.mxu0 }
  0xca   : > { %v700_v3 = vadd.f32 %v696_v57, %v607_v1 }
  0xcc   : > { %v780_v58 = vpop.f32.mrf.mxu1 }
  0xcd   : > { %v784_v5 = vadd.f32 %v780_v58, %v700_v3 }
  0xd0   : > { %v860_v60 = vpop.f32.mrf.mxu2 }
  0xd1   : > { %v953_v62 = vpop.f32.mrf.mxu3  ;;  %v698_v63 = vpop.f32.mrf.mxu0  ;;  %v864_v6 = vadd.f32 %v860_v60, %v784_v5 }
  0xd3   : > { %v957_v9 = vadd.f32 %v953_v62, %v864_v6 }
  0xd4   : > { %v782_v0 = vpop.f32.mrf.mxu1 }
  0xd8   : > { %v862_v2 = vpop.f32.mrf.mxu2 }
  0xd9   : > { %v955_v4 = vpop.f32.mrf.mxu3 }
  0xe9   : > { %v1037_v11 = vpop.f32.mrf.mxu0 }
  0xea   : > { %v1041_v12 = vadd.f32 %v1037_v11, %v957_v9 }
  0xec   : > { %v1046_v15 = vadd.f32 %v1576_v10, %v1041_v12 }
  0xee   : > { %v1049_v16 = vadd.f32 %v1048_v13, %v1046_v15 }
  0xf0   : > { %v1050_v17 = vmax.f32 %v1049_v16, 0.0 }
  0xf1   : > { %v1039_v18 = vpop.f32.mrf.mxu0 }
  0xf2   : > { %v1054_v19 = vsel %vm1053_vm0, %v1050_v17, 0.0 }
  0xf3   : > { %v1055_v20 = vpack.c.bf16 %v1054_v19, %v1054_v19 }
  0xf5   : > { %1056 = vst [vmem:[%s274_s24] sm:$0xf] %v1055_v20 }
  0xf6 PF: > { %s14_s17 = sadd.s32 1, %s1599_s17   ;;  %s1910_s15 = smov %s1595_s16 }
  0xf7   : > { %p11_p5 = scmp.ge.s32.totalorder %s14_s17, 4   ;;  %s1911_s16 = smov %s1913_s18 }
  0xf9   :  { %13 = sbr.rel (!%p11_p5) target bundleno = 2 (0x2), region = 77 }

</bundles_post_ra>
